<compile_context>
chip_gen: v7x
topology: tpu7x:2x2x1
jax: 0.10.0
libtpu: 0.0.40
codegen_flags: <defaults>
</compile_context>

<pallas_src>
import functools

import jax
import jax.numpy as jnp
from jax.experimental import pallas as pl
from jax.experimental.pallas import tpu as pltpu

BN_EPS = 1e-5
LANE = 128
VMEM_LIMIT = 32 * 1024 * 1024


def _round_up(x, m):
    return (x + m - 1) // m * m


def _out_size(n, stride):
    # k=3 / pad=1 (and k=1 / pad=0) output size for stride `stride`.
    return (n - 1) // stride + 1


# ---------------------------------------------------------------------------
# Kernel A: conv1 (3x3) + bias + BN1 partial statistics.
# Input is the spatially padded, channel-padded, flattened image, additionally
# extended by (Wp+1) zero rows on both ends so every tap is a contiguous slice.
# ---------------------------------------------------------------------------
def _conv1_kernel(xe_ref, w_ref, b_ref, m_ref, y_ref, st_ref, *,
                  Hp, Wp, Ho, Wo, stride):
    Np = Hp * Wp
    Cpo = w_ref.shape[-1]
    x = xe_ref[0]                                   # (Ne, Cpi) bf16
    acc = jnp.zeros((Np, Cpo), jnp.float32)
    for kh in range(3):
        for kw in range(3):
            off = kh * Wp + kw                      # static shift, no wrap
            acc = acc + jnp.dot(x[off:off + Np, :], w_ref[kh * 3 + kw],
                                preferred_element_type=jnp.float32)
    y = acc + b_ref[...]                            # (Np, Cpo) f32

    if stride != 1:
        # TODO(synk): strided blocks still do stride-1 MXU work; only the HBM
        # write / downstream traffic is reduced (subsample before the store).
        Hp1, Wp1 = Ho + 2, Wo + 2
        yr = y.reshape(Hp, Wp, Cpo)
        yr = yr[1:1 + (Ho - 1) * stride + 1:stride,
                1:1 + (Wo - 1) * stride + 1:stride, :]
        zc = jnp.zeros((Ho, 1, Cpo), yr.dtype)
        yr = jnp.concatenate([zc, yr, zc], axis=1)
        zr = jnp.zeros((1, Wo + 2, Cpo), yr.dtype)
        yr = jnp.concatenate([zr, yr, zr], axis=0)
        y = yr.reshape((Ho + 2) * (Wo + 2), Cpo)

    mask = m_ref[0]                                 # (Np_out, 1), 1 on valid pixels
    ym = y * mask
    ssum = jnp.sum(ym, axis=0, keepdims=True)       # per-channel sum
    ssq = jnp.sum(ym * y, axis=0, keepdims=True)    # per-channel sum of squares
    y_ref[0] = y.astype(y_ref.dtype)
    st_ref[0] = jnp.concatenate(
        [ssum, ssq, jnp.zeros((6, Cpo), jnp.float32)], axis=0)


# ---------------------------------------------------------------------------
# Kernel B: bn1-apply + relu + conv2 (3x3) + bias + BN2 partial statistics.
# ---------------------------------------------------------------------------
def _mid_kernel(y1_ref, s1_ref, t1_ref, w_ref, b_ref, m_ref, y_ref, st_ref, *,
                Hp1, Wp1):
    Np1 = Hp1 * Wp1
    ext = Wp1 + 1
    Cpo = w_ref.shape[-1]
    mask = m_ref[0]                                 # (Np1, 1)

    a = y1_ref[0] * s1_ref[...] + t1_ref[...]       # BN1 apply (f32, VPU)
    a = jnp.maximum(a, 0.0) * mask                  # ReLU; zero the pad ring
    a_bf = a.astype(jnp.bfloat16)
    z = jnp.zeros((ext, Cpo), jnp.bfloat16)
    a_ext = jnp.concatenate([z, a_bf, z], axis=0)   # (Np1 + 2*ext, Cpo)

    acc = jnp.zeros((Np1, Cpo), jnp.float32)
    for kh in range(3):
        for kw in range(3):
            off = kh * Wp1 + kw
            acc = acc + jnp.dot(a_ext[off:off + Np1, :], w_ref[kh * 3 + kw],
                                preferred_element_type=jnp.float32)
    y2 = acc + b_ref[...]

    ym = y2 * mask
    ssum = jnp.sum(ym, axis=0, keepdims=True)
    ssq = jnp.sum(ym * y2, axis=0, keepdims=True)
    y_ref[0] = y2.astype(y_ref.dtype)
    st_ref[0] = jnp.concatenate(
        [ssum, ssq, jnp.zeros((6, Cpo), jnp.float32)], axis=0)


# ---------------------------------------------------------------------------
# Kernel C: bn2-apply + shortcut (optional fused 1x1 projection) + add + relu.
# ---------------------------------------------------------------------------
def _tail_kernel(y2_ref, s2_ref, t2_ref, xe_ref, *rest,
                 Hp, Wp, Ho, Wo, stride, has_proj):
    if has_proj:
        w3_ref, b3_ref, out_ref = rest
    else:
        (out_ref,) = rest
    Np = Hp * Wp
    Hp1, Wp1 = Ho + 2, Wo + 2
    Np1 = Hp1 * Wp1

    y = y2_ref[0] * s2_ref[...] + t2_ref[...]       # BN2 apply (f32)

    x = xe_ref[0]                                   # (Ne, Cpi) bf16
    xi = x[Wp + 1:Wp + 1 + Np, :]                   # padded-flat x (ring is 0)
    Cpi = xi.shape[-1]
    if stride != 1:
        xr = xi.reshape(Hp, Wp, Cpi)
        xr = xr[1:1 + (Ho - 1) * stride + 1:stride,
                1:1 + (Wo - 1) * stride + 1:stride, :]
        zc = jnp.zeros((Ho, 1, Cpi), xr.dtype)
        xr = jnp.concatenate([zc, xr, zc], axis=1)
        zr = jnp.zeros((1, Wp1, Cpi), xr.dtype)
        xr = jnp.concatenate([zr, xr, zr], axis=0)
        xi = xr.reshape(Np1, Cpi)

    if has_proj:
        sc = jnp.dot(xi, w3_ref[...], preferred_element_type=jnp.float32)
        sc = sc + b3_ref[...]
    else:
        sc = xi.astype(jnp.float32)

    out_ref[0] = jnp.maximum(y + sc, 0.0).astype(out_ref.dtype)


# ---------------------------------------------------------------------------
# Wrapper-side BN coefficient finish (tiny per-channel math).
# ---------------------------------------------------------------------------
def _bn_coeffs(stats, count, gamma, beta, use_bn):
    cp = stats.shape[-1]
    if not use_bn:
        return (jnp.ones((1, cp), jnp.float32), jnp.zeros((1, cp), jnp.float32))
    ssum = jnp.sum(stats[:, 0, :], axis=0)
    ssq = jnp.sum(stats[:, 1, :], axis=0)
    mean = ssum / count
    var = jnp.maximum(ssq / count - mean * mean, 0.0)   # biased variance
    scale = gamma * jax.lax.rsqrt(var + BN_EPS)
    shift = beta - mean * scale
    return scale.reshape(1, cp), shift.reshape(1, cp)


@functools.partial(
    jax.jit, static_argnames=("strides", "use_bn", "has_proj", "out_channels"))
def _residual_forward(params, x_nchw, *, strides, use_bn, has_proj, out_channels):
    B, Cin, H, W = x_nchw.shape
    s = strides
    Ho, Wo = _out_size(H, s), _out_size(W, s)
    Hp, Wp = H + 2, W + 2
    Hp1, Wp1 = Ho + 2, Wo + 2
    Np, Np1 = Hp * Wp, Hp1 * Wp1
    Ne = Np + 2 * (Wp + 1)
    Cpi = params["w1"].shape[1]
    Cpo = params["w1"].shape[2]

    # Single reformat pass: NCHW f32 -> padded NHWC bf16, flattened + extended.
    x = jnp.transpose(x_nchw, (0, 2, 3, 1)).astype(jnp.bfloat16)
    x = jnp.pad(x, ((0, 0), (1, 1), (1, 1), (0, Cpi - Cin)))
    xe = jnp.pad(x.reshape(B, Np, Cpi), ((0, 0), (Wp + 1, Wp + 1), (0, 0)))

    # Interior-pixel mask on the (padded, flattened) output grid.
    rid = jnp.arange(Hp1)[:, None]
    cid = jnp.arange(Wp1)[None, :]
    mask = ((rid >= 1) & (rid <= Ho) & (cid >= 1) & (cid <= Wo))
    mask = mask.astype(jnp.float32).reshape(1, Np1, 1)

    cp = pltpu.CompilerParams(dimension_semantics=("parallel",),
                              vmem_limit_bytes=VMEM_LIMIT)
    vec_spec = pl.BlockSpec((1, Cpo), lambda b: (0, 0))
    mask_spec = pl.BlockSpec((1, Np1, 1), lambda b: (0, 0, 0))
    n_valid = B * Ho * Wo

    # --- kernel A: conv1 + bias + BN1 stats ---------------------------------
    y1, st1 = pl.pallas_call(
        functools.partial(_conv1_kernel, Hp=Hp, Wp=Wp, Ho=Ho, Wo=Wo, stride=s),
        out_shape=(jax.ShapeDtypeStruct((B, Np1, Cpo), jnp.float32),
                   jax.ShapeDtypeStruct((B, 8, Cpo), jnp.float32)),
        grid=(B,),
        in_specs=[pl.BlockSpec((1, Ne, Cpi), lambda b: (b, 0, 0)),
                  pl.BlockSpec((9, Cpi, Cpo), lambda b: (0, 0, 0)),
                  vec_spec, mask_spec],
        out_specs=(pl.BlockSpec((1, Np1, Cpo), lambda b: (b, 0, 0)),
                   pl.BlockSpec((1, 8, Cpo), lambda b: (b, 0, 0))),
        compiler_params=cp,
    )(xe, params["w1"], params["b1"], mask)

    scale1, shift1 = _bn_coeffs(st1, n_valid, params["g1"], params["be1"], use_bn)

    # --- kernel B: bn1 + relu + conv2 + bias + BN2 stats --------------------
    y2, st2 = pl.pallas_call(
        functools.partial(_mid_kernel, Hp1=Hp1, Wp1=Wp1),
        out_shape=(jax.ShapeDtypeStruct((B, Np1, Cpo), jnp.float32),
                   jax.ShapeDtypeStruct((B, 8, Cpo), jnp.float32)),
        grid=(B,),
        in_specs=[pl.BlockSpec((1, Np1, Cpo), lambda b: (b, 0, 0)),
                  vec_spec, vec_spec,
                  pl.BlockSpec((9, Cpo, Cpo), lambda b: (0, 0, 0)),
                  vec_spec, mask_spec],
        out_specs=(pl.BlockSpec((1, Np1, Cpo), lambda b: (b, 0, 0)),
                   pl.BlockSpec((1, 8, Cpo), lambda b: (b, 0, 0))),
        compiler_params=cp,
    )(y1, scale1, shift1, params["w2"], params["b2"], mask)

    scale2, shift2 = _bn_coeffs(st2, n_valid, params["g2"], params["be2"], use_bn)

    # --- kernel C: bn2 + shortcut + add + relu ------------------------------
    tail_in = [y2, scale2, shift2, xe]
    tail_specs = [pl.BlockSpec((1, Np1, Cpo), lambda b: (b, 0, 0)),
                  vec_spec, vec_spec,
                  pl.BlockSpec((1, Ne, Cpi), lambda b: (b, 0, 0))]
    if has_proj:
        tail_in += [params["w3"], params["b3"]]
        tail_specs += [pl.BlockSpec((Cpi, Cpo), lambda b: (0, 0)), vec_spec]

    outp = pl.pallas_call(
        functools.partial(_tail_kernel, Hp=Hp, Wp=Wp, Ho=Ho, Wo=Wo,
                          stride=s, has_proj=has_proj),
        out_shape=jax.ShapeDtypeStruct((B, Np1, Cpo), jnp.float32),
        grid=(B,),
        in_specs=tail_specs,
        out_specs=pl.BlockSpec((1, Np1, Cpo), lambda b: (b, 0, 0)),
        compiler_params=cp,
    )(*tail_in)

    # Final extraction: drop pad ring + channel padding, back to NCHW.
    out = outp.reshape(B, Hp1, Wp1, Cpo)[:, 1:Ho + 1, 1:Wo + 1, :out_channels]
    return jnp.transpose(out, (0, 3, 1, 2))


# ---------------------------------------------------------------------------
# Residual block wrapper (parameters initialized deterministically in-script).
# ---------------------------------------------------------------------------
class ResidualPallas:
    def __init__(self, in_channels, out_channels, strides=1, use_bn=True,
                 key=jax.random.PRNGKey(0)):
        self.in_channels = in_channels
        self.out_channels = out_channels
        self.strides = strides
        self.use_bn = use_bn
        self.has_proj = (in_channels != out_channels) or (strides != 1)
        k1, k2, k3, k4, k5, k6 = jax.random.split(key, 6)

        def u(k, shape, fan_in):
            bound = 1.0 / jnp.sqrt(fan_in)
            return jax.random.uniform(k, shape, jnp.float32, -bound, bound)

        fi1 = in_channels * 9
        self.w1 = u(k1, (3, 3, in_channels, out_channels), fi1)
        self.b1 = u(k2, (out_channels,), fi1)
        fi2 = out_channels * 9
        self.w2 = u(k3, (3, 3, out_channels, out_channels), fi2)
        self.b2 = u(k4, (out_channels,), fi2)
        if self.has_proj:
            self.w3 = u(k5, (in_channels, out_channels), in_channels)
            self.b3 = u(k6, (out_channels,), in_channels)
        self.gamma1 = jnp.ones((out_channels,), jnp.float32)
        self.beta1 = jnp.zeros((out_channels,), jnp.float32)
        self.gamma2 = jnp.ones((out_channels,), jnp.float32)
        self.beta2 = jnp.zeros((out_channels,), jnp.float32)
        # TODO(synk): BatchNorm running-stat (momentum) updates are training
        # bookkeeping only and do not affect the forward output; not implemented.

        # Lane-dense, bf16 kernel-side parameters (channels padded to 128).
        Cpi = _round_up(in_channels, LANE)
        Cpo = _round_up(out_channels, LANE)
        dco = Cpo - out_channels
        w1p = jnp.pad(self.w1, ((0, 0), (0, 0), (0, Cpi - in_channels), (0, dco)))
        w2p = jnp.pad(self.w2, ((0, 0), (0, 0), (0, dco), (0, dco)))
        params = {
            "w1": w1p.reshape(9, Cpi, Cpo).astype(jnp.bfloat16),
            "b1": jnp.pad(self.b1, (0, dco)).reshape(1, Cpo),
            "w2": w2p.reshape(9, Cpo, Cpo).astype(jnp.bfloat16),
            "b2": jnp.pad(self.b2, (0, dco)).reshape(1, Cpo),
            "g1": jnp.pad(self.gamma1, (0, dco)),
            "be1": jnp.pad(self.beta1, (0, dco)),
            "g2": jnp.pad(self.gamma2, (0, dco)),
            "be2": jnp.pad(self.beta2, (0, dco)),
        }
        if self.has_proj:
            params["w3"] = jnp.pad(
                self.w3, ((0, Cpi - in_channels), (0, dco))).astype(jnp.bfloat16)
            params["b3"] = jnp.pad(self.b3, (0, dco)).reshape(1, Cpo)
        self.params = params

    def __call__(self, x_nchw):
        return _residual_forward(self.params, x_nchw,
                                 strides=self.strides, use_bn=self.use_bn,
                                 has_proj=self.has_proj,
                                 out_channels=self.out_channels)


# ---------------------------------------------------------------------------
# Pure-JAX (XLA) reference mirroring the kernel's precision policy
# (bf16 MXU operands, f32 accumulation / elementwise math).
# ---------------------------------------------------------------------------
def _ref_conv3x3(xb, wb, b, stride):
    B, H, W, _ = xb.shape
    Ho, Wo = _out_size(H, stride), _out_size(W, stride)
    xp = jnp.pad(xb, ((0, 0), (1, 1), (1, 1), (0, 0)))
    acc = jnp.zeros((B, Ho, Wo, wb.shape[-1]), jnp.float32)
    for kh in range(3):
        for kw in range(3):
            patch = xp[:, kh:kh + (Ho - 1) * stride + 1:stride,
                       kw:kw + (Wo - 1) * stride + 1:stride, :]
            acc = acc + jnp.einsum("bhwi,io->bhwo", patch, wb[kh, kw],
                                   preferred_element_type=jnp.float32)
    return acc + b.reshape(1, 1, 1, -1)


def _ref_bn_coeffs(y, gamma, beta, use_bn):
    if not use_bn:
        c = y.shape[-1]
        return jnp.ones((c,), jnp.float32), jnp.zeros((c,), jnp.float32)
    n = y.shape[0] * y.shape[1] * y.shape[2]
    ssum = jnp.sum(y, axis=(0, 1, 2))
    ssq = jnp.sum(y * y, axis=(0, 1, 2))
    mean = ssum / n
    var = jnp.maximum(ssq / n - mean * mean, 0.0)
    scale = gamma * jax.lax.rsqrt(var + BN_EPS)
    return scale, beta - mean * scale


def _ref_forward(block, x_nchw):
    s = block.strides
    x = jnp.transpose(x_nchw, (0, 2, 3, 1)).astype(jnp.bfloat16)

    y1 = _ref_conv3x3(x, block.w1.astype(jnp.bfloat16), block.b1, s)
    sc1, sh1 = _ref_bn_coeffs(y1, block.gamma1, block.beta1, block.use_bn)
    a = jnp.maximum(y1 * sc1 + sh1, 0.0).astype(jnp.bfloat16)

    y2 = _ref_conv3x3(a, block.w2.astype(jnp.bfloat16), block.b2, 1)
    sc2, sh2 = _ref_bn_coeffs(y2, block.gamma2, block.beta2, block.use_bn)
    y = y2 * sc2 + sh2

    if block.has_proj:
        xs = x[:, ::s, ::s, :]
        sc = jnp.einsum("bhwi,io->bhwo", xs, block.w3.astype(jnp.bfloat16),
                        preferred_element_type=jnp.float32)
        sc = sc + block.b3.reshape(1, 1, 1, -1)
    else:
        sc = x.astype(jnp.float32)

    out = jnp.maximum(y + sc, 0.0)
    return jnp.transpose(out, (0, 3, 1, 2))


if __name__ == "__main__":
    B, Cin, Cout, H, W = 2, 4, 8, 16, 16
    key = jax.random.PRNGKey(0)
    kx, kp = jax.random.split(key)
    x = jax.random.normal(kx, (B, Cin, H, W), jnp.float32)

    block = ResidualPallas(Cin, Cout, strides=1, use_bn=True, key=kp)
    out = jax.block_until_ready(block(x))
    assert out.shape == (B, Cout, H, W), out.shape

    ref = jax.block_until_ready(_ref_forward(block, x))
    max_err = float(jnp.max(jnp.abs(out - ref)))
    assert jnp.allclose(out, ref, atol=1e-2, rtol=1e-2), max_err

    print("KERNEL_OK")
</pallas_src>

<mosaic_0001>
module attributes {stable_mosaic.version = 11 : i64} {
  func.func @_conv1_kernel(%arg0: i32, %arg1: memref<1x362x128xbf16, #tpu.memory_space<vmem>>, %arg2: memref<9x128x128xbf16, #tpu.memory_space<vmem>>, %arg3: memref<1x128xf32, #tpu.memory_space<vmem>>, %arg4: memref<1x324x1xf32, #tpu.memory_space<vmem>>, %arg5: memref<1x324x128xf32, #tpu.memory_space<vmem>>, %arg6: memref<1x8x128xf32, #tpu.memory_space<vmem>>) attributes {dimension_semantics = [#tpu.dimension_semantics<parallel>], iteration_bounds = array<i64: 2>, scalar_prefetch = 0 : i64, scratch_operands = 0 : i64, tpu.core_type = #tpu.core_type<tc>, window_params = [{transform_indices = @transform_0, window_bounds = array<i64: 1, 362, 128>}, {pipeline_mode = #tpu.pipeline_mode<synchronous>, transform_indices = @transform_1, window_bounds = array<i64: 9, 128, 128>}, {pipeline_mode = #tpu.pipeline_mode<synchronous>, transform_indices = @transform_2, window_bounds = array<i64: 1, 128>}, {pipeline_mode = #tpu.pipeline_mode<synchronous>, transform_indices = @transform_3, window_bounds = array<i64: 1, 324, 1>}, {transform_indices = @transform_4, window_bounds = array<i64: 1, 324, 128>}, {transform_indices = @transform_5, window_bounds = array<i64: 1, 8, 128>}]} {
    %c0 = arith.constant 0 : index
    %c0_0 = arith.constant 0 : index
    %c0_1 = arith.constant 0 : index
    %0 = vector.load %arg1[%c0, %c0_0, %c0_1] : memref<1x362x128xbf16, #tpu.memory_space<vmem>>, vector<1x362x128xbf16>
    %1 = vector.shape_cast %0 : vector<1x362x128xbf16> to vector<362x128xbf16>
    %cst = arith.constant 0.000000e+00 : f32
    %2 = vector.broadcast %cst : f32 to vector<324x128xf32>
    %3 = vector.extract_strided_slice %1 {offsets = [0, 0], sizes = [324, 128], strides = [1, 1]} : vector<362x128xbf16> to vector<324x128xbf16>
    %c0_2 = arith.constant 0 : index
    %c0_3 = arith.constant 0 : index
    %c0_4 = arith.constant 0 : index
    %4 = vector.load %arg2[%c0_2, %c0_3, %c0_4] : memref<9x128x128xbf16, #tpu.memory_space<vmem>>, vector<1x128x128xbf16>
    %5 = vector.shape_cast %4 : vector<1x128x128xbf16> to vector<128x128xbf16>
    %cst_5 = arith.constant dense<0.000000e+00> : vector<324x128xf32>
    %6 = tpu.matmul %3, %5, %cst_5 {dimension_numbers = #tpu.dot_dimension_numbers<[1], [0], [0], [1], [0, 0, 1, 1], [], []>} : vector<324x128xbf16>, vector<128x128xbf16>, vector<324x128xf32> -> vector<324x128xf32>
    %7 = arith.addf %2, %6 : vector<324x128xf32>
    %8 = vector.extract_strided_slice %1 {offsets = [1, 0], sizes = [324, 128], strides = [1, 1]} : vector<362x128xbf16> to vector<324x128xbf16>
    %c1 = arith.constant 1 : index
    %c0_6 = arith.constant 0 : index
    %c0_7 = arith.constant 0 : index
    %9 = vector.load %arg2[%c1, %c0_6, %c0_7] : memref<9x128x128xbf16, #tpu.memory_space<vmem>>, vector<1x128x128xbf16>
    %10 = vector.shape_cast %9 : vector<1x128x128xbf16> to vector<128x128xbf16>
    %cst_8 = arith.constant dense<0.000000e+00> : vector<324x128xf32>
    %11 = tpu.matmul %8, %10, %cst_8 {dimension_numbers = #tpu.dot_dimension_numbers<[1], [0], [0], [1], [0, 0, 1, 1], [], []>} : vector<324x128xbf16>, vector<128x128xbf16>, vector<324x128xf32> -> vector<324x128xf32>
    %12 = arith.addf %7, %11 : vector<324x128xf32>
    %13 = vector.extract_strided_slice %1 {offsets = [2, 0], sizes = [324, 128], strides = [1, 1]} : vector<362x128xbf16> to vector<324x128xbf16>
    %c2 = arith.constant 2 : index
    %c0_9 = arith.constant 0 : index
    %c0_10 = arith.constant 0 : index
    %14 = vector.load %arg2[%c2, %c0_9, %c0_10] : memref<9x128x128xbf16, #tpu.memory_space<vmem>>, vector<1x128x128xbf16>
    %15 = vector.shape_cast %14 : vector<1x128x128xbf16> to vector<128x128xbf16>
    %cst_11 = arith.constant dense<0.000000e+00> : vector<324x128xf32>
    %16 = tpu.matmul %13, %15, %cst_11 {dimension_numbers = #tpu.dot_dimension_numbers<[1], [0], [0], [1], [0, 0, 1, 1], [], []>} : vector<324x128xbf16>, vector<128x128xbf16>, vector<324x128xf32> -> vector<324x128xf32>
    %17 = arith.addf %12, %16 : vector<324x128xf32>
    %18 = vector.extract_strided_slice %1 {offsets = [18, 0], sizes = [324, 128], strides = [1, 1]} : vector<362x128xbf16> to vector<324x128xbf16>
    %c3 = arith.constant 3 : index
    %c0_12 = arith.constant 0 : index
    %c0_13 = arith.constant 0 : index
    %19 = vector.load %arg2[%c3, %c0_12, %c0_13] : memref<9x128x128xbf16, #tpu.memory_space<vmem>>, vector<1x128x128xbf16>
    %20 = vector.shape_cast %19 : vector<1x128x128xbf16> to vector<128x128xbf16>
    %cst_14 = arith.constant dense<0.000000e+00> : vector<324x128xf32>
    %21 = tpu.matmul %18, %20, %cst_14 {dimension_numbers = #tpu.dot_dimension_numbers<[1], [0], [0], [1], [0, 0, 1, 1], [], []>} : vector<324x128xbf16>, vector<128x128xbf16>, vector<324x128xf32> -> vector<324x128xf32>
    %22 = arith.addf %17, %21 : vector<324x128xf32>
    %23 = vector.extract_strided_slice %1 {offsets = [19, 0], sizes = [324, 128], strides = [1, 1]} : vector<362x128xbf16> to vector<324x128xbf16>
    %c4 = arith.constant 4 : index
    %c0_15 = arith.constant 0 : index
    %c0_16 = arith.constant 0 : index
    %24 = vector.load %arg2[%c4, %c0_15, %c0_16] : memref<9x128x128xbf16, #tpu.memory_space<vmem>>, vector<1x128x128xbf16>
    %25 = vector.shape_cast %24 : vector<1x128x128xbf16> to vector<128x128xbf16>
    %cst_17 = arith.constant dense<0.000000e+00> : vector<324x128xf32>
    %26 = tpu.matmul %23, %25, %cst_17 {dimension_numbers = #tpu.dot_dimension_numbers<[1], [0], [0], [1], [0, 0, 1, 1], [], []>} : vector<324x128xbf16>, vector<128x128xbf16>, vector<324x128xf32> -> vector<324x128xf32>
    %27 = arith.addf %22, %26 : vector<324x128xf32>
    %28 = vector.extract_strided_slice %1 {offsets = [20, 0], sizes = [324, 128], strides = [1, 1]} : vector<362x128xbf16> to vector<324x128xbf16>
    %c5 = arith.constant 5 : index
    %c0_18 = arith.constant 0 : index
    %c0_19 = arith.constant 0 : index
    %29 = vector.load %arg2[%c5, %c0_18, %c0_19] : memref<9x128x128xbf16, #tpu.memory_space<vmem>>, vector<1x128x128xbf16>
    %30 = vector.shape_cast %29 : vector<1x128x128xbf16> to vector<128x128xbf16>
    %cst_20 = arith.constant dense<0.000000e+00> : vector<324x128xf32>
    %31 = tpu.matmul %28, %30, %cst_20 {dimension_numbers = #tpu.dot_dimension_numbers<[1], [0], [0], [1], [0, 0, 1, 1], [], []>} : vector<324x128xbf16>, vector<128x128xbf16>, vector<324x128xf32> -> vector<324x128xf32>
    %32 = arith.addf %27, %31 : vector<324x128xf32>
    %33 = vector.extract_strided_slice %1 {offsets = [36, 0], sizes = [324, 128], strides = [1, 1]} : vector<362x128xbf16> to vector<324x128xbf16>
    %c6 = arith.constant 6 : index
    %c0_21 = arith.constant 0 : index
    %c0_22 = arith.constant 0 : index
    %34 = vector.load %arg2[%c6, %c0_21, %c0_22] : memref<9x128x128xbf16, #tpu.memory_space<vmem>>, vector<1x128x128xbf16>
    %35 = vector.shape_cast %34 : vector<1x128x128xbf16> to vector<128x128xbf16>
    %cst_23 = arith.constant dense<0.000000e+00> : vector<324x128xf32>
    %36 = tpu.matmul %33, %35, %cst_23 {dimension_numbers = #tpu.dot_dimension_numbers<[1], [0], [0], [1], [0, 0, 1, 1], [], []>} : vector<324x128xbf16>, vector<128x128xbf16>, vector<324x128xf32> -> vector<324x128xf32>
    %37 = arith.addf %32, %36 : vector<324x128xf32>
    %38 = vector.extract_strided_slice %1 {offsets = [37, 0], sizes = [324, 128], strides = [1, 1]} : vector<362x128xbf16> to vector<324x128xbf16>
    %c7 = arith.constant 7 : index
    %c0_24 = arith.constant 0 : index
    %c0_25 = arith.constant 0 : index
    %39 = vector.load %arg2[%c7, %c0_24, %c0_25] : memref<9x128x128xbf16, #tpu.memory_space<vmem>>, vector<1x128x128xbf16>
    %40 = vector.shape_cast %39 : vector<1x128x128xbf16> to vector<128x128xbf16>
    %cst_26 = arith.constant dense<0.000000e+00> : vector<324x128xf32>
    %41 = tpu.matmul %38, %40, %cst_26 {dimension_numbers = #tpu.dot_dimension_numbers<[1], [0], [0], [1], [0, 0, 1, 1], [], []>} : vector<324x128xbf16>, vector<128x128xbf16>, vector<324x128xf32> -> vector<324x128xf32>
    %42 = arith.addf %37, %41 : vector<324x128xf32>
    %43 = vector.extract_strided_slice %1 {offsets = [38, 0], sizes = [324, 128], strides = [1, 1]} : vector<362x128xbf16> to vector<324x128xbf16>
    %c8 = arith.constant 8 : index
    %c0_27 = arith.constant 0 : index
    %c0_28 = arith.constant 0 : index
    %44 = vector.load %arg2[%c8, %c0_27, %c0_28] : memref<9x128x128xbf16, #tpu.memory_space<vmem>>, vector<1x128x128xbf16>
    %45 = vector.shape_cast %44 : vector<1x128x128xbf16> to vector<128x128xbf16>
    %cst_29 = arith.constant dense<0.000000e+00> : vector<324x128xf32>
    %46 = tpu.matmul %43, %45, %cst_29 {dimension_numbers = #tpu.dot_dimension_numbers<[1], [0], [0], [1], [0, 0, 1, 1], [], []>} : vector<324x128xbf16>, vector<128x128xbf16>, vector<324x128xf32> -> vector<324x128xf32>
    %47 = arith.addf %42, %46 : vector<324x128xf32>
    %c0_30 = arith.constant 0 : index
    %c0_31 = arith.constant 0 : index
    %48 = vector.load %arg3[%c0_30, %c0_31] : memref<1x128xf32, #tpu.memory_space<vmem>>, vector<1x128xf32>
    %49 = vector.broadcast %48 : vector<1x128xf32> to vector<324x128xf32>
    %50 = arith.addf %47, %49 : vector<324x128xf32>
    %c0_32 = arith.constant 0 : index
    %c0_33 = arith.constant 0 : index
    %c0_34 = arith.constant 0 : index
    %51 = vector.load %arg4[%c0_32, %c0_33, %c0_34] : memref<1x324x1xf32, #tpu.memory_space<vmem>>, vector<1x324x1xf32>
    %52 = vector.shape_cast %51 : vector<1x324x1xf32> to vector<324x1xf32>
    %53 = vector.broadcast %52 : vector<324x1xf32> to vector<324x128xf32>
    %54 = arith.mulf %50, %53 : vector<324x128xf32>
    %cst_35 = arith.constant dense<0.000000e+00> : vector<128xf32>
    %55 = vector.multi_reduction <add>, %54, %cst_35 [0] : vector<324x128xf32> to vector<128xf32>
    %56 = vector.shape_cast %55 : vector<128xf32> to vector<1x128xf32>
    %57 = arith.mulf %54, %50 : vector<324x128xf32>
    %cst_36 = arith.constant dense<0.000000e+00> : vector<128xf32>
    %58 = vector.multi_reduction <add>, %57, %cst_36 [0] : vector<324x128xf32> to vector<128xf32>
    %59 = vector.shape_cast %58 : vector<128xf32> to vector<1x128xf32>
    %c0_37 = arith.constant 0 : index
    %c0_38 = arith.constant 0 : index
    %c0_39 = arith.constant 0 : index
    %60 = vector.load %arg5[%c0_37, %c0_38, %c0_39] : memref<1x324x128xf32, #tpu.memory_space<vmem>>, vector<1x324x128xf32>
    %61 = vector.shape_cast %60 : vector<1x324x128xf32> to vector<324x128xf32>
    %62 = vector.shape_cast %50 : vector<324x128xf32> to vector<1x324x128xf32>
    tpu.vector_store %arg5[%c0_37, %c0_38, %c0_39], %62 {strides = array<i32>} : memref<1x324x128xf32, #tpu.memory_space<vmem>>, vector<1x324x128xf32>,
    %cst_40 = arith.constant 0.000000e+00 : f32
    %63 = vector.broadcast %cst_40 : f32 to vector<6x128xf32>
    %64 = tpu.concatenate %56, %59, %63 in 0 : vector<1x128xf32>, vector<1x128xf32>, vector<6x128xf32> -> vector<8x128xf32>
    %c0_41 = arith.constant 0 : index
    %c0_42 = arith.constant 0 : index
    %c0_43 = arith.constant 0 : index
    %65 = vector.load %arg6[%c0_41, %c0_42, %c0_43] : memref<1x8x128xf32, #tpu.memory_space<vmem>>, vector<1x8x128xf32>
    %66 = vector.shape_cast %65 : vector<1x8x128xf32> to vector<8x128xf32>
    %67 = vector.shape_cast %64 : vector<8x128xf32> to vector<1x8x128xf32>
    tpu.vector_store %arg6[%c0_41, %c0_42, %c0_43], %67 {strides = array<i32>} : memref<1x8x128xf32, #tpu.memory_space<vmem>>, vector<1x8x128xf32>,
    return
  }
  func.func @transform_0(%arg0: i32) -> (i32, i32, i32) {
    %c0_i32 = arith.constant 0 : i32
    %c0_i32_0 = arith.constant 0 : i32
    %c0_i32_1 = arith.constant 0 : i32
    return %arg0, %c0_i32, %c0_i32_0 : i32, i32, i32
  }
  func.func @transform_1(%arg0: i32) -> (i32, i32, i32) {
    %c0_i32 = arith.constant 0 : i32
    %c0_i32_0 = arith.constant 0 : i32
    %c0_i32_1 = arith.constant 0 : i32
    %c0_i32_2 = arith.constant 0 : i32
    return %c0_i32, %c0_i32_0, %c0_i32_1 : i32, i32, i32
  }
  func.func @transform_2(%arg0: i32) -> (i32, i32) {
    %c0_i32 = arith.constant 0 : i32
    %c0_i32_0 = arith.constant 0 : i32
    %c0_i32_1 = arith.constant 0 : i32
    return %c0_i32, %c0_i32_0 : i32, i32
  }
  func.func @transform_3(%arg0: i32) -> (i32, i32, i32) {
    %c0_i32 = arith.constant 0 : i32
    %c0_i32_0 = arith.constant 0 : i32
    %c0_i32_1 = arith.constant 0 : i32
    %c0_i32_2 = arith.constant 0 : i32
    return %c0_i32, %c0_i32_0, %c0_i32_1 : i32, i32, i32
  }
  func.func @transform_4(%arg0: i32) -> (i32, i32, i32) {
    %c0_i32 = arith.constant 0 : i32
    %c0_i32_0 = arith.constant 0 : i32
    %c0_i32_1 = arith.constant 0 : i32
    return %arg0, %c0_i32, %c0_i32_0 : i32, i32, i32
  }
  func.func @transform_5(%arg0: i32) -> (i32, i32, i32) {
    %c0_i32 = arith.constant 0 : i32
    %c0_i32_0 = arith.constant 0 : i32
    %c0_i32_1 = arith.constant 0 : i32
    return %arg0, %c0_i32, %c0_i32_0 : i32, i32, i32
  }
}

module attributes {stable_mosaic.version = 11 : i64} {
  func.func @_mid_kernel(%arg0: i32, %arg1: memref<1x324x128xf32, #tpu.memory_space<vmem>>, %arg2: memref<1x128xf32, #tpu.memory_space<vmem>>, %arg3: memref<1x128xf32, #tpu.memory_space<vmem>>, %arg4: memref<9x128x128xbf16, #tpu.memory_space<vmem>>, %arg5: memref<1x128xf32, #tpu.memory_space<vmem>>, %arg6: memref<1x324x1xf32, #tpu.memory_space<vmem>>, %arg7: memref<1x324x128xf32, #tpu.memory_space<vmem>>, %arg8: memref<1x8x128xf32, #tpu.memory_space<vmem>>) attributes {dimension_semantics = [#tpu.dimension_semantics<parallel>], iteration_bounds = array<i64: 2>, scalar_prefetch = 0 : i64, scratch_operands = 0 : i64, tpu.core_type = #tpu.core_type<tc>, window_params = [{transform_indices = @transform_0, window_bounds = array<i64: 1, 324, 128>}, {pipeline_mode = #tpu.pipeline_mode<synchronous>, transform_indices = @transform_1, window_bounds = array<i64: 1, 128>}, {pipeline_mode = #tpu.pipeline_mode<synchronous>, transform_indices = @transform_2, window_bounds = array<i64: 1, 128>}, {pipeline_mode = #tpu.pipeline_mode<synchronous>, transform_indices = @transform_3, window_bounds = array<i64: 9, 128, 128>}, {pipeline_mode = #tpu.pipeline_mode<synchronous>, transform_indices = @transform_4, window_bounds = array<i64: 1, 128>}, {pipeline_mode = #tpu.pipeline_mode<synchronous>, transform_indices = @transform_5, window_bounds = array<i64: 1, 324, 1>}, {transform_indices = @transform_6, window_bounds = array<i64: 1, 324, 128>}, {transform_indices = @transform_7, window_bounds = array<i64: 1, 8, 128>}]} {
    %c0 = arith.constant 0 : index
    %c0_0 = arith.constant 0 : index
    %c0_1 = arith.constant 0 : index
    %0 = vector.load %arg6[%c0, %c0_0, %c0_1] : memref<1x324x1xf32, #tpu.memory_space<vmem>>, vector<1x324x1xf32>
    %1 = vector.shape_cast %0 : vector<1x324x1xf32> to vector<324x1xf32>
    %c0_2 = arith.constant 0 : index
    %c0_3 = arith.constant 0 : index
    %c0_4 = arith.constant 0 : index
    %2 = vector.load %arg1[%c0_2, %c0_3, %c0_4] : memref<1x324x128xf32, #tpu.memory_space<vmem>>, vector<1x324x128xf32>
    %3 = vector.shape_cast %2 : vector<1x324x128xf32> to vector<324x128xf32>
    %c0_5 = arith.constant 0 : index
    %c0_6 = arith.constant 0 : index
    %4 = vector.load %arg2[%c0_5, %c0_6] : memref<1x128xf32, #tpu.memory_space<vmem>>, vector<1x128xf32>
    %5 = vector.broadcast %4 : vector<1x128xf32> to vector<324x128xf32>
    %6 = arith.mulf %3, %5 : vector<324x128xf32>
    %c0_7 = arith.constant 0 : index
    %c0_8 = arith.constant 0 : index
    %7 = vector.load %arg3[%c0_7, %c0_8] : memref<1x128xf32, #tpu.memory_space<vmem>>, vector<1x128xf32>
    %8 = vector.broadcast %7 : vector<1x128xf32> to vector<324x128xf32>
    %9 = arith.addf %6, %8 : vector<324x128xf32>
    %cst = arith.constant 0.000000e+00 : f32
    %10 = vector.broadcast %cst : f32 to vector<324x128xf32>
    %11 = arith.maximumf %9, %10 : vector<324x128xf32>
    %12 = vector.broadcast %1 : vector<324x1xf32> to vector<324x128xf32>
    %13 = arith.mulf %11, %12 : vector<324x128xf32>
    %14 = arith.truncf %13 : vector<324x128xf32> to vector<324x128xbf16>
    %cst_9 = arith.constant 0.000000e+00 : bf16
    %15 = vector.broadcast %cst_9 : bf16 to vector<19x128xbf16>
    %16 = tpu.concatenate %15, %14, %15 in 0 : vector<19x128xbf16>, vector<324x128xbf16>, vector<19x128xbf16> -> vector<362x128xbf16>
    %cst_10 = arith.constant 0.000000e+00 : f32
    %17 = vector.broadcast %cst_10 : f32 to vector<324x128xf32>
    %18 = vector.extract_strided_slice %16 {offsets = [0, 0], sizes = [324, 128], strides = [1, 1]} : vector<362x128xbf16> to vector<324x128xbf16>
    %c0_11 = arith.constant 0 : index
    %c0_12 = arith.constant 0 : index
    %c0_13 = arith.constant 0 : index
    %19 = vector.load %arg4[%c0_11, %c0_12, %c0_13] : memref<9x128x128xbf16, #tpu.memory_space<vmem>>, vector<1x128x128xbf16>
    %20 = vector.shape_cast %19 : vector<1x128x128xbf16> to vector<128x128xbf16>
    %cst_14 = arith.constant dense<0.000000e+00> : vector<324x128xf32>
    %21 = tpu.matmul %18, %20, %cst_14 {dimension_numbers = #tpu.dot_dimension_numbers<[1], [0], [0], [1], [0, 0, 1, 1], [], []>} : vector<324x128xbf16>, vector<128x128xbf16>, vector<324x128xf32> -> vector<324x128xf32>
    %22 = arith.addf %17, %21 : vector<324x128xf32>
    %23 = vector.extract_strided_slice %16 {offsets = [1, 0], sizes = [324, 128], strides = [1, 1]} : vector<362x128xbf16> to vector<324x128xbf16>
    %c1 = arith.constant 1 : index
    %c0_15 = arith.constant 0 : index
    %c0_16 = arith.constant 0 : index
    %24 = vector.load %arg4[%c1, %c0_15, %c0_16] : memref<9x128x128xbf16, #tpu.memory_space<vmem>>, vector<1x128x128xbf16>
    %25 = vector.shape_cast %24 : vector<1x128x128xbf16> to vector<128x128xbf16>
    %cst_17 = arith.constant dense<0.000000e+00> : vector<324x128xf32>
    %26 = tpu.matmul %23, %25, %cst_17 {dimension_numbers = #tpu.dot_dimension_numbers<[1], [0], [0], [1], [0, 0, 1, 1], [], []>} : vector<324x128xbf16>, vector<128x128xbf16>, vector<324x128xf32> -> vector<324x128xf32>
    %27 = arith.addf %22, %26 : vector<324x128xf32>
    %28 = vector.extract_strided_slice %16 {offsets = [2, 0], sizes = [324, 128], strides = [1, 1]} : vector<362x128xbf16> to vector<324x128xbf16>
    %c2 = arith.constant 2 : index
    %c0_18 = arith.constant 0 : index
    %c0_19 = arith.constant 0 : index
    %29 = vector.load %arg4[%c2, %c0_18, %c0_19] : memref<9x128x128xbf16, #tpu.memory_space<vmem>>, vector<1x128x128xbf16>
    %30 = vector.shape_cast %29 : vector<1x128x128xbf16> to vector<128x128xbf16>
    %cst_20 = arith.constant dense<0.000000e+00> : vector<324x128xf32>
    %31 = tpu.matmul %28, %30, %cst_20 {dimension_numbers = #tpu.dot_dimension_numbers<[1], [0], [0], [1], [0, 0, 1, 1], [], []>} : vector<324x128xbf16>, vector<128x128xbf16>, vector<324x128xf32> -> vector<324x128xf32>
    %32 = arith.addf %27, %31 : vector<324x128xf32>
    %33 = vector.extract_strided_slice %16 {offsets = [18, 0], sizes = [324, 128], strides = [1, 1]} : vector<362x128xbf16> to vector<324x128xbf16>
    %c3 = arith.constant 3 : index
    %c0_21 = arith.constant 0 : index
    %c0_22 = arith.constant 0 : index
    %34 = vector.load %arg4[%c3, %c0_21, %c0_22] : memref<9x128x128xbf16, #tpu.memory_space<vmem>>, vector<1x128x128xbf16>
    %35 = vector.shape_cast %34 : vector<1x128x128xbf16> to vector<128x128xbf16>
    %cst_23 = arith.constant dense<0.000000e+00> : vector<324x128xf32>
    %36 = tpu.matmul %33, %35, %cst_23 {dimension_numbers = #tpu.dot_dimension_numbers<[1], [0], [0], [1], [0, 0, 1, 1], [], []>} : vector<324x128xbf16>, vector<128x128xbf16>, vector<324x128xf32> -> vector<324x128xf32>
    %37 = arith.addf %32, %36 : vector<324x128xf32>
    %38 = vector.extract_strided_slice %16 {offsets = [19, 0], sizes = [324, 128], strides = [1, 1]} : vector<362x128xbf16> to vector<324x128xbf16>
    %c4 = arith.constant 4 : index
    %c0_24 = arith.constant 0 : index
    %c0_25 = arith.constant 0 : index
    %39 = vector.load %arg4[%c4, %c0_24, %c0_25] : memref<9x128x128xbf16, #tpu.memory_space<vmem>>, vector<1x128x128xbf16>
    %40 = vector.shape_cast %39 : vector<1x128x128xbf16> to vector<128x128xbf16>
    %cst_26 = arith.constant dense<0.000000e+00> : vector<324x128xf32>
    %41 = tpu.matmul %38, %40, %cst_26 {dimension_numbers = #tpu.dot_dimension_numbers<[1], [0], [0], [1], [0, 0, 1, 1], [], []>} : vector<324x128xbf16>, vector<128x128xbf16>, vector<324x128xf32> -> vector<324x128xf32>
    %42 = arith.addf %37, %41 : vector<324x128xf32>
    %43 = vector.extract_strided_slice %16 {offsets = [20, 0], sizes = [324, 128], strides = [1, 1]} : vector<362x128xbf16> to vector<324x128xbf16>
    %c5 = arith.constant 5 : index
    %c0_27 = arith.constant 0 : index
    %c0_28 = arith.constant 0 : index
    %44 = vector.load %arg4[%c5, %c0_27, %c0_28] : memref<9x128x128xbf16, #tpu.memory_space<vmem>>, vector<1x128x128xbf16>
    %45 = vector.shape_cast %44 : vector<1x128x128xbf16> to vector<128x128xbf16>
    %cst_29 = arith.constant dense<0.000000e+00> : vector<324x128xf32>
    %46 = tpu.matmul %43, %45, %cst_29 {dimension_numbers = #tpu.dot_dimension_numbers<[1], [0], [0], [1], [0, 0, 1, 1], [], []>} : vector<324x128xbf16>, vector<128x128xbf16>, vector<324x128xf32> -> vector<324x128xf32>
    %47 = arith.addf %42, %46 : vector<324x128xf32>
    %48 = vector.extract_strided_slice %16 {offsets = [36, 0], sizes = [324, 128], strides = [1, 1]} : vector<362x128xbf16> to vector<324x128xbf16>
    %c6 = arith.constant 6 : index
    %c0_30 = arith.constant 0 : index
    %c0_31 = arith.constant 0 : index
    %49 = vector.load %arg4[%c6, %c0_30, %c0_31] : memref<9x128x128xbf16, #tpu.memory_space<vmem>>, vector<1x128x128xbf16>
    %50 = vector.shape_cast %49 : vector<1x128x128xbf16> to vector<128x128xbf16>
    %cst_32 = arith.constant dense<0.000000e+00> : vector<324x128xf32>
    %51 = tpu.matmul %48, %50, %cst_32 {dimension_numbers = #tpu.dot_dimension_numbers<[1], [0], [0], [1], [0, 0, 1, 1], [], []>} : vector<324x128xbf16>, vector<128x128xbf16>, vector<324x128xf32> -> vector<324x128xf32>
    %52 = arith.addf %47, %51 : vector<324x128xf32>
    %53 = vector.extract_strided_slice %16 {offsets = [37, 0], sizes = [324, 128], strides = [1, 1]} : vector<362x128xbf16> to vector<324x128xbf16>
    %c7 = arith.constant 7 : index
    %c0_33 = arith.constant 0 : index
    %c0_34 = arith.constant 0 : index
    %54 = vector.load %arg4[%c7, %c0_33, %c0_34] : memref<9x128x128xbf16, #tpu.memory_space<vmem>>, vector<1x128x128xbf16>
    %55 = vector.shape_cast %54 : vector<1x128x128xbf16> to vector<128x128xbf16>
    %cst_35 = arith.constant dense<0.000000e+00> : vector<324x128xf32>
    %56 = tpu.matmul %53, %55, %cst_35 {dimension_numbers = #tpu.dot_dimension_numbers<[1], [0], [0], [1], [0, 0, 1, 1], [], []>} : vector<324x128xbf16>, vector<128x128xbf16>, vector<324x128xf32> -> vector<324x128xf32>
    %57 = arith.addf %52, %56 : vector<324x128xf32>
    %58 = vector.extract_strided_slice %16 {offsets = [38, 0], sizes = [324, 128], strides = [1, 1]} : vector<362x128xbf16> to vector<324x128xbf16>
    %c8 = arith.constant 8 : index
    %c0_36 = arith.constant 0 : index
    %c0_37 = arith.constant 0 : index
    %59 = vector.load %arg4[%c8, %c0_36, %c0_37] : memref<9x128x128xbf16, #tpu.memory_space<vmem>>, vector<1x128x128xbf16>
    %60 = vector.shape_cast %59 : vector<1x128x128xbf16> to vector<128x128xbf16>
    %cst_38 = arith.constant dense<0.000000e+00> : vector<324x128xf32>
    %61 = tpu.matmul %58, %60, %cst_38 {dimension_numbers = #tpu.dot_dimension_numbers<[1], [0], [0], [1], [0, 0, 1, 1], [], []>} : vector<324x128xbf16>, vector<128x128xbf16>, vector<324x128xf32> -> vector<324x128xf32>
    %62 = arith.addf %57, %61 : vector<324x128xf32>
    %c0_39 = arith.constant 0 : index
    %c0_40 = arith.constant 0 : index
    %63 = vector.load %arg5[%c0_39, %c0_40] : memref<1x128xf32, #tpu.memory_space<vmem>>, vector<1x128xf32>
    %64 = vector.broadcast %63 : vector<1x128xf32> to vector<324x128xf32>
    %65 = arith.addf %62, %64 : vector<324x128xf32>
    %66 = vector.broadcast %1 : vector<324x1xf32> to vector<324x128xf32>
    %67 = arith.mulf %65, %66 : vector<324x128xf32>
    %cst_41 = arith.constant dense<0.000000e+00> : vector<128xf32>
    %68 = vector.multi_reduction <add>, %67, %cst_41 [0] : vector<324x128xf32> to vector<128xf32>
    %69 = vector.shape_cast %68 : vector<128xf32> to vector<1x128xf32>
    %70 = arith.mulf %67, %65 : vector<324x128xf32>
    %cst_42 = arith.constant dense<0.000000e+00> : vector<128xf32>
    %71 = vector.multi_reduction <add>, %70, %cst_42 [0] : vector<324x128xf32> to vector<128xf32>
    %72 = vector.shape_cast %71 : vector<128xf32> to vector<1x128xf32>
    %c0_43 = arith.constant 0 : index
    %c0_44 = arith.constant 0 : index
    %c0_45 = arith.constant 0 : index
    %73 = vector.load %arg7[%c0_43, %c0_44, %c0_45] : memref<1x324x128xf32, #tpu.memory_space<vmem>>, vector<1x324x128xf32>
    %74 = vector.shape_cast %73 : vector<1x324x128xf32> to vector<324x128xf32>
    %75 = vector.shape_cast %65 : vector<324x128xf32> to vector<1x324x128xf32>
    tpu.vector_store %arg7[%c0_43, %c0_44, %c0_45], %75 {strides = array<i32>} : memref<1x324x128xf32, #tpu.memory_space<vmem>>, vector<1x324x128xf32>,
    %cst_46 = arith.constant 0.000000e+00 : f32
    %76 = vector.broadcast %cst_46 : f32 to vector<6x128xf32>
    %77 = tpu.concatenate %69, %72, %76 in 0 : vector<1x128xf32>, vector<1x128xf32>, vector<6x128xf32> -> vector<8x128xf32>
    %c0_47 = arith.constant 0 : index
    %c0_48 = arith.constant 0 : index
    %c0_49 = arith.constant 0 : index
    %78 = vector.load %arg8[%c0_47, %c0_48, %c0_49] : memref<1x8x128xf32, #tpu.memory_space<vmem>>, vector<1x8x128xf32>
    %79 = vector.shape_cast %78 : vector<1x8x128xf32> to vector<8x128xf32>
    %80 = vector.shape_cast %77 : vector<8x128xf32> to vector<1x8x128xf32>
    tpu.vector_store %arg8[%c0_47, %c0_48, %c0_49], %80 {strides = array<i32>} : memref<1x8x128xf32, #tpu.memory_space<vmem>>, vector<1x8x128xf32>,
    return
  }
  func.func @transform_0(%arg0: i32) -> (i32, i32, i32) {
    %c0_i32 = arith.constant 0 : i32
    %c0_i32_0 = arith.constant 0 : i32
    %c0_i32_1 = arith.constant 0 : i32
    return %arg0, %c0_i32, %c0_i32_0 : i32, i32, i32
  }
  func.func @transform_1(%arg0: i32) -> (i32, i32) {
    %c0_i32 = arith.constant 0 : i32
    %c0_i32_0 = arith.constant 0 : i32
    %c0_i32_1 = arith.constant 0 : i32
    return %c0_i32, %c0_i32_0 : i32, i32
  }
  func.func @transform_2(%arg0: i32) -> (i32, i32) {
    %c0_i32 = arith.constant 0 : i32
    %c0_i32_0 = arith.constant 0 : i32
    %c0_i32_1 = arith.constant 0 : i32
    return %c0_i32, %c0_i32_0 : i32, i32
  }
  func.func @transform_3(%arg0: i32) -> (i32, i32, i32) {
    %c0_i32 = arith.constant 0 : i32
    %c0_i32_0 = arith.constant 0 : i32
    %c0_i32_1 = arith.constant 0 : i32
    %c0_i32_2 = arith.constant 0 : i32
    return %c0_i32, %c0_i32_0, %c0_i32_1 : i32, i32, i32
  }
  func.func @transform_4(%arg0: i32) -> (i32, i32) {
    %c0_i32 = arith.constant 0 : i32
    %c0_i32_0 = arith.constant 0 : i32
    %c0_i32_1 = arith.constant 0 : i32
    return %c0_i32, %c0_i32_0 : i32, i32
  }
  func.func @transform_5(%arg0: i32) -> (i32, i32, i32) {
    %c0_i32 = arith.constant 0 : i32
    %c0_i32_0 = arith.constant 0 : i32
    %c0_i32_1 = arith.constant 0 : i32
    %c0_i32_2 = arith.constant 0 : i32
    return %c0_i32, %c0_i32_0, %c0_i32_1 : i32, i32, i32
  }
  func.func @transform_6(%arg0: i32) -> (i32, i32, i32) {
    %c0_i32 = arith.constant 0 : i32
    %c0_i32_0 = arith.constant 0 : i32
    %c0_i32_1 = arith.constant 0 : i32
    return %arg0, %c0_i32, %c0_i32_0 : i32, i32, i32
  }
  func.func @transform_7(%arg0: i32) -> (i32, i32, i32) {
    %c0_i32 = arith.constant 0 : i32
    %c0_i32_0 = arith.constant 0 : i32
    %c0_i32_1 = arith.constant 0 : i32
    return %arg0, %c0_i32, %c0_i32_0 : i32, i32, i32
  }
}

module attributes {stable_mosaic.version = 11 : i64} {
  func.func @_tail_kernel(%arg0: i32, %arg1: memref<1x324x128xf32, #tpu.memory_space<vmem>>, %arg2: memref<1x128xf32, #tpu.memory_space<vmem>>, %arg3: memref<1x128xf32, #tpu.memory_space<vmem>>, %arg4: memref<1x362x128xbf16, #tpu.memory_space<vmem>>, %arg5: memref<128x128xbf16, #tpu.memory_space<vmem>>, %arg6: memref<1x128xf32, #tpu.memory_space<vmem>>, %arg7: memref<1x324x128xf32, #tpu.memory_space<vmem>>) attributes {dimension_semantics = [#tpu.dimension_semantics<parallel>], iteration_bounds = array<i64: 2>, scalar_prefetch = 0 : i64, scratch_operands = 0 : i64, tpu.core_type = #tpu.core_type<tc>, window_params = [{transform_indices = @transform_0, window_bounds = array<i64: 1, 324, 128>}, {pipeline_mode = #tpu.pipeline_mode<synchronous>, transform_indices = @transform_1, window_bounds = array<i64: 1, 128>}, {pipeline_mode = #tpu.pipeline_mode<synchronous>, transform_indices = @transform_2, window_bounds = array<i64: 1, 128>}, {transform_indices = @transform_3, window_bounds = array<i64: 1, 362, 128>}, {pipeline_mode = #tpu.pipeline_mode<synchronous>, transform_indices = @transform_4, window_bounds = array<i64: 128, 128>}, {pipeline_mode = #tpu.pipeline_mode<synchronous>, transform_indices = @transform_5, window_bounds = array<i64: 1, 128>}, {transform_indices = @transform_6, window_bounds = array<i64: 1, 324, 128>}]} {
    %c0 = arith.constant 0 : index
    %c0_0 = arith.constant 0 : index
    %c0_1 = arith.constant 0 : index
    %0 = vector.load %arg1[%c0, %c0_0, %c0_1] : memref<1x324x128xf32, #tpu.memory_space<vmem>>, vector<1x324x128xf32>
    %1 = vector.shape_cast %0 : vector<1x324x128xf32> to vector<324x128xf32>
    %c0_2 = arith.constant 0 : index
    %c0_3 = arith.constant 0 : index
    %2 = vector.load %arg2[%c0_2, %c0_3] : memref<1x128xf32, #tpu.memory_space<vmem>>, vector<1x128xf32>
    %3 = vector.broadcast %2 : vector<1x128xf32> to vector<324x128xf32>
    %4 = arith.mulf %1, %3 : vector<324x128xf32>
    %c0_4 = arith.constant 0 : index
    %c0_5 = arith.constant 0 : index
    %5 = vector.load %arg3[%c0_4, %c0_5] : memref<1x128xf32, #tpu.memory_space<vmem>>, vector<1x128xf32>
    %6 = vector.broadcast %5 : vector<1x128xf32> to vector<324x128xf32>
    %7 = arith.addf %4, %6 : vector<324x128xf32>
    %c0_6 = arith.constant 0 : index
    %c0_7 = arith.constant 0 : index
    %c0_8 = arith.constant 0 : index
    %8 = vector.load %arg4[%c0_6, %c0_7, %c0_8] : memref<1x362x128xbf16, #tpu.memory_space<vmem>>, vector<1x362x128xbf16>
    %9 = vector.shape_cast %8 : vector<1x362x128xbf16> to vector<362x128xbf16>
    %10 = vector.extract_strided_slice %9 {offsets = [19, 0], sizes = [324, 128], strides = [1, 1]} : vector<362x128xbf16> to vector<324x128xbf16>
    %c0_9 = arith.constant 0 : index
    %c0_10 = arith.constant 0 : index
    %11 = vector.load %arg5[%c0_9, %c0_10] : memref<128x128xbf16, #tpu.memory_space<vmem>>, vector<128x128xbf16>
    %cst = arith.constant dense<0.000000e+00> : vector<324x128xf32>
    %12 = tpu.matmul %10, %11, %cst {dimension_numbers = #tpu.dot_dimension_numbers<[1], [0], [0], [1], [0, 0, 1, 1], [], []>} : vector<324x128xbf16>, vector<128x128xbf16>, vector<324x128xf32> -> vector<324x128xf32>
    %c0_11 = arith.constant 0 : index
    %c0_12 = arith.constant 0 : index
    %13 = vector.load %arg6[%c0_11, %c0_12] : memref<1x128xf32, #tpu.memory_space<vmem>>, vector<1x128xf32>
    %14 = vector.broadcast %13 : vector<1x128xf32> to vector<324x128xf32>
    %15 = arith.addf %12, %14 : vector<324x128xf32>
    %16 = arith.addf %7, %15 : vector<324x128xf32>
    %cst_13 = arith.constant 0.000000e+00 : f32
    %17 = vector.broadcast %cst_13 : f32 to vector<324x128xf32>
    %18 = arith.maximumf %16, %17 : vector<324x128xf32>
    %c0_14 = arith.constant 0 : index
    %c0_15 = arith.constant 0 : index
    %c0_16 = arith.constant 0 : index
    %19 = vector.load %arg7[%c0_14, %c0_15, %c0_16] : memref<1x324x128xf32, #tpu.memory_space<vmem>>, vector<1x324x128xf32>
    %20 = vector.shape_cast %19 : vector<1x324x128xf32> to vector<324x128xf32>
    %21 = vector.shape_cast %18 : vector<324x128xf32> to vector<1x324x128xf32>
    tpu.vector_store %arg7[%c0_14, %c0_15, %c0_16], %21 {strides = array<i32>} : memref<1x324x128xf32, #tpu.memory_space<vmem>>, vector<1x324x128xf32>,
    return
  }
  func.func @transform_0(%arg0: i32) -> (i32, i32, i32) {
    %c0_i32 = arith.constant 0 : i32
    %c0_i32_0 = arith.constant 0 : i32
    %c0_i32_1 = arith.constant 0 : i32
    return %arg0, %c0_i32, %c0_i32_0 : i32, i32, i32
  }
  func.func @transform_1(%arg0: i32) -> (i32, i32) {
    %c0_i32 = arith.constant 0 : i32
    %c0_i32_0 = arith.constant 0 : i32
    %c0_i32_1 = arith.constant 0 : i32
    return %c0_i32, %c0_i32_0 : i32, i32
  }
  func.func @transform_2(%arg0: i32) -> (i32, i32) {
    %c0_i32 = arith.constant 0 : i32
    %c0_i32_0 = arith.constant 0 : i32
    %c0_i32_1 = arith.constant 0 : i32
    return %c0_i32, %c0_i32_0 : i32, i32
  }
  func.func @transform_3(%arg0: i32) -> (i32, i32, i32) {
    %c0_i32 = arith.constant 0 : i32
    %c0_i32_0 = arith.constant 0 : i32
    %c0_i32_1 = arith.constant 0 : i32
    return %arg0, %c0_i32, %c0_i32_0 : i32, i32, i32
  }
  func.func @transform_4(%arg0: i32) -> (i32, i32) {
    %c0_i32 = arith.constant 0 : i32
    %c0_i32_0 = arith.constant 0 : i32
    %c0_i32_1 = arith.constant 0 : i32
    return %c0_i32, %c0_i32_0 : i32, i32
  }
  func.func @transform_5(%arg0: i32) -> (i32, i32) {
    %c0_i32 = arith.constant 0 : i32
    %c0_i32_0 = arith.constant 0 : i32
    %c0_i32_1 = arith.constant 0 : i32
    return %c0_i32, %c0_i32_0 : i32, i32
  }
  func.func @transform_6(%arg0: i32) -> (i32, i32, i32) {
    %c0_i32 = arith.constant 0 : i32
    %c0_i32_0 = arith.constant 0 : i32
    %c0_i32_1 = arith.constant 0 : i32
    return %arg0, %c0_i32, %c0_i32_0 : i32, i32, i32
  }
}

</mosaic_0001>

<bundles_post_ra>
// kernel: _residual_forward.5
= control target key start
LH: loop header
LB: loop body
LE: loop exit
PB: predicated region body
PF: predicated region fallthrough
CT: control target
= control target key end

     0   :  { %s1498_s21 = smov 0   ;;  %s1903_s0 = inlined_call_operand.vmem [shape: f32[2,324,128], index: 0, kind: input, shape index: {}]   ;;  %s1904_s1 = inlined_call_operand.vmem [shape: f32[1,128], index: 1, kind: input, shape index: {}]   ;;  %s1905_s2 = inlined_call_operand.vmem [shape: f32[1,128], index: 2, kind: input, shape index: {}]   ;;  %s1906_s3 = inlined_call_operand.vmem [shape: bf16[2,362,128], index: 3, kind: input, shape index: {}]   ;;  %s1907_s4 = inlined_call_operand.vmem [shape: bf16[128,128], index: 4, kind: input, shape index: {}]   ;;  %s1908_s5 = inlined_call_operand.vmem [shape: f32[1,128], index: 5, kind: input, shape index: {}]   ;;  %s1909_s6 = inlined_call_operand.vmem [shape: f32[2,324,128], index: 6, kind: output, shape index: {}]  }
   0x1 LB: > { %s1225_s22 = sadd.s32 4294967295, %s1459_s21   ;;  %p1229_p0 = scmp.ge.s32.totalorder %s1459_s21, 1  ;;  %s1459_s21 = sphi %s1498_s21, %s16_s21  }
   0x2   : > { %p222_p1 = scmp.lt.s32.totalorder %s1459_s21, 3 }
   0x4   : > { %p223_p2 = pnand %p1229_p0, %p222_p1 }
   0x5   : > { %v1424_v0 = vld [vmem:[%s1907_s4] sm:$0xff] (!%p223_p2)   ;;  %v1461_v1 = vmov (!%p223_p2), 0.0   ;;  %v1425_v2 = vld [vmem:[%s1907_s4 + $0x8] sm:$0xff] (!%p223_p2)   ;;  %p257_p3 = scmp.lt.s32.totalorder (!%p223_p2), %s1225_s22, 1  ;;  %vm1462_vm0 = vmmov (!%p223_p2), 0   ;;  %v1426_v3 = vld [vmem:[%s1907_s4 + $0x10] sm:$0xff] (!%p223_p2)  }
   0x6   : > { %226 = sbr.rel (%p223_p2) target bundleno = 339 (0x153), region = 44  ;;  %1296 = vmatprep.subr.bf16.mxu0 (!%p223_p2), %v1461_v1  ;;  %1396 = vmatprep.subr.bf16.mxu1 (!%p223_p2), %v1461_v1  ;;  %v1427_v4 = vld [vmem:[%s1907_s4 + $0x18] sm:$0xff] (!%p223_p2)   ;;  %v1428_v6 = vld [vmem:[%s1907_s4 + $0x20] sm:$0xff] (!%p223_p2)   ;;  %v1429_v11 = vld [vmem:[%s1907_s4 + $0x28] sm:$0xff] (!%p223_p2)   ;;  %vm577_vm1 = vsmask.f32 (!%p223_p2), 6400 }
   0x7   : > { %1297 = vmatpush3.bf16.msra.mxu0 (!%p223_p2), %v1424_v0  ;;  %1404 = vmatpush3.bf16.msra.mxu1 (!%p223_p2), %v1424_v0  ;;  %v1430_v19 = vld [vmem:[%s1907_s4 + $0x30] sm:$0xff] (!%p223_p2)   ;;  %v1431_v30 = vld [vmem:[%s1907_s4 + $0x38] sm:$0xff] (!%p223_p2)  }
   0x8   : > { %1298 = vmatprep.subr.bf16.mxu0 (!%p223_p2), %v1461_v1  ;;  %1397 = vmatprep.subr.bf16.mxu1 (!%p223_p2), %v1461_v1 }
   0x9   : > { %1312 = vmatprep.mubr.msk.bf16.mxu0 (!%p223_p2), %vm1462_vm0, %v1461_v1  ;;  %1356 = vmatprep.mubr.msk.bf16.mxu1 (!%p223_p2), %vm1462_vm0, %v1461_v1 }
   0xb   : > { %1299 = vmatpush3.bf16.msra.mxu0 (!%p223_p2), %v1425_v2  ;;  %1405 = vmatpush3.bf16.msra.mxu1 (!%p223_p2), %v1425_v2 }
   0xc   : > { %1300 = vmatprep.subr.bf16.mxu0 (!%p223_p2), %v1461_v1  ;;  %1398 = vmatprep.subr.bf16.mxu1 (!%p223_p2), %v1461_v1 }
   0xd   : > { %s1911_s22 = smov (!%p257_p3, %s1225_s22), 1 }
   0xe   : > { %s1413_s29 = smul.u32 184, %s1911_s22 }
   0xf   : > { %1301 = vmatpush3.bf16.msra.mxu0 %v1426_v3  ;;  %1406 = vmatpush3.bf16.msra.mxu1 %v1426_v3  ;;  %s1412_s19 = smul.u32 328, %s1911_s22 }
  0x10   : > { %s1531_s8 = scalar_lea.vmem %s1906_s3, %s1413_s29  ;;  %1302 = vmatprep.subr.bf16.mxu0 %v1461_v1  ;;  %1399 = vmatprep.subr.bf16.mxu1 %v1461_v1 }
  0x11   : > { %v1432_v5 = vld [vmem:[%s1531_s8 + $0x8] sm:$0xff]   ;;  %v1433_v7 = vld [vmem:[%s1531_s8 + $0x10] sm:$0xff]   ;;  %v1434_v8 = vld [vmem:[%s1531_s8 + $0x60] sm:$0xff]   ;;  %s1671_s24 = scalar_lea.vmem %s1903_s0, %s1412_s19  ;;  %s1715_s9 = scalar_lea.vmem %s1909_s6, %s1412_s19 }
  0x12   : > { %v1435_v9 = vld [vmem:[%s1531_s8 + $0x68] sm:$0xff]   ;;  %v579_v10 = vshrl.u32 %v1432_v5, 16  ;;  %v582_v12 = vshll.u32 %v1432_v5, 16  ;;  %v587_v13 = vshrl.u32 %v1433_v7, 16  ;;  %v590_v14 = vshll.u32 %v1433_v7, 16  ;;  %v1436_v21 = vld [vmem:[%s1531_s8 + $0x18] sm:$0xff]  }
  0x13   : > { %1303 = vmatpush3.bf16.msra.mxu0 %v1427_v4  ;;  %1407 = vmatpush3.bf16.msra.mxu1 %v1427_v4  ;;  %v677_v15 = vshrl.u32 %v1434_v8, 16  ;;  %v680_v16 = vshll.u32 %v1434_v8, 16  ;;  %v686_v17 = vshrl.u32 %v1435_v9, 16  ;;  %v689_v18 = vshll.u32 %v1435_v9, 16  ;;  %v1437_v25 = vld [vmem:[%s1531_s8 + $0x70] sm:$0xff]   ;;  %v1438_v39 = vld [vmem:[%s1531_s8 + $0x20] sm:$0xff]  }
  0x14   : > { %1304 = vmatprep.subr.bf16.mxu0 %v1461_v1  ;;  %1400 = vmatprep.subr.bf16.mxu1 %v1461_v1  ;;  %v581_v20 = vrot.slane %v579_v10, 1  ;;  %v584_v22 = vrot.slane %v582_v12, 2  ;;  %v589_v23 = vrot.slane %v587_v13, 1  ;;  %v592_v24 = vrot.slane %v590_v14, 2  ;;  %v1439_v40 = vld [vmem:[%s1531_s8 + $0x78] sm:$0xff]   ;;  %v1448_v50 = vld [vmem:[%s1531_s8 + $0x48] sm:$0xff]  }
  0x15   : > { %v679_v26 = vrot.slane %v677_v15, 1  ;;  %v682_v27 = vrot.slane %v680_v16, 2  ;;  %v688_v28 = vrot.slane %v686_v17, 1  ;;  %v691_v29 = vrot.slane %v689_v18, 2  ;;  %v1440_v52 = vld [vmem:[%s1531_s8 + $0x28] sm:$0xff]   ;;  %v1449_v53 = vld [vmem:[%s1531_s8 + $0xa0] sm:$0xff]  }
  0x16   : > { %v596_v31 = vshrl.u32 %v1436_v21, 16  ;;  %v585_v32 = vor.u32 %v584_v22, %v581_v20  ;;  %v593_v33 = vor.u32 %v592_v24, %v589_v23  ;;  %v599_v34 = vshll.u32 %v1436_v21, 16  ;;  %v1441_v55 = vld [vmem:[%s1531_s8 + $0x80] sm:$0xff]   ;;  %v1450_v57 = vld [vmem:[%s1531_s8 + $0x50] sm:$0xff]   ;;  %v1451_v5 = vld [vmem:[%s1531_s8 + $0xa8] ss:$0 sps:$4 sm:$0xff]  }
  0x17   : > { %1305 = vmatpush3.bf16.msra.mxu0 %v1428_v6  ;;  %1408 = vmatpush3.bf16.msra.mxu1 %v1428_v6  ;;  %v695_v35 = vshrl.u32 %v1437_v25, 16  ;;  %v1562_v36 = vor.u32 %v682_v27, %v679_v26  ;;  %v692_v37 = vor.u32 %v691_v29, %v688_v28  ;;  %v698_v38 = vshll.u32 %v1437_v25, 16  ;;  %v1452_v6 = vld [vmem:[%s1531_s8 + $0x58] sm:$0xff]  }
  0x18   : > { %1306 = vmatprep.subr.bf16.mxu0 %v1461_v1  ;;  %1401 = vmatprep.subr.bf16.mxu1 %v1461_v1  ;;  %v594_v41 = vsel %vm577_vm1, %v585_v32, %v593_v33  ;;  %v598_v42 = vrot.slane %v596_v31, 1  ;;  %v601_v43 = vrot.slane %v599_v34, 2  ;;  %v605_v47 = vshrl.u32 %v1438_v39, 16 }
  0x19   : > { %v697_v44 = vrot.slane %v695_v35, 1  ;;  %v693_v45 = vsel %vm577_vm1, %v1562_v36, %v692_v37  ;;  %v700_v46 = vrot.slane %v698_v38, 2  ;;  %v608_v48 = vshll.u32 %v1438_v39, 16  ;;  %v1442_v38 = vld [vmem:[%s1531_s8 + $0x30] sm:$0xff]  }
  0x1a   : > { %v704_v49 = vshrl.u32 %v1439_v40, 16  ;;  %v707_v51 = vshll.u32 %v1439_v40, 16  ;;  %v602_v54 = vor.u32 %v601_v43, %v598_v42  ;;  %v607_v58 = vrot.slane %v605_v47, 1  ;;  %v1443_v42 = vld [vmem:[%s1531_s8 + $0x88] sm:$0xff]  }
  0x1b   : > { %1307 = vmatpush3.bf16.msra.mxu0 %v1429_v11  ;;  %1409 = vmatpush3.bf16.msra.mxu1 %v1429_v11  ;;  %v701_v56 = vor.u32 %v700_v46, %v697_v44  ;;  %v610_v59 = vrot.slane %v608_v48, 2  ;;  %v650_v61 = vshrl.u32 %v1448_v50, 16  ;;  %v614_v63 = vshrl.u32 %v1440_v52, 16 }
  0x1c   : > { %1308 = vmatprep.subr.bf16.mxu0 %v1461_v1  ;;  %1402 = vmatprep.subr.bf16.mxu1 %v1461_v1  ;;  %v706_v60 = vrot.slane %v704_v49, 1  ;;  %v709_v62 = vrot.slane %v707_v51, 2  ;;  %v653_v0 = vshll.u32 %v1448_v50, 16  ;;  %v749_v2 = vshrl.u32 %v1449_v53, 16 }
  0x1d   : > { %v603_v3 = vsel %vm577_vm1, %v593_v33, %v602_v54  ;;  %v752_v4 = vshll.u32 %v1449_v53, 16  ;;  %v702_v7 = vsel %vm577_vm1, %v692_v37, %v701_v56  ;;  %v617_v8 = vshll.u32 %v1440_v52, 16 }
  0x1e   : > { %v713_v9 = vshrl.u32 %v1441_v55, 16  ;;  %v659_v10 = vshrl.u32 %v1450_v57, 16  ;;  %v652_v11 = vrot.slane %v650_v61, 1  ;;  %v655_v12 = vrot.slane %v653_v0, 2 }
  0x1f   : > { %1309 = vmatpush3.bf16.msra.mxu0 %v1430_v19  ;;  %1410 = vmatpush3.bf16.msra.mxu1 %v1430_v19  ;;  %v662_v13 = vshll.u32 %v1450_v57, 16  ;;  %v758_v14 = vshrl.u32 %v1451_v5, 16  ;;  %v751_v15 = vrot.slane %v749_v2, 1  ;;  %v754_v16 = vrot.slane %v752_v4, 2 }
  0x20   : > { %1310 = vmatprep.subr.bf16.mxu0 %v1461_v1  ;;  %1403 = vmatprep.subr.bf16.mxu1 %v1461_v1  ;;  %v661_v17 = vrot.slane %v659_v10, 1  ;;  %v761_v18 = vshll.u32 %v1451_v5, 16  ;;  %v611_v19 = vor.u32 %v610_v59, %v607_v58  ;;  %v668_v22 = vshrl.u32 %v1452_v6, 16  ;;  %v1445_v59 = vld [vmem:[%s1531_s8 + $0x90] sm:$0xff]   ;;  %v1446_v5 = vld [vmem:[%s1531_s8 + $0x40] sm:$0xff]   ;;  %v1447_v10 = vld [vmem:[%s1531_s8 + $0x98] sm:$0xff]  }
  0x21   : > { %v664_v20 = vrot.slane %v662_v13, 2  ;;  %v760_v21 = vrot.slane %v758_v14, 1  ;;  %v710_v23 = vor.u32 %v709_v62, %v706_v60  ;;  %v716_v24 = vshll.u32 %v1441_v55, 16  ;;  %v1444_v55 = vld [vmem:[%s1531_s8 + $0x38] sm:$0xff]  }
  0x22   : > { %v763_v25 = vrot.slane %v761_v18, 2  ;;  %v671_v26 = vshll.u32 %v1452_v6, 16  ;;  %v1588_v27 = vor.u32 %v655_v12, %v652_v11  ;;  %v670_v29 = vrot.slane %v668_v22, 1 }
  0x23   : > { %1311 = vmatpush3.bf16.msra.mxu0 %v1431_v30  ;;  %1411 = vmatpush3.bf16.msra.mxu1 %v1431_v30  ;;  %v665_v28 = vor.u32 %v664_v20, %v661_v17  ;;  %v616_v30 = vrot.slane %v614_v63, 1  ;;  %v1590_v31 = vor.u32 %v754_v16, %v751_v15  ;;  %v612_v34 = vsel %vm577_vm1, %v602_v54, %v611_v19 }
  0x24   : > { %v1592_v32 = vor.u32 %v763_v25, %v760_v21  ;;  %v673_v33 = vrot.slane %v671_v26, 2  ;;  %v619_v35 = vrot.slane %v617_v8, 2  ;;  %v715_v37 = vrot.slane %v713_v9, 1 }
  0x25   : > { %v1598_v39 = vsel %vm577_vm1, %v1588_v27, %v665_v28  ;;  %v711_v40 = vsel %vm577_vm1, %v701_v56, %v710_v23  ;;  %v623_v47 = vshrl.u32 %v1442_v38, 16  ;;  %v626_v48 = vshll.u32 %v1442_v38, 16 }
  0x26   : > { %1313 = vmatmul.mubr.bf16.vlgmr.msra.gmra.mrb[0].mxu0 %v594_v41  ;;  %1357 = vmatmul.mubr.bf16.vlgmr.msra.gmra.mrb[0].mxu1 %v693_v45  ;;  %v718_v41 = vrot.slane %v716_v24, 2  ;;  %v1605_v43 = vsel %vm577_vm1, %v1590_v31, %v1592_v32  ;;  %v674_v44 = vor.u32 %v673_v33, %v670_v29  ;;  %v620_v49 = vor.u32 %v619_v35, %v616_v30  ;;  %v295_v30 = vld [vmem:[%s1671_s24 + $0xb0] sm:$0xff]  ;;  %v1687_v35 = vld [vmem:[%s1905_s2] ss:$0 sm:$0xff] }
  0x27   : > { %1316 = vmatprep.mubr.msk.bf16.mxu0 %vm1462_vm0, %v1461_v1  ;;  %1360 = vmatprep.mubr.msk.bf16.mxu1 %vm1462_vm0, %v1461_v1  ;;  %v722_v51 = vshrl.u32 %v1443_v42, 16  ;;  %v725_v52 = vshll.u32 %v1443_v42, 16  ;;  %v625_v53 = vrot.slane %v623_v47, 1  ;;  %v628_v54 = vrot.slane %v626_v48, 2  ;;  %v275_v42 = vld [vmem:[%s1671_s24 + $0x10] sm:$0xff] }
  0x28   : > { %v1608_v45 = vsel %vm577_vm1, %v665_v28, %v674_v44  ;;  %v1612_v46 = vsel %vm577_vm1, %v674_v44, %v1562_v36  ;;  %v719_v50 = vor.u32 %v718_v41, %v715_v37  ;;  %v621_v36 = vsel %vm577_vm1, %v611_v19, %v620_v49 }
  0x29   : > { %v724_v57 = vrot.slane %v722_v51, 1  ;;  %v727_v58 = vrot.slane %v725_v52, 2  ;;  %v632_v60 = vshrl.u32 %v1444_v55, 16  ;;  %v635_v61 = vshll.u32 %v1444_v55, 16  ;;  %v276_v52 = vld [vmem:[%s1671_s24 + $0x18] sm:$0xff] }
  0x2a   : > { %v720_v56 = vsel %vm577_vm1, %v710_v23, %v719_v50  ;;  %v629_v62 = vor.u32 %v628_v54, %v625_v53  ;;  %v731_v0 = vshrl.u32 %v1445_v59, 16  ;;  %v734_v2 = vshll.u32 %v1445_v59, 16  ;;  %v298_v53 = vld [vmem:[%s1671_s24 + $0xc8] sm:$0xff] }
  0x2b   : > { %v728_v63 = vor.u32 %v727_v58, %v724_v57  ;;  %v637_v4 = vrot.slane %v635_v61, 2  ;;  %v641_v11 = vshrl.u32 %v1446_v5, 16  ;;  %v644_v12 = vshll.u32 %v1446_v5, 16 }
  0x2c   : > { %v630_v6 = vsel %vm577_vm1, %v620_v49, %v629_v62  ;;  %v733_v8 = vrot.slane %v731_v0, 1  ;;  %v736_v9 = vrot.slane %v734_v2, 2  ;;  %v740_v15 = vshrl.u32 %v1447_v10, 16 }
  0x2d   : > { %v743_v16 = vshll.u32 %v1447_v10, 16  ;;  %v643_v17 = vrot.slane %v641_v11, 1  ;;  %v646_v18 = vrot.slane %v644_v12, 2  ;;  %v277_v10 = vld [vmem:[%s1671_s24 + $0x20] sm:$0xff]  ;;  %v299_v11 = vld [vmem:[%s1671_s24 + $0xd0] sm:$0xff] }
  0x2e   : > { %1317 = vmatmul.mubr.bf16.gmra.mrb[4].mxu0 %v603_v3  ;;  %1361 = vmatmul.mubr.bf16.gmra.mrb[4].mxu1 %v702_v7  ;;  %v634_v3 = vrot.slane %v632_v60, 1  ;;  %v729_v7 = vsel %vm577_vm1, %v719_v50, %v728_v63  ;;  %v737_v14 = vor.u32 %v736_v9, %v733_v8  ;;  %v742_v21 = vrot.slane %v740_v15, 1 }
  0x2f   : > { %1320 = vmatprep.mubr.msk.bf16.mxu0 %vm1462_vm0, %v1461_v1  ;;  %1364 = vmatprep.mubr.msk.bf16.mxu1 %vm1462_vm0, %v1461_v1  ;;  %v745_v22 = vrot.slane %v743_v16, 2  ;;  %v647_v23 = vor.u32 %v646_v18, %v643_v17 }
  0x30   : > { %v638_v13 = vor.u32 %v637_v4, %v634_v3  ;;  %v738_v20 = vsel %vm577_vm1, %v728_v63, %v737_v14 }
  0x31   : > { %v746_v24 = vor.u32 %v745_v22, %v742_v21  ;;  %v657_v28 = vsel %vm577_vm1, %v647_v23, %v1588_v27  ;;  %v273_v27 = vld [vmem:[%s1671_s24] sm:$0xff]  ;;  %v300_v21 = vld [vmem:[%s1671_s24 + $0xd8] sm:$0xff] }
  0x32   : > { %v639_v19 = vsel %vm577_vm1, %v629_v62, %v638_v13  ;;  %v648_v25 = vsel %vm577_vm1, %v638_v13, %v647_v23 }
  0x33   : > { %v747_v26 = vsel %vm577_vm1, %v737_v14, %v746_v24  ;;  %v756_v29 = vsel %vm577_vm1, %v746_v24, %v1590_v31  ;;  %v274_v31 = vld [vmem:[%s1671_s24 + $0x8] sm:$0xff] }
  0x36   : > { %1321 = vmatmul.mubr.bf16.gmra.mrb[8].mxu0 %v612_v34  ;;  %1365 = vmatmul.mubr.bf16.gmra.mrb[8].mxu1 %v711_v40 }
  0x37   : > { %1324 = vmatprep.mubr.msk.bf16.mxu0 %vm1462_vm0, %v1461_v1  ;;  %1368 = vmatprep.mubr.msk.bf16.mxu1 %vm1462_vm0, %v1461_v1 }
  0x3e   : > { %1325 = vmatmul.mubr.bf16.gmra.mrb[12].mxu0 %v621_v36  ;;  %1369 = vmatmul.mubr.bf16.gmra.mrb[12].mxu1 %v720_v56 }
  0x3f   : > { %1328 = vmatprep.mubr.msk.bf16.mxu0 %vm1462_vm0, %v1461_v1  ;;  %1372 = vmatprep.mubr.msk.bf16.mxu1 %vm1462_vm0, %v1461_v1 }
  0x46   : > { %1329 = vmatmul.mubr.bf16.gmra.mrb[16].mxu0 %v630_v6  ;;  %1373 = vmatmul.mubr.bf16.gmra.mrb[16].mxu1 %v729_v7 }
  0x47   : > { %1332 = vmatprep.mubr.msk.bf16.mxu0 %vm1462_vm0, %v1461_v1  ;;  %1376 = vmatprep.mubr.msk.bf16.mxu1 %vm1462_vm0, %v1461_v1 }
  0x4e   : > { %1333 = vmatmul.mubr.bf16.gmra.mrb[20].mxu0 %v639_v19  ;;  %1377 = vmatmul.mubr.bf16.gmra.mrb[20].mxu1 %v738_v20  ;;  %v278_v20 = vld [vmem:[%s1671_s24 + $0x28] sm:$0xff] }
  0x4f   : > { %1336 = vmatprep.mubr.msk.bf16.mxu0 %vm1462_vm0, %v1461_v1  ;;  %1380 = vmatprep.mubr.msk.bf16.mxu1 %vm1462_vm0, %v1461_v1 }
  0x56   : > { %1337 = vmatmul.mubr.bf16.gmra.mrb[24].mxu0 %v648_v25  ;;  %1381 = vmatmul.mubr.bf16.gmra.mrb[24].mxu1 %v747_v26 }
  0x57   : > { %1340 = vmatprep.mubr.msk.bf16.mxu0 %vm1462_vm0, %v1461_v1  ;;  %1384 = vmatprep.mubr.msk.bf16.mxu1 %vm1462_vm0, %v1461_v1 }
  0x5e   : > { %1341 = vmatmul.mubr.bf16.gmra.mrb[28].mxu0 %v657_v28  ;;  %1385 = vmatmul.mubr.bf16.gmra.mrb[28].mxu1 %v756_v29 }
  0x5f   : > { %1344 = vmatprep.mubr.msk.bf16.mxu0 %vm1462_vm0, %v1461_v1  ;;  %1388 = vmatprep.mubr.msk.bf16.mxu1 %vm1462_vm0, %v1461_v1 }
  0x66   : > { %1345 = vmatmul.mubr.bf16.gmra.mrb[32].mxu0 %v1598_v39  ;;  %1389 = vmatmul.mubr.bf16.gmra.mrb[32].mxu1 %v1605_v43  ;;  %v1694_v39 = vld [vmem:[%s1908_s5] ss:$0 sm:$0xff] }
  0x67   : > { %1348 = vmatprep.mubr.msk.bf16.mxu0 %vm1462_vm0, %v1461_v1  ;;  %1392 = vmatprep.mubr.msk.bf16.mxu1 %vm1462_vm0, %v1461_v1  ;;  %v297_v43 = vld [vmem:[%s1671_s24 + $0xc0] sm:$0xff] }
  0x6e   : > { %1349 = vmatmul.mubr.bf16.gmra.mrb[36].mxu0 %v1608_v45  ;;  %1393 = vmatmul.mubr.bf16.gmra.mrb[36].mxu1 %v1592_v32  ;;  %v296_v32 = vld [vmem:[%s1671_s24 + $0xb8] sm:$0xff] }
  0x6f   : > { %1352 = vmatprep.mubr.msk.bf16.mxu0 %vm1462_vm0, %v1461_v1  ;;  %v1677_v1 = vld [vmem:[%s1904_s1] ss:$0 sm:$0xff] }
  0x70   : > { %v321_v33 = vmul.f32 %v1677_v1, %v273_v27  ;;  %v343_v34 = vmul.f32 %v1677_v1, %v295_v30  ;;  %v322_v37 = vmul.f32 %v1677_v1, %v274_v31  ;;  %v344_v38 = vmul.f32 %v1677_v1, %v296_v32 }
  0x71   : > { %v323_v55 = vmul.f32 %v1677_v1, %v275_v42  ;;  %v345_v56 = vmul.f32 %v1677_v1, %v297_v43  ;;  %v324_v63 = vmul.f32 %v1677_v1, %v276_v52  ;;  %v346_v0 = vmul.f32 %v1677_v1, %v298_v53 }
  0x72   : > { %v369_v40 = vadd.f32 %v1687_v35, %v321_v33  ;;  %v391_v41 = vadd.f32 %v1687_v35, %v343_v34  ;;  %v370_v48 = vadd.f32 %v1687_v35, %v322_v37  ;;  %v392_v51 = vadd.f32 %v1687_v35, %v344_v38 }
  0x73   : > { %v371_v7 = vadd.f32 %v1687_v35, %v323_v55  ;;  %v393_v9 = vadd.f32 %v1687_v35, %v345_v56  ;;  %v372_v16 = vadd.f32 %v1687_v35, %v324_v63  ;;  %v394_v19 = vadd.f32 %v1687_v35, %v346_v0  ;;  %v280_v55 = vld [vmem:[%s1671_s24 + $0x38] sm:$0xff] }
  0x74   : > { %v325_v23 = vmul.f32 %v1677_v1, %v277_v10  ;;  %v347_v25 = vmul.f32 %v1677_v1, %v299_v11  ;;  %v326_v32 = vmul.f32 %v1677_v1, %v278_v20  ;;  %v348_v33 = vmul.f32 %v1677_v1, %v300_v21 }
  0x76   : > { %1353 = vmatmul.mubr.bf16.gmra.mrb[40].mxu0 %v1612_v46  ;;  %v373_v42 = vadd.f32 %v1687_v35, %v325_v23  ;;  %v282_v23 = vld [vmem:[%s1671_s24 + $0x48] sm:$0xff] }
  0xf9   : > { %v869_v44 = vpop.f32.mrb[0].mxu0  ;;  %v957_v45 = vpop.f32.mrb[0].mxu1 }
  0xfa   : > { %v870_v46 = vadd.f32 %v1694_v39, %v869_v44  ;;  %v1314_v47 = vpop.f32.mrb[1].mxu0  ;;  %v958_v49 = vadd.f32 %v1694_v39, %v957_v45  ;;  %v1358_v50 = vpop.f32.mrb[1].mxu1  ;;  %v395_v44 = vadd.f32 %v1687_v35, %v347_v25  ;;  %v279_v45 = vld [vmem:[%s1671_s24 + $0x30] sm:$0xff] }
  0xfb   : > { %v872_v54 = vpop.f32.mrb[2].mxu0  ;;  %v960_v36 = vpop.f32.mrb[2].mxu1 }
  0xfc   : > { %v1035_v57 = vadd.f32 %v870_v46, %v369_v40  ;;  %v873_v58 = vadd.f32 %v1694_v39, %v872_v54  ;;  %v1315_v59 = vpop.f32.mrb[3].mxu0  ;;  %v1057_v60 = vadd.f32 %v958_v49, %v391_v41  ;;  %v961_v61 = vadd.f32 %v1694_v39, %v960_v36  ;;  %v1359_v62 = vpop.f32.mrb[3].mxu1  ;;  %v301_v46 = vld [vmem:[%s1671_s24 + $0xe0] sm:$0xff]  ;;  %v302_v36 = vld [vmem:[%s1671_s24 + $0xe8] sm:$0xff] }
  0xfd   : > { %v396_v54 = vadd.f32 %v1687_v35, %v348_v33  ;;  %v349_v59 = vmul.f32 %v1677_v1, %v301_v46 }
  0xfe   : > { %v1076_v2 = vmax.f32 %v1035_v57, 0.0  ;;  %v1036_v3 = vadd.f32 %v873_v58, %v370_v48  ;;  %v1098_v4 = vmax.f32 %v1057_v60, 0.0  ;;  %v1058_v5 = vadd.f32 %v961_v61, %v392_v51 }
  0xff   : > { %v374_v51 = vadd.f32 %v1687_v35, %v326_v32  ;;  %v327_v57 = vmul.f32 %v1677_v1, %v279_v45 }
 0x100   : > { %1117 = vst [vmem:[%s1715_s9] sm:$0xff] %v1076_v2  ;;  %v1077_v6 = vmax.f32 %v1036_v3, 0.0  ;;  %1139 = vst [vmem:[%s1715_s9 + $0xb0] sm:$0xff] %v1098_v4  ;;  %v1099_v8 = vmax.f32 %v1058_v5, 0.0  ;;  %v328_v3 = vmul.f32 %v1677_v1, %v280_v55  ;;  %v350_v4 = vmul.f32 %v1677_v1, %v302_v36 }
 0x101   : > { %v877_v12 = vpop.f32.mrb[4].mxu0  ;;  %v965_v13 = vpop.f32.mrb[4].mxu1  ;;  %v375_v10 = vadd.f32 %v1687_v35, %v327_v57  ;;  %v284_v57 = vld [vmem:[%s1671_s24 + $0x58] sm:$0xff] }
 0x102   : > { %1118 = vst [vmem:[%s1715_s9 + $0x8] sm:$0xff] %v1077_v6  ;;  %v878_v14 = vadd.f32 %v1694_v39, %v877_v12  ;;  %v1318_v15 = vpop.f32.mrb[5].mxu0  ;;  %1140 = vst [vmem:[%s1715_s9 + $0xb8] sm:$0xff] %v1099_v8  ;;  %v966_v17 = vadd.f32 %v1694_v39, %v965_v13  ;;  %v1362_v18 = vpop.f32.mrb[5].mxu1  ;;  %v397_v12 = vadd.f32 %v1687_v35, %v349_v59  ;;  %v281_v13 = vld [vmem:[%s1671_s24 + $0x40] sm:$0xff] }
 0x103   : > { %v880_v22 = vpop.f32.mrb[6].mxu0  ;;  %v968_v24 = vpop.f32.mrb[6].mxu1 }
 0x104   : > { %v1037_v26 = vadd.f32 %v878_v14, %v371_v7  ;;  %v881_v28 = vadd.f32 %v1694_v39, %v880_v22  ;;  %v1319_v29 = vpop.f32.mrb[7].mxu0  ;;  %v1059_v27 = vadd.f32 %v966_v17, %v393_v9  ;;  %v969_v30 = vadd.f32 %v1694_v39, %v968_v24  ;;  %v1363_v31 = vpop.f32.mrb[7].mxu1  ;;  %v303_v14 = vld [vmem:[%s1671_s24 + $0xf0] sm:$0xff]  ;;  %v304_v24 = vld [vmem:[%s1671_s24 + $0xf8] sm:$0xff] }
 0x105   : > { %v398_v22 = vadd.f32 %v1687_v35, %v350_v4  ;;  %v351_v29 = vmul.f32 %v1677_v1, %v303_v14 }
 0x106   : > { %v1078_v34 = vmax.f32 %v1037_v26, 0.0  ;;  %v1038_v37 = vadd.f32 %v881_v28, %v372_v16  ;;  %v1100_v38 = vmax.f32 %v1059_v27, 0.0  ;;  %v1060_v40 = vadd.f32 %v969_v30, %v394_v19 }
 0x107   : > { %v376_v19 = vadd.f32 %v1687_v35, %v328_v3  ;;  %v329_v26 = vmul.f32 %v1677_v1, %v281_v13 }
 0x108   : > { %1119 = vst [vmem:[%s1715_s9 + $0x10] sm:$0xff] %v1078_v34  ;;  %v1079_v41 = vmax.f32 %v1038_v37, 0.0  ;;  %1141 = vst [vmem:[%s1715_s9 + $0xc0] sm:$0xff] %v1100_v38  ;;  %v1101_v43 = vmax.f32 %v1060_v40, 0.0  ;;  %v330_v37 = vmul.f32 %v1677_v1, %v282_v23  ;;  %v352_v38 = vmul.f32 %v1677_v1, %v304_v24 }
 0x109   : > { %v885_v47 = vpop.f32.mrb[8].mxu0  ;;  %v973_v48 = vpop.f32.mrb[8].mxu1  ;;  %v377_v45 = vadd.f32 %v1687_v35, %v329_v26  ;;  %v286_v26 = vld [vmem:[%s1671_s24 + $0x68] sm:$0xff] }
 0x10a   : > { %1120 = vst [vmem:[%s1715_s9 + $0x18] sm:$0xff] %v1079_v41  ;;  %v886_v49 = vadd.f32 %v1694_v39, %v885_v47  ;;  %v1322_v50 = vpop.f32.mrb[9].mxu0  ;;  %1142 = vst [vmem:[%s1715_s9 + $0xc8] sm:$0xff] %v1101_v43  ;;  %v974_v52 = vadd.f32 %v1694_v39, %v973_v48  ;;  %v1366_v53 = vpop.f32.mrb[9].mxu1  ;;  %v399_v47 = vadd.f32 %v1687_v35, %v351_v29  ;;  %v283_v48 = vld [vmem:[%s1671_s24 + $0x50] sm:$0xff] }
 0x10b   : > { %v888_v56 = vpop.f32.mrb[10].mxu0  ;;  %v976_v58 = vpop.f32.mrb[10].mxu1 }
 0x10c   : > { %v1039_v60 = vadd.f32 %v886_v49, %v373_v42  ;;  %v889_v61 = vadd.f32 %v1694_v39, %v888_v56  ;;  %v1323_v62 = vpop.f32.mrb[11].mxu0  ;;  %v1061_v63 = vadd.f32 %v974_v52, %v395_v44  ;;  %v977_v0 = vadd.f32 %v1694_v39, %v976_v58  ;;  %v1367_v2 = vpop.f32.mrb[11].mxu1  ;;  %v305_v49 = vld [vmem:[%s1671_s24 + $0x100] sm:$0xff]  ;;  %v306_v58 = vld [vmem:[%s1671_s24 + $0x108] sm:$0xff] }
 0x10d   : > { %v400_v56 = vadd.f32 %v1687_v35, %v352_v38  ;;  %v353_v62 = vmul.f32 %v1677_v1, %v305_v49 }
 0x10e   : > { %v1080_v5 = vmax.f32 %v1039_v60, 0.0  ;;  %v1040_v6 = vadd.f32 %v889_v61, %v374_v51  ;;  %v1102_v7 = vmax.f32 %v1061_v63, 0.0  ;;  %v1062_v8 = vadd.f32 %v977_v0, %v396_v54 }
 0x10f   : > { %v378_v54 = vadd.f32 %v1687_v35, %v330_v37  ;;  %v331_v60 = vmul.f32 %v1677_v1, %v283_v48 }
 0x110   : > { %1121 = vst [vmem:[%s1715_s9 + $0x20] sm:$0xff] %v1080_v5  ;;  %v1081_v9 = vmax.f32 %v1040_v6, 0.0  ;;  %1143 = vst [vmem:[%s1715_s9 + $0xd0] sm:$0xff] %v1102_v7  ;;  %v1103_v11 = vmax.f32 %v1062_v8, 0.0  ;;  %v332_v6 = vmul.f32 %v1677_v1, %v284_v57  ;;  %v354_v7 = vmul.f32 %v1677_v1, %v306_v58 }
 0x111   : > { %v893_v15 = vpop.f32.mrb[12].mxu0  ;;  %v981_v16 = vpop.f32.mrb[12].mxu1  ;;  %v379_v13 = vadd.f32 %v1687_v35, %v331_v60  ;;  %v288_v60 = vld [vmem:[%s1671_s24 + $0x78] sm:$0xff] }
 0x112   : > { %1122 = vst [vmem:[%s1715_s9 + $0x28] sm:$0xff] %v1081_v9  ;;  %v894_v17 = vadd.f32 %v1694_v39, %v893_v15  ;;  %v1326_v18 = vpop.f32.mrb[13].mxu0  ;;  %1144 = vst [vmem:[%s1715_s9 + $0xd8] sm:$0xff] %v1103_v11  ;;  %v982_v20 = vadd.f32 %v1694_v39, %v981_v16  ;;  %v1370_v21 = vpop.f32.mrb[13].mxu1  ;;  %v401_v15 = vadd.f32 %v1687_v35, %v353_v62  ;;  %v285_v16 = vld [vmem:[%s1671_s24 + $0x60] sm:$0xff] }
 0x113   : > { %v896_v25 = vpop.f32.mrb[14].mxu0  ;;  %v984_v28 = vpop.f32.mrb[14].mxu1 }
 0x114   : > { %v1041_v27 = vadd.f32 %v894_v17, %v375_v10  ;;  %v897_v30 = vadd.f32 %v1694_v39, %v896_v25  ;;  %v1327_v31 = vpop.f32.mrb[15].mxu0  ;;  %v1063_v32 = vadd.f32 %v982_v20, %v397_v12  ;;  %v985_v33 = vadd.f32 %v1694_v39, %v984_v28  ;;  %v1371_v34 = vpop.f32.mrb[15].mxu1  ;;  %v307_v17 = vld [vmem:[%s1671_s24 + $0x110] sm:$0xff]  ;;  %v308_v28 = vld [vmem:[%s1671_s24 + $0x118] sm:$0xff] }
 0x115   : > { %v402_v25 = vadd.f32 %v1687_v35, %v354_v7  ;;  %v355_v31 = vmul.f32 %v1677_v1, %v307_v17 }
 0x116   : > { %v1082_v40 = vmax.f32 %v1041_v27, 0.0  ;;  %v1042_v41 = vadd.f32 %v897_v30, %v376_v19  ;;  %v1104_v42 = vmax.f32 %v1063_v32, 0.0  ;;  %v1064_v43 = vadd.f32 %v985_v33, %v398_v22 }
 0x117   : > { %v380_v22 = vadd.f32 %v1687_v35, %v332_v6  ;;  %v333_v27 = vmul.f32 %v1677_v1, %v285_v16 }
 0x118   : > { %1123 = vst [vmem:[%s1715_s9 + $0x30] sm:$0xff] %v1082_v40  ;;  %v1083_v44 = vmax.f32 %v1042_v41, 0.0  ;;  %1145 = vst [vmem:[%s1715_s9 + $0xe0] sm:$0xff] %v1104_v42  ;;  %v1105_v46 = vmax.f32 %v1064_v43, 0.0  ;;  %v334_v41 = vmul.f32 %v1677_v1, %v286_v26  ;;  %v356_v42 = vmul.f32 %v1677_v1, %v308_v28 }
 0x119   : > { %v901_v50 = vpop.f32.mrb[16].mxu0  ;;  %v989_v51 = vpop.f32.mrb[16].mxu1  ;;  %v381_v48 = vadd.f32 %v1687_v35, %v333_v27  ;;  %v290_v27 = vld [vmem:[%s1671_s24 + $0x88] sm:$0xff] }
 0x11a   : > { %1124 = vst [vmem:[%s1715_s9 + $0x38] sm:$0xff] %v1083_v44  ;;  %v902_v52 = vadd.f32 %v1694_v39, %v901_v50  ;;  %v1330_v53 = vpop.f32.mrb[17].mxu0  ;;  %1146 = vst [vmem:[%s1715_s9 + $0xe8] sm:$0xff] %v1105_v46  ;;  %v990_v55 = vadd.f32 %v1694_v39, %v989_v51  ;;  %v1374_v36 = vpop.f32.mrb[17].mxu1  ;;  %v403_v50 = vadd.f32 %v1687_v35, %v355_v31  ;;  %v287_v51 = vld [vmem:[%s1671_s24 + $0x70] sm:$0xff] }
 0x11b   : > { %v904_v59 = vpop.f32.mrb[18].mxu0  ;;  %v992_v61 = vpop.f32.mrb[18].mxu1 }
 0x11c   : > { %v1043_v63 = vadd.f32 %v902_v52, %v377_v45  ;;  %v905_v0 = vadd.f32 %v1694_v39, %v904_v59  ;;  %v1331_v2 = vpop.f32.mrb[19].mxu0  ;;  %v1065_v3 = vadd.f32 %v990_v55, %v399_v47  ;;  %v993_v4 = vadd.f32 %v1694_v39, %v992_v61  ;;  %v1375_v5 = vpop.f32.mrb[19].mxu1  ;;  %v309_v52 = vld [vmem:[%s1671_s24 + $0x120] sm:$0xff]  ;;  %v310_v61 = vld [vmem:[%s1671_s24 + $0x128] sm:$0xff] }
 0x11d   : > { %v404_v59 = vadd.f32 %v1687_v35, %v356_v42  ;;  %v357_v2 = vmul.f32 %v1677_v1, %v309_v52 }
 0x11e   : > { %v1084_v8 = vmax.f32 %v1043_v63, 0.0  ;;  %v1044_v9 = vadd.f32 %v905_v0, %v378_v54  ;;  %v1106_v10 = vmax.f32 %v1065_v3, 0.0  ;;  %v1066_v11 = vadd.f32 %v993_v4, %v400_v56 }
 0x11f   : > { %v382_v56 = vadd.f32 %v1687_v35, %v334_v41  ;;  %v335_v63 = vmul.f32 %v1677_v1, %v287_v51 }
 0x120   : > { %1125 = vst [vmem:[%s1715_s9 + $0x40] sm:$0xff] %v1084_v8  ;;  %v1085_v12 = vmax.f32 %v1044_v9, 0.0  ;;  %1147 = vst [vmem:[%s1715_s9 + $0xf0] sm:$0xff] %v1106_v10  ;;  %v1107_v14 = vmax.f32 %v1066_v11, 0.0  ;;  %v336_v9 = vmul.f32 %v1677_v1, %v288_v60  ;;  %v358_v10 = vmul.f32 %v1677_v1, %v310_v61 }
 0x121   : > { %v909_v18 = vpop.f32.mrb[20].mxu0  ;;  %v997_v19 = vpop.f32.mrb[20].mxu1  ;;  %v383_v16 = vadd.f32 %v1687_v35, %v335_v63  ;;  %v292_v63 = vld [vmem:[%s1671_s24 + $0x98] sm:$0xff] }
 0x122   : > { %1126 = vst [vmem:[%s1715_s9 + $0x48] sm:$0xff] %v1085_v12  ;;  %v910_v20 = vadd.f32 %v1694_v39, %v909_v18  ;;  %v1334_v21 = vpop.f32.mrb[21].mxu0  ;;  %1148 = vst [vmem:[%s1715_s9 + $0xf8] sm:$0xff] %v1107_v14  ;;  %v998_v23 = vadd.f32 %v1694_v39, %v997_v19  ;;  %v1378_v24 = vpop.f32.mrb[21].mxu1  ;;  %v405_v18 = vadd.f32 %v1687_v35, %v357_v2  ;;  %v289_v19 = vld [vmem:[%s1671_s24 + $0x80] sm:$0xff] }
 0x123   : > { %v912_v29 = vpop.f32.mrb[22].mxu0  ;;  %v1000_v30 = vpop.f32.mrb[22].mxu1 }
 0x124   : > { %v1045_v32 = vadd.f32 %v910_v20, %v379_v13  ;;  %v913_v33 = vadd.f32 %v1694_v39, %v912_v29  ;;  %v1335_v34 = vpop.f32.mrb[23].mxu0  ;;  %v1067_v37 = vadd.f32 %v998_v23, %v401_v15  ;;  %v1001_v38 = vadd.f32 %v1694_v39, %v1000_v30  ;;  %v1379_v40 = vpop.f32.mrb[23].mxu1  ;;  %v311_v20 = vld [vmem:[%s1671_s24 + $0x130] sm:$0xff]  ;;  %v312_v30 = vld [vmem:[%s1671_s24 + $0x138] sm:$0xff] }
 0x125   : > { %v406_v29 = vadd.f32 %v1687_v35, %v358_v10  ;;  %v359_v34 = vmul.f32 %v1677_v1, %v311_v20 }
 0x126   : > { %v1086_v43 = vmax.f32 %v1045_v32, 0.0  ;;  %v1046_v44 = vadd.f32 %v913_v33, %v380_v22  ;;  %v1108_v45 = vmax.f32 %v1067_v37, 0.0  ;;  %v1068_v46 = vadd.f32 %v1001_v38, %v402_v25 }
 0x127   : > { %v384_v25 = vadd.f32 %v1687_v35, %v336_v9  ;;  %v337_v32 = vmul.f32 %v1677_v1, %v289_v19 }
 0x128   : > { %1127 = vst [vmem:[%s1715_s9 + $0x50] sm:$0xff] %v1086_v43  ;;  %v1087_v47 = vmax.f32 %v1046_v44, 0.0  ;;  %1149 = vst [vmem:[%s1715_s9 + $0x100] sm:$0xff] %v1108_v45  ;;  %v1109_v49 = vmax.f32 %v1068_v46, 0.0  ;;  %v338_v44 = vmul.f32 %v1677_v1, %v290_v27  ;;  %v360_v45 = vmul.f32 %v1677_v1, %v312_v30  ;;  %v294_v30 = vld [vmem:[%s1671_s24 + $0xa8] sm:$0xff] }
 0x129   : > { %v917_v53 = vpop.f32.mrb[24].mxu0  ;;  %v1005_v54 = vpop.f32.mrb[24].mxu1  ;;  %v385_v51 = vadd.f32 %v1687_v35, %v337_v32 }
 0x12a   : > { %1128 = vst [vmem:[%s1715_s9 + $0x58] sm:$0xff] %v1087_v47  ;;  %v918_v55 = vadd.f32 %v1694_v39, %v917_v53  ;;  %v1338_v36 = vpop.f32.mrb[25].mxu0  ;;  %1150 = vst [vmem:[%s1715_s9 + $0x108] sm:$0xff] %v1109_v49  ;;  %v1006_v57 = vadd.f32 %v1694_v39, %v1005_v54  ;;  %v1382_v58 = vpop.f32.mrb[25].mxu1  ;;  %v407_v53 = vadd.f32 %v1687_v35, %v359_v34  ;;  %v291_v54 = vld [vmem:[%s1671_s24 + $0x90] sm:$0xff] }
 0x12b   : > { %v920_v62 = vpop.f32.mrb[26].mxu0  ;;  %v1008_v0 = vpop.f32.mrb[26].mxu1  ;;  %v339_v2 = vmul.f32 %v1677_v1, %v291_v54 }
 0x12c   : > { %v1047_v3 = vadd.f32 %v918_v55, %v381_v48  ;;  %v921_v4 = vadd.f32 %v1694_v39, %v920_v62  ;;  %v1339_v5 = vpop.f32.mrb[27].mxu0  ;;  %v1069_v6 = vadd.f32 %v1006_v57, %v403_v50  ;;  %v1009_v7 = vadd.f32 %v1694_v39, %v1008_v0  ;;  %v1383_v8 = vpop.f32.mrb[27].mxu1  ;;  %v313_v55 = vld [vmem:[%s1671_s24 + $0x140] sm:$0xf] }
 0x12d   : > { %v408_v62 = vadd.f32 %v1687_v35, %v360_v45 }
 0x12e   : > { %v1088_v11 = vmax.f32 %v1047_v3, 0.0  ;;  %v1048_v12 = vadd.f32 %v921_v4, %v382_v56  ;;  %v1110_v13 = vmax.f32 %v1069_v6, 0.0  ;;  %v1070_v14 = vadd.f32 %v1009_v7, %v404_v59 }
 0x12f   : > { %v386_v59 = vadd.f32 %v1687_v35, %v338_v44  ;;  %v361_v4 = vmul.f32 %v1677_v1, %v313_v55 }
 0x130   : > { %1129 = vst [vmem:[%s1715_s9 + $0x60] sm:$0xff] %v1088_v11  ;;  %v1089_v15 = vmax.f32 %v1048_v12, 0.0  ;;  %1151 = vst [vmem:[%s1715_s9 + $0x110] sm:$0xff] %v1110_v13  ;;  %v1111_v17 = vmax.f32 %v1070_v14, 0.0  ;;  %v340_v11 = vmul.f32 %v1677_v1, %v292_v63 }
 0x131   : > { %v925_v21 = vpop.f32.mrb[28].mxu0  ;;  %v1013_v22 = vpop.f32.mrb[28].mxu1  ;;  %v409_v19 = vadd.f32 %v1687_v35, %v361_v4 }
 0x132   : > { %1130 = vst [vmem:[%s1715_s9 + $0x68] sm:$0xff] %v1089_v15  ;;  %v926_v23 = vadd.f32 %v1694_v39, %v925_v21  ;;  %v1342_v24 = vpop.f32.mrb[29].mxu0  ;;  %1152 = vst [vmem:[%s1715_s9 + $0x118] sm:$0xff] %v1111_v17  ;;  %v1014_v26 = vadd.f32 %v1694_v39, %v1013_v22  ;;  %v1386_v28 = vpop.f32.mrb[29].mxu1  ;;  %v387_v17 = vadd.f32 %v1687_v35, %v339_v2  ;;  %v293_v22 = vld [vmem:[%s1671_s24 + $0xa0] sm:$0xff] }
 0x133   : > { %v928_v31 = vpop.f32.mrb[30].mxu0  ;;  %v1016_v33 = vpop.f32.mrb[30].mxu1 }
 0x134   : > { %v1049_v37 = vadd.f32 %v926_v23, %v383_v16  ;;  %v929_v38 = vadd.f32 %v1694_v39, %v928_v31  ;;  %v1343_v40 = vpop.f32.mrb[31].mxu0  ;;  %v1071_v41 = vadd.f32 %v1014_v26, %v405_v18  ;;  %v1017_v42 = vadd.f32 %v1694_v39, %v1016_v33  ;;  %v1387_v43 = vpop.f32.mrb[31].mxu1 }
 0x135   : > { %v342_v43 = vmul.f32 %v1677_v1, %v294_v30 }
 0x136   : > { %v1090_v46 = vmax.f32 %v1049_v37, 0.0  ;;  %v1050_v47 = vadd.f32 %v929_v38, %v384_v25  ;;  %v1112_v48 = vmax.f32 %v1071_v41, 0.0  ;;  %v1072_v49 = vadd.f32 %v1017_v42, %v406_v29 }
 0x137   : > { %v388_v25 = vadd.f32 %v1687_v35, %v340_v11  ;;  %v341_v37 = vmul.f32 %v1677_v1, %v293_v22 }
 0x138   : > { %1131 = vst [vmem:[%s1715_s9 + $0x70] sm:$0xff] %v1090_v46  ;;  %v1091_v50 = vmax.f32 %v1050_v47, 0.0  ;;  %1153 = vst [vmem:[%s1715_s9 + $0x120] sm:$0xff] %v1112_v48  ;;  %v1113_v52 = vmax.f32 %v1072_v49, 0.0  ;;  %v390_v49 = vadd.f32 %v1687_v35, %v342_v43 }
 0x139   : > { %v933_v36 = vpop.f32.mrb[32].mxu0  ;;  %v1021_v56 = vpop.f32.mrb[32].mxu1  ;;  %v389_v45 = vadd.f32 %v1687_v35, %v341_v37 }
 0x13a   : > { %1132 = vst [vmem:[%s1715_s9 + $0x78] sm:$0xff] %v1091_v50  ;;  %v934_v57 = vadd.f32 %v1694_v39, %v933_v36  ;;  %v1346_v58 = vpop.f32.mrb[33].mxu0  ;;  %1154 = vst [vmem:[%s1715_s9 + $0x128] sm:$0xff] %v1113_v52  ;;  %v1022_v60 = vadd.f32 %v1694_v39, %v1021_v56  ;;  %v1390_v61 = vpop.f32.mrb[33].mxu1 }
 0x13b   : > { %v936_v0 = vpop.f32.mrb[34].mxu0  ;;  %v1024_v3 = vpop.f32.mrb[34].mxu1 }
 0x13c   : > { %v1051_v5 = vadd.f32 %v934_v57, %v385_v51  ;;  %v937_v6 = vadd.f32 %v1694_v39, %v936_v0  ;;  %v1347_v7 = vpop.f32.mrb[35].mxu0  ;;  %v1073_v8 = vadd.f32 %v1022_v60, %v407_v53  ;;  %v1025_v9 = vadd.f32 %v1694_v39, %v1024_v3  ;;  %v1391_v10 = vpop.f32.mrb[35].mxu1 }
 0x13e   : > { %v1092_v12 = vmax.f32 %v1051_v5, 0.0  ;;  %v1052_v13 = vadd.f32 %v937_v6, %v386_v59  ;;  %v1114_v14 = vmax.f32 %v1073_v8, 0.0  ;;  %v1074_v15 = vadd.f32 %v1025_v9, %v408_v62 }
 0x140   : > { %1133 = vst [vmem:[%s1715_s9 + $0x80] sm:$0xff] %v1092_v12  ;;  %v1093_v16 = vmax.f32 %v1052_v13, 0.0  ;;  %1155 = vst [vmem:[%s1715_s9 + $0x130] sm:$0xff] %v1114_v14  ;;  %v1115_v18 = vmax.f32 %v1074_v15, 0.0 }
 0x141   : > { %v941_v20 = vpop.f32.mrb[36].mxu0  ;;  %v1029_v21 = vpop.f32.mrb[36].mxu1 }
 0x142   : > { %1134 = vst [vmem:[%s1715_s9 + $0x88] sm:$0xff] %v1093_v16  ;;  %v942_v23 = vadd.f32 %v1694_v39, %v941_v20  ;;  %v1350_v24 = vpop.f32.mrb[37].mxu0  ;;  %1156 = vst [vmem:[%s1715_s9 + $0x138] sm:$0xff] %v1115_v18  ;;  %v1030_v26 = vadd.f32 %v1694_v39, %v1029_v21  ;;  %v1394_v28 = vpop.f32.mrb[37].mxu1 }
 0x143   : > { %v944_v29 = vpop.f32.mrb[38].mxu0  ;;  %v1032_v27 = vpop.f32.mrb[38].mxu1 }
 0x144   : > { %v1053_v31 = vadd.f32 %v942_v23, %v387_v17  ;;  %v945_v32 = vadd.f32 %v1694_v39, %v944_v29  ;;  %v1351_v33 = vpop.f32.mrb[39].mxu0  ;;  %v1075_v34 = vadd.f32 %v1030_v26, %v409_v19  ;;  %v1395_v38 = vpop.f32.mrb[39].mxu1 }
 0x146   : > { %v1094_v40 = vmax.f32 %v1053_v31, 0.0  ;;  %v1054_v41 = vadd.f32 %v945_v32, %v388_v25  ;;  %v1116_v42 = vmax.f32 %v1075_v34, 0.0 }
 0x148   : > { %1135 = vst [vmem:[%s1715_s9 + $0x90] sm:$0xff] %v1094_v40  ;;  %v1095_v44 = vmax.f32 %v1054_v41, 0.0  ;;  %1157 = vst [vmem:[%s1715_s9 + $0x140] sm:$0xf] %v1116_v42 }
 0x149   : > { %v949_v46 = vpop.f32.mrb[40].mxu0 }
 0x14a   : > { %1136 = vst [vmem:[%s1715_s9 + $0x98] sm:$0xff] %v1095_v44  ;;  %v950_v47 = vadd.f32 %v1694_v39, %v949_v46  ;;  %v1354_v48 = vpop.f32.mrb[41].mxu0 }
 0x14b   : > { %v952_v50 = vpop.f32.mrb[42].mxu0 }
 0x14c   : > { %v1055_v51 = vadd.f32 %v950_v47, %v389_v45  ;;  %v953_v52 = vadd.f32 %v1694_v39, %v952_v50  ;;  %v1355_v53 = vpop.f32.mrb[43].mxu0 }
 0x14e   : > { %v1096_v1 = vmax.f32 %v1055_v51, 0.0  ;;  %v1056_v54 = vadd.f32 %v953_v52, %v390_v49 }
 0x150   : > { %1137 = vst [vmem:[%s1715_s9 + $0xa0] sm:$0xff] %v1096_v1  ;;  %v1097_v55 = vmax.f32 %v1056_v54, 0.0 }
 0x152   : > { %1138 = vst [vmem:[%s1715_s9 + $0xa8] sm:$0xff] %v1097_v55 }
 0x153 PF: > { %s16_s21 = sadd.s32 1, %s1459_s21  }
 0x154   : > { %p13_p4 = scmp.ge.s32.totalorder %s16_s21, 4  }
 0x156   :  { %15 = sbr.rel (!%p13_p4) target bundleno = 1 (0x1), region = 77 }

// kernel: _residual_forward.3
= control target key start
LH: loop header
LB: loop body
LE: loop exit
PB: predicated region body
PF: predicated region fallthrough
CT: control target
= control target key end

     0   :  { %s5914_s18 = smov 0   ;;  %s8000_s0 = inlined_call_operand.vmem [shape: bf16[2,362,128], index: 0, kind: input, shape index: {}]   ;;  %s8001_s1 = inlined_call_operand.vmem [shape: bf16[9,128,128], index: 1, kind: input, shape index: {}]   ;;  %s8002_s2 = inlined_call_operand.vmem [shape: f32[1,128], index: 2, kind: input, shape index: {}]   ;;  %s8003_s3 = inlined_call_operand.vmem [shape: f32[1,324,1], index: 3, kind: input, shape index: {}]   ;;  %s8004_s4 = inlined_call_operand.vmem [shape: f32[2,324,128], index: 4, kind: output, shape index: {0}]   ;;  %s8005_s5 = inlined_call_operand.vmem [shape: f32[2,8,128], index: 5, kind: output, shape index: {1}]  }
   0x1 LB: > { %s4318_s19 = sadd.s32 4294967295, %s5879_s18   ;;  %p4322_p0 = scmp.ge.s32.totalorder %s5879_s18, 1  ;;  %s5879_s18 = sphi %s5914_s18, %s16_s18  }
   0x2   : > { %p190_p1 = scmp.lt.s32.totalorder %s5879_s18, 3 }
   0x4   : > { %p191_p2 = pnand %p4322_p0, %p190_p1 }
   0x6   : > { %194 = sbr.rel (%p191_p2) target bundleno = 1036 (0x40c), region = 36 }
   0xd   : > { %v5747_v0 = vld [vmem:[%s8001_s1 + $0x40] sm:$0xff]   ;;  %v8009_v1 = vmov 0.0   ;;  %v5748_v2 = vld [vmem:[%s8001_s1 + $0x48] sm:$0xff]   ;;  %p222_p3 = scmp.lt.s32.totalorder %s4318_s19, 1  ;;  %vm5882_vm0 = vmmov 0   ;;  %v5749_v3 = vld [vmem:[%s8001_s1 + $0x50] sm:$0xff]  }
   0xe   : > { %4816 = vmatprep.subr.bf16.mxu0 %v8009_v1  ;;  %5716 = vmatprep.subr.bf16.mxu1 %v8009_v1  ;;  %v5750_v4 = vld [vmem:[%s8001_s1 + $0x58] sm:$0xff]   ;;  %v5751_v5 = vld [vmem:[%s8001_s1 + $0x60] sm:$0xff]   ;;  %v5752_v9 = vld [vmem:[%s8001_s1 + $0x68] sm:$0xff]   ;;  %vm419_vm1 = vsmask.f32 7424  ;;  %vm1142_vm2 = vcmask 1046528  }
   0xf   : > { %4817 = vmatpush3.bf16.msra.mxu0 %v5747_v0  ;;  %5724 = vmatpush3.bf16.msra.mxu1 %v5747_v0  ;;  %s8234_s19 = smov (!%p222_p3, %s4318_s19), 1  ;;  %v5753_v13 = vld [vmem:[%s8001_s1 + $0x70] sm:$0xff]   ;;  %v5754_v20 = vld [vmem:[%s8001_s1 + $0x78] sm:$0xff]   ;;  %v5759_v31 = vld [vmem:[%s8001_s1 + $0x80] sm:$0xff]   ;;  %vm1830_vm3 = vsmask.f32 6400 }
  0x10   : > { %4818 = vmatprep.subr.bf16.mxu0 %v8009_v1  ;;  %5717 = vmatprep.subr.bf16.mxu1 %v8009_v1  ;;  %s5732_s26 = smul.u32 184, %s8234_s19  ;;  %v5760_v34 = vld [vmem:[%s8001_s1] sm:$0xff]   ;;  %v5763_v35 = vld [vmem:[%s8001_s1 + $0x88] sm:$0xff]   ;;  %v5767_v49 = vld [vmem:[%s8001_s1 + $0x90] sm:$0xff]   ;;  %vm2251_vm4 = vcmask 1045504   ;;  %vm3363_vm6 = vcmask 1044480  }
  0x11   : > { %4832 = vmatprep.mubr.msk.bf16.mxu0 %vm5882_vm0, %v8009_v1  ;;  %4876 = vmatprep.mubr.msk.bf16.mxu1 %vm5882_vm0, %v8009_v1  ;;  %v5766_v42 = vld [vmem:[%s8001_s1 + $0x8] sm:$0xff]   ;;  %v5770_v50 = vld [vmem:[%s8001_s1 + $0x10] sm:$0xff]   ;;  %v5773_v57 = vld [vmem:[%s8001_s1 + $0x98] sm:$0xff]   ;;  %vm2942_vm5 = vsmask.f32 5376  ;;  %vm4089_vm7 = vcmask 1043456  }
  0x12   : > { %s5947_s29 = scalar_lea.vmem %s8000_s0, %s5732_s26  ;;  %v5774_v58 = vld [vmem:[%s8001_s1 + $0x18] sm:$0xff]   ;;  %s4325_s12 = sshll.u32 %s8234_s19, 3  ;;  %vm4227_vm8 = vcmask 1040384   ;;  %vm4229_vm9 = vcmask 1041408  }
  0x13   : > { %4819 = vmatpush3.bf16.msra.mxu0 %v5748_v2  ;;  %5725 = vmatpush3.bf16.msra.mxu1 %v5748_v2  ;;  %v5958_v6 = vld [vmem:[%s5947_s29] sm:$0xff]   ;;  %v5961_v7 = vld [vmem:[%s5947_s29 + $0x58] sm:$0xff]   ;;  %v5966_v8 = vld [vmem:[%s5947_s29 + $0x8] sm:$0xff]   ;;  %s235_s15 = scalar_lea.vmem %s8005_s5, %s4325_s12 }
  0x14   : > { %4820 = vmatprep.subr.bf16.mxu0 %v8009_v1  ;;  %5718 = vmatprep.subr.bf16.mxu1 %v8009_v1  ;;  %v423_v10 = vshll.u32 %v5958_v6, 16  ;;  %v5973_v11 = vld [vmem:[%s5947_s29 + $0x60] sm:$0xff]   ;;  %v5976_v12 = vshll.u32 %v5961_v7, 16  ;;  %v421_v14 = vshrl.u32 %v5958_v6, 16  ;;  %v8007_v15 = vshll.u32 %v5966_v8, 16  ;;  %v6000_v22 = vld [vmem:[%s5947_s29 + $0x10] sm:$0xff]  }
  0x15   : > { %v5987_v18 = vshrl.u32 %v5961_v7, 16  ;;  %v5990_v19 = vshll.u32 %v5973_v11, 16  ;;  %v6007_v26 = vld [vmem:[%s5947_s29 + $0x68] sm:$0xff]   ;;  %v8006_v27 = vshrl.u32 %v5966_v8, 16  ;;  %v6013_v28 = vshll.u32 %v6000_v22, 16  ;;  %v6036_v37 = vld [vmem:[%s5947_s29 + $0x18] sm:$0xff]  }
  0x16   : > { %8072 = vst [vmem:[#allocation2_spill] sm:$0xff] %v5976_v12  ;;  %v425_v16 = vrot.slane %v423_v10, 1  ;;  %v510_v17 = vrot.slane %v5976_v12, 1  ;;  %v430_v21 = vrot.slane %v8007_v15, 1  ;;  %v6021_v32 = vshrl.u32 %v5973_v11, 16  ;;  %v6045_v41 = vld [vmem:[%s5947_s29 + $0x70] sm:$0xff]  }
  0x17   : > { %4821 = vmatpush3.bf16.msra.mxu0 %v5749_v3  ;;  %5726 = vmatpush3.bf16.msra.mxu1 %v5749_v3  ;;  %8073 = vst [vmem:[#allocation3_spill] sm:$0xff] %v5987_v18  ;;  %8074 = vst [vmem:[#allocation4_spill] sm:$0xff] %v5990_v19  ;;  %v518_v25 = vrot.slane %v5990_v19, 1  ;;  %v6024_v33 = vshll.u32 %v6007_v26, 16  ;;  %v438_v36 = vrot.slane %v6013_v28, 1  ;;  %v6055_v43 = vshrl.u32 %v6000_v22, 16 }
  0x18   : > { %4822 = vmatprep.subr.bf16.mxu0 %v8009_v1  ;;  %5719 = vmatprep.subr.bf16.mxu1 %v8009_v1  ;;  %v426_v23 = vor.u32 %v425_v16, %v421_v14  ;;  %v514_v24 = vor.u32 %v5987_v18, %v510_v17  ;;  %8075 = vst [vmem:[#allocation5_spill] sm:$0xff] %v6013_v28  ;;  %8076 = vst [vmem:[#allocation6_spill] sm:$0xff] %v6021_v32  ;;  %v6058_v44 = vshrl.u32 %v6007_v26, 16  ;;  %v6076_v51 = vld [vmem:[%s5947_s29 + $0x20] sm:$0xff]   ;;  %v6080_v52 = vld [vmem:[%s5947_s29 + $0x78] sm:$0xff]  }
  0x19   : > { %8077 = vst [vmem:[#allocation7_spill] sm:$0xff] %v6024_v33  ;;  %v434_v38 = vor.u32 %v8006_v27, %v430_v21  ;;  %v522_v39 = vor.u32 %v6021_v32, %v518_v25  ;;  %v526_v40 = vrot.slane %v6024_v33, 1  ;;  %8078 = vst [vmem:[#allocation8_spill] sm:$0xff] %v6055_v43  ;;  %v6063_v47 = vshll.u32 %v6036_v37, 16  ;;  %v6097_v59 = vld [vmem:[%s5947_s29 + $0x28] sm:$0xff]   ;;  %v6116_v3 = vld [vmem:[%s5947_s29 + $0x80] sm:$0xff]  }
  0x1a   : > { %v431_v29 = vsel %vm419_vm1, %v426_v23, %v430_v21  ;;  %v519_v30 = vsel %vm419_vm1, %v514_v24, %v518_v25  ;;  %8079 = vst [vmem:[#allocation9_spill] sm:$0xff] %v6058_v44  ;;  %v6066_v48 = vshll.u32 %v6045_v41, 16  ;;  %v442_v53 = vor.u32 %v6055_v43, %v438_v36  ;;  %v5783_v14 = vld [vmem:[%s8001_s1 + $0xa8] sm:$0xff]   ;;  %v6150_v25 = vld [vmem:[%s5947_s29 + $0x30] sm:$0xff]  }
  0x1b   : > { %4823 = vmatpush3.bf16.msra.mxu0 %v5750_v4  ;;  %5727 = vmatpush3.bf16.msra.mxu1 %v5750_v4  ;;  %v439_v45 = vsel %vm419_vm1, %v434_v38, %v438_v36  ;;  %v527_v46 = vsel %vm419_vm1, %v522_v39, %v526_v40  ;;  %8080 = vst [vmem:[#allocation10_spill] sm:$0xff] %v6063_v47  ;;  %v446_v54 = vrot.slane %v6063_v47, 1  ;;  %v6102_v60 = vshll.u32 %v6076_v51, 16  ;;  %v5777_v4 = vld [vmem:[%s8001_s1 + $0xa0] sm:$0xff]   ;;  %v5784_v23 = vld [vmem:[%s8001_s1 + $0x28] sm:$0xff]   ;;  %v6168_v36 = vld [vmem:[%s5947_s29 + $0x90] sm:$0xff]  }
  0x1c   : > { %4824 = vmatprep.subr.bf16.mxu0 %v8009_v1  ;;  %5720 = vmatprep.subr.bf16.mxu1 %v8009_v1  ;;  %8081 = vst [vmem:[#allocation11_spill] sm:$0xff] %v6066_v48  ;;  %v530_v55 = vor.u32 %v6058_v44, %v526_v40  ;;  %v534_v56 = vrot.slane %v6066_v48, 1  ;;  %v6105_v61 = vshll.u32 %v6080_v52, 16  ;;  %v6110_v0 = vshrl.u32 %v6036_v37, 16 }
  0x1d   : > { %8082 = vst [vmem:[#allocation12_spill] sm:$0xff] %v6102_v60  ;;  %v447_v62 = vsel %vm419_vm1, %v442_v53, %v446_v54  ;;  %v6113_v2 = vshrl.u32 %v6045_v41, 16  ;;  %v454_v10 = vrot.slane %v6102_v60, 1  ;;  %v6141_v21 = vshll.u32 %v6116_v3, 16  ;;  %v5789_v53 = vld [vmem:[%s8001_s1 + $0xb0] sm:$0xff]  }
  0x1e   : > { %8083 = vst [vmem:[#allocation13_spill] sm:$0xff] %v6105_v61  ;;  %v535_v63 = vsel %vm419_vm1, %v530_v55, %v534_v56  ;;  %8084 = vst [vmem:[#allocation14_spill] sm:$0xff] %v6110_v0  ;;  %v450_v16 = vor.u32 %v6110_v0, %v446_v54  ;;  %v6147_v24 = vshrl.u32 %v6076_v51, 16 }
  0x1f   : > { %4825 = vmatpush3.bf16.msra.mxu0 %v5751_v5  ;;  %5728 = vmatpush3.bf16.msra.mxu1 %v5751_v5  ;;  %8085 = vst [vmem:[#allocation15_spill] sm:$0xff] %v6113_v2  ;;  %v5778_v5 = vld [vmem:[%s8001_s1 + $0x20] sm:$0xff]   ;;  %8087 = vst [vmem:[#allocation17_spill] sm:$0xff] %v6141_v21 }
  0x20   : > { %4826 = vmatprep.subr.bf16.mxu0 %v8009_v1  ;;  %5721 = vmatprep.subr.bf16.mxu1 %v8009_v1  ;;  %8088 = vst [vmem:[#allocation18_spill] sm:$0xff] %v6147_v24  ;;  %v455_v39 = vsel %vm419_vm1, %v450_v16, %v454_v10  ;;  %v6228_v16 = vld [vmem:[%s5947_s29 + $0x98] sm:$0xff]  }
  0x23   : > { %4827 = vmatpush3.bf16.msra.mxu0 %v5752_v9  ;;  %5729 = vmatpush3.bf16.msra.mxu1 %v5752_v9  ;;  %v6125_v9 = vshll.u32 %v6097_v59, 16 }
  0x24   : > { %4828 = vmatprep.subr.bf16.mxu0 %v8009_v1  ;;  %5722 = vmatprep.subr.bf16.mxu1 %v8009_v1 }
  0x25   : > { %8086 = vst [vmem:[#allocation16_spill] sm:$0xff] %v6125_v9 }
  0x27   : > { %4829 = vmatpush3.bf16.msra.mxu0 %v5753_v13  ;;  %5730 = vmatpush3.bf16.msra.mxu1 %v5753_v13  ;;  %v542_v13 = vrot.slane %v6105_v61, 1 }
  0x28   : > { %4830 = vmatprep.subr.bf16.mxu0 %v8009_v1  ;;  %5723 = vmatprep.subr.bf16.mxu1 %v8009_v1 }
  0x2b   : > { %4831 = vmatpush3.bf16.msra.mxu0 %v5754_v20  ;;  %5731 = vmatpush3.bf16.msra.mxu1 %v5754_v20  ;;  %v538_v20 = vor.u32 %v6113_v2, %v534_v56  ;;  %v458_v56 = vor.u32 %v6147_v24, %v454_v10  ;;  %v5792_v10 = vld [vmem:[%s8001_s1 + $0xb8] sm:$0xff]  }
  0x2c   : > { %5016 = vmatprep.subr.bf16.mxu0 %v8009_v1  ;;  %4916 = vmatprep.subr.bf16.mxu1 %v8009_v1 }
  0x2d   : > { %v543_v40 = vsel %vm419_vm1, %v538_v20, %v542_v13 }
  0x2e   : > { %4833 = vmatmul.mubr.bf16.vlgmr.msra.gmra.mrb[0].mxu0 %v431_v29  ;;  %4877 = vmatmul.mubr.bf16.vlgmr.msra.gmra.mrb[0].mxu1 %v519_v30  ;;  %v6153_v29 = vld [vmem:[%s5947_s29 + $0x50] sm:$0xff]   ;;  %v462_v30 = vrot.slane %v6125_v9, 1 }
  0x2f   : > { %5017 = vmatpush3.bf16.msra.mxu0 %v5759_v31  ;;  %4836 = vmatprep.mubr.msk.bf16.mxu0 %vm5882_vm0, %v8009_v1  ;;  %v6157_v31 = vshrl.u32 %v6080_v52, 16  ;;  %v6171_v38 = vshll.u32 %v6153_v29, 16  ;;  %v6195_v55 = vshrl.u32 %v6153_v29, 16 }
  0x30   : > { %4880 = vmatprep.mubr.msk.bf16.mxu1 %vm5882_vm0, %v8009_v1  ;;  %4917 = vmatpush3.bf16.msra.mxu1 %v5760_v34  ;;  %v6160_v34 = vld [vmem:[%s5947_s29 + $0x88] sm:$0xff]  }
  0x31   : > { %5018 = vmatprep.subr.bf16.mxu0 %v8009_v1  ;;  %4918 = vmatprep.subr.bf16.mxu1 %v8009_v1  ;;  %8089 = vst [vmem:[#allocation19_spill] sm:$0xff] %v6157_v31  ;;  %8090 = vst [vmem:[#allocation20_spill] sm:$0xff] %v6171_v38  ;;  %v8008_v54 = vrot.slane %v6171_v38, 1 }
  0x32   : > { %8093 = vst [vmem:[#allocation23_spill] sm:$0xff] %v6195_v55 }
  0x33   : > { %5019 = vmatpush3.bf16.msra.mxu0 %v5763_v35  ;;  %v6163_v35 = vld [vmem:[%s5947_s29 + $0x38] sm:$0xff]  }
  0x34   : > { %4919 = vmatpush3.bf16.msra.mxu1 %v5766_v42  ;;  %5020 = vmatprep.subr.bf16.mxu0 %v8009_v1  ;;  %v550_v42 = vrot.slane %v6141_v21, 1  ;;  %v6270_v21 = vld [vmem:[%s5947_s29 + $0xa0] sm:$0xf] }
  0x35   : > { %4920 = vmatprep.subr.bf16.mxu1 %v8009_v1 }
  0x36   : > { %4837 = vmatmul.mubr.bf16.gmra.mrb[4].mxu0 %v439_v45  ;;  %4881 = vmatmul.mubr.bf16.gmra.mrb[4].mxu1 %v527_v46  ;;  %v6177_v45 = vshrl.u32 %v6097_v59, 16  ;;  %v6180_v46 = vld [vmem:[%s5947_s29 + $0x40] sm:$0xff]  }
  0x37   : > { %4840 = vmatprep.mubr.msk.bf16.mxu0 %vm5882_vm0, %v8009_v1  ;;  %4884 = vmatprep.mubr.msk.bf16.mxu1 %vm5882_vm0, %v8009_v1  ;;  %v6277_v61 = vshrl.u32 %v6180_v46, 16 }
  0x38   : > { %5021 = vmatpush3.bf16.msra.mxu0 %v5767_v49  ;;  %4921 = vmatpush3.bf16.msra.mxu1 %v5770_v50  ;;  %8091 = vst [vmem:[#allocation21_spill] sm:$0xff] %v6177_v45  ;;  %v5788_v49 = vld [vmem:[%s8001_s1 + $0x30] sm:$0xff]   ;;  %v6186_v50 = vshrl.u32 %v6116_v3, 16 }
  0x39   : > { %5022 = vmatprep.subr.bf16.mxu0 %v8009_v1  ;;  %4922 = vmatprep.subr.bf16.mxu1 %v8009_v1  ;;  %8105 = vst [vmem:[#allocation34_spill] sm:$0xff] %v6277_v61 }
  0x3a   : > { %8092 = vst [vmem:[#allocation22_spill] sm:$0xff] %v6186_v50 }
  0x3c   : > { %5023 = vmatpush3.bf16.msra.mxu0 %v5773_v57  ;;  %4923 = vmatpush3.bf16.msra.mxu1 %v5774_v58  ;;  %v6199_v57 = vshll.u32 %v6150_v25, 16  ;;  %v6202_v58 = vshll.u32 %v6160_v34, 16 }
  0x3d   : > { %5024 = vmatprep.subr.bf16.mxu0 %v8009_v1  ;;  %4924 = vmatprep.subr.bf16.mxu1 %v8009_v1 }
  0x3e   : > { %4841 = vmatmul.mubr.bf16.gmra.mrb[8].mxu0 %v447_v62  ;;  %4885 = vmatmul.mubr.bf16.gmra.mrb[8].mxu1 %v535_v63  ;;  %8094 = vst [vmem:[#allocation24_spill] sm:$0xff] %v6199_v57  ;;  %8095 = vst [vmem:[#allocation25_spill] sm:$0xff] %v6202_v58  ;;  %v546_v62 = vor.u32 %v6157_v31, %v542_v13  ;;  %v6210_v63 = vshll.u32 %v6163_v35, 16  ;;  %v6225_v13 = vshll.u32 %v6180_v46, 16  ;;  %v6280_v31 = vshrl.u32 %v6228_v16, 16 }
  0x3f   : > { %4844 = vmatprep.mubr.msk.bf16.mxu0 %vm5882_vm0, %v8009_v1  ;;  %4888 = vmatprep.mubr.msk.bf16.mxu1 %vm5882_vm0, %v8009_v1 }
  0x40   : > { %5025 = vmatpush3.bf16.msra.mxu0 %v5777_v4  ;;  %4925 = vmatpush3.bf16.msra.mxu1 %v5778_v5  ;;  %8096 = vst [vmem:[#allocation26_spill] sm:$0xff] %v6210_v63  ;;  %v6213_v4 = vshll.u32 %v6168_v36, 16  ;;  %v5791_v5 = vld [vmem:[%s8001_s1 + $0x38] sm:$0xff]   ;;  %8098 = vst [vmem:[#allocation28_spill] sm:$0xff] %v6225_v13  ;;  %v551_v27 = vsel %vm419_vm1, %v546_v62, %v550_v42  ;;  %v478_v15 = vrot.slane %v6210_v63, 1  ;;  %v8104_v62 = vmov 0.0  }
  0x41   : > { %5026 = vmatprep.subr.bf16.mxu0 %v8009_v1  ;;  %4926 = vmatprep.subr.bf16.mxu1 %v8009_v1  ;;  %8106 = vst [vmem:[#allocation35_spill] sm:$0xff] %v6280_v31 }
  0x42   : > { %8097 = vst [vmem:[#allocation27_spill] sm:$0xff] %v6213_v4 }
  0x44   : > { %5027 = vmatpush3.bf16.msra.mxu0 %v5783_v14  ;;  %4927 = vmatpush3.bf16.msra.mxu1 %v5784_v23  ;;  %v506_v14 = vor.u32 %v6195_v55, %v8008_v54  ;;  %v470_v23 = vrot.slane %v6199_v57, 1  ;;  %v6249_v54 = vshrl.u32 %v6163_v35, 16 }
  0x45   : > { %4928 = vmatprep.subr.bf16.mxu1 %v8009_v1  ;;  %5028 = vmatprep.subr.bf16.mxu0 %v8009_v1 }
  0x46   : > { %4845 = vmatmul.mubr.bf16.gmra.mrb[12].mxu0 %v455_v39  ;;  %4889 = vmatmul.mubr.bf16.gmra.mrb[12].mxu1 %v543_v40  ;;  %v6235_v20 = vsel %vm419_vm1, %v506_v14, %v510_v17  ;;  %v558_v39 = vrot.slane %v6202_v58, 1  ;;  %v6240_v40 = vshrl.u32 %v6150_v25, 16  ;;  %8101 = vst [vmem:[#allocation31_spill] sm:$0xff] %v6249_v54  ;;  %v566_v17 = vrot.slane %v6213_v4, 1 }
  0x47   : > { %4848 = vmatprep.mubr.msk.bf16.mxu0 %vm5882_vm0, %v8009_v1  ;;  %4892 = vmatprep.mubr.msk.bf16.mxu1 %vm5882_vm0, %v8009_v1  ;;  %v6253_v14 = vshrl.u32 %v6168_v36, 16 }
  0x48   : > { %4929 = vmatpush3.bf16.msra.mxu1 %v5788_v49  ;;  %5029 = vmatpush3.bf16.msra.mxu0 %v5789_v53  ;;  %8099 = vst [vmem:[#allocation29_spill] sm:$0xff] %v6240_v40  ;;  %v6243_v49 = vshrl.u32 %v6160_v34, 16  ;;  %v463_v53 = vsel %vm419_vm1, %v458_v56, %v462_v30  ;;  %v6257_v56 = vshll.u32 %v6228_v16, 16 }
  0x49   : > { %4930 = vmatprep.subr.bf16.mxu1 %v8009_v1  ;;  %5030 = vmatprep.subr.bf16.mxu0 %v8009_v1  ;;  %8102 = vst [vmem:[#allocation32_spill] sm:$0xff] %v6253_v14  ;;  %v486_v1 = vrot.slane %v6225_v13, 1 }
  0x4a   : > { %8100 = vst [vmem:[#allocation30_spill] sm:$0xff] %v6243_v49  ;;  %8103 = vst [vmem:[#allocation33_spill] sm:$0xff] %v6257_v56 }
  0x4c   : > { %4931 = vmatpush3.bf16.msra.mxu1 %v5791_v5  ;;  %5031 = vmatpush3.bf16.msra.mxu0 %v5792_v10  ;;  %v466_v5 = vor.u32 %v6177_v45, %v462_v30  ;;  %v554_v10 = vor.u32 %v6186_v50, %v550_v42  ;;  %v474_v30 = vor.u32 %v6240_v40, %v470_v23 }
  0x4d   : > { %5116 = vmatprep.subr.bf16.mxu1 %v8104_v62  ;;  %5216 = vmatprep.subr.bf16.mxu0 %v8104_v62  ;;  %v562_v42 = vor.u32 %v6243_v49, %v558_v39 }
  0x4e   : > { %4849 = vmatmul.mubr.bf16.gmra.mrb[16].mxu0 %v463_v53  ;;  %4893 = vmatmul.mubr.bf16.gmra.mrb[16].mxu1 %v551_v27  ;;  %v471_v4 = vsel %vm419_vm1, %v466_v5, %v470_v23  ;;  %v559_v58 = vsel %vm419_vm1, %v554_v10, %v558_v39  ;;  %v574_v27 = vrot.slane %v6257_v56, 1  ;;  %v6274_v53 = vld [vmem:[%s5947_s29 + $0x48] sm:$0xff]   ;;  %v482_v23 = vor.u32 %v6249_v54, %v478_v15 }
  0x4f   : > { %4852 = vmatprep.mubr.msk.bf16.mxu0 %vm5882_vm0, %v8104_v62  ;;  %4896 = vmatprep.mubr.msk.bf16.mxu1 %vm5882_vm0, %v8104_v62  ;;  %v567_v5 = vsel %vm419_vm1, %v562_v42, %v566_v17  ;;  %v6295_v10 = vshll.u32 %v6274_v53, 16  ;;  %v570_v39 = vor.u32 %v6253_v14, %v566_v17 }
  0x51   : > { %8107 = vst [vmem:[#allocation36_spill] sm:$0xff] %v6295_v10  ;;  %v575_v42 = vsel %vm419_vm1, %v570_v39, %v574_v27  ;;  %v494_v49 = vrot.slane %v6295_v10, 1  ;;  %v8109_v39 = vrot.slane %v6171_v38, 1 }
  0x56   : > { %4853 = vmatmul.mubr.bf16.gmra.mrb[20].mxu0 %v471_v4  ;;  %4897 = vmatmul.mubr.bf16.gmra.mrb[20].mxu1 %v559_v58  ;;  %v6290_v58 = vcombine.low %v6270_v21, %v6270_v21  ;;  %v479_v4 = vsel %vm419_vm1, %v474_v30, %v478_v15  ;;  %v487_v30 = vsel %vm419_vm1, %v482_v23, %v486_v1  ;;  %v6316_v23 = vshrl.u32 %v6274_v53, 16 }
  0x57   : > { %4856 = vmatprep.mubr.msk.bf16.mxu0 %vm5882_vm0, %v8104_v62  ;;  %4900 = vmatprep.mubr.msk.bf16.mxu1 %vm5882_vm0, %v8104_v62  ;;  %v578_v15 = vor.u32 %v6280_v31, %v574_v27 }
  0x58   : > { %v580_v56 = vshll.u32 %v6290_v58, 16  ;;  %8108 = vst [vmem:[#allocation37_spill] sm:$0xff] %v6316_v23 }
  0x5a   : > { %v582_v50 = vrot.slane %v580_v56, 1  ;;  %v584_v56 = vshrl.u32 %v6290_v58, 16 }
  0x5c   : > { %v586_v27 = vor.u32 %v584_v56, %v582_v50  ;;  %v5799_v56 = vld [vmem:[%s8001_s1 + $0xd8] sm:$0xff]  }
  0x5e   : > { %4857 = vmatmul.mubr.bf16.gmra.mrb[24].mxu0 %v479_v4  ;;  %4901 = vmatmul.mubr.bf16.gmra.mrb[24].mxu1 %v567_v5  ;;  %v490_v4 = vor.u32 %v6277_v61, %v486_v1  ;;  %v583_v5 = vsel %vm419_vm1, %v578_v15, %v582_v50  ;;  %v498_v1 = vor.u32 %v6316_v23, %v494_v49  ;;  %v1143_v50 = vrot.slane %v5958_v6, 1  ;;  %v5794_v15 = vld [vmem:[%s8001_s1 + $0x100] sm:$0xff]  }
  0x5f   : > { %4860 = vmatprep.mubr.msk.bf16.mxu0 %vm5882_vm0, %v8104_v62  ;;  %4904 = vmatprep.mubr.msk.bf16.mxu1 %vm5882_vm0, %v8104_v62 }
  0x60   : > { %v495_v17 = vsel %vm419_vm1, %v490_v4, %v494_v49  ;;  %v1144_v49 = vrot.slane %v5966_v8, 1  ;;  %v5795_v4 = vld [vmem:[%s8001_s1 + $0xc8] sm:$0xff]  }
  0x66   : > { %4861 = vmatmul.mubr.bf16.gmra.mrb[28].mxu0 %v487_v30  ;;  %4905 = vmatmul.mubr.bf16.gmra.mrb[28].mxu1 %v575_v42  ;;  %v503_v30 = vsel %vm419_vm1, %v498_v1, %v8109_v39  ;;  %v5793_v42 = vld [vmem:[%s8001_s1 + $0xc0] sm:$0xff]  }
  0x67   : > { %4864 = vmatprep.mubr.msk.bf16.mxu0 %vm5882_vm0, %v8104_v62  ;;  %4908 = vmatprep.mubr.msk.bf16.mxu1 %vm5882_vm0, %v8104_v62  ;;  %v5801_v39 = vld [vmem:[%s8001_s1 + $0xe0] sm:$0xff]  }
  0x6e   : > { %4865 = vmatmul.mubr.bf16.gmra.mrb[32].mxu0 %v495_v17  ;;  %4909 = vmatmul.mubr.bf16.gmra.mrb[32].mxu1 %v583_v5  ;;  %v1146_v17 = vrot.slane %v6000_v22, 1  ;;  %v5796_v5 = vld [vmem:[%s8001_s1 + $0x108] sm:$0xff]  }
  0x6f   : > { %4868 = vmatprep.mubr.msk.bf16.mxu0 %vm5882_vm0, %v8104_v62  ;;  %4912 = vmatprep.mubr.msk.bf16.mxu1 %vm5882_vm0, %v8104_v62 }
  0x70   : > { %v6369_v1 = vsel %vm1142_vm2, %v1144_v49, %v1146_v17 }
  0x76   : > { %4869 = vmatmul.mubr.bf16.gmra.mrb[36].mxu0 %v503_v30  ;;  %4913 = vmatmul.mubr.bf16.gmra.mrb[36].mxu1 %v586_v27  ;;  %v5798_v27 = vld [vmem:[%s8001_s1 + $0x110] sm:$0xff]   ;;  %v1148_v30 = vrot.slane %v6036_v37, 1 }
  0x77   : > { %4872 = vmatprep.mubr.msk.bf16.mxu0 %vm5882_vm0, %v8104_v62  ;;  %4932 = vmatprep.mubr.msk.bf16.mxu1 %vm5882_vm0, %v8104_v62 }
  0x7e   : > { %4873 = vmatmul.mubr.bf16.gmra.mrb[40].mxu0 %v6235_v20  ;;  %4933 = vmatmul.mubr.bf16.vlgmr.msra.gmra.mrb[40].mxu1 %v5958_v6  ;;  %v1145_v20 = vsel %vm1142_vm2, %v1143_v50, %v1144_v49  ;;  %v5797_v6 = vld [vmem:[%s8001_s1 + $0xd0] sm:$0xff]   ;;  %v6395_v50 = vsel %vm1142_vm2, %v1146_v17, %v1148_v30  ;;  %v5802_v49 = vld [vmem:[%s8001_s1 + $0x120] sm:$0xff]  }
  0x7f   : > { %4936 = vmatprep.mubr.msk.bf16.mxu1 %vm5882_vm0, %v8104_v62  ;;  %5032 = vmatprep.mubr.msk.bf16.mxu0 %vm5882_vm0, %v8104_v62  ;;  %v5806_v17 = vld [vmem:[%s8001_s1 + $0x130] sm:$0xff]  }
  0x80   : > { %5117 = vmatpush3.bf16.msra.mxu1 %v5793_v42  ;;  %v5800_v42 = vld [vmem:[%s8001_s1 + $0x118] sm:$0xff]  }
  0x81   : > { %5118 = vmatprep.subr.bf16.mxu1 %v8104_v62 }
  0x84   : > { %5119 = vmatpush3.bf16.msra.mxu1 %v5795_v4  ;;  %v5805_v4 = vld [vmem:[%s8001_s1 + $0xf0] sm:$0xff]  }
  0x85   : > { %5120 = vmatprep.subr.bf16.mxu1 %v8104_v62 }
  0x86   : > { %4937 = vmatmul.mubr.bf16.gmra.mrb[44].mxu1 %v5966_v8  ;;  %5033 = vmatmul.mubr.bf16.vlgmr.msra.gmra.mrb[44].mxu0 %v1145_v20  ;;  %v1150_v20 = vrot.slane %v6076_v51, 1 }
  0x87   : > { %5217 = vmatpush3.bf16.msra.mxu0 %v5794_v15  ;;  %4940 = vmatprep.mubr.msk.bf16.mxu1 %vm5882_vm0, %v8104_v62  ;;  %v5804_v15 = vld [vmem:[%s8001_s1 + $0x128] sm:$0xff]  }
  0x88   : > { %5036 = vmatprep.mubr.msk.bf16.mxu0 %vm5882_vm0, %v8104_v62  ;;  %5218 = vmatprep.subr.bf16.mxu0 %v8104_v62 }
  0x89   : > { %5121 = vmatpush3.bf16.msra.mxu1 %v5797_v6  ;;  %v6421_v6 = vsel %vm1142_vm2, %v1148_v30, %v1150_v20  ;;  %v8111_v30 = vshrl.u32 %v5966_v8, 16 }
  0x8a   : > { %5122 = vmatprep.subr.bf16.mxu1 %v8104_v62 }
  0x8b   : > { %5219 = vmatpush3.bf16.msra.mxu0 %v5796_v5  ;;  %v1152_v5 = vrot.slane %v6097_v59, 1 }
  0x8c   : > { %5220 = vmatprep.subr.bf16.mxu0 %v8104_v62 }
  0x8d   : > { %5123 = vmatpush3.bf16.msra.mxu1 %v5799_v56  ;;  %v5808_v56 = vld [vmem:[%s8001_s1 + $0x138] sm:$0xff]  }
  0x8e   : > { %4941 = vmatmul.mubr.bf16.gmra.mrb[48].mxu1 %v6000_v22  ;;  %5037 = vmatmul.mubr.bf16.gmra.mrb[48].mxu0 %v6369_v1  ;;  %v5803_v22 = vld [vmem:[%s8001_s1 + $0xe8] sm:$0xff]  }
  0x8f   : > { %4944 = vmatprep.mubr.msk.bf16.mxu1 %vm5882_vm0, %v8104_v62  ;;  %5040 = vmatprep.mubr.msk.bf16.mxu0 %vm5882_vm0, %v8104_v62 }
  0x90   : > { %5221 = vmatpush3.bf16.msra.mxu0 %v5798_v27  ;;  %5124 = vmatprep.subr.bf16.mxu1 %v8104_v62  ;;  %v8110_v27 = vshll.u32 %v5966_v8, 16  ;;  %v1156_v8 = vrot.slane %v6163_v35, 1 }
  0x91   : > { %5222 = vmatprep.subr.bf16.mxu0 %v8104_v62  ;;  %5125 = vmatpush3.bf16.msra.mxu1 %v5801_v39 }
  0x92   : > { %5126 = vmatprep.subr.bf16.mxu1 %v8104_v62  ;;  %v6447_v39 = vrot.slane %v8110_v27, 2 }
  0x94   : > { %5223 = vmatpush3.bf16.msra.mxu0 %v5800_v42  ;;  %v6451_v42 = vrot.slane %v8111_v30, 1 }
  0x95   : > { %5224 = vmatprep.subr.bf16.mxu0 %v8104_v62  ;;  %5127 = vmatpush3.bf16.msra.mxu1 %v5803_v22  ;;  %v1154_v22 = vrot.slane %v6150_v25, 1 }
  0x96   : > { %4945 = vmatmul.mubr.bf16.gmra.mrb[52].mxu1 %v6036_v37  ;;  %5041 = vmatmul.mubr.bf16.gmra.mrb[52].mxu0 %v6395_v50  ;;  %v5807_v37 = vld [vmem:[%s8001_s1 + $0xf8] sm:$0xff]  }
  0x97   : > { %4948 = vmatprep.mubr.msk.bf16.mxu1 %vm5882_vm0, %v8104_v62  ;;  %5044 = vmatprep.mubr.msk.bf16.mxu0 %vm5882_vm0, %v8104_v62 }
  0x98   : > { %5225 = vmatpush3.bf16.msra.mxu0 %v5802_v49  ;;  %5128 = vmatprep.subr.bf16.mxu1 %v8104_v62 }
  0x99   : > { %5226 = vmatprep.subr.bf16.mxu0 %v8104_v62  ;;  %5129 = vmatpush3.bf16.msra.mxu1 %v5805_v4  ;;  %v6471_v4 = vsel %vm1142_vm2, %v1154_v22, %v1156_v8 }
  0x9a   : > { %5130 = vmatprep.subr.bf16.mxu1 %v8104_v62 }
  0x9c   : > { %5227 = vmatpush3.bf16.msra.mxu0 %v5804_v15 }
  0x9d   : > { %5228 = vmatprep.subr.bf16.mxu0 %v8104_v62  ;;  %5131 = vmatpush3.bf16.msra.mxu1 %v5807_v37 }
  0x9e   : > { %4949 = vmatmul.mubr.bf16.gmra.mrb[56].mxu1 %v6076_v51  ;;  %5045 = vmatmul.mubr.bf16.gmra.mrb[56].mxu0 %v6421_v6  ;;  %v6440_v51 = vsel %vm1142_vm2, %v1150_v20, %v1152_v5 }
  0x9f   : > { %4952 = vmatprep.mubr.msk.bf16.mxu1 %vm5882_vm0, %v8104_v62  ;;  %5048 = vmatprep.mubr.msk.bf16.mxu0 %vm5882_vm0, %v8104_v62 }
  0xa0   : > { %5229 = vmatpush3.bf16.msra.mxu0 %v5806_v17  ;;  %5316 = vmatprep.subr.bf16.mxu1 %v8104_v62 }
  0xa1   : > { %5230 = vmatprep.subr.bf16.mxu0 %v8104_v62 }
  0xa4   : > { %5231 = vmatpush3.bf16.msra.mxu0 %v5808_v56 }
  0xa5   : > { %5416 = vmatprep.subr.bf16.mxu0 %v8104_v62 }
  0xa6   : > { %4953 = vmatmul.mubr.bf16.gmra.mrb[60].mxu1 %v6097_v59  ;;  %5049 = vmatmul.mubr.bf16.gmra.mrb[60].mxu0 %v6440_v51  ;;  %v6459_v59 = vsel %vm1142_vm2, %v1152_v5, %v1154_v22 }
  0xa7   : > { %4956 = vmatprep.mubr.msk.bf16.mxu1 %vm5882_vm0, %v8104_v62  ;;  %5052 = vmatprep.mubr.msk.bf16.mxu0 %vm5882_vm0, %v8104_v62 }
  0xae   : > { %4957 = vmatmul.mubr.bf16.gmra.mrb[64].mxu1 %v6150_v25  ;;  %5053 = vmatmul.mubr.bf16.gmra.mrb[64].mxu0 %v6459_v59  ;;  %v1158_v25 = vrot.slane %v6180_v46, 1 }
  0xaf   : > { %4960 = vmatprep.mubr.msk.bf16.mxu1 %vm5882_vm0, %v8104_v62  ;;  %5056 = vmatprep.mubr.msk.bf16.mxu0 %vm5882_vm0, %v8104_v62 }
  0xb0   : > { %v6481_v20 = vsel %vm1142_vm2, %v1156_v8, %v1158_v25 }
  0xb6   : > { %4961 = vmatmul.mubr.bf16.gmra.mrb[68].mxu1 %v6163_v35  ;;  %5057 = vmatmul.mubr.bf16.gmra.mrb[68].mxu0 %v6471_v4  ;;  %v1160_v35 = vrot.slane %v6274_v53, 1 }
  0xb7   : > { %4964 = vmatprep.mubr.msk.bf16.mxu1 %vm5882_vm0, %v8104_v62  ;;  %5060 = vmatprep.mubr.msk.bf16.mxu0 %vm5882_vm0, %v8104_v62 }
  0xb8   : > { %v6491_v15 = vsel %vm1142_vm2, %v1158_v25, %v1160_v35 }
  0xbe   : > { %4965 = vmatmul.mubr.bf16.gmra.mrb[72].mxu1 %v6180_v46  ;;  %5061 = vmatmul.mubr.bf16.gmra.mrb[72].mxu0 %v6481_v20  ;;  %v1162_v46 = vrot.slane %v6153_v29, 1 }
  0xbf   : > { %4968 = vmatprep.mubr.msk.bf16.mxu1 %vm5882_vm0, %v8104_v62  ;;  %5064 = vmatprep.mubr.msk.bf16.mxu0 %vm5882_vm0, %v8104_v62 }
  0xc0   : > { %v6501_v37 = vsel %vm1142_vm2, %v1160_v35, %v1162_v46 }
  0xc6   : > { %4969 = vmatmul.mubr.bf16.gmra.mrb[76].mxu1 %v6274_v53  ;;  %5065 = vmatmul.mubr.bf16.gmra.mrb[76].mxu0 %v6491_v15  ;;  %v1164_v53 = vrot.slane %v5961_v7, 1 }
  0xc7   : > { %4972 = vmatprep.mubr.msk.bf16.mxu1 %vm5882_vm0, %v8104_v62  ;;  %5068 = vmatprep.mubr.msk.bf16.mxu0 %vm5882_vm0, %v8104_v62 }
  0xc8   : > { %v6511_v17 = vsel %vm1142_vm2, %v1162_v46, %v1164_v53 }
  0xce   : > { %4973 = vmatmul.mubr.bf16.gmra.mrb[80].mxu1 %v6153_v29  ;;  %5069 = vmatmul.mubr.bf16.gmra.mrb[80].mxu0 %v6501_v37  ;;  %v1166_v29 = vrot.slane %v5973_v11, 1 }
  0xcf   : > { %4976 = vmatprep.mubr.msk.bf16.mxu1 %vm5882_vm0, %v8104_v62  ;;  %5072 = vmatprep.mubr.msk.bf16.mxu0 %vm5882_vm0, %v8104_v62 }
  0xd0   : > { %v6521_v5 = vsel %vm1142_vm2, %v1164_v53, %v1166_v29 }
  0xd6   : > { %4977 = vmatmul.mubr.bf16.gmra.mrb[84].mxu1 %v5961_v7  ;;  %5073 = vmatmul.mubr.bf16.gmra.mrb[84].mxu0 %v6511_v17  ;;  %v1168_v7 = vrot.slane %v6007_v26, 1 }
  0xd7   : > { %4980 = vmatprep.mubr.msk.bf16.mxu1 %vm5882_vm0, %v8104_v62  ;;  %5076 = vmatprep.mubr.msk.bf16.mxu0 %vm5882_vm0, %v8104_v62 }
  0xd8   : > { %v6531_v56 = vsel %vm1142_vm2, %v1166_v29, %v1168_v7 }
  0xde   : > { %4981 = vmatmul.mubr.bf16.gmra.mrb[88].mxu1 %v5973_v11  ;;  %5077 = vmatmul.mubr.bf16.gmra.mrb[88].mxu0 %v6521_v5  ;;  %v1170_v11 = vrot.slane %v6045_v41, 1 }
  0xdf   : > { %4984 = vmatprep.mubr.msk.bf16.mxu1 %vm5882_vm0, %v8104_v62  ;;  %5080 = vmatprep.mubr.msk.bf16.mxu0 %vm5882_vm0, %v8104_v62 }
  0xe0   : > { %v6541_v27 = vsel %vm1142_vm2, %v1168_v7, %v1170_v11 }
  0xe6   : > { %4985 = vmatmul.mubr.bf16.gmra.mrb[92].mxu1 %v6007_v26  ;;  %5081 = vmatmul.mubr.bf16.gmra.mrb[92].mxu0 %v6531_v56  ;;  %v1172_v26 = vrot.slane %v6080_v52, 1 }
  0xe7   : > { %4988 = vmatprep.mubr.msk.bf16.mxu1 %vm5882_vm0, %v8104_v62  ;;  %5084 = vmatprep.mubr.msk.bf16.mxu0 %vm5882_vm0, %v8104_v62 }
  0xe8   : > { %v6551_v30 = vsel %vm1142_vm2, %v1170_v11, %v1172_v26 }
  0xee   : > { %4989 = vmatmul.mubr.bf16.gmra.mrb[96].mxu1 %v6045_v41  ;;  %5085 = vmatmul.mubr.bf16.gmra.mrb[96].mxu0 %v6541_v27  ;;  %v1174_v41 = vrot.slane %v6116_v3, 1 }
  0xef   : > { %4992 = vmatprep.mubr.msk.bf16.mxu1 %vm5882_vm0, %v8104_v62  ;;  %5088 = vmatprep.mubr.msk.bf16.mxu0 %vm5882_vm0, %v8104_v62 }
  0xf0   : > { %v6561_v22 = vsel %vm1142_vm2, %v1172_v26, %v1174_v41  ;;  %v1178_v26 = vrot.slane %v6168_v36, 1 }
  0xf1   : > { %8112 = vst [vmem:[#allocation38_spill] sm:$0xff] %v6561_v22 }
  0xf6   : > { %4993 = vmatmul.mubr.bf16.gmra.mrb[100].mxu1 %v6080_v52  ;;  %5089 = vmatmul.mubr.bf16.gmra.mrb[100].mxu0 %v6551_v30  ;;  %v1176_v52 = vrot.slane %v6160_v34, 1 }
  0xf7   : > { %4996 = vmatprep.mubr.msk.bf16.mxu1 %vm5882_vm0, %v8104_v62  ;;  %5092 = vmatprep.mubr.msk.bf16.mxu0 %vm5882_vm0, %v8104_v62 }
  0xfe   : > { %4997 = vmatmul.mubr.bf16.gmra.mrb[104].mxu1 %v6116_v3  ;;  %5093 = vmatmul.mubr.bf16.gmra.mrb[104].mxu0 %v6561_v22  ;;  %v6577_v3 = vsel %vm1142_vm2, %v1174_v41, %v1176_v52  ;;  %v5809_v22 = vld [vmem:[%s8001_s1 + $0x140] sm:$0xff]  }
  0xff   : > { %5000 = vmatprep.mubr.msk.bf16.mxu1 %vm5882_vm0, %v8104_v62  ;;  %5096 = vmatprep.mubr.msk.bf16.mxu0 %vm5882_vm0, %v8104_v62  ;;  %8114 = vst [vmem:[#allocation40_spill] sm:$0xff] %v6577_v3 }
 0x101   : > { %v6570_v8 = vpop.f32.mrb[0].mxu0  ;;  %v6572_v25 = vpop.f32.mrb[0].mxu1 }
 0x102   : > { %8113 = vst [vmem:[#allocation39_spill] sm:$0xff] %v6572_v25  ;;  %v4834_v35 = vpop.f32.mrb[1].mxu0  ;;  %v4878_v46 = vpop.f32.mrb[1].mxu1 }
 0x103   : > { %v6574_v53 = vpop.f32.mrb[2].mxu0  ;;  %v6579_v29 = vpop.f32.mrb[2].mxu1 }
 0x104   : > { %8115 = vst [vmem:[#allocation41_spill] sm:$0xff] %v6579_v29  ;;  %v4835_v7 = vpop.f32.mrb[3].mxu0  ;;  %v4879_v11 = vpop.f32.mrb[3].mxu1 }
 0x106   : > { %5001 = vmatmul.mubr.bf16.gmra.mrb[108].mxu1 %v6160_v34  ;;  %5097 = vmatmul.mubr.bf16.gmra.mrb[108].mxu0 %v6577_v3  ;;  %v6595_v34 = vsel %vm1142_vm2, %v1176_v52, %v1178_v26 }
 0x107   : > { %5004 = vmatprep.mubr.msk.bf16.mxu1 %vm5882_vm0, %v8104_v62  ;;  %5100 = vmatprep.mubr.msk.bf16.mxu0 %vm5882_vm0, %v8104_v62  ;;  %8117 = vst [vmem:[#allocation43_spill] sm:$0xff] %v6595_v34 }
 0x109   : > { %v6588_v35 = vpop.f32.mrb[4].mxu0  ;;  %v6590_v41 = vpop.f32.mrb[4].mxu1 }
 0x10a   : > { %8116 = vst [vmem:[#allocation42_spill] sm:$0xff] %v6590_v41  ;;  %v4838_v46 = vpop.f32.mrb[5].mxu0  ;;  %v4882_v49 = vpop.f32.mrb[5].mxu1 }
 0x10b   : > { %v6592_v7 = vpop.f32.mrb[6].mxu0  ;;  %v6597_v11 = vpop.f32.mrb[6].mxu1  ;;  %v6606_v49 = vrot.slane %v6228_v16, 1 }
 0x10c   : > { %8118 = vst [vmem:[#allocation44_spill] sm:$0xff] %v6597_v11  ;;  %v4839_v29 = vpop.f32.mrb[7].mxu0  ;;  %v4883_v31 = vpop.f32.mrb[7].mxu1 }
 0x10d   : > { %8119 = vst [vmem:[#allocation45_spill] sm:$0xff] %v6606_v49 }
 0x10e   : > { %5005 = vmatmul.mubr.bf16.gmra.mrb[112].mxu1 %v6168_v36  ;;  %5101 = vmatmul.mubr.bf16.gmra.mrb[112].mxu0 %v6595_v34  ;;  %v6616_v36 = vsel %vm1142_vm2, %v1178_v26, %v6606_v49 }
 0x10f   : > { %5008 = vmatprep.mubr.msk.bf16.mxu1 %vm5882_vm0, %v8104_v62  ;;  %5104 = vmatprep.mubr.msk.bf16.mxu0 %vm5882_vm0, %v8104_v62  ;;  %8121 = vst [vmem:[#allocation47_spill] sm:$0xff] %v6616_v36 }
 0x111   : > { %v6608_v46 = vpop.f32.mrb[8].mxu0  ;;  %v6610_v52 = vpop.f32.mrb[8].mxu1 }
 0x112   : > { %8120 = vst [vmem:[#allocation46_spill] sm:$0xff] %v6610_v52  ;;  %v4842_v11 = vpop.f32.mrb[9].mxu0  ;;  %v4886_v29 = vpop.f32.mrb[9].mxu1 }
 0x113   : > { %v6612_v31 = vpop.f32.mrb[10].mxu0  ;;  %v6618_v41 = vpop.f32.mrb[10].mxu1  ;;  %v1182_v11 = vrot.slane %v6290_v58, 1 }
 0x114   : > { %8122 = vst [vmem:[#allocation48_spill] sm:$0xff] %v6618_v41  ;;  %v4843_v25 = vpop.f32.mrb[11].mxu0  ;;  %v4887_v34 = vpop.f32.mrb[11].mxu1 }
 0x116   : > { %5009 = vmatmul.mubr.bf16.gmra.mrb[116].mxu1 %v6228_v16  ;;  %5105 = vmatmul.mubr.bf16.gmra.mrb[116].mxu0 %v6616_v36  ;;  %v1183_v16 = vsel %vm1142_vm2, %v6606_v49, %v1182_v11 }
 0x117   : > { %5012 = vmatprep.mubr.msk.bf16.mxu1 %vm5882_vm0, %v8104_v62  ;;  %5108 = vmatprep.mubr.msk.bf16.mxu0 %vm5882_vm0, %v8104_v62 }
 0x119   : > { %v6627_v29 = vpop.f32.mrb[12].mxu0  ;;  %v6629_v26 = vpop.f32.mrb[12].mxu1 }
 0x11a   : > { %8123 = vst [vmem:[#allocation49_spill] sm:$0xff] %v6629_v26  ;;  %v4846_v52 = vpop.f32.mrb[13].mxu0  ;;  %v4890_v41 = vpop.f32.mrb[13].mxu1 }
 0x11b   : > { %v6631_v25 = vpop.f32.mrb[14].mxu0  ;;  %v6635_v34 = vpop.f32.mrb[14].mxu1 }
 0x11c   : > { %8124 = vst [vmem:[#allocation50_spill] sm:$0xff] %v6635_v34  ;;  %v4847_v36 = vpop.f32.mrb[15].mxu0  ;;  %v4891_v14 = vpop.f32.mrb[15].mxu1 }
 0x11d   : > { %v1834_v14 = vrot.slane %v6055_v43, 1 }
 0x11e   : > { %5013 = vmatmul.mubr.bf16.gmra.mrb[120].mxu1 %v6290_v58  ;;  %5109 = vmatmul.mubr.bf16.gmra.mrb[120].mxu0 %v1183_v16  ;;  %v1835_v58 = vrot.slane %v6013_v28, 2  ;;  %v8128_v28 = vor.u32 %v6447_v39, %v6451_v42  ;;  %v5813_v39 = vld [vmem:[%s8001_s1 + $0x150] sm:$0xff]   ;;  %v5812_v42 = vld [vmem:[%s8001_s1 + $0x188] sm:$0xff]  }
 0x11f   : > { %5112 = vmatprep.mubr.msk.bf16.mxu0 %vm5882_vm0, %v8104_v62  ;;  %5132 = vmatprep.mubr.msk.bf16.mxu1 %vm5882_vm0, %v8104_v62 }
 0x121   : > { %v6642_v52 = vpop.f32.mrb[16].mxu0  ;;  %v6644_v41 = vpop.f32.mrb[16].mxu1 }
 0x122   : > { %8125 = vst [vmem:[#allocation51_spill] sm:$0xff] %v6644_v41  ;;  %v4850_v26 = vpop.f32.mrb[17].mxu0  ;;  %v4894_v3 = vpop.f32.mrb[17].mxu1 }
 0x123   : > { %v6646_v49 = vpop.f32.mrb[18].mxu0  ;;  %v6648_v34 = vpop.f32.mrb[18].mxu1  ;;  %v1836_v3 = vor.u32 %v1835_v58, %v1834_v14  ;;  %v5811_v26 = vld [vmem:[%s8001_s1 + $0x148] sm:$0xff]   ;;  %v5810_v58 = vld [vmem:[%s8001_s1 + $0x180] sm:$0xff]  }
 0x124   : > { %8126 = vst [vmem:[#allocation52_spill] sm:$0xff] %v6648_v34  ;;  %v4851_v36 = vpop.f32.mrb[19].mxu0  ;;  %v4895_v16 = vpop.f32.mrb[19].mxu1  ;;  %v1838_v34 = vrot.slane %v6110_v0, 1  ;;  %v1843_v0 = vrot.slane %v6102_v60, 2 }
 0x126   : > { %5113 = vmatmul.mubr.bf16.gmra.mrb[124].mxu0 %v1182_v11  ;;  %5133 = vmatmul.mubr.bf16.vlgmr.msra.gmra.mrb[124].mxu1 %v6369_v1 }
 0x127   : > { %5136 = vmatprep.mubr.msk.bf16.mxu1 %vm5882_vm0, %v8104_v62  ;;  %5232 = vmatprep.mubr.msk.bf16.mxu0 %vm5882_vm0, %v8104_v62 }
 0x128   : > { %5317 = vmatpush3.bf16.msra.mxu1 %v5809_v22  ;;  %v1837_v22 = vsel %vm1830_vm3, %v8128_v28, %v1836_v3 }
 0x129   : > { %v6663_v36 = vpop.f32.mrb[20].mxu0  ;;  %v6665_v16 = vpop.f32.mrb[20].mxu1  ;;  %5318 = vmatprep.subr.bf16.mxu1 %v8104_v62 }
 0x12a   : > { %8127 = vst [vmem:[#allocation53_spill] sm:$0xff] %v6665_v16  ;;  %v4854_v1 = vpop.f32.mrb[21].mxu0  ;;  %v4898_v11 = vpop.f32.mrb[21].mxu1  ;;  %v1839_v16 = vrot.slane %v6063_v47, 2 }
 0x12b   : > { %v6668_v43 = vpop.f32.mrb[22].mxu0  ;;  %v6674_v14 = vpop.f32.mrb[22].mxu1 }
 0x12c   : > { %v4855_v41 = vpop.f32.mrb[23].mxu0  ;;  %v4899_v1 = vpop.f32.mrb[23].mxu1  ;;  %5319 = vmatpush3.bf16.msra.mxu1 %v5811_v26  ;;  %v1840_v28 = vor.u32 %v1839_v16, %v1838_v34 }
 0x12d   : > { %5320 = vmatprep.subr.bf16.mxu1 %v8104_v62  ;;  %v1842_v1 = vrot.slane %v6147_v24, 1 }
 0x12e   : > { %5137 = vmatmul.mubr.bf16.gmra.mrb[128].mxu1 %v6395_v50  ;;  %5233 = vmatmul.mubr.bf16.vlgmr.msra.gmra.mrb[128].mxu0 %v1837_v22  ;;  %v5815_v50 = vld [vmem:[%s8001_s1 + $0x158] sm:$0xff]   ;;  %v1841_v22 = vsel %vm1830_vm3, %v1836_v3, %v1840_v28  ;;  %v5817_v3 = vld [vmem:[%s8001_s1 + $0x160] sm:$0xff]  }
 0x12f   : > { %5417 = vmatpush3.bf16.msra.mxu0 %v5810_v58  ;;  %5140 = vmatprep.mubr.msk.bf16.mxu1 %vm5882_vm0, %v8104_v62 }
 0x130   : > { %5236 = vmatprep.mubr.msk.bf16.mxu0 %vm5882_vm0, %v8104_v62  ;;  %5418 = vmatprep.subr.bf16.mxu0 %v8104_v62 }
 0x131   : > { %v6694_v41 = vpop.f32.mrb[24].mxu0  ;;  %v6696_v26 = vpop.f32.mrb[24].mxu1  ;;  %5321 = vmatpush3.bf16.msra.mxu1 %v5813_v39 }
 0x132   : > { %8129 = vst [vmem:[#allocation54_spill] sm:$0xff] %v6696_v26  ;;  %v4858_v11 = vpop.f32.mrb[25].mxu0  ;;  %v4902_v34 = vpop.f32.mrb[25].mxu1  ;;  %5322 = vmatprep.subr.bf16.mxu1 %v8104_v62 }
 0x133   : > { %v6702_v16 = vpop.f32.mrb[26].mxu0  ;;  %v6705_v58 = vpop.f32.mrb[26].mxu1  ;;  %5419 = vmatpush3.bf16.msra.mxu0 %v5812_v42  ;;  %v5814_v11 = vld [vmem:[%s8001_s1 + $0x190] sm:$0xff]   ;;  %v278_v34 = vld [vmem:[%s5947_s29 + $0xa4] sm:$0xf]  ;;  %v5816_v42 = vld [vmem:[%s8001_s1 + $0x198] sm:$0xff]  }
 0x134   : > { %8130 = vst [vmem:[#allocation55_spill] sm:$0xff] %v6705_v58  ;;  %v4859_v39 = vpop.f32.mrb[27].mxu0  ;;  %v4903_v47 = vpop.f32.mrb[27].mxu1  ;;  %5420 = vmatprep.subr.bf16.mxu0 %v8104_v62 }
 0x135   : > { %5323 = vmatpush3.bf16.msra.mxu1 %v5815_v50  ;;  %v1844_v47 = vor.u32 %v1843_v0, %v1842_v1  ;;  %v6735_v0 = vcombine.low %v6270_v21, %v278_v34  ;;  %v5818_v21 = vld [vmem:[%s8001_s1 + $0x1a0] sm:$0xff]  }
 0x136   : > { %5141 = vmatmul.mubr.bf16.gmra.mrb[132].mxu1 %v6421_v6  ;;  %5237 = vmatmul.mubr.bf16.gmra.mrb[132].mxu0 %v1841_v22  ;;  %v5819_v6 = vld [vmem:[%s8001_s1 + $0x168] sm:$0xff]  }
 0x137   : > { %5144 = vmatprep.mubr.msk.bf16.mxu1 %vm5882_vm0, %v8104_v62  ;;  %5240 = vmatprep.mubr.msk.bf16.mxu0 %vm5882_vm0, %v8104_v62  ;;  %8132 = vst [vmem:[#allocation57_spill] sm:$0xff] %v6735_v0  ;;  %v1845_v24 = vsel %vm1830_vm3, %v1840_v28, %v1844_v47  ;;  %v8043_v34 = vshrl.u32 %v6735_v0, 16  ;;  %v5821_v28 = vld [vmem:[%s8001_s1 + $0x170] sm:$0xff]  }
 0x138   : > { %5421 = vmatpush3.bf16.msra.mxu0 %v5814_v11  ;;  %5324 = vmatprep.subr.bf16.mxu1 %v8104_v62 }
 0x139   : > { %v6726_v50 = vpop.f32.mrb[28].mxu0  ;;  %v6728_v39 = vpop.f32.mrb[28].mxu1  ;;  %5422 = vmatprep.subr.bf16.mxu0 %v8104_v62  ;;  %5325 = vmatpush3.bf16.msra.mxu1 %v5817_v3  ;;  %v1847_v3 = vrot.slane %v6125_v9, 2 }
 0x13a   : > { %8131 = vst [vmem:[#allocation56_spill] sm:$0xff] %v6728_v39  ;;  %v4862_v22 = vpop.f32.mrb[29].mxu0  ;;  %v4906_v1 = vpop.f32.mrb[29].mxu1  ;;  %5326 = vmatprep.subr.bf16.mxu1 %v8104_v62  ;;  %v1846_v39 = vrot.slane %v6177_v45, 1 }
 0x13b   : > { %v6738_v11 = vpop.f32.mrb[30].mxu0  ;;  %v6741_v60 = vpop.f32.mrb[30].mxu1  ;;  %v8042_v22 = vshll.u32 %v6735_v0, 16 }
 0x13c   : > { %v4863_v58 = vpop.f32.mrb[31].mxu0  ;;  %v4907_v26 = vpop.f32.mrb[31].mxu1  ;;  %5423 = vmatpush3.bf16.msra.mxu0 %v5816_v42  ;;  %v1848_v42 = vor.u32 %v1847_v3, %v1846_v39  ;;  %v5825_v39 = vld [vmem:[%s8001_s1 + $0x178] sm:$0xff]  }
 0x13d   : > { %5424 = vmatprep.subr.bf16.mxu0 %v8104_v62  ;;  %5327 = vmatpush3.bf16.msra.mxu1 %v5819_v6  ;;  %v3014_v26 = vrot.slane %v8043_v34, 2  ;;  %v3015_v58 = vrot.slane %v8042_v22, 3  ;;  %v5820_v6 = vld [vmem:[%s8001_s1 + $0x1a8] sm:$0xff]   ;;  %v1850_v34 = vrot.slane %v6240_v40, 1 }
 0x13e   : > { %5145 = vmatmul.mubr.bf16.gmra.mrb[136].mxu1 %v6440_v51  ;;  %5241 = vmatmul.mubr.bf16.gmra.mrb[136].mxu0 %v1845_v24 }
 0x13f   : > { %5148 = vmatprep.mubr.msk.bf16.mxu1 %vm5882_vm0, %v8104_v62  ;;  %5244 = vmatprep.mubr.msk.bf16.mxu0 %vm5882_vm0, %v8104_v62  ;;  %v6767_v24 = vor.u32 %v3015_v58, %v3014_v26  ;;  %v1849_v26 = vsel %vm1830_vm3, %v1844_v47, %v1848_v42 }
 0x140   : > { %5425 = vmatpush3.bf16.msra.mxu0 %v5818_v21  ;;  %5328 = vmatprep.subr.bf16.mxu1 %v8104_v62 }
 0x141   : > { %8133 = vst [vmem:[#allocation58_spill] sm:$0xff] %v6767_v24  ;;  %v6769_v51 = vpop.f32.mrb[32].mxu0  ;;  %v6771_v1 = vpop.f32.mrb[32].mxu1  ;;  %5426 = vmatprep.subr.bf16.mxu0 %v8104_v62  ;;  %5329 = vmatpush3.bf16.msra.mxu1 %v5821_v28  ;;  %v1851_v24 = vrot.slane %v6199_v57, 2 }
 0x142   : > { %v4866_v3 = vpop.f32.mrb[33].mxu0  ;;  %v4910_v21 = vpop.f32.mrb[33].mxu1  ;;  %5330 = vmatprep.subr.bf16.mxu1 %v8104_v62 }
 0x143   : > { %v6778_v22 = vpop.f32.mrb[34].mxu0  ;;  %v6781_v58 = vpop.f32.mrb[34].mxu1  ;;  %v5822_v3 = vld [vmem:[%s8001_s1 + $0x1b0] sm:$0xff]   ;;  %v1852_v47 = vor.u32 %v1851_v24, %v1850_v34  ;;  %v1854_v24 = vrot.slane %v6249_v54, 1 }
 0x144   : > { %v4867_v45 = vpop.f32.mrb[35].mxu0  ;;  %v4911_v28 = vpop.f32.mrb[35].mxu1  ;;  %5427 = vmatpush3.bf16.msra.mxu0 %v5820_v6 }
 0x145   : > { %5428 = vmatprep.subr.bf16.mxu0 %v8104_v62  ;;  %5331 = vmatpush3.bf16.msra.mxu1 %v5825_v39  ;;  %v5826_v45 = vld [vmem:[%s8001_s1 + $0x1b8] sm:$0xff]   ;;  %v1853_v28 = vsel %vm1830_vm3, %v1848_v42, %v1852_v47 }
 0x146   : > { %5149 = vmatmul.mubr.bf16.gmra.mrb[140].mxu1 %v6459_v59  ;;  %5245 = vmatmul.mubr.bf16.gmra.mrb[140].mxu0 %v1849_v26 }
 0x147   : > { %5152 = vmatprep.mubr.msk.bf16.mxu1 %vm5882_vm0, %v8104_v62  ;;  %5248 = vmatprep.mubr.msk.bf16.mxu0 %vm5882_vm0, %v8104_v62 }
 0x148   : > { %5429 = vmatpush3.bf16.msra.mxu0 %v5822_v3  ;;  %5516 = vmatprep.subr.bf16.mxu1 %v8104_v62  ;;  %v1855_v3 = vrot.slane %v6210_v63, 2  ;;  %v1859_v63 = vrot.slane %v6225_v13, 2 }
 0x149   : > { %v6798_v6 = vpop.f32.mrb[36].mxu0  ;;  %v6800_v39 = vpop.f32.mrb[36].mxu1  ;;  %5430 = vmatprep.subr.bf16.mxu0 %v8104_v62 }
 0x14a   : > { %8134 = vst [vmem:[#allocation59_spill] sm:$0xff] %v6800_v39  ;;  %v4870_v59 = vpop.f32.mrb[37].mxu0  ;;  %v4914_v21 = vpop.f32.mrb[37].mxu1  ;;  %v1856_v42 = vor.u32 %v1855_v3, %v1854_v24 }
 0x14b   : > { %v6803_v26 = vpop.f32.mrb[38].mxu0  ;;  %v853_v34 = vpop.f32.mrb[38].mxu1 }
 0x14c   : > { %v4871_v40 = vpop.f32.mrb[39].mxu0  ;;  %v4915_v57 = vpop.f32.mrb[39].mxu1  ;;  %5431 = vmatpush3.bf16.msra.mxu0 %v5826_v45 }
 0x14d   : > { %5616 = vmatprep.subr.bf16.mxu0 %v8104_v62 }
 0x14e   : > { %5153 = vmatmul.mubr.bf16.gmra.mrb[144].mxu1 %v6471_v4  ;;  %5249 = vmatmul.mubr.bf16.gmra.mrb[144].mxu0 %v1853_v28  ;;  %v1857_v4 = vsel %vm1830_vm3, %v1852_v47, %v1856_v42  ;;  %v1858_v28 = vrot.slane %v6277_v61, 1 }
 0x14f   : > { %5156 = vmatprep.mubr.msk.bf16.mxu1 %vm5882_vm0, %v8104_v62  ;;  %5252 = vmatprep.mubr.msk.bf16.mxu0 %vm5882_vm0, %v8104_v62 }
 0x151   : > { %v6814_v59 = vpop.f32.mrb[40].mxu0  ;;  %v959_v21 = vpop.f32.mrb[40].mxu1 }
 0x152   : > { %v960_v34 = vadd.f32 %v959_v21, %v6570_v8  ;;  %v4874_v40 = vpop.f32.mrb[41].mxu0  ;;  %v4934_v57 = vpop.f32.mrb[41].mxu1  ;;  %v1860_v8 = vor.u32 %v1859_v63, %v1858_v28 }
 0x153   : > { %v6817_v45 = vpop.f32.mrb[42].mxu0  ;;  %v962_v54 = vpop.f32.mrb[42].mxu1 }
 0x154   : > { %v963_v9 = vadd.f32 %v962_v54, %v6574_v53  ;;  %v4875_v39 = vpop.f32.mrb[43].mxu0  ;;  %v4935_v24 = vpop.f32.mrb[43].mxu1 }
 0x155   : > { %v1862_v39 = vrot.slane %v6316_v23, 1 }
 0x156   : > { %5157 = vmatmul.mubr.bf16.gmra.mrb[148].mxu1 %v6481_v20  ;;  %5253 = vmatmul.mubr.bf16.gmra.mrb[148].mxu0 %v1857_v4  ;;  %v1861_v20 = vsel %vm1830_vm3, %v1856_v42, %v1860_v8  ;;  %v1863_v4 = vrot.slane %v6295_v10, 2 }
 0x157   : > { %5160 = vmatprep.mubr.msk.bf16.mxu1 %vm5882_vm0, %v8104_v62  ;;  %5256 = vmatprep.mubr.msk.bf16.mxu0 %vm5882_vm0, %v8104_v62 }
 0x159   : > { %v967_v3 = vpop.f32.mrb[44].mxu1  ;;  %v1287_v47 = vpop.f32.mrb[44].mxu0 }
 0x15a   : > { %v968_v21 = vadd.f32 %v967_v3, %v6588_v35  ;;  %v4938_v40 = vpop.f32.mrb[45].mxu1  ;;  %v5034_v57 = vpop.f32.mrb[45].mxu0  ;;  %v6829_v61 = vadd.f32 %v1287_v47, %v960_v34  ;;  %v1864_v35 = vor.u32 %v1863_v4, %v1862_v39 }
 0x15b   : > { %v970_v54 = vpop.f32.mrb[46].mxu1  ;;  %v1290_v53 = vpop.f32.mrb[46].mxu0  ;;  %v1866_v57 = vrot.slane %v6195_v55, 1 }
 0x15c   : > { %v971_v24 = vadd.f32 %v970_v54, %v6592_v7  ;;  %v5035_v13 = vpop.f32.mrb[47].mxu0  ;;  %v4939_v63 = vpop.f32.mrb[47].mxu1  ;;  %v6835_v28 = vadd.f32 %v1290_v53, %v963_v9  ;;  %v1867_v54 = vrot.slane %v6171_v38, 2 }
 0x15e   : > { %5161 = vmatmul.mubr.bf16.gmra.mrb[152].mxu1 %v6491_v15  ;;  %5257 = vmatmul.mubr.bf16.gmra.mrb[152].mxu0 %v1861_v20  ;;  %v1865_v15 = vsel %vm1830_vm3, %v1860_v8, %v1864_v35 }
 0x15f   : > { %5164 = vmatprep.mubr.msk.bf16.mxu1 %vm5882_vm0, %v8104_v62  ;;  %5260 = vmatprep.mubr.msk.bf16.mxu0 %vm5882_vm0, %v8104_v62 }
 0x161   : > { %v975_v42 = vpop.f32.mrb[48].mxu1  ;;  %v1295_v34 = vpop.f32.mrb[48].mxu0 }
 0x162   : > { %v976_v3 = vadd.f32 %v975_v42, %v6608_v46  ;;  %v4942_v47 = vpop.f32.mrb[49].mxu1  ;;  %v5038_v7 = vpop.f32.mrb[49].mxu0  ;;  %v6843_v13 = vadd.f32 %v1295_v34, %v968_v21  ;;  %v1868_v46 = vor.u32 %v1867_v54, %v1866_v57 }
 0x163   : > { %v978_v9 = vpop.f32.mrb[50].mxu1  ;;  %v1298_v40 = vpop.f32.mrb[50].mxu0  ;;  %v1870_v7 = vrot.slane %v5987_v18, 1 }
 0x164   : > { %v979_v53 = vadd.f32 %v978_v9, %v6612_v31  ;;  %v5039_v20 = vpop.f32.mrb[51].mxu0  ;;  %v4943_v39 = vpop.f32.mrb[51].mxu1  ;;  %v6849_v4 = vadd.f32 %v1298_v40, %v971_v24  ;;  %v1871_v9 = vrot.slane %v5976_v12, 2 }
 0x166   : > { %5165 = vmatmul.mubr.bf16.gmra.mrb[156].mxu1 %v6501_v37  ;;  %5261 = vmatmul.mubr.bf16.gmra.mrb[156].mxu0 %v1865_v15  ;;  %v1869_v37 = vsel %vm1830_vm3, %v1864_v35, %v1868_v46 }
 0x167   : > { %5168 = vmatprep.mubr.msk.bf16.mxu1 %vm5882_vm0, %v8104_v62  ;;  %5264 = vmatprep.mubr.msk.bf16.mxu0 %vm5882_vm0, %v8104_v62 }
 0x169   : > { %v983_v8 = vpop.f32.mrb[52].mxu1  ;;  %v1303_v21 = vpop.f32.mrb[52].mxu0 }
 0x16a   : > { %v984_v63 = vadd.f32 %v983_v8, %v6627_v29  ;;  %v4946_v42 = vpop.f32.mrb[53].mxu1  ;;  %v5042_v31 = vpop.f32.mrb[53].mxu0  ;;  %v6857_v34 = vadd.f32 %v1303_v21, %v976_v3  ;;  %v1872_v29 = vor.u32 %v1871_v9, %v1870_v7 }
 0x16b   : > { %v986_v24 = vpop.f32.mrb[54].mxu1  ;;  %v1306_v47 = vpop.f32.mrb[54].mxu0  ;;  %v1874_v42 = vrot.slane %v6021_v32, 1  ;;  %v1875_v31 = vrot.slane %v5990_v19, 2 }
 0x16c   : > { %v987_v40 = vadd.f32 %v986_v24, %v6631_v25  ;;  %v5043_v15 = vpop.f32.mrb[55].mxu0  ;;  %v4947_v57 = vpop.f32.mrb[55].mxu1  ;;  %v6863_v54 = vadd.f32 %v1306_v47, %v979_v53 }
 0x16e   : > { %5169 = vmatmul.mubr.bf16.gmra.mrb[160].mxu1 %v6511_v17  ;;  %5265 = vmatmul.mubr.bf16.gmra.mrb[160].mxu0 %v1869_v37  ;;  %v1873_v17 = vsel %vm1830_vm3, %v1868_v46, %v1872_v29 }
 0x16f   : > { %5172 = vmatprep.mubr.msk.bf16.mxu1 %vm5882_vm0, %v8104_v62  ;;  %5268 = vmatprep.mubr.msk.bf16.mxu0 %vm5882_vm0, %v8104_v62 }
 0x171   : > { %v991_v35 = vpop.f32.mrb[56].mxu1  ;;  %v1311_v3 = vpop.f32.mrb[56].mxu0 }
 0x172   : > { %v992_v20 = vadd.f32 %v991_v35, %v6642_v52  ;;  %v4950_v39 = vpop.f32.mrb[57].mxu1  ;;  %v5046_v25 = vpop.f32.mrb[57].mxu0  ;;  %v6871_v8 = vadd.f32 %v1311_v3, %v984_v63  ;;  %v1876_v52 = vor.u32 %v1875_v31, %v1874_v42  ;;  %v1878_v3 = vrot.slane %v6058_v44, 1 }
 0x173   : > { %v994_v53 = vpop.f32.mrb[58].mxu1  ;;  %v1314_v21 = vpop.f32.mrb[58].mxu0  ;;  %v1879_v39 = vrot.slane %v6024_v33, 2 }
 0x174   : > { %v995_v24 = vadd.f32 %v994_v53, %v6646_v49  ;;  %v5047_v47 = vpop.f32.mrb[59].mxu0  ;;  %v4951_v37 = vpop.f32.mrb[59].mxu1  ;;  %v6877_v7 = vadd.f32 %v1314_v21, %v987_v40 }
 0x176   : > { %5173 = vmatmul.mubr.bf16.gmra.mrb[164].mxu1 %v6521_v5  ;;  %5269 = vmatmul.mubr.bf16.gmra.mrb[164].mxu0 %v1873_v17  ;;  %v1877_v5 = vsel %vm1830_vm3, %v1872_v29, %v1876_v52 }
 0x177   : > { %5176 = vmatprep.mubr.msk.bf16.mxu1 %vm5882_vm0, %v8104_v62  ;;  %5272 = vmatprep.mubr.msk.bf16.mxu0 %vm5882_vm0, %v8104_v62 }
 0x179   : > { %v999_v46 = vpop.f32.mrb[60].mxu1  ;;  %v1319_v63 = vpop.f32.mrb[60].mxu0 }
 0x17a   : > { %v1000_v9 = vadd.f32 %v999_v46, %v6663_v36  ;;  %v4954_v15 = vpop.f32.mrb[61].mxu1  ;;  %v5050_v49 = vpop.f32.mrb[61].mxu0  ;;  %v6885_v57 = vadd.f32 %v1319_v63, %v992_v20  ;;  %v1880_v36 = vor.u32 %v1879_v39, %v1878_v3  ;;  %v1882_v46 = vrot.slane %v6113_v2, 1 }
 0x17b   : > { %v1002_v40 = vpop.f32.mrb[62].mxu1  ;;  %v1322_v35 = vpop.f32.mrb[62].mxu0  ;;  %v1883_v63 = vrot.slane %v6066_v48, 2 }
 0x17c   : > { %v1003_v25 = vadd.f32 %v1002_v40, %v6668_v43  ;;  %v5051_v53 = vpop.f32.mrb[63].mxu0  ;;  %v4955_v21 = vpop.f32.mrb[63].mxu1  ;;  %v6891_v17 = vadd.f32 %v1322_v35, %v995_v24 }
 0x17d   : > { %v8135_v21 = vld [vmem:[#allocation19_spill] sm:$0xff] }
 0x17e   : > { %5177 = vmatmul.mubr.bf16.gmra.mrb[168].mxu1 %v6531_v56  ;;  %5273 = vmatmul.mubr.bf16.gmra.mrb[168].mxu0 %v1877_v5  ;;  %v1881_v56 = vsel %vm1830_vm3, %v1876_v52, %v1880_v36 }
 0x17f   : > { %5180 = vmatprep.mubr.msk.bf16.mxu1 %vm5882_vm0, %v8104_v62  ;;  %5276 = vmatprep.mubr.msk.bf16.mxu0 %vm5882_vm0, %v8104_v62 }
 0x181   : > { %v1007_v29 = vpop.f32.mrb[64].mxu1  ;;  %v1327_v20 = vpop.f32.mrb[64].mxu0 }
 0x182   : > { %v1008_v42 = vadd.f32 %v1007_v29, %v6694_v41  ;;  %v4958_v31 = vpop.f32.mrb[65].mxu1  ;;  %v5054_v43 = vpop.f32.mrb[65].mxu0  ;;  %v6899_v47 = vadd.f32 %v1327_v20, %v1000_v9  ;;  %v1884_v41 = vor.u32 %v1883_v63, %v1882_v46  ;;  %v1886_v29 = vrot.slane %v8135_v21, 1  ;;  %v8136_v20 = vld [vmem:[#allocation13_spill] sm:$0xff] }
 0x183   : > { %v1010_v24 = vpop.f32.mrb[66].mxu1  ;;  %v1330_v37 = vpop.f32.mrb[66].mxu0  ;;  %v1887_v31 = vrot.slane %v8136_v20, 2 }
 0x184   : > { %v1011_v15 = vadd.f32 %v1010_v24, %v6702_v16  ;;  %v5055_v49 = vpop.f32.mrb[67].mxu0  ;;  %v4959_v40 = vpop.f32.mrb[67].mxu1  ;;  %v6905_v35 = vadd.f32 %v1330_v37, %v1003_v25 }
 0x186   : > { %5181 = vmatmul.mubr.bf16.gmra.mrb[172].mxu1 %v6541_v27  ;;  %5277 = vmatmul.mubr.bf16.gmra.mrb[172].mxu0 %v1881_v56  ;;  %v1885_v27 = vsel %vm1830_vm3, %v1880_v36, %v1884_v41 }
 0x187   : > { %5184 = vmatprep.mubr.msk.bf16.mxu1 %vm5882_vm0, %v8104_v62  ;;  %5280 = vmatprep.mubr.msk.bf16.mxu0 %vm5882_vm0, %v8104_v62 }
 0x189   : > { %v1015_v52 = vpop.f32.mrb[68].mxu1  ;;  %v1335_v9 = vpop.f32.mrb[68].mxu0 }
 0x18a   : > { %v1016_v5 = vadd.f32 %v1015_v52, %v6726_v50  ;;  %v4962_v3 = vpop.f32.mrb[69].mxu1  ;;  %v5058_v16 = vpop.f32.mrb[69].mxu0  ;;  %v6913_v39 = vadd.f32 %v1335_v9, %v1008_v42  ;;  %v1888_v50 = vor.u32 %v1887_v31, %v1886_v29  ;;  %v8137_v52 = vld [vmem:[#allocation22_spill] sm:$0xff] }
 0x18b   : > { %v1018_v25 = vpop.f32.mrb[70].mxu1  ;;  %v1338_v53 = vpop.f32.mrb[70].mxu0  ;;  %v1890_v9 = vrot.slane %v8137_v52, 1  ;;  %v8138_v3 = vld [vmem:[#allocation17_spill] sm:$0xff]  ;;  %v8139_v31 = vld [vmem:[#allocation38_spill] sm:$0xff] }
 0x18c   : > { %v1019_v43 = vadd.f32 %v1018_v25, %v6738_v11  ;;  %v5059_v24 = vpop.f32.mrb[71].mxu0  ;;  %v4963_v37 = vpop.f32.mrb[71].mxu1  ;;  %v6919_v56 = vadd.f32 %v1338_v53, %v1011_v15  ;;  %v1891_v16 = vrot.slane %v8138_v3, 2 }
 0x18e   : > { %5185 = vmatmul.mubr.bf16.gmra.mrb[176].mxu1 %v6551_v30  ;;  %5281 = vmatmul.mubr.bf16.gmra.mrb[176].mxu0 %v1885_v27  ;;  %v1889_v30 = vsel %vm1830_vm3, %v1884_v41, %v1888_v50 }
 0x18f   : > { %5188 = vmatprep.mubr.msk.bf16.mxu1 %vm5882_vm0, %v8104_v62  ;;  %5284 = vmatprep.mubr.msk.bf16.mxu0 %vm5882_vm0, %v8104_v62 }
 0x191   : > { %v1023_v36 = vpop.f32.mrb[72].mxu1  ;;  %v1343_v42 = vpop.f32.mrb[72].mxu0 }
 0x192   : > { %v1024_v46 = vadd.f32 %v1023_v36, %v6769_v51  ;;  %v4966_v63 = vpop.f32.mrb[73].mxu1  ;;  %v5062_v11 = vpop.f32.mrb[73].mxu0  ;;  %v6927_v49 = vadd.f32 %v1343_v42, %v1016_v5  ;;  %v1892_v51 = vor.u32 %v1891_v16, %v1890_v9 }
 0x193   : > { %v1026_v15 = vpop.f32.mrb[74].mxu1  ;;  %v1346_v40 = vpop.f32.mrb[74].mxu0  ;;  %v8140_v11 = vld [vmem:[#allocation30_spill] sm:$0xff] }
 0x194   : > { %v1027_v25 = vadd.f32 %v1026_v15, %v6778_v22  ;;  %v5063_v53 = vpop.f32.mrb[75].mxu0  ;;  %v4967_v27 = vpop.f32.mrb[75].mxu1  ;;  %v6933_v29 = vadd.f32 %v1346_v40, %v1019_v43  ;;  %v1893_v63 = vsel %vm1830_vm3, %v1888_v50, %v1892_v51  ;;  %v1894_v15 = vrot.slane %v8140_v11, 1  ;;  %v8141_v40 = vld [vmem:[#allocation25_spill] sm:$0xff] }
 0x196   : > { %5189 = vmatmul.mubr.bf16.gmra.mrb[180].mxu1 %v8139_v31  ;;  %5285 = vmatmul.mubr.bf16.gmra.mrb[180].mxu0 %v1889_v30  ;;  %v1895_v30 = vrot.slane %v8141_v40, 2  ;;  %v8142_v31 = vld [vmem:[#allocation40_spill] sm:$0xff]  ;;  %v8145_v40 = vld [vmem:[#allocation43_spill] sm:$0xff] }
 0x197   : > { %5192 = vmatprep.mubr.msk.bf16.mxu1 %vm5882_vm0, %v8104_v62  ;;  %5288 = vmatprep.mubr.msk.bf16.mxu0 %vm5882_vm0, %v8104_v62 }
 0x199   : > { %v1031_v41 = vpop.f32.mrb[76].mxu1  ;;  %v1351_v5 = vpop.f32.mrb[76].mxu0 }
 0x19a   : > { %v1032_v24 = vadd.f32 %v1031_v41, %v6798_v6  ;;  %v4970_v37 = vpop.f32.mrb[77].mxu1  ;;  %v5066_v22 = vpop.f32.mrb[77].mxu0  ;;  %v6941_v36 = vadd.f32 %v1351_v5, %v1024_v46  ;;  %v1896_v6 = vor.u32 %v1895_v30, %v1894_v15 }
 0x19b   : > { %v1034_v43 = vpop.f32.mrb[78].mxu1  ;;  %v1354_v42 = vpop.f32.mrb[78].mxu0 }
 0x19c   : > { %v1035_v53 = vadd.f32 %v1034_v43, %v6803_v26  ;;  %v5067_v27 = vpop.f32.mrb[79].mxu0  ;;  %v4971_v9 = vpop.f32.mrb[79].mxu1  ;;  %v6947_v16 = vadd.f32 %v1354_v42, %v1027_v25  ;;  %v1897_v43 = vsel %vm1830_vm3, %v1892_v51, %v1896_v6  ;;  %v8143_v42 = vld [vmem:[#allocation32_spill] sm:$0xff] }
 0x19d   : > { %v8144_v27 = vld [vmem:[#allocation27_spill] sm:$0xff] }
 0x19e   : > { %5193 = vmatmul.mubr.bf16.gmra.mrb[184].mxu1 %v8142_v31  ;;  %5289 = vmatmul.mubr.bf16.gmra.mrb[184].mxu0 %v1893_v63  ;;  %v1898_v63 = vrot.slane %v8143_v42, 1  ;;  %v1899_v9 = vrot.slane %v8144_v27, 2  ;;  %v8149_v42 = vld [vmem:[#allocation41_spill] sm:$0xff] }
 0x19f   : > { %5196 = vmatprep.mubr.msk.bf16.mxu1 %vm5882_vm0, %v8104_v62  ;;  %5292 = vmatprep.mubr.msk.bf16.mxu0 %vm5882_vm0, %v8104_v62 }
 0x1a1   : > { %v1039_v50 = vpop.f32.mrb[80].mxu1  ;;  %v1359_v46 = vpop.f32.mrb[80].mxu0 }
 0x1a2   : > { %v1040_v41 = vadd.f32 %v1039_v50, %v6814_v59  ;;  %v4974_v5 = vpop.f32.mrb[81].mxu1  ;;  %v5070_v26 = vpop.f32.mrb[81].mxu0  ;;  %v6955_v37 = vadd.f32 %v1359_v46, %v1032_v24  ;;  %v1900_v59 = vor.u32 %v1899_v9, %v1898_v63  ;;  %v8146_v50 = vld [vmem:[#allocation39_spill] sm:$0xff] }
 0x1a3   : > { %v1042_v25 = vpop.f32.mrb[82].mxu1  ;;  %v1362_v22 = vpop.f32.mrb[82].mxu0 }
 0x1a4   : > { %v1043_v31 = vadd.f32 %v1042_v25, %v6817_v45  ;;  %v5071_v11 = vpop.f32.mrb[83].mxu0  ;;  %v4975_v15 = vpop.f32.mrb[83].mxu1  ;;  %v6961_v30 = vadd.f32 %v1362_v22, %v1035_v53  ;;  %v8147_v25 = vld [vmem:[#allocation35_spill] sm:$0xff] }
 0x1a5   : > { %v1902_v22 = vrot.slane %v8147_v25, 1 }
 0x1a6   : > { %5197 = vmatmul.mubr.bf16.gmra.mrb[188].mxu1 %v8145_v40  ;;  %5293 = vmatmul.mubr.bf16.gmra.mrb[188].mxu0 %v1897_v43  ;;  %v1901_v40 = vsel %vm1830_vm3, %v1896_v6, %v1900_v59  ;;  %v8148_v43 = vld [vmem:[#allocation33_spill] sm:$0xff] }
 0x1a7   : > { %5200 = vmatprep.mubr.msk.bf16.mxu1 %vm5882_vm0, %v8104_v62  ;;  %5296 = vmatprep.mubr.msk.bf16.mxu0 %vm5882_vm0, %v8104_v62  ;;  %v1903_v15 = vrot.slane %v8148_v43, 2 }
 0x1a9   : > { %v1047_v51 = vpop.f32.mrb[84].mxu1  ;;  %v1367_v24 = vpop.f32.mrb[84].mxu0  ;;  %v1904_v6 = vor.u32 %v1903_v15, %v1902_v22  ;;  %v8153_v15 = vshrl.u32 %v6735_v0, 16 }
 0x1aa   : > { %v1048_v46 = vadd.f32 %v1047_v51, %v8146_v50  ;;  %v4978_v5 = vpop.f32.mrb[85].mxu1  ;;  %v5074_v45 = vpop.f32.mrb[85].mxu0  ;;  %v6969_v11 = vadd.f32 %v1367_v24, %v1040_v41  ;;  %v8150_v51 = vld [vmem:[#allocation47_spill] sm:$0xff]  ;;  %v1517_v41 = vrot.slane %v6735_v0, 1 }
 0x1ab   : > { %v1050_v53 = vpop.f32.mrb[86].mxu1  ;;  %v1370_v26 = vpop.f32.mrb[86].mxu0  ;;  %v6984_v24 = vld [vmem:[%s5947_s29 + $0xa8] sm:$0xf]  ;;  %v8151_v5 = vld [vmem:[#allocation42_spill] sm:$0xff]  ;;  %v1905_v25 = vsel %vm1830_vm3, %v1900_v59, %v1904_v6  ;;  %v1909_v43 = vrot.slane %v8153_v15, 1 }
 0x1ac   : > { %v1051_v27 = vadd.f32 %v1050_v53, %v8149_v42  ;;  %v5075_v63 = vpop.f32.mrb[87].mxu0  ;;  %v4979_v9 = vpop.f32.mrb[87].mxu1  ;;  %v6975_v52 = vadd.f32 %v1370_v26, %v1043_v31  ;;  %v8152_v26 = vld [vmem:[#allocation45_spill] sm:$0xff]  ;;  %v6994_v22 = vcombine.low %v6984_v24, %v6984_v24 }
 0x1ae   : > { %5201 = vmatmul.mubr.bf16.gmra.mrb[192].mxu1 %v8150_v51  ;;  %5297 = vmatmul.mubr.bf16.gmra.mrb[192].mxu0 %v1901_v40  ;;  %v1518_v40 = vsel %vm1142_vm2, %v8152_v26, %v1517_v41  ;;  %v1519_v59 = vrot.slane %v6994_v22, 1  ;;  %v1916_v15 = vshrl.u32 %v6994_v22, 16 }
 0x1af   : > { %5204 = vmatprep.mubr.msk.bf16.mxu1 %vm5882_vm0, %v8104_v62  ;;  %5300 = vmatprep.mubr.msk.bf16.mxu0 %vm5882_vm0, %v8104_v62 }
 0x1b0   : > { %v1520_v20 = vsel %vm1142_vm2, %v1517_v41, %v1519_v59  ;;  %v1918_v48 = vrot.slane %v1916_v15, 1 }
 0x1b1   : > { %v1055_v50 = vpop.f32.mrb[88].mxu1  ;;  %v1375_v42 = vpop.f32.mrb[88].mxu0 }
 0x1b2   : > { %v1056_v45 = vadd.f32 %v1055_v50, %v8151_v5  ;;  %v4982_v31 = vpop.f32.mrb[89].mxu1  ;;  %v5078_v53 = vpop.f32.mrb[89].mxu0  ;;  %v6989_v63 = vadd.f32 %v1375_v42, %v1048_v46  ;;  %v8154_v50 = vshll.u32 %v6735_v0, 16 }
 0x1b3   : > { %v1058_v9 = vpop.f32.mrb[90].mxu1  ;;  %v1378_v51 = vpop.f32.mrb[90].mxu0  ;;  %v8155_v31 = vld [vmem:[#allocation44_spill] sm:$0xff] }
 0x1b4   : > { %v1912_v5 = vrot.slane %v8154_v50, 2  ;;  %v1059_v53 = vadd.f32 %v1058_v9, %v8155_v31  ;;  %v5079_v3 = vpop.f32.mrb[91].mxu0  ;;  %v4983_v26 = vpop.f32.mrb[91].mxu1  ;;  %v7001_v46 = vadd.f32 %v1378_v51, %v1051_v27  ;;  %v1919_v50 = vshll.u32 %v6994_v22, 16  ;;  %v8156_v31 = vld [vmem:[#allocation46_spill] sm:$0xff] }
 0x1b6   : > { %5205 = vmatmul.mubr.bf16.gmra.mrb[196].mxu1 %v1518_v40  ;;  %5301 = vmatmul.mubr.bf16.gmra.mrb[196].mxu0 %v1905_v25  ;;  %v1913_v42 = vor.u32 %v1912_v5, %v1909_v43  ;;  %v1921_v43 = vrot.slane %v1919_v50, 2  ;;  %v8157_v5 = vld [vmem:[#allocation48_spill] sm:$0xff] }
 0x1b7   : > { %5208 = vmatprep.mubr.msk.bf16.mxu1 %vm5882_vm0, %v8104_v62  ;;  %5304 = vmatprep.mubr.msk.bf16.mxu0 %vm5882_vm0, %v8104_v62 }
 0x1b8   : > { %v1914_v2 = vsel %vm1830_vm3, %v1904_v6, %v1913_v42  ;;  %v8158_v6 = vld [vmem:[#allocation49_spill] sm:$0xff] }
 0x1b9   : > { %v1063_v9 = vpop.f32.mrb[92].mxu1  ;;  %v1383_v3 = vpop.f32.mrb[92].mxu0 }
 0x1ba   : > { %v1064_v27 = vadd.f32 %v1063_v9, %v8156_v31  ;;  %v4986_v51 = vpop.f32.mrb[93].mxu1  ;;  %v5082_v40 = vpop.f32.mrb[93].mxu0  ;;  %v7011_v25 = vadd.f32 %v1383_v3, %v1056_v45  ;;  %v1922_v45 = vor.u32 %v1921_v43, %v1918_v48  ;;  %v5845_v48 = vld [vmem:[%s5947_s29 + $0x8] sm:$0xff]  }
 0x1bb   : > { %v1066_v26 = vpop.f32.mrb[94].mxu1  ;;  %v1386_v21 = vpop.f32.mrb[94].mxu0 }
 0x1bc   : > { %v1067_v44 = vadd.f32 %v1066_v26, %v8157_v5  ;;  %v5083_v33 = vpop.f32.mrb[95].mxu0  ;;  %v4987_v32 = vpop.f32.mrb[95].mxu1  ;;  %v7016_v19 = vadd.f32 %v1386_v21, %v1059_v53  ;;  %v8159_v53 = vld [vmem:[#allocation50_spill] sm:$0xff]  ;;  %v7035_v26 = vld [vmem:[%s5947_s29 + $0x10] sm:$0xff]  }
 0x1be   : > { %5209 = vmatmul.mubr.bf16.gmra.mrb[200].mxu1 %v1520_v20  ;;  %5305 = vmatmul.mubr.bf16.gmra.mrb[200].mxu0 %v1914_v2  ;;  %v1923_v2 = vsel %vm1830_vm3, %v1913_v42, %v1922_v45  ;;  %v2253_v42 = vrot.slane %v7035_v26, 2 }
 0x1bf   : > { %5212 = vmatprep.mubr.msk.bf16.mxu1 %vm5882_vm0, %v8104_v62  ;;  %5308 = vmatprep.mubr.msk.bf16.mxu0 %vm5882_vm0, %v8104_v62 }
 0x1c1   : > { %v1071_v41 = vpop.f32.mrb[96].mxu1  ;;  %v1391_v9 = vpop.f32.mrb[96].mxu0 }
 0x1c2   : > { %v1072_v15 = vadd.f32 %v1071_v41, %v8158_v6  ;;  %v4990_v50 = vpop.f32.mrb[97].mxu1  ;;  %v5086_v33 = vpop.f32.mrb[97].mxu0  ;;  %v7023_v32 = vadd.f32 %v1391_v9, %v1064_v27  ;;  %v2252_v27 = vrot.slane %v5845_v48, 2  ;;  %v8160_v41 = vld [vmem:[#allocation51_spill] sm:$0xff] }
 0x1c3   : > { %v1074_v21 = vpop.f32.mrb[98].mxu1  ;;  %v1394_v20 = vpop.f32.mrb[98].mxu0 }
 0x1c4   : > { %v1075_v3 = vadd.f32 %v1074_v21, %v8159_v53  ;;  %v5087_v31 = vpop.f32.mrb[99].mxu0  ;;  %v4991_v51 = vpop.f32.mrb[99].mxu1  ;;  %v7027_v40 = vadd.f32 %v1394_v20, %v1067_v44  ;;  %v2254_v21 = vsel %vm2251_vm4, %v2252_v27, %v2253_v42  ;;  %v8161_v20 = vld [vmem:[#allocation52_spill] sm:$0xff] }
 0x1c5   : > { %v5827_v51 = vld [vmem:[%s8001_s1 + $0x1c0] sm:$0xff]  }
 0x1c6   : > { %5213 = vmatmul.mubr.bf16.gmra.mrb[204].mxu1 %v1519_v59  ;;  %5309 = vmatmul.mubr.bf16.gmra.mrb[204].mxu0 %v1923_v2 }
 0x1c7   : > { %5312 = vmatprep.mubr.msk.bf16.mxu0 %vm5882_vm0, %v8104_v62  ;;  %5332 = vmatprep.mubr.msk.bf16.mxu1 %vm5882_vm0, %v8104_v62 }
 0x1c9   : > { %v1079_v43 = vpop.f32.mrb[100].mxu1  ;;  %v1399_v5 = vpop.f32.mrb[100].mxu0 }
 0x1ca   : > { %v1080_v44 = vadd.f32 %v1079_v43, %v8160_v41  ;;  %v4994_v59 = vpop.f32.mrb[101].mxu1  ;;  %v5090_v9 = vpop.f32.mrb[101].mxu0  ;;  %v7039_v6 = vadd.f32 %v1399_v5, %v1072_v15  ;;  %v7053_v15 = vld [vmem:[%s5947_s29 + $0x18] sm:$0xff]   ;;  %v5829_v43 = vld [vmem:[%s8001_s1 + $0x1c8] sm:$0xff]  }
 0x1cb   : > { %v1082_v50 = vpop.f32.mrb[102].mxu1  ;;  %v1402_v33 = vpop.f32.mrb[102].mxu0  ;;  %v2255_v27 = vrot.slane %v7053_v15, 2 }
 0x1cc   : > { %v1083_v2 = vadd.f32 %v1082_v50, %v8161_v20  ;;  %v5091_v53 = vpop.f32.mrb[103].mxu0  ;;  %v4995_v31 = vpop.f32.mrb[103].mxu1  ;;  %v7046_v48 = vadd.f32 %v1402_v33, %v1075_v3 }
 0x1cd   : > { %v2256_v20 = vsel %vm2251_vm4, %v2253_v42, %v2255_v27  ;;  %v5828_v53 = vld [vmem:[%s8001_s1 + $0x200] sm:$0xff]  }
 0x1ce   : > { %5313 = vmatmul.mubr.bf16.gmra.mrb[208].mxu0 %v1922_v45  ;;  %5333 = vmatmul.mubr.bf16.vlgmr.msra.gmra.mrb[208].mxu1 %v2254_v21  ;;  %v8162_v45 = vld [vmem:[#allocation53_spill] sm:$0xff]  ;;  %v7077_v42 = vld [vmem:[%s5947_s29 + $0x20] sm:$0xff]  }
 0x1cf   : > { %5336 = vmatprep.mubr.msk.bf16.mxu1 %vm5882_vm0, %v8104_v62  ;;  %5432 = vmatprep.mubr.msk.bf16.mxu0 %vm5882_vm0, %v8104_v62 }
 0x1d0   : > { %5517 = vmatpush3.bf16.msra.mxu1 %v5827_v51 }
 0x1d1   : > { %v1087_v5 = vpop.f32.mrb[104].mxu1  ;;  %v1407_v3 = vpop.f32.mrb[104].mxu0  ;;  %5518 = vmatprep.subr.bf16.mxu1 %v8104_v62 }
 0x1d2   : > { %v1088_v41 = vadd.f32 %v1087_v5, %v8162_v45  ;;  %v4998_v59 = vpop.f32.mrb[105].mxu1  ;;  %v5094_v9 = vpop.f32.mrb[105].mxu0  ;;  %v7061_v50 = vadd.f32 %v1407_v3, %v1080_v44  ;;  %v5831_v44 = vld [vmem:[%s8001_s1 + $0x1d0] sm:$0xff]   ;;  %v5833_v5 = vld [vmem:[%s8001_s1 + $0x1d8] sm:$0xff]   ;;  %v8163_v3 = vld [vmem:[#allocation54_spill] sm:$0xff] }
 0x1d3   : > { %v1090_v33 = vpop.f32.mrb[106].mxu1  ;;  %v1410_v21 = vpop.f32.mrb[106].mxu0 }
 0x1d4   : > { %v1091_v31 = vadd.f32 %v1090_v33, %v6674_v14  ;;  %v5095_v51 = vpop.f32.mrb[107].mxu0  ;;  %v4999_v12 = vpop.f32.mrb[107].mxu1  ;;  %5519 = vmatpush3.bf16.msra.mxu1 %v5829_v43  ;;  %v7068_v18 = vadd.f32 %v1410_v21, %v1083_v2  ;;  %v2257_v14 = vrot.slane %v7077_v42, 2 }
 0x1d5   : > { %5520 = vmatprep.subr.bf16.mxu1 %v8104_v62  ;;  %v5830_v12 = vld [vmem:[%s8001_s1 + $0x208] sm:$0xff]  }
 0x1d6   : > { %5337 = vmatmul.mubr.bf16.gmra.mrb[212].mxu1 %v2256_v20  ;;  %5433 = vmatmul.mubr.bf16.vlgmr.msra.gmra.mrb[212].mxu0 %v2256_v20  ;;  %v8164_v51 = vld [vmem:[#allocation55_spill] sm:$0xff] }
 0x1d7   : > { %5617 = vmatpush3.bf16.msra.mxu0 %v5828_v53  ;;  %5340 = vmatprep.mubr.msk.bf16.mxu1 %vm5882_vm0, %v8104_v62  ;;  %v2258_v53 = vsel %vm2251_vm4, %v2255_v27, %v2257_v14  ;;  %v5834_v27 = vld [vmem:[%s8001_s1 + $0x218] sm:$0xff]  }
 0x1d8   : > { %5436 = vmatprep.mubr.msk.bf16.mxu0 %vm5882_vm0, %v8104_v62  ;;  %5618 = vmatprep.subr.bf16.mxu0 %v8104_v62 }
 0x1d9   : > { %v1095_v2 = vpop.f32.mrb[108].mxu1  ;;  %v1415_v43 = vpop.f32.mrb[108].mxu0  ;;  %5521 = vmatpush3.bf16.msra.mxu1 %v5831_v44 }
 0x1da   : > { %v1096_v45 = vadd.f32 %v1095_v2, %v8163_v3  ;;  %v5002_v59 = vpop.f32.mrb[109].mxu1  ;;  %v5098_v9 = vpop.f32.mrb[109].mxu0  ;;  %5522 = vmatprep.subr.bf16.mxu1 %v8104_v62  ;;  %v7091_v33 = vadd.f32 %v1415_v43, %v1088_v41  ;;  %v5832_v2 = vld [vmem:[%s8001_s1 + $0x210] sm:$0xff]   ;;  %v5835_v41 = vld [vmem:[%s8001_s1 + $0x1e0] sm:$0xff]   ;;  %v5837_v43 = vld [vmem:[%s8001_s1 + $0x1e8] sm:$0xff]  }
 0x1db   : > { %v1098_v21 = vpop.f32.mrb[110].mxu1  ;;  %v1418_v20 = vpop.f32.mrb[110].mxu0  ;;  %5619 = vmatpush3.bf16.msra.mxu0 %v5830_v12 }
 0x1dc   : > { %v1099_v44 = vadd.f32 %v1098_v21, %v8164_v51  ;;  %v5099_v55 = vpop.f32.mrb[111].mxu0  ;;  %v5003_v38 = vpop.f32.mrb[111].mxu1  ;;  %5620 = vmatprep.subr.bf16.mxu0 %v8104_v62  ;;  %v7099_v3 = vadd.f32 %v1418_v20, %v1091_v31 }
 0x1dd   : > { %5523 = vmatpush3.bf16.msra.mxu1 %v5833_v5  ;;  %v7109_v38 = vld [vmem:[%s5947_s29 + $0x28] sm:$0xff]   ;;  %v8165_v5 = vld [vmem:[#allocation56_spill] sm:$0xff] }
 0x1de   : > { %5341 = vmatmul.mubr.bf16.gmra.mrb[216].mxu1 %v2258_v53  ;;  %5437 = vmatmul.mubr.bf16.gmra.mrb[216].mxu0 %v2258_v53  ;;  %v2259_v55 = vrot.slane %v7109_v38, 2 }
 0x1df   : > { %5344 = vmatprep.mubr.msk.bf16.mxu1 %vm5882_vm0, %v8104_v62  ;;  %5440 = vmatprep.mubr.msk.bf16.mxu0 %vm5882_vm0, %v8104_v62 }
 0x1e0   : > { %5621 = vmatpush3.bf16.msra.mxu0 %v5832_v2  ;;  %5524 = vmatprep.subr.bf16.mxu1 %v8104_v62  ;;  %v2260_v2 = vsel %vm2251_vm4, %v2257_v14, %v2259_v55  ;;  %v5838_v14 = vld [vmem:[%s8001_s1 + $0x228] sm:$0xff]  }
 0x1e1   : > { %v1103_v31 = vpop.f32.mrb[112].mxu1  ;;  %v1423_v12 = vpop.f32.mrb[112].mxu0  ;;  %5622 = vmatprep.subr.bf16.mxu0 %v8104_v62  ;;  %5525 = vmatpush3.bf16.msra.mxu1 %v5835_v41 }
 0x1e2   : > { %v1104_v59 = vadd.f32 %v1103_v31, %v8165_v5  ;;  %v5006_v9 = vpop.f32.mrb[113].mxu1  ;;  %v5102_v21 = vpop.f32.mrb[113].mxu0  ;;  %5526 = vmatprep.subr.bf16.mxu1 %v8104_v62  ;;  %v7122_v20 = vadd.f32 %v1423_v12, %v1096_v45  ;;  %v5836_v31 = vld [vmem:[%s8001_s1 + $0x220] sm:$0xff]   ;;  %v5839_v45 = vld [vmem:[%s8001_s1 + $0x1f0] sm:$0xff]   ;;  %v5841_v12 = vld [vmem:[%s8001_s1 + $0x1f8] sm:$0xff]  }
 0x1e3   : > { %v1106_v53 = vpop.f32.mrb[114].mxu1  ;;  %v1426_v51 = vpop.f32.mrb[114].mxu0 }
 0x1e4   : > { %v1107_v23 = vadd.f32 %v1106_v53, %v6741_v60  ;;  %v5103_v41 = vpop.f32.mrb[115].mxu0  ;;  %v5007_v10 = vpop.f32.mrb[115].mxu1  ;;  %5623 = vmatpush3.bf16.msra.mxu0 %v5834_v27  ;;  %v7129_v5 = vadd.f32 %v1426_v51, %v1099_v44  ;;  %v7140_v60 = vld [vmem:[%s5947_s29 + $0x30] sm:$0xff]  }
 0x1e5   : > { %5624 = vmatprep.subr.bf16.mxu0 %v8104_v62  ;;  %5527 = vmatpush3.bf16.msra.mxu1 %v5837_v43  ;;  %8166 = vst [vmem:[#allocation38_spill] sm:$0xff] %v7140_v60  ;;  %v2261_v10 = vrot.slane %v7140_v60, 2 }
 0x1e6   : > { %5345 = vmatmul.mubr.bf16.gmra.mrb[220].mxu1 %v2260_v2  ;;  %5441 = vmatmul.mubr.bf16.gmra.mrb[220].mxu0 %v2260_v2 }
 0x1e7   : > { %5348 = vmatprep.mubr.msk.bf16.mxu1 %vm5882_vm0, %v8104_v62  ;;  %5444 = vmatprep.mubr.msk.bf16.mxu0 %vm5882_vm0, %v8104_v62  ;;  %v2262_v41 = vsel %vm2251_vm4, %v2259_v55, %v2261_v10 }
 0x1e8   : > { %5625 = vmatpush3.bf16.msra.mxu0 %v5836_v31  ;;  %5528 = vmatprep.subr.bf16.mxu1 %v8104_v62 }
 0x1e9   : > { %v1111_v44 = vpop.f32.mrb[116].mxu1  ;;  %v1431_v27 = vpop.f32.mrb[116].mxu0  ;;  %5626 = vmatprep.subr.bf16.mxu0 %v8104_v62  ;;  %5529 = vmatpush3.bf16.msra.mxu1 %v5839_v45 }
 0x1ea   : > { %v1112_v43 = vadd.f32 %v1111_v44, %v6771_v1  ;;  %v5010_v9 = vpop.f32.mrb[117].mxu1  ;;  %v5106_v21 = vpop.f32.mrb[117].mxu0  ;;  %5530 = vmatprep.subr.bf16.mxu1 %v8104_v62  ;;  %v7153_v53 = vadd.f32 %v1431_v27, %v1104_v59  ;;  %v5840_v1 = vld [vmem:[%s8001_s1 + $0x230] sm:$0xff]  }
 0x1eb   : > { %v1114_v51 = vpop.f32.mrb[118].mxu1  ;;  %v1434_v2 = vpop.f32.mrb[118].mxu0 }
 0x1ec   : > { %v1115_v31 = vadd.f32 %v1114_v51, %v6781_v58  ;;  %v5107_v45 = vpop.f32.mrb[119].mxu0  ;;  %v5011_v60 = vpop.f32.mrb[119].mxu1  ;;  %5627 = vmatpush3.bf16.msra.mxu0 %v5838_v14  ;;  %v7160_v44 = vadd.f32 %v1434_v2, %v1107_v23  ;;  %v7168_v58 = vld [vmem:[%s5947_s29 + $0x38] sm:$0xff]   ;;  %v8168_v14 = vld [vmem:[#allocation59_spill] sm:$0xff] }
 0x1ed   : > { %5628 = vmatprep.subr.bf16.mxu0 %v8104_v62  ;;  %5531 = vmatpush3.bf16.msra.mxu1 %v5841_v12  ;;  %8167 = vst [vmem:[#allocation40_spill] sm:$0xff] %v7168_v58  ;;  %v2263_v55 = vrot.slane %v7168_v58, 2  ;;  %v5842_v23 = vld [vmem:[%s8001_s1 + $0x238] sm:$0xff]  }
 0x1ee   : > { %5349 = vmatmul.mubr.bf16.gmra.mrb[224].mxu1 %v2262_v41  ;;  %5445 = vmatmul.mubr.bf16.gmra.mrb[224].mxu0 %v2262_v41 }
 0x1ef   : > { %5352 = vmatprep.mubr.msk.bf16.mxu1 %vm5882_vm0, %v8104_v62  ;;  %5448 = vmatprep.mubr.msk.bf16.mxu0 %vm5882_vm0, %v8104_v62  ;;  %v2264_v2 = vsel %vm2251_vm4, %v2261_v10, %v2263_v55 }
 0x1f0   : > { %5629 = vmatpush3.bf16.msra.mxu0 %v5840_v1 }
 0x1f1   : > { %v1119_v59 = vpop.f32.mrb[120].mxu1  ;;  %v1439_v60 = vpop.f32.mrb[120].mxu0  ;;  %5630 = vmatprep.subr.bf16.mxu0 %v8104_v62 }
 0x1f2   : > { %v1120_v27 = vadd.f32 %v1119_v59, %v8168_v14  ;;  %v5110_v12 = vpop.f32.mrb[121].mxu0  ;;  %v5014_v9 = vpop.f32.mrb[121].mxu1  ;;  %v7176_v21 = vadd.f32 %v1439_v60, %v1112_v43  ;;  %v7186_v59 = vld [vmem:[%s5947_s29 + $0x40] sm:$0xff]  }
 0x1f3   : > { %v1442_v51 = vpop.f32.mrb[122].mxu0  ;;  %v1122_v41 = vpop.f32.mrb[122].mxu1  ;;  %8169 = vst [vmem:[#allocation43_spill] sm:$0xff] %v7186_v59  ;;  %v2265_v43 = vrot.slane %v7186_v59, 2 }
 0x1f4   : > { %v5111_v45 = vpop.f32.mrb[123].mxu0  ;;  %v5015_v1 = vpop.f32.mrb[123].mxu1  ;;  %5631 = vmatpush3.bf16.msra.mxu0 %v5842_v23  ;;  %v7179_v58 = vadd.f32 %v1442_v51, %v1115_v31 }
 0x1f6   : > { %5353 = vmatmul.mubr.bf16.gmra.mrb[228].mxu1 %v2264_v2  ;;  %5449 = vmatmul.mubr.bf16.gmra.mrb[228].mxu0 %v2264_v2  ;;  %v2266_v2 = vsel %vm2251_vm4, %v2263_v55, %v2265_v43 }
 0x1f7   : > { %5356 = vmatprep.mubr.msk.bf16.mxu1 %vm5882_vm0, %v8104_v62  ;;  %5452 = vmatprep.mubr.msk.bf16.mxu0 %vm5882_vm0, %v8104_v62 }
 0x1f9   : > { %v1447_v60 = vpop.f32.mrb[124].mxu0  ;;  %v1606_v10 = vpop.f32.mrb[124].mxu1 }
 0x1fa   : > { %v7189_v14 = vadd.f32 %v1447_v60, %v1120_v27  ;;  %v1772_v31 = vadd.f32 %v1606_v10, %v6829_v61  ;;  %v5114_v23 = vpop.f32.mrb[125].mxu0  ;;  %v5134_v12 = vpop.f32.mrb[125].mxu1  ;;  %v7199_v27 = vld [vmem:[%s5947_s29 + $0x48] sm:$0xff]  }
 0x1fb   : > { %v1450_v9 = vpop.f32.mrb[126].mxu0  ;;  %v1609_v51 = vpop.f32.mrb[126].mxu1  ;;  %8171 = vst [vmem:[#allocation41_spill] sm:$0xff] %v7199_v27  ;;  %v2267_v61 = vrot.slane %v7199_v27, 2 }
 0x1fc   : > { %8170 = vst [vmem:[#allocation39_spill] sm:$0xff] %v7189_v14  ;;  %v1773_v41 = vadd.f32 %v1609_v51, %v6835_v28  ;;  %v5115_v45 = vpop.f32.mrb[127].mxu0  ;;  %v5135_v1 = vpop.f32.mrb[127].mxu1 }
 0x1fe   : > { %5357 = vmatmul.mubr.bf16.gmra.mrb[232].mxu1 %v2266_v2  ;;  %5453 = vmatmul.mubr.bf16.gmra.mrb[232].mxu0 %v2266_v2  ;;  %v2268_v2 = vsel %vm2251_vm4, %v2265_v43, %v2267_v61 }
 0x1ff   : > { %5360 = vmatprep.mubr.msk.bf16.mxu1 %vm5882_vm0, %v8104_v62  ;;  %5456 = vmatprep.mubr.msk.bf16.mxu0 %vm5882_vm0, %v8104_v62 }
 0x201   : > { %v1614_v60 = vpop.f32.mrb[128].mxu1  ;;  %v2027_v10 = vpop.f32.mrb[128].mxu0 }
 0x202   : > { %v1774_v55 = vadd.f32 %v1614_v60, %v6843_v13  ;;  %v7203_v28 = vadd.f32 %v2027_v10, %v1772_v31  ;;  %v5138_v23 = vpop.f32.mrb[129].mxu1  ;;  %v5234_v12 = vpop.f32.mrb[129].mxu0  ;;  %v7214_v13 = vld [vmem:[%s5947_s29 + $0x50] sm:$0xff]  }
 0x203   : > { %v1617_v9 = vpop.f32.mrb[130].mxu1  ;;  %v2030_v51 = vpop.f32.mrb[130].mxu0  ;;  %8172 = vst [vmem:[#allocation47_spill] sm:$0xff] %v7214_v13  ;;  %v2269_v31 = vrot.slane %v7214_v13, 2 }
 0x204   : > { %v1775_v45 = vadd.f32 %v1617_v9, %v6849_v4  ;;  %v7207_v1 = vadd.f32 %v2030_v51, %v1773_v41  ;;  %v5235_v59 = vpop.f32.mrb[131].mxu0  ;;  %v5139_v14 = vpop.f32.mrb[131].mxu1 }
 0x205   : > { %v2270_v12 = vsel %vm2251_vm4, %v2267_v61, %v2269_v31 }
 0x206   : > { %5361 = vmatmul.mubr.bf16.gmra.mrb[236].mxu1 %v2268_v2  ;;  %5457 = vmatmul.mubr.bf16.gmra.mrb[236].mxu0 %v2268_v2 }
 0x207   : > { %5364 = vmatprep.mubr.msk.bf16.mxu1 %vm5882_vm0, %v8104_v62  ;;  %5460 = vmatprep.mubr.msk.bf16.mxu0 %vm5882_vm0, %v8104_v62 }
 0x209   : > { %v1622_v60 = vpop.f32.mrb[132].mxu1  ;;  %v2035_v43 = vpop.f32.mrb[132].mxu0 }
 0x20a   : > { %v1776_v4 = vadd.f32 %v1622_v60, %v6857_v34  ;;  %v7218_v41 = vadd.f32 %v2035_v43, %v1774_v55  ;;  %v5142_v59 = vpop.f32.mrb[133].mxu1  ;;  %v5238_v14 = vpop.f32.mrb[133].mxu0  ;;  %v7229_v34 = vld [vmem:[%s5947_s29 + $0x58] sm:$0xff]  }
 0x20b   : > { %v1625_v10 = vpop.f32.mrb[134].mxu1  ;;  %v2038_v23 = vpop.f32.mrb[134].mxu0  ;;  %8173 = vst [vmem:[#allocation42_spill] sm:$0xff] %v7229_v34  ;;  %v2271_v55 = vrot.slane %v7229_v34, 2 }
 0x20c   : > { %v1777_v9 = vadd.f32 %v1625_v10, %v6863_v54  ;;  %v7222_v51 = vadd.f32 %v2038_v23, %v1775_v45  ;;  %v5239_v2 = vpop.f32.mrb[135].mxu0  ;;  %v5143_v27 = vpop.f32.mrb[135].mxu1 }
 0x20d   : > { %v2272_v10 = vsel %vm2251_vm4, %v2269_v31, %v2271_v55 }
 0x20e   : > { %5365 = vmatmul.mubr.bf16.gmra.mrb[240].mxu1 %v2270_v12  ;;  %5461 = vmatmul.mubr.bf16.gmra.mrb[240].mxu0 %v2270_v12 }
 0x20f   : > { %5368 = vmatprep.mubr.msk.bf16.mxu1 %vm5882_vm0, %v8104_v62  ;;  %5464 = vmatprep.mubr.msk.bf16.mxu0 %vm5882_vm0, %v8104_v62 }
 0x211   : > { %v1630_v60 = vpop.f32.mrb[136].mxu1  ;;  %v2043_v61 = vpop.f32.mrb[136].mxu0 }
 0x212   : > { %v1778_v54 = vadd.f32 %v1630_v60, %v6871_v8  ;;  %v7233_v45 = vadd.f32 %v2043_v61, %v1776_v4  ;;  %v5146_v27 = vpop.f32.mrb[137].mxu1  ;;  %v5242_v43 = vpop.f32.mrb[137].mxu0  ;;  %v5856_v8 = vld [vmem:[%s5947_s29 + $0x60] sm:$0xff]  }
 0x213   : > { %v1633_v59 = vpop.f32.mrb[138].mxu1  ;;  %v2046_v14 = vpop.f32.mrb[138].mxu0  ;;  %v2273_v4 = vrot.slane %v5856_v8, 2 }
 0x214   : > { %v1779_v23 = vadd.f32 %v1633_v59, %v6877_v7  ;;  %v7237_v12 = vadd.f32 %v2046_v14, %v1777_v9  ;;  %v5243_v2 = vpop.f32.mrb[139].mxu0  ;;  %v5147_v13 = vpop.f32.mrb[139].mxu1 }
 0x215   : > { %v2274_v59 = vsel %vm2251_vm4, %v2271_v55, %v2273_v4 }
 0x216   : > { %5369 = vmatmul.mubr.bf16.gmra.mrb[244].mxu1 %v2272_v10  ;;  %5465 = vmatmul.mubr.bf16.gmra.mrb[244].mxu0 %v2272_v10 }
 0x217   : > { %5372 = vmatprep.mubr.msk.bf16.mxu1 %vm5882_vm0, %v8104_v62  ;;  %5468 = vmatprep.mubr.msk.bf16.mxu0 %vm5882_vm0, %v8104_v62 }
 0x219   : > { %v1638_v60 = vpop.f32.mrb[140].mxu1  ;;  %v2051_v61 = vpop.f32.mrb[140].mxu0 }
 0x21a   : > { %v1780_v31 = vadd.f32 %v1638_v60, %v6885_v57  ;;  %v7245_v7 = vadd.f32 %v2051_v61, %v1778_v54  ;;  %v5150_v9 = vpop.f32.mrb[141].mxu1  ;;  %v5246_v27 = vpop.f32.mrb[141].mxu0  ;;  %v5857_v57 = vld [vmem:[%s5947_s29 + $0x68] sm:$0xff]  }
 0x21b   : > { %v1641_v13 = vpop.f32.mrb[142].mxu1  ;;  %v2054_v43 = vpop.f32.mrb[142].mxu0  ;;  %v2275_v54 = vrot.slane %v5857_v57, 2  ;;  %v5858_v57 = vld [vmem:[%s5947_s29 + $0x70] sm:$0xff]  }
 0x21c   : > { %v1781_v14 = vadd.f32 %v1641_v13, %v6891_v17  ;;  %v7249_v10 = vadd.f32 %v2054_v43, %v1779_v23  ;;  %v5247_v2 = vpop.f32.mrb[143].mxu0  ;;  %v5151_v34 = vpop.f32.mrb[143].mxu1 }
 0x21d   : > { %v2276_v27 = vsel %vm2251_vm4, %v2273_v4, %v2275_v54 }
 0x21e   : > { %8174 = vst [vmem:[#allocation45_spill] sm:$0xff] %v7249_v10  ;;  %5373 = vmatmul.mubr.bf16.gmra.mrb[248].mxu1 %v2274_v59  ;;  %5469 = vmatmul.mubr.bf16.gmra.mrb[248].mxu0 %v2274_v59  ;;  %v2277_v10 = vrot.slane %v5858_v57, 2 }
 0x21f   : > { %5376 = vmatprep.mubr.msk.bf16.mxu1 %vm5882_vm0, %v8104_v62  ;;  %5472 = vmatprep.mubr.msk.bf16.mxu0 %vm5882_vm0, %v8104_v62 }
 0x221   : > { %v1646_v8 = vpop.f32.mrb[144].mxu1  ;;  %v2059_v60 = vpop.f32.mrb[144].mxu0 }
 0x222   : > { %v1782_v55 = vadd.f32 %v1646_v8, %v6899_v47  ;;  %v7257_v17 = vadd.f32 %v2059_v60, %v1780_v31  ;;  %v5154_v23 = vpop.f32.mrb[145].mxu1  ;;  %v5250_v61 = vpop.f32.mrb[145].mxu0  ;;  %v2278_v60 = vsel %vm2251_vm4, %v2275_v54, %v2277_v10 }
 0x223   : > { %v1649_v34 = vpop.f32.mrb[146].mxu1  ;;  %v2062_v9 = vpop.f32.mrb[146].mxu0 }
 0x224   : > { %v1783_v13 = vadd.f32 %v1649_v34, %v6905_v35  ;;  %v7261_v43 = vadd.f32 %v2062_v9, %v1781_v14  ;;  %v5251_v59 = vpop.f32.mrb[147].mxu0  ;;  %v5155_v2 = vpop.f32.mrb[147].mxu1 }
 0x226   : > { %5377 = vmatmul.mubr.bf16.gmra.mrb[252].mxu1 %v2276_v27  ;;  %5473 = vmatmul.mubr.bf16.gmra.mrb[252].mxu0 %v2276_v27 }
 0x227   : > { %5380 = vmatprep.mubr.msk.bf16.mxu1 %vm5882_vm0, %v8104_v62  ;;  %5476 = vmatprep.mubr.msk.bf16.mxu0 %vm5882_vm0, %v8104_v62 }
 0x229   : > { %v1654_v47 = vpop.f32.mrb[148].mxu1  ;;  %v2067_v31 = vpop.f32.mrb[148].mxu0 }
 0x22a   : > { %v1784_v4 = vadd.f32 %v1654_v47, %v6913_v39  ;;  %v7269_v35 = vadd.f32 %v2067_v31, %v1782_v55  ;;  %v5158_v14 = vpop.f32.mrb[149].mxu1  ;;  %v5254_v8 = vpop.f32.mrb[149].mxu0  ;;  %v5859_v39 = vld [vmem:[%s5947_s29 + $0x78] sm:$0xff]  }
 0x22b   : > { %v1657_v23 = vpop.f32.mrb[150].mxu1  ;;  %v2070_v61 = vpop.f32.mrb[150].mxu0  ;;  %v2279_v55 = vrot.slane %v5859_v39, 2 }
 0x22c   : > { %v1785_v34 = vadd.f32 %v1657_v23, %v6919_v56  ;;  %v7273_v9 = vadd.f32 %v2070_v61, %v1783_v13  ;;  %v5255_v27 = vpop.f32.mrb[151].mxu0  ;;  %v5159_v59 = vpop.f32.mrb[151].mxu1 }
 0x22d   : > { %v2280_v8 = vsel %vm2251_vm4, %v2277_v10, %v2279_v55 }
 0x22e   : > { %5381 = vmatmul.mubr.bf16.gmra.mrb[0].mxu1 %v2278_v60  ;;  %5477 = vmatmul.mubr.bf16.gmra.mrb[0].mxu0 %v2278_v60 }
 0x22f   : > { %5384 = vmatprep.mubr.msk.bf16.mxu1 %vm5882_vm0, %v8104_v62  ;;  %5480 = vmatprep.mubr.msk.bf16.mxu0 %vm5882_vm0, %v8104_v62 }
 0x231   : > { %v1662_v2 = vpop.f32.mrb[152].mxu1  ;;  %v2075_v54 = vpop.f32.mrb[152].mxu0 }
 0x232   : > { %v1786_v57 = vadd.f32 %v1662_v2, %v6927_v49  ;;  %v7281_v56 = vadd.f32 %v2075_v54, %v1784_v4  ;;  %v5162_v13 = vpop.f32.mrb[153].mxu1  ;;  %v5258_v47 = vpop.f32.mrb[153].mxu0  ;;  %v5860_v49 = vld [vmem:[%s5947_s29 + $0x80] sm:$0xff]  }
 0x233   : > { %v1665_v31 = vpop.f32.mrb[154].mxu1  ;;  %v2078_v14 = vpop.f32.mrb[154].mxu0  ;;  %v2281_v4 = vrot.slane %v5860_v49, 2 }
 0x234   : > { %v1787_v60 = vadd.f32 %v1665_v31, %v6933_v29  ;;  %v7285_v23 = vadd.f32 %v2078_v14, %v1785_v34  ;;  %v5259_v61 = vpop.f32.mrb[155].mxu0  ;;  %v5163_v27 = vpop.f32.mrb[155].mxu1 }
 0x235   : > { %v2282_v47 = vsel %vm2251_vm4, %v2279_v55, %v2281_v4 }
 0x236   : > { %5385 = vmatmul.mubr.bf16.gmra.mrb[4].mxu1 %v2280_v8  ;;  %5481 = vmatmul.mubr.bf16.gmra.mrb[4].mxu0 %v2280_v8 }
 0x237   : > { %5388 = vmatprep.mubr.msk.bf16.mxu1 %vm5882_vm0, %v8104_v62  ;;  %5484 = vmatprep.mubr.msk.bf16.mxu0 %vm5882_vm0, %v8104_v62 }
 0x239   : > { %v1670_v59 = vpop.f32.mrb[156].mxu1  ;;  %v2083_v39 = vpop.f32.mrb[156].mxu0 }
 0x23a   : > { %v1788_v10 = vadd.f32 %v1670_v59, %v6941_v36  ;;  %v7293_v29 = vadd.f32 %v2083_v39, %v1786_v57  ;;  %v5166_v34 = vpop.f32.mrb[157].mxu1  ;;  %v5262_v2 = vpop.f32.mrb[157].mxu0  ;;  %v5861_v36 = vld [vmem:[%s5947_s29 + $0x88] sm:$0xff]  }
 0x23b   : > { %v1673_v54 = vpop.f32.mrb[158].mxu1  ;;  %v2086_v13 = vpop.f32.mrb[158].mxu0  ;;  %v2283_v57 = vrot.slane %v5861_v36, 2 }
 0x23c   : > { %v1789_v31 = vadd.f32 %v1673_v54, %v6947_v16  ;;  %v7297_v14 = vadd.f32 %v2086_v13, %v1787_v60  ;;  %v5263_v8 = vpop.f32.mrb[159].mxu0  ;;  %v5167_v61 = vpop.f32.mrb[159].mxu1 }
 0x23d   : > { %v2284_v2 = vsel %vm2251_vm4, %v2281_v4, %v2283_v57 }
 0x23e   : > { %5389 = vmatmul.mubr.bf16.gmra.mrb[8].mxu1 %v2282_v47  ;;  %5485 = vmatmul.mubr.bf16.gmra.mrb[8].mxu0 %v2282_v47 }
 0x23f   : > { %5392 = vmatprep.mubr.msk.bf16.mxu1 %vm5882_vm0, %v8104_v62  ;;  %5488 = vmatprep.mubr.msk.bf16.mxu0 %vm5882_vm0, %v8104_v62 }
 0x241   : > { %v1678_v27 = vpop.f32.mrb[160].mxu1  ;;  %v2091_v49 = vpop.f32.mrb[160].mxu0 }
 0x242   : > { %v1790_v55 = vadd.f32 %v1678_v27, %v6955_v37  ;;  %v7305_v16 = vadd.f32 %v2091_v49, %v1788_v10  ;;  %v5170_v60 = vpop.f32.mrb[161].mxu1  ;;  %v5266_v59 = vpop.f32.mrb[161].mxu0  ;;  %v5862_v37 = vld [vmem:[%s5947_s29 + $0x90] sm:$0xff]  }
 0x243   : > { %v1681_v39 = vpop.f32.mrb[162].mxu1  ;;  %v2094_v34 = vpop.f32.mrb[162].mxu0  ;;  %v2285_v10 = vrot.slane %v5862_v37, 2 }
 0x244   : > { %v1791_v54 = vadd.f32 %v1681_v39, %v6961_v30  ;;  %v7309_v13 = vadd.f32 %v2094_v34, %v1789_v31  ;;  %v5267_v47 = vpop.f32.mrb[163].mxu0  ;;  %v5171_v8 = vpop.f32.mrb[163].mxu1 }
 0x245   : > { %v2286_v59 = vsel %vm2251_vm4, %v2283_v57, %v2285_v10 }
 0x246   : > { %5393 = vmatmul.mubr.bf16.gmra.mrb[12].mxu1 %v2284_v2  ;;  %5489 = vmatmul.mubr.bf16.gmra.mrb[12].mxu0 %v2284_v2 }
 0x247   : > { %5396 = vmatprep.mubr.msk.bf16.mxu1 %vm5882_vm0, %v8104_v62  ;;  %5492 = vmatprep.mubr.msk.bf16.mxu0 %vm5882_vm0, %v8104_v62 }
 0x249   : > { %v1686_v61 = vpop.f32.mrb[164].mxu1  ;;  %v2099_v36 = vpop.f32.mrb[164].mxu0 }
 0x24a   : > { %v1792_v4 = vadd.f32 %v1686_v61, %v6969_v11  ;;  %v7317_v30 = vadd.f32 %v2099_v36, %v1790_v55  ;;  %v5174_v31 = vpop.f32.mrb[165].mxu1  ;;  %v5270_v27 = vpop.f32.mrb[165].mxu0  ;;  %v5863_v11 = vld [vmem:[%s5947_s29 + $0x98] sm:$0xff]  }
 0x24b   : > { %v1689_v49 = vpop.f32.mrb[166].mxu1  ;;  %v2102_v60 = vpop.f32.mrb[166].mxu0  ;;  %v2287_v55 = vrot.slane %v5863_v11, 2 }
 0x24c   : > { %v1793_v39 = vadd.f32 %v1689_v49, %v6975_v52  ;;  %v7321_v34 = vadd.f32 %v2102_v60, %v1791_v54  ;;  %v5271_v2 = vpop.f32.mrb[167].mxu0  ;;  %v5175_v47 = vpop.f32.mrb[167].mxu1  ;;  %v5883_v49 = vmov 0   ;;  %v3763_v60 = vld [vmem:[%s8003_s3] sm:$0xff] }
 0x24d   : > { %v2288_v27 = vsel %vm2251_vm4, %v2285_v10, %v2287_v55  ;;  %5745 = vset.pattern.permute.xlu0 %v5883_v49  ;;  %5746 = vset.pattern.permute.xlu1 %v5883_v49  ;;  %v3764_v10 = vld [vmem:[%s8003_s3 + $0x8] sm:$0xff]  ;;  %v2289_v47 = vrot.slane %v6735_v0, 2 }
 0x24e   : > { %5397 = vmatmul.mubr.bf16.gmra.mrb[16].mxu1 %v2286_v59  ;;  %5493 = vmatmul.mubr.bf16.gmra.mrb[16].mxu0 %v2286_v59 }
 0x24f   : > { %5400 = vmatprep.mubr.msk.bf16.mxu1 %vm5882_vm0, %v8104_v62  ;;  %5496 = vmatprep.mubr.msk.bf16.mxu0 %vm5882_vm0, %v8104_v62  ;;  %v2290_v49 = vsel %vm2251_vm4, %v2287_v55, %v2289_v47  ;;  %v3766_v55 = vld [vmem:[%s8003_s3 + $0x18] sm:$0xff] }
 0x250   : > { %3806 = vperm.xlu0 %5745, %v3763_v60   ;;  %v3765_v60 = vld [vmem:[%s8003_s3 + $0x10] sm:$0xff] }
 0x251   : > { %v1694_v8 = vpop.f32.mrb[168].mxu1  ;;  %v2107_v37 = vpop.f32.mrb[168].mxu0  ;;  %3816 = vperm.xlu1 %5746, %v3765_v60  }
 0x252   : > { %v1794_v57 = vadd.f32 %v1694_v8, %v6989_v63  ;;  %v7329_v61 = vadd.f32 %v2107_v37, %v1792_v4  ;;  %v5178_v52 = vpop.f32.mrb[169].mxu1  ;;  %v5274_v54 = vpop.f32.mrb[169].mxu0 }
 0x253   : > { %v1697_v36 = vpop.f32.mrb[170].mxu1  ;;  %v2110_v31 = vpop.f32.mrb[170].mxu0 }
 0x254   : > { %v1795_v59 = vadd.f32 %v1697_v36, %v7001_v46  ;;  %v7336_v2 = vadd.f32 %v2110_v31, %v1793_v39  ;;  %v5275_v63 = vpop.f32.mrb[171].mxu0  ;;  %v5179_v4 = vpop.f32.mrb[171].mxu1  ;;  %v280_v46 = vld [vmem:[%s5947_s29 + $0xac] sm:$0xf]  ;;  %3811 = vperm.xlu0 %5745, %v3764_v10   ;;  %v7373_v10 = vld [vmem:[%s5947_s29 + $0xb0] sm:$0xf] }
 0x255   : > { %v7351_v36 = vcombine.low %v6984_v24, %v280_v46  ;;  %v3767_v24 = vld [vmem:[%s8003_s3 + $0x20] sm:$0xff]  ;;  %3821 = vperm.xlu1 %5746, %v3766_v55   ;;  %v3769_v46 = vld [vmem:[%s8003_s3 + $0x30] sm:$0xff] }
 0x256   : > { %5401 = vmatmul.mubr.bf16.gmra.mrb[20].mxu1 %v2288_v27  ;;  %5497 = vmatmul.mubr.bf16.gmra.mrb[20].mxu0 %v2288_v27 }
 0x257   : > { %5404 = vmatprep.mubr.msk.bf16.mxu1 %vm5882_vm0, %v8104_v62  ;;  %5500 = vmatprep.mubr.msk.bf16.mxu0 %vm5882_vm0, %v8104_v62 }
 0x258   : > { %3826 = vperm.xlu0 %5745, %v3767_v24  }
 0x259   : > { %v1702_v39 = vpop.f32.mrb[172].mxu1  ;;  %v2115_v11 = vpop.f32.mrb[172].mxu0 }
 0x25a   : > { %v1796_v8 = vadd.f32 %v1702_v39, %v7011_v25  ;;  %v7348_v37 = vadd.f32 %v2115_v11, %v1794_v57  ;;  %v5182_v52 = vpop.f32.mrb[173].mxu1  ;;  %v5278_v54 = vpop.f32.mrb[173].mxu0 }
 0x25b   : > { %v1705_v31 = vpop.f32.mrb[174].mxu1  ;;  %v2118_v27 = vpop.f32.mrb[174].mxu0 }
 0x25c   : > { %8175 = vst [vmem:[#allocation44_spill] sm:$0xff] %v7348_v37  ;;  %v1797_v63 = vadd.f32 %v1705_v31, %v7016_v19  ;;  %v7358_v4 = vadd.f32 %v2118_v27, %v1795_v59  ;;  %v5279_v25 = vpop.f32.mrb[175].mxu0  ;;  %v5183_v57 = vpop.f32.mrb[175].mxu1  ;;  %v2291_v19 = vrot.slane %v6994_v22, 2  ;;  %v2626_v59 = vrot.slane %v7351_v36, 2  ;;  %3836 = vperm.xlu0 %5745, %v3769_v46  }
 0x25d   : > { %v4494_v57 = vcombine.low %v7373_v10, %v7373_v10 }
 0x25e   : > { %8176 = vst [vmem:[#allocation46_spill] sm:$0xff] %v7358_v4  ;;  %5405 = vmatmul.mubr.bf16.gmra.mrb[24].mxu1 %v2290_v49  ;;  %5501 = vmatmul.mubr.bf16.gmra.mrb[24].mxu0 %v2290_v49  ;;  %v2292_v60 = vsel %vm2251_vm4, %v2289_v47, %v2291_v19  ;;  %v2627_v25 = vsel %vm2251_vm4, %v2289_v47, %v2626_v59  ;;  %v3773_v47 = vld [vmem:[%s8003_s3 + $0x50] sm:$0xff] }
 0x25f   : > { %5408 = vmatprep.mubr.msk.bf16.mxu1 %vm5882_vm0, %v8104_v62  ;;  %5504 = vmatprep.mubr.msk.bf16.mxu0 %vm5882_vm0, %v8104_v62 }
 0x261   : > { %v1710_v39 = vpop.f32.mrb[176].mxu1  ;;  %v2123_v11 = vpop.f32.mrb[176].mxu0 }
 0x262   : > { %v1798_v52 = vadd.f32 %v1710_v39, %v7023_v32  ;;  %v7379_v54 = vadd.f32 %v2123_v11, %v1796_v8  ;;  %v5186_v31 = vpop.f32.mrb[177].mxu1  ;;  %v5282_v27 = vpop.f32.mrb[177].mxu0  ;;  %v3768_v32 = vld [vmem:[%s8003_s3 + $0x28] sm:$0xff]  ;;  %v3771_v8 = vld [vmem:[%s8003_s3 + $0x40] sm:$0xff]  ;;  %v8179_v11 = vld [vmem:[#allocation5_spill] sm:$0xff] }
 0x263   : > { %v1713_v49 = vpop.f32.mrb[178].mxu1  ;;  %v2126_v22 = vpop.f32.mrb[178].mxu0  ;;  %3831 = vperm.xlu1 %5746, %v3768_v32   ;;  %3846 = vperm.xlu0 %5745, %v3771_v8   ;;  %v2944_v31 = vrot.slane %v8179_v11, 3  ;;  %v8182_v8 = vld [vmem:[#allocation14_spill] sm:$0xff] }
 0x264   : > { %8177 = vst [vmem:[#allocation48_spill] sm:$0xff] %v7379_v54  ;;  %v1799_v24 = vadd.f32 %v1713_v49, %v7027_v40  ;;  %v7386_v55 = vadd.f32 %v2126_v22, %v1797_v63  ;;  %v5283_v46 = vpop.f32.mrb[179].mxu0  ;;  %v5187_v0 = vpop.f32.mrb[179].mxu1  ;;  %v2628_v40 = vrot.slane %v4494_v57, 2 }
 0x265   : > { %v3770_v0 = vld [vmem:[%s8003_s3 + $0x38] sm:$0xff]  ;;  %v8181_v46 = vld [vmem:[#allocation10_spill] sm:$0xff] }
 0x266   : > { %8178 = vst [vmem:[#allocation49_spill] sm:$0xff] %v7386_v55  ;;  %5409 = vmatmul.mubr.bf16.gmra.mrb[28].mxu1 %v2292_v60  ;;  %5505 = vmatmul.mubr.bf16.gmra.mrb[28].mxu0 %v2627_v25  ;;  %v8180_v25 = vld [vmem:[#allocation8_spill] sm:$0xff]  ;;  %v2947_v32 = vrot.slane %v8181_v46, 3  ;;  %v2946_v55 = vrot.slane %v8182_v8, 2  ;;  %v2629_v37 = vsel %vm2251_vm4, %v2626_v59, %v2628_v40 }
 0x267   : > { %5412 = vmatprep.mubr.msk.bf16.mxu1 %vm5882_vm0, %v8104_v62  ;;  %5508 = vmatprep.mubr.msk.bf16.mxu0 %vm5882_vm0, %v8104_v62  ;;  %v2943_v57 = vrot.slane %v8180_v25, 2  ;;  %v8184_v25 = vld [vmem:[#allocation18_spill] sm:$0xff] }
 0x268   : > { %3841 = vperm.xlu1 %5746, %v3770_v0   ;;  %3856 = vperm.xlu0 %5745, %v3773_v47   ;;  %v2948_v59 = vor.u32 %v2947_v32, %v2946_v55 }
 0x269   : > { %v1718_v63 = vpop.f32.mrb[180].mxu1  ;;  %v2131_v39 = vpop.f32.mrb[180].mxu0 }
 0x26a   : > { %v1800_v27 = vadd.f32 %v1718_v63, %v7039_v6  ;;  %v7406_v49 = vadd.f32 %v2131_v39, %v1798_v52  ;;  %v5190_v22 = vpop.f32.mrb[181].mxu1  ;;  %v5286_v60 = vpop.f32.mrb[181].mxu0  ;;  %v3772_v52 = vld [vmem:[%s8003_s3 + $0x48] sm:$0xff]  ;;  %v3775_v63 = vld [vmem:[%s8003_s3 + $0x60] sm:$0xff]  ;;  %v2945_v39 = vor.u32 %v2944_v31, %v2943_v57  ;;  %v2950_v57 = vrot.slane %v8184_v25, 2 }
 0x26b   : > { %v1721_v54 = vpop.f32.mrb[182].mxu1  ;;  %v2134_v4 = vpop.f32.mrb[182].mxu0  ;;  %v8183_v22 = vld [vmem:[#allocation12_spill] sm:$0xff] }
 0x26c   : > { %v1801_v0 = vadd.f32 %v1721_v54, %v7046_v48  ;;  %v7413_v47 = vadd.f32 %v2134_v4, %v1799_v24  ;;  %v5287_v11 = vpop.f32.mrb[183].mxu0  ;;  %v5191_v6 = vpop.f32.mrb[183].mxu1  ;;  %3851 = vperm.xlu1 %5746, %v3772_v52   ;;  %3866 = vperm.xlu0 %5745, %v3775_v63   ;;  %v3774_v48 = vld [vmem:[%s8003_s3 + $0x58] sm:$0xff]  ;;  %v3777_v4 = vld [vmem:[%s8003_s3 + $0x70] sm:$0xff]  ;;  %v2951_v60 = vrot.slane %v8183_v22, 3  ;;  %v2949_v8 = vsel %vm2942_vm5, %v2945_v39, %v2948_v59 }
 0x26d   : > { %v3365_v39 = vrot.slane %v7053_v15, 3  ;;  %v8185_v15 = vld [vmem:[#allocation16_spill] sm:$0xff] }
 0x26e   : > { %5413 = vmatmul.mubr.bf16.gmra.mrb[32].mxu1 %v2291_v19  ;;  %5509 = vmatmul.mubr.bf16.gmra.mrb[32].mxu0 %v2629_v37  ;;  %v2955_v22 = vrot.slane %v8185_v15, 3  ;;  %v8187_v15 = vld [vmem:[#allocation24_spill] sm:$0xff] }
 0x26f   : > { %5512 = vmatprep.mubr.msk.bf16.mxu0 %vm5882_vm0, %v8104_v62  ;;  %5532 = vmatprep.mubr.msk.bf16.mxu1 %vm5882_vm0, %v8104_v62 }
 0x270   : > { %3861 = vperm.xlu1 %5746, %v3774_v48   ;;  %3876 = vperm.xlu0 %5745, %v3777_v4   ;;  %v3778_v48 = vld [vmem:[%s8003_s3 + $0x78] sm:$0xff] }
 0x271   : > { %v1726_v54 = vpop.f32.mrb[184].mxu1  ;;  %v2139_v19 = vpop.f32.mrb[184].mxu0 }
 0x272   : > { %v1802_v37 = vadd.f32 %v1726_v54, %v7061_v50  ;;  %v7432_v24 = vadd.f32 %v2139_v19, %v1800_v27  ;;  %v5194_v55 = vpop.f32.mrb[185].mxu1  ;;  %v5290_v31 = vpop.f32.mrb[185].mxu0  ;;  %v3776_v50 = vld [vmem:[%s8003_s3 + $0x68] sm:$0xff]  ;;  %v3779_v27 = vld [vmem:[%s8003_s3 + $0x80] sm:$0xff] }
 0x273   : > { %v1729_v46 = vpop.f32.mrb[186].mxu1  ;;  %v2142_v32 = vpop.f32.mrb[186].mxu0 }
 0x274   : > { %v1803_v11 = vadd.f32 %v1729_v46, %v7068_v18  ;;  %v7438_v6 = vadd.f32 %v2142_v32, %v1801_v0  ;;  %v5291_v52 = vpop.f32.mrb[187].mxu0  ;;  %v5195_v63 = vpop.f32.mrb[187].mxu1  ;;  %3871 = vperm.xlu1 %5746, %v3776_v50   ;;  %3886 = vperm.xlu0 %5745, %v3779_v27   ;;  %v2952_v18 = vor.u32 %v2951_v60, %v2950_v57  ;;  %v3364_v0 = vrot.slane %v7035_v26, 3  ;;  %v8186_v60 = vld [vmem:[#allocation21_spill] sm:$0xff]  ;;  %v3783_v27 = vld [vmem:[%s8003_s3 + $0xa0] sm:$0xff] }
 0x275   : > { %v2954_v25 = vrot.slane %v8186_v60, 2 }
 0x276   : > { %5513 = vmatmul.mubr.bf16.gmra.mrb[36].mxu0 %v2628_v40  ;;  %5533 = vmatmul.mubr.bf16.vlgmr.msra.gmra.mrb[36].mxu1 %v2949_v8  ;;  %v3781_v40 = vld [vmem:[%s8003_s3 + $0x90] sm:$0xff]  ;;  %v2953_v32 = vsel %vm2942_vm5, %v2948_v59, %v2952_v18  ;;  %v3366_v8 = vsel %vm3363_vm6, %v3364_v0, %v3365_v39  ;;  %v3367_v59 = vrot.slane %v7077_v42, 3  ;;  %v2959_v42 = vrot.slane %v8187_v15, 3  ;;  %v8190_v15 = vld [vmem:[#allocation31_spill] sm:$0xff] }
 0x277   : > { %5536 = vmatprep.mubr.msk.bf16.mxu1 %vm5882_vm0, %v8104_v62  ;;  %5632 = vmatprep.mubr.msk.bf16.mxu0 %vm5882_vm0, %v8104_v62  ;;  %v3785_v0 = vld [vmem:[%s8003_s3 + $0xb0] sm:$0xff] }
 0x278   : > { %3881 = vperm.xlu1 %5746, %v3778_v48   ;;  %3896 = vperm.xlu0 %5745, %v3781_v40  }
 0x279   : > { %v1734_v4 = vpop.f32.mrb[188].mxu1  ;;  %v2147_v54 = vpop.f32.mrb[188].mxu0 }
 0x27a   : > { %v1804_v19 = vadd.f32 %v1734_v4, %v7091_v33  ;;  %v7459_v55 = vadd.f32 %v2147_v54, %v1802_v37  ;;  %v5198_v26 = vpop.f32.mrb[189].mxu1  ;;  %v5294_v31 = vpop.f32.mrb[189].mxu0  ;;  %v3780_v37 = vld [vmem:[%s8003_s3 + $0x88] sm:$0xff] }
 0x27b   : > { %v1737_v57 = vpop.f32.mrb[190].mxu1  ;;  %v2150_v46 = vpop.f32.mrb[190].mxu0 }
 0x27c   : > { %v1805_v52 = vadd.f32 %v1737_v57, %v7099_v3  ;;  %v7466_v63 = vadd.f32 %v2150_v46, %v1803_v11  ;;  %v5295_v50 = vpop.f32.mrb[191].mxu0  ;;  %v5199_v33 = vpop.f32.mrb[191].mxu1  ;;  %3891 = vperm.xlu1 %5746, %v3780_v37   ;;  %3906 = vperm.xlu0 %5745, %v3783_v27   ;;  %v2956_v3 = vor.u32 %v2955_v22, %v2954_v25  ;;  %v3782_v11 = vld [vmem:[%s8003_s3 + $0x98] sm:$0xff]  ;;  %v3787_v37 = vld [vmem:[%s8003_s3 + $0xc0] sm:$0xff] }
 0x27d   : > { %v8188_v22 = vld [vmem:[#allocation29_spill] sm:$0xff] }
 0x27e   : > { %5537 = vmatmul.mubr.bf16.gmra.mrb[40].mxu1 %v2953_v32  ;;  %5633 = vmatmul.mubr.bf16.vlgmr.msra.gmra.mrb[40].mxu0 %v3366_v8  ;;  %v2958_v60 = vrot.slane %v8188_v22, 2  ;;  %v2957_v46 = vsel %vm2942_vm5, %v2952_v18, %v2956_v3  ;;  %v3368_v32 = vsel %vm3363_vm6, %v3365_v39, %v3367_v59  ;;  %v3369_v18 = vrot.slane %v7109_v38, 3  ;;  %v3786_v39 = vld [vmem:[%s8003_s3 + $0xb8] sm:$0xff] }
 0x27f   : > { %5540 = vmatprep.mubr.msk.bf16.mxu1 %vm5882_vm0, %v8104_v62  ;;  %5636 = vmatprep.mubr.msk.bf16.mxu0 %vm5882_vm0, %v8104_v62 }
 0x280   : > { %3901 = vperm.xlu1 %5746, %v3782_v11   ;;  %3916 = vperm.xlu0 %5745, %v3785_v0  }
 0x281   : > { %v1742_v48 = vpop.f32.mrb[192].mxu1  ;;  %v2155_v40 = vpop.f32.mrb[192].mxu0 }
 0x282   : > { %v1806_v4 = vadd.f32 %v1742_v48, %v7122_v20  ;;  %v7486_v54 = vadd.f32 %v2155_v40, %v1804_v19  ;;  %v5202_v26 = vpop.f32.mrb[193].mxu1  ;;  %v5298_v31 = vpop.f32.mrb[193].mxu0  ;;  %v3784_v19 = vld [vmem:[%s8003_s3 + $0xa8] sm:$0xff] }
 0x283   : > { %v1745_v25 = vpop.f32.mrb[194].mxu1  ;;  %v2158_v57 = vpop.f32.mrb[194].mxu0  ;;  %v8189_v31 = vld [vmem:[#allocation26_spill] sm:$0xff] }
 0x284   : > { %v1807_v8 = vadd.f32 %v1745_v25, %v7129_v5  ;;  %v7493_v50 = vadd.f32 %v2158_v57, %v1805_v52  ;;  %v5299_v33 = vpop.f32.mrb[195].mxu0  ;;  %v5203_v20 = vpop.f32.mrb[195].mxu1  ;;  %3911 = vperm.xlu1 %5746, %v3784_v19   ;;  %3926 = vperm.xlu0 %5745, %v3787_v37   ;;  %v2960_v5 = vor.u32 %v2959_v42, %v2958_v60  ;;  %v3789_v52 = vld [vmem:[%s8003_s3 + $0xd0] sm:$0xff]  ;;  %v2963_v38 = vrot.slane %v8189_v31, 3 }
 0x285   : > { %v2962_v42 = vrot.slane %v8190_v15, 2  ;;  %v3370_v57 = vsel %vm3363_vm6, %v3367_v59, %v3369_v18  ;;  %v3791_v20 = vld [vmem:[%s8003_s3 + $0xe0] sm:$0xff]  ;;  %v3793_v19 = vld [vmem:[%s8003_s3 + $0xf0] sm:$0xff] }
 0x286   : > { %5541 = vmatmul.mubr.bf16.gmra.mrb[44].mxu1 %v2957_v46  ;;  %5637 = vmatmul.mubr.bf16.gmra.mrb[44].mxu0 %v3368_v32  ;;  %v2961_v25 = vsel %vm2942_vm5, %v2956_v3, %v2960_v5  ;;  %v8191_v3 = vld [vmem:[#allocation38_spill] sm:$0xff] }
 0x287   : > { %5544 = vmatprep.mubr.msk.bf16.mxu1 %vm5882_vm0, %v8104_v62  ;;  %5640 = vmatprep.mubr.msk.bf16.mxu0 %vm5882_vm0, %v8104_v62  ;;  %v3371_v59 = vrot.slane %v8191_v3, 3 }
 0x288   : > { %3921 = vperm.xlu1 %5746, %v3786_v39   ;;  %3936 = vperm.xlu0 %5745, %v3789_v52  }
 0x289   : > { %v1750_v27 = vpop.f32.mrb[196].mxu1  ;;  %v2163_v11 = vpop.f32.mrb[196].mxu0 }
 0x28a   : > { %v1808_v0 = vadd.f32 %v1750_v27, %v7153_v53  ;;  %v7513_v48 = vadd.f32 %v2163_v11, %v1806_v4  ;;  %v5206_v40 = vpop.f32.mrb[197].mxu1  ;;  %v5302_v26 = vpop.f32.mrb[197].mxu0  ;;  %v3788_v4 = vld [vmem:[%s8003_s3 + $0xc8] sm:$0xff] }
 0x28b   : > { %v1753_v22 = vpop.f32.mrb[198].mxu1  ;;  %v2166_v60 = vpop.f32.mrb[198].mxu0  ;;  %v8192_v26 = vld [vmem:[#allocation28_spill] sm:$0xff] }
 0x28c   : > { %v1809_v46 = vadd.f32 %v1753_v22, %v7160_v44  ;;  %v7520_v32 = vadd.f32 %v2166_v60, %v1807_v8  ;;  %v5303_v33 = vpop.f32.mrb[199].mxu0  ;;  %v5207_v53 = vpop.f32.mrb[199].mxu1  ;;  %3931 = vperm.xlu1 %5746, %v3788_v4   ;;  %3946 = vperm.xlu0 %5745, %v3791_v20   ;;  %v2964_v44 = vor.u32 %v2963_v38, %v2962_v42  ;;  %v3790_v8 = vld [vmem:[%s8003_s3 + $0xd8] sm:$0xff]  ;;  %v2967_v31 = vrot.slane %v8192_v26, 3  ;;  %v8193_v38 = vld [vmem:[#allocation34_spill] sm:$0xff]  ;;  %v3797_v20 = vld [vmem:[%s8003_s3 + $0x110] sm:$0xff] }
 0x28d   : > { %v2966_v15 = vrot.slane %v8193_v38, 2  ;;  %v3795_v4 = vld [vmem:[%s8003_s3 + $0x100] sm:$0xff]  ;;  %v8196_v26 = vld [vmem:[#allocation36_spill] sm:$0xff]  ;;  %v8197_v38 = vld [vmem:[#allocation37_spill] sm:$0xff] }
 0x28e   : > { %5545 = vmatmul.mubr.bf16.gmra.mrb[48].mxu1 %v2961_v25  ;;  %5641 = vmatmul.mubr.bf16.gmra.mrb[48].mxu0 %v3370_v57  ;;  %v2965_v60 = vsel %vm2942_vm5, %v2960_v5, %v2964_v44  ;;  %v3372_v25 = vsel %vm3363_vm6, %v3369_v18, %v3371_v59  ;;  %v8194_v5 = vld [vmem:[#allocation40_spill] sm:$0xff] }
 0x28f   : > { %5548 = vmatprep.mubr.msk.bf16.mxu1 %vm5882_vm0, %v8104_v62  ;;  %5644 = vmatprep.mubr.msk.bf16.mxu0 %vm5882_vm0, %v8104_v62  ;;  %v3373_v18 = vrot.slane %v8194_v5, 3  ;;  %v3798_v5 = vld [vmem:[%s8003_s3 + $0x118] sm:$0xff] }
 0x290   : > { %3941 = vperm.xlu1 %5746, %v3790_v8   ;;  %3956 = vperm.xlu0 %5745, %v3793_v19   ;;  %v8195_v19 = vld [vmem:[#allocation39_spill] sm:$0xff] }
 0x291   : > { %v1758_v37 = vpop.f32.mrb[200].mxu1  ;;  %v2171_v39 = vpop.f32.mrb[200].mxu0 }
 0x292   : > { %v1810_v52 = vadd.f32 %v1758_v37, %v7176_v21  ;;  %v7540_v27 = vadd.f32 %v2171_v39, %v1808_v0  ;;  %v5210_v11 = vpop.f32.mrb[201].mxu1  ;;  %v5306_v40 = vpop.f32.mrb[201].mxu0  ;;  %v3792_v0 = vld [vmem:[%s8003_s3 + $0xe8] sm:$0xff] }
 0x293   : > { %v1761_v42 = vpop.f32.mrb[202].mxu1  ;;  %v2174_v22 = vpop.f32.mrb[202].mxu0 }
 0x294   : > { %v1811_v57 = vadd.f32 %v1761_v42, %v7179_v58  ;;  %v7547_v33 = vadd.f32 %v2174_v22, %v1809_v46  ;;  %v5307_v53 = vpop.f32.mrb[203].mxu0  ;;  %v5211_v21 = vpop.f32.mrb[203].mxu1  ;;  %3951 = vperm.xlu1 %5746, %v3792_v0   ;;  %3966 = vperm.xlu0 %5745, %v3795_v4   ;;  %v2968_v58 = vor.u32 %v2967_v31, %v2966_v15  ;;  %v3794_v46 = vld [vmem:[%s8003_s3 + $0xf8] sm:$0xff]  ;;  %v2971_v31 = vrot.slane %v8196_v26, 3  ;;  %v3799_v4 = vld [vmem:[%s8003_s3 + $0x120] sm:$0xff]  ;;  %v8199_v26 = vld [vmem:[#allocation20_spill] sm:$0xff] }
 0x295   : > { %v2970_v15 = vrot.slane %v8197_v38, 2  ;;  %v8200_v38 = vld [vmem:[#allocation23_spill] sm:$0xff] }
 0x296   : > { %5549 = vmatmul.mubr.bf16.gmra.mrb[52].mxu1 %v2965_v60  ;;  %5645 = vmatmul.mubr.bf16.gmra.mrb[52].mxu0 %v3372_v25  ;;  %v2969_v22 = vsel %vm2942_vm5, %v2964_v44, %v2968_v58  ;;  %v3374_v60 = vsel %vm3363_vm6, %v3371_v59, %v3373_v18  ;;  %v8198_v59 = vld [vmem:[#allocation43_spill] sm:$0xff] }
 0x297   : > { %5552 = vmatprep.mubr.msk.bf16.mxu1 %vm5882_vm0, %v8104_v62  ;;  %5648 = vmatprep.mubr.msk.bf16.mxu0 %vm5882_vm0, %v8104_v62  ;;  %v2972_v44 = vor.u32 %v2971_v31, %v2970_v15  ;;  %v2975_v31 = vrot.slane %v8199_v26, 3  ;;  %v2974_v15 = vrot.slane %v8200_v38, 2  ;;  %v8203_v38 = vld [vmem:[#allocation2_spill] sm:$0xff] }
 0x298   : > { %3961 = vperm.xlu1 %5746, %v3794_v46   ;;  %3976 = vperm.xlu0 %5745, %v3797_v20   ;;  %v3801_v46 = vld [vmem:[%s8003_s3 + $0x130] sm:$0xff] }
 0x299   : > { %v1766_v3 = vpop.f32.mrb[204].mxu1  ;;  %v2179_v8 = vpop.f32.mrb[204].mxu0 }
 0x29a   : > { %v1812_v37 = vadd.f32 %v1766_v3, %v8195_v19  ;;  %v7567_v39 = vadd.f32 %v2179_v8, %v1810_v52  ;;  %v5310_v11 = vpop.f32.mrb[205].mxu0  ;;  %v5214_v40 = vpop.f32.mrb[205].mxu1  ;;  %v3796_v52 = vld [vmem:[%s8003_s3 + $0x108] sm:$0xff] }
 0x29b   : > { %v2182_v42 = vpop.f32.mrb[206].mxu0  ;;  %v1769_v25 = vpop.f32.mrb[206].mxu1 }
 0x29c   : > { %v7573_v53 = vadd.f32 %v2182_v42, %v1811_v57  ;;  %v5311_v21 = vpop.f32.mrb[207].mxu0  ;;  %v5215_v0 = vpop.f32.mrb[207].mxu1  ;;  %3971 = vperm.xlu1 %5746, %v3796_v52   ;;  %3986 = vperm.xlu0 %5745, %v3799_v4   ;;  %v3375_v57 = vrot.slane %v8198_v59, 3  ;;  %v3802_v4 = vld [vmem:[%s8003_s3 + $0x138] sm:$0xff] }
 0x29e   : > { %5553 = vmatmul.mubr.bf16.gmra.mrb[56].mxu1 %v2969_v22  ;;  %5649 = vmatmul.mubr.bf16.gmra.mrb[56].mxu0 %v3374_v60  ;;  %v2973_v60 = vsel %vm2942_vm5, %v2968_v58, %v2972_v44  ;;  %v3376_v25 = vsel %vm3363_vm6, %v3373_v18, %v3375_v57  ;;  %v8201_v58 = vld [vmem:[#allocation41_spill] sm:$0xff] }
 0x29f   : > { %5556 = vmatprep.mubr.msk.bf16.mxu1 %vm5882_vm0, %v8104_v62  ;;  %5652 = vmatprep.mubr.msk.bf16.mxu0 %vm5882_vm0, %v8104_v62  ;;  %v3377_v18 = vrot.slane %v8201_v58, 3 }
 0x2a0   : > { %3981 = vperm.xlu1 %5746, %v3798_v5   ;;  %3996 = vperm.xlu0 %5745, %v3801_v46  }
 0x2a1   : > { %v2187_v20 = vpop.f32.mrb[208].mxu0  ;;  %v2396_v3 = vpop.f32.mrb[208].mxu1 }
 0x2a2   : > { %v7592_v8 = vadd.f32 %v2187_v20, %v1812_v37  ;;  %v2562_v19 = vadd.f32 %v2396_v3, %v7203_v28  ;;  %v5314_v11 = vpop.f32.mrb[209].mxu0  ;;  %v5334_v40 = vpop.f32.mrb[209].mxu1  ;;  %v3800_v28 = vld [vmem:[%s8003_s3 + $0x128] sm:$0xff]  ;;  %v3803_v37 = vld [vmem:[%s8003_s3 + $0x140] sm:$0xf] }
 0x2a3   : > { %v2190_v42 = vpop.f32.mrb[210].mxu0  ;;  %v2399_v22 = vpop.f32.mrb[210].mxu1  ;;  %v8202_v40 = vld [vmem:[#allocation3_spill] sm:$0xff] }
 0x2a4   : > { %v2563_v21 = vadd.f32 %v2399_v22, %v7207_v1  ;;  %v5315_v0 = vpop.f32.mrb[211].mxu0  ;;  %v5335_v52 = vpop.f32.mrb[211].mxu1  ;;  %3991 = vperm.xlu1 %5746, %v3800_v28   ;;  %4006 = vperm.xlu0 %5745, %v3803_v37   ;;  %v2976_v1 = vor.u32 %v2975_v31, %v2974_v15  ;;  %v2978_v26 = vrot.slane %v8202_v40, 2  ;;  %v2979_v42 = vrot.slane %v8203_v38, 3  ;;  %v8204_v28 = vld [vmem:[#allocation47_spill] sm:$0xff] }
 0x2a5   : > { %v3379_v37 = vrot.slane %v8204_v28, 3 }
 0x2a6   : > { %5557 = vmatmul.mubr.bf16.gmra.mrb[60].mxu1 %v2973_v60  ;;  %5653 = vmatmul.mubr.bf16.gmra.mrb[60].mxu0 %v3376_v25  ;;  %v2977_v22 = vsel %vm2942_vm5, %v2972_v44, %v2976_v1  ;;  %v3378_v60 = vsel %vm3363_vm6, %v3375_v57, %v3377_v18 }
 0x2a7   : > { %5560 = vmatprep.mubr.msk.bf16.mxu1 %vm5882_vm0, %v8104_v62  ;;  %5656 = vmatprep.mubr.msk.bf16.mxu0 %vm5882_vm0, %v8104_v62 }
 0x2a8   : > { %4001 = vperm.xlu1 %5746, %v3802_v4  }
 0x2a9   : > { %v2404_v59 = vpop.f32.mrb[212].mxu1  ;;  %v2715_v5 = vpop.f32.mrb[212].mxu0 }
 0x2aa   : > { %v2564_v46 = vadd.f32 %v2404_v59, %v7218_v41  ;;  %v7615_v20 = vadd.f32 %v2715_v5, %v2562_v19  ;;  %v5338_v3 = vpop.f32.mrb[213].mxu1  ;;  %v5434_v11 = vpop.f32.mrb[213].mxu0  ;;  %v2980_v19 = vor.u32 %v2979_v42, %v2978_v26  ;;  %v8205_v59 = vld [vmem:[#allocation4_spill] sm:$0xff]  ;;  %v3380_v26 = vsel %vm3363_vm6, %v3377_v18, %v3379_v37 }
 0x2ab   : > { %v2407_v31 = vpop.f32.mrb[214].mxu1  ;;  %v2718_v15 = vpop.f32.mrb[214].mxu0  ;;  %v2983_v5 = vrot.slane %v8205_v59, 3  ;;  %v8206_v3 = vld [vmem:[#allocation6_spill] sm:$0xff] }
 0x2ac   : > { %v2565_v25 = vadd.f32 %v2407_v31, %v7222_v51  ;;  %v7622_v0 = vadd.f32 %v2718_v15, %v2563_v21  ;;  %v5435_v52 = vpop.f32.mrb[215].mxu0  ;;  %v5339_v41 = vpop.f32.mrb[215].mxu1  ;;  %v2982_v11 = vrot.slane %v8206_v3, 2  ;;  %v2981_v31 = vsel %vm2942_vm5, %v2976_v1, %v2980_v19 }
 0x2ae   : > { %5561 = vmatmul.mubr.bf16.gmra.mrb[64].mxu1 %v2977_v22  ;;  %5657 = vmatmul.mubr.bf16.gmra.mrb[64].mxu0 %v3378_v60  ;;  %v8207_v60 = vld [vmem:[#allocation42_spill] sm:$0xff] }
 0x2af   : > { %5564 = vmatprep.mubr.msk.bf16.mxu1 %vm5882_vm0, %v8104_v62  ;;  %5660 = vmatprep.mubr.msk.bf16.mxu0 %vm5882_vm0, %v8104_v62  ;;  %v3381_v52 = vrot.slane %v8207_v60, 3 }
 0x2b1   : > { %v2412_v44 = vpop.f32.mrb[216].mxu1  ;;  %v2723_v58 = vpop.f32.mrb[216].mxu0 }
 0x2b2   : > { %v2566_v57 = vadd.f32 %v2412_v44, %v7233_v45  ;;  %v7630_v51 = vadd.f32 %v2723_v58, %v2564_v46  ;;  %v5342_v21 = vpop.f32.mrb[217].mxu1  ;;  %v5438_v4 = vpop.f32.mrb[217].mxu0  ;;  %v2984_v46 = vor.u32 %v2983_v5, %v2982_v11  ;;  %v8208_v44 = vld [vmem:[#allocation7_spill] sm:$0xff]  ;;  %v3382_v5 = vsel %vm3363_vm6, %v3379_v37, %v3381_v52  ;;  %v8210_v11 = vld [vmem:[#allocation45_spill] sm:$0xff] }
 0x2b3   : > { %v2415_v40 = vpop.f32.mrb[218].mxu1  ;;  %v2726_v38 = vpop.f32.mrb[218].mxu0  ;;  %v2987_v58 = vrot.slane %v8208_v44, 3  ;;  %v8209_v21 = vld [vmem:[#allocation9_spill] sm:$0xff]  ;;  %v8212_v44 = vld [vmem:[#allocation15_spill] sm:$0xff] }
 0x2b4   : > { %v2567_v42 = vadd.f32 %v2415_v40, %v7237_v12  ;;  %v7637_v15 = vadd.f32 %v2726_v38, %v2565_v25  ;;  %v5439_v22 = vpop.f32.mrb[219].mxu0  ;;  %v5343_v45 = vpop.f32.mrb[219].mxu1  ;;  %v2986_v4 = vrot.slane %v8209_v21, 2  ;;  %v2985_v40 = vsel %vm2942_vm5, %v2980_v19, %v2984_v46 }
 0x2b5   : > { %v5864_v22 = vld [vmem:[%s5947_s29 + $0x60] sm:$0xff]   ;;  %v2990_v21 = vrot.slane %v8212_v44, 2 }
 0x2b6   : > { %5565 = vmatmul.mubr.bf16.gmra.mrb[68].mxu1 %v2981_v31  ;;  %5661 = vmatmul.mubr.bf16.gmra.mrb[68].mxu0 %v3380_v26  ;;  %v2988_v26 = vor.u32 %v2987_v58, %v2986_v4  ;;  %v3383_v45 = vrot.slane %v5864_v22, 3 }
 0x2b7   : > { %5568 = vmatprep.mubr.msk.bf16.mxu1 %vm5882_vm0, %v8104_v62  ;;  %5664 = vmatprep.mubr.msk.bf16.mxu0 %vm5882_vm0, %v8104_v62 }
 0x2b8   : > { %v3384_v58 = vsel %vm3363_vm6, %v3381_v52, %v3383_v45 }
 0x2b9   : > { %v2420_v1 = vpop.f32.mrb[220].mxu1  ;;  %v2731_v41 = vpop.f32.mrb[220].mxu0 }
 0x2ba   : > { %v2568_v18 = vadd.f32 %v2420_v1, %v7245_v7  ;;  %v7645_v12 = vadd.f32 %v2731_v41, %v2566_v57  ;;  %v5346_v25 = vpop.f32.mrb[221].mxu1  ;;  %v5442_v28 = vpop.f32.mrb[221].mxu0 }
 0x2bb   : > { %v2423_v59 = vpop.f32.mrb[222].mxu1  ;;  %v2734_v3 = vpop.f32.mrb[222].mxu0  ;;  %v8211_v25 = vld [vmem:[#allocation11_spill] sm:$0xff] }
 0x2bc   : > { %v2569_v38 = vadd.f32 %v2423_v59, %v8210_v11  ;;  %v7652_v31 = vadd.f32 %v2734_v3, %v2567_v42  ;;  %v5443_v7 = vpop.f32.mrb[223].mxu0  ;;  %v5347_v57 = vpop.f32.mrb[223].mxu1  ;;  %v2991_v28 = vrot.slane %v8211_v25, 3 }
 0x2bd   : > { %v5865_v7 = vld [vmem:[%s5947_s29 + $0x68] sm:$0xff]  }
 0x2be   : > { %5569 = vmatmul.mubr.bf16.gmra.mrb[72].mxu1 %v2985_v40  ;;  %5665 = vmatmul.mubr.bf16.gmra.mrb[72].mxu0 %v3382_v5  ;;  %v2989_v40 = vsel %vm2942_vm5, %v2984_v46, %v2988_v26  ;;  %v2992_v11 = vor.u32 %v2991_v28, %v2990_v21  ;;  %v3385_v57 = vrot.slane %v5865_v7, 3 }
 0x2bf   : > { %5572 = vmatprep.mubr.msk.bf16.mxu1 %vm5882_vm0, %v8104_v62  ;;  %5668 = vmatprep.mubr.msk.bf16.mxu0 %vm5882_vm0, %v8104_v62 }
 0x2c0   : > { %v3386_v28 = vsel %vm3363_vm6, %v3383_v45, %v3385_v57 }
 0x2c1   : > { %v2428_v19 = vpop.f32.mrb[224].mxu1  ;;  %v2739_v60 = vpop.f32.mrb[224].mxu0 }
 0x2c2   : > { %v2570_v37 = vadd.f32 %v2428_v19, %v7257_v17  ;;  %v7660_v1 = vadd.f32 %v2739_v60, %v2568_v18  ;;  %v5350_v42 = vpop.f32.mrb[225].mxu1  ;;  %v5446_v41 = vpop.f32.mrb[225].mxu0  ;;  %v8213_v60 = vld [vmem:[#allocation13_spill] sm:$0xff] }
 0x2c3   : > { %v2431_v59 = vpop.f32.mrb[226].mxu1  ;;  %v2742_v3 = vpop.f32.mrb[226].mxu0  ;;  %v2995_v42 = vrot.slane %v8213_v60, 3  ;;  %v8214_v41 = vld [vmem:[#allocation19_spill] sm:$0xff] }
 0x2c4   : > { %v2571_v4 = vadd.f32 %v2431_v59, %v7261_v43  ;;  %v7667_v5 = vadd.f32 %v2742_v3, %v2569_v38  ;;  %v5447_v17 = vpop.f32.mrb[227].mxu0  ;;  %v5351_v18 = vpop.f32.mrb[227].mxu1  ;;  %v2994_v25 = vrot.slane %v8214_v41, 2  ;;  %v2993_v3 = vsel %vm2942_vm5, %v2988_v26, %v2992_v11 }
 0x2c5   : > { %v5866_v17 = vld [vmem:[%s5947_s29 + $0x70] sm:$0xff]  }
 0x2c6   : > { %5573 = vmatmul.mubr.bf16.gmra.mrb[76].mxu1 %v2989_v40  ;;  %5669 = vmatmul.mubr.bf16.gmra.mrb[76].mxu0 %v3384_v58  ;;  %v2996_v58 = vor.u32 %v2995_v42, %v2994_v25  ;;  %v3387_v18 = vrot.slane %v5866_v17, 3 }
 0x2c7   : > { %5576 = vmatprep.mubr.msk.bf16.mxu1 %vm5882_vm0, %v8104_v62  ;;  %5672 = vmatprep.mubr.msk.bf16.mxu0 %vm5882_vm0, %v8104_v62 }
 0x2c8   : > { %v3388_v42 = vsel %vm3363_vm6, %v3385_v57, %v3387_v18 }
 0x2c9   : > { %v2436_v46 = vpop.f32.mrb[228].mxu1  ;;  %v2747_v22 = vpop.f32.mrb[228].mxu0 }
 0x2ca   : > { %v2572_v52 = vadd.f32 %v2436_v46, %v7269_v35  ;;  %v7675_v43 = vadd.f32 %v2747_v22, %v2570_v37  ;;  %v5354_v38 = vpop.f32.mrb[229].mxu1  ;;  %v5450_v19 = vpop.f32.mrb[229].mxu0  ;;  %v8215_v22 = vld [vmem:[#allocation17_spill] sm:$0xff] }
 0x2cb   : > { %v2439_v44 = vpop.f32.mrb[230].mxu1  ;;  %v2750_v59 = vpop.f32.mrb[230].mxu0  ;;  %v2999_v38 = vrot.slane %v8215_v22, 3  ;;  %v8216_v19 = vld [vmem:[#allocation22_spill] sm:$0xff] }
 0x2cc   : > { %v2573_v21 = vadd.f32 %v2439_v44, %v7273_v9  ;;  %v7682_v40 = vadd.f32 %v2750_v59, %v2571_v4  ;;  %v5451_v35 = vpop.f32.mrb[231].mxu0  ;;  %v5355_v37 = vpop.f32.mrb[231].mxu1  ;;  %v2998_v60 = vrot.slane %v8216_v19, 2  ;;  %v2997_v59 = vsel %vm2942_vm5, %v2992_v11, %v2996_v58 }
 0x2cd   : > { %v5867_v35 = vld [vmem:[%s5947_s29 + $0x78] sm:$0xff]  }
 0x2ce   : > { %5577 = vmatmul.mubr.bf16.gmra.mrb[80].mxu1 %v2993_v3  ;;  %5673 = vmatmul.mubr.bf16.gmra.mrb[80].mxu0 %v3386_v28  ;;  %v3000_v28 = vor.u32 %v2999_v38, %v2998_v60  ;;  %v3389_v37 = vrot.slane %v5867_v35, 3 }
 0x2cf   : > { %5580 = vmatprep.mubr.msk.bf16.mxu1 %vm5882_vm0, %v8104_v62  ;;  %5676 = vmatprep.mubr.msk.bf16.mxu0 %vm5882_vm0, %v8104_v62 }
 0x2d0   : > { %v3390_v38 = vsel %vm3363_vm6, %v3387_v18, %v3389_v37 }
 0x2d1   : > { %v2444_v26 = vpop.f32.mrb[232].mxu1  ;;  %v2755_v7 = vpop.f32.mrb[232].mxu0 }
 0x2d2   : > { %v2574_v45 = vadd.f32 %v2444_v26, %v7281_v56  ;;  %v7690_v9 = vadd.f32 %v2755_v7, %v2572_v52  ;;  %v5358_v4 = vpop.f32.mrb[233].mxu1  ;;  %v5454_v46 = vpop.f32.mrb[233].mxu0  ;;  %v8217_v7 = vld [vmem:[#allocation25_spill] sm:$0xff] }
 0x2d3   : > { %v2447_v41 = vpop.f32.mrb[234].mxu1  ;;  %v2758_v44 = vpop.f32.mrb[234].mxu0  ;;  %v3003_v4 = vrot.slane %v8217_v7, 3  ;;  %v8218_v46 = vld [vmem:[#allocation30_spill] sm:$0xff] }
 0x2d4   : > { %v2575_v25 = vadd.f32 %v2447_v41, %v7285_v23  ;;  %v7697_v3 = vadd.f32 %v2758_v44, %v2573_v21  ;;  %v5455_v56 = vpop.f32.mrb[235].mxu0  ;;  %v5359_v52 = vpop.f32.mrb[235].mxu1  ;;  %v3002_v22 = vrot.slane %v8218_v46, 2  ;;  %v3001_v44 = vsel %vm2942_vm5, %v2996_v58, %v3000_v28 }
 0x2d5   : > { %v5868_v56 = vld [vmem:[%s5947_s29 + $0x80] sm:$0xff]  }
 0x2d6   : > { %5581 = vmatmul.mubr.bf16.gmra.mrb[84].mxu1 %v2997_v59  ;;  %5677 = vmatmul.mubr.bf16.gmra.mrb[84].mxu0 %v3388_v42  ;;  %v3004_v42 = vor.u32 %v3003_v4, %v3002_v22  ;;  %v3391_v52 = vrot.slane %v5868_v56, 3 }
 0x2d7   : > { %5584 = vmatprep.mubr.msk.bf16.mxu1 %vm5882_vm0, %v8104_v62  ;;  %5680 = vmatprep.mubr.msk.bf16.mxu0 %vm5882_vm0, %v8104_v62 }
 0x2d8   : > { %v3392_v4 = vsel %vm3363_vm6, %v3389_v37, %v3391_v52 }
 0x2d9   : > { %v2452_v11 = vpop.f32.mrb[236].mxu1  ;;  %v2763_v17 = vpop.f32.mrb[236].mxu0 }
 0x2da   : > { %v2576_v57 = vadd.f32 %v2452_v11, %v7293_v29  ;;  %v7705_v23 = vadd.f32 %v2763_v17, %v2574_v45  ;;  %v5362_v21 = vpop.f32.mrb[237].mxu1  ;;  %v5458_v26 = vpop.f32.mrb[237].mxu0  ;;  %v8219_v17 = vld [vmem:[#allocation27_spill] sm:$0xff] }
 0x2db   : > { %v2455_v19 = vpop.f32.mrb[238].mxu1  ;;  %v2766_v41 = vpop.f32.mrb[238].mxu0  ;;  %v3007_v21 = vrot.slane %v8219_v17, 3  ;;  %v8220_v26 = vld [vmem:[#allocation32_spill] sm:$0xff] }
 0x2dc   : > { %v2577_v60 = vadd.f32 %v2455_v19, %v7297_v14  ;;  %v7712_v59 = vadd.f32 %v2766_v41, %v2575_v25  ;;  %v5459_v29 = vpop.f32.mrb[239].mxu0  ;;  %v5363_v45 = vpop.f32.mrb[239].mxu1  ;;  %v3006_v7 = vrot.slane %v8220_v26, 2  ;;  %v3005_v41 = vsel %vm2942_vm5, %v3000_v28, %v3004_v42 }
 0x2dd   : > { %v5869_v29 = vld [vmem:[%s5947_s29 + $0x88] sm:$0xff]  }
 0x2de   : > { %5585 = vmatmul.mubr.bf16.gmra.mrb[88].mxu1 %v3001_v44  ;;  %5681 = vmatmul.mubr.bf16.gmra.mrb[88].mxu0 %v3390_v38  ;;  %v3008_v38 = vor.u32 %v3007_v21, %v3006_v7  ;;  %v3393_v45 = vrot.slane %v5869_v29, 3 }
 0x2df   : > { %5588 = vmatprep.mubr.msk.bf16.mxu1 %vm5882_vm0, %v8104_v62  ;;  %5684 = vmatprep.mubr.msk.bf16.mxu0 %vm5882_vm0, %v8104_v62 }
 0x2e0   : > { %v3394_v21 = vsel %vm3363_vm6, %v3391_v52, %v3393_v45 }
 0x2e1   : > { %v2460_v58 = vpop.f32.mrb[240].mxu1  ;;  %v2771_v35 = vpop.f32.mrb[240].mxu0 }
 0x2e2   : > { %v2578_v18 = vadd.f32 %v2460_v58, %v7305_v16  ;;  %v7720_v14 = vadd.f32 %v2771_v35, %v2576_v57  ;;  %v5366_v25 = vpop.f32.mrb[241].mxu1  ;;  %v5462_v11 = vpop.f32.mrb[241].mxu0  ;;  %v8221_v35 = vld [vmem:[#allocation33_spill] sm:$0xff] }
 0x2e3   : > { %v2463_v46 = vpop.f32.mrb[242].mxu1  ;;  %v2774_v19 = vpop.f32.mrb[242].mxu0  ;;  %v3011_v25 = vrot.slane %v8221_v35, 3  ;;  %v8222_v11 = vld [vmem:[#allocation35_spill] sm:$0xff] }
 0x2e4   : > { %v2579_v22 = vadd.f32 %v2463_v46, %v7309_v13  ;;  %v7727_v44 = vadd.f32 %v2774_v19, %v2577_v60  ;;  %v5463_v16 = vpop.f32.mrb[243].mxu0  ;;  %v5367_v57 = vpop.f32.mrb[243].mxu1  ;;  %v3010_v17 = vrot.slane %v8222_v11, 2  ;;  %v3009_v19 = vsel %vm2942_vm5, %v3004_v42, %v3008_v38 }
 0x2e5   : > { %v5870_v16 = vld [vmem:[%s5947_s29 + $0x90] sm:$0xff]  }
 0x2e6   : > { %5589 = vmatmul.mubr.bf16.gmra.mrb[92].mxu1 %v3005_v41  ;;  %5685 = vmatmul.mubr.bf16.gmra.mrb[92].mxu0 %v3392_v4  ;;  %v3012_v4 = vor.u32 %v3011_v25, %v3010_v17  ;;  %v3395_v57 = vrot.slane %v5870_v16, 3 }
 0x2e7   : > { %5592 = vmatprep.mubr.msk.bf16.mxu1 %vm5882_vm0, %v8104_v62  ;;  %5688 = vmatprep.mubr.msk.bf16.mxu0 %vm5882_vm0, %v8104_v62 }
 0x2e8   : > { %v3396_v35 = vsel %vm3363_vm6, %v3393_v45, %v3395_v57  ;;  %v3022_v45 = vshll.u32 %v7351_v36, 16 }
 0x2e9   : > { %v2468_v28 = vpop.f32.mrb[244].mxu1  ;;  %v2779_v56 = vpop.f32.mrb[244].mxu0 }
 0x2ea   : > { %v2580_v37 = vadd.f32 %v2468_v28, %v7317_v30  ;;  %v7735_v13 = vadd.f32 %v2779_v56, %v2578_v18  ;;  %v5370_v60 = vpop.f32.mrb[245].mxu1  ;;  %v5466_v58 = vpop.f32.mrb[245].mxu0 }
 0x2eb   : > { %v2471_v26 = vpop.f32.mrb[246].mxu1  ;;  %v2782_v46 = vpop.f32.mrb[246].mxu0  ;;  %v3013_v58 = vsel %vm2942_vm5, %v3008_v38, %v3012_v4  ;;  %v3019_v38 = vshrl.u32 %v7351_v36, 16 }
 0x2ec   : > { %v2581_v7 = vadd.f32 %v2471_v26, %v7321_v34  ;;  %v7742_v41 = vadd.f32 %v2782_v46, %v2579_v22  ;;  %v5467_v30 = vpop.f32.mrb[247].mxu0  ;;  %v5371_v18 = vpop.f32.mrb[247].mxu1 }
 0x2ee   : > { %5593 = vmatmul.mubr.bf16.gmra.mrb[96].mxu1 %v3009_v19  ;;  %5689 = vmatmul.mubr.bf16.gmra.mrb[96].mxu0 %v3394_v21 }
 0x2ef   : > { %5596 = vmatprep.mubr.msk.bf16.mxu1 %vm5882_vm0, %v8104_v62  ;;  %5692 = vmatprep.mubr.msk.bf16.mxu0 %vm5882_vm0, %v8104_v62 }
 0x2f1   : > { %v2476_v42 = vpop.f32.mrb[248].mxu1  ;;  %v2787_v52 = vpop.f32.mrb[248].mxu0 }
 0x2f2   : > { %v2582_v34 = vadd.f32 %v2476_v42, %v7329_v61  ;;  %v7750_v22 = vadd.f32 %v2787_v52, %v2580_v37  ;;  %v5374_v29 = vpop.f32.mrb[249].mxu1  ;;  %v5470_v28 = vpop.f32.mrb[249].mxu0  ;;  %v282_v61 = vld [vmem:[%s5947_s29 + $0xb4] sm:$0x1]  ;;  %v5871_v37 = vld [vmem:[%s5947_s29 + $0x98] sm:$0xff]   ;;  %s5733_s29 = smul.u32 328, %s8234_s19 }
 0x2f3   : > { %v2479_v56 = vpop.f32.mrb[250].mxu1  ;;  %v2790_v60 = vpop.f32.mrb[250].mxu0  ;;  %v3397_v46 = vrot.slane %v5871_v37, 3  ;;  %v7766_v21 = vcombine.low %v7373_v10, %v282_v61  ;;  %v8225_v28 = vld [vmem:[#allocation58_spill] sm:$0xff] }
 0x2f4   : > { %v2583_v25 = vadd.f32 %v2479_v56, %v7336_v2  ;;  %v7755_v11 = vadd.f32 %v2790_v60, %v2581_v7  ;;  %v5471_v17 = vpop.f32.mrb[251].mxu0  ;;  %v5375_v26 = vpop.f32.mrb[251].mxu1  ;;  %v8223_v7 = vld [vmem:[#allocation44_spill] sm:$0xff]  ;;  %v3017_v56 = vsel %vm2942_vm5, %v3012_v4, %v8225_v28  ;;  %v8228_v4 = vld [vmem:[#allocation57_spill] sm:$0xff]  ;;  %s7869_s9 = scalar_lea.vmem %s8004_s4, %s5733_s29 }
 0x2f5   : > { %v3398_v60 = vsel %vm3363_vm6, %v3395_v57, %v3397_v46  ;;  %v8226_v17 = vld [vmem:[#allocation46_spill] sm:$0xff]  ;;  %v3028_v57 = vshrl.u32 %v7766_v21, 16 }
 0x2f6   : > { %5597 = vmatmul.mubr.bf16.gmra.mrb[100].mxu1 %v3013_v58  ;;  %5693 = vmatmul.mubr.bf16.gmra.mrb[100].mxu0 %v3396_v35  ;;  %v3021_v58 = vrot.slane %v3019_v38, 2  ;;  %v3024_v35 = vrot.slane %v3022_v45, 3  ;;  %v3031_v38 = vshll.u32 %v7766_v21, 16 }
 0x2f7   : > { %5600 = vmatprep.mubr.msk.bf16.mxu1 %vm5882_vm0, %v8104_v62  ;;  %5696 = vmatprep.mubr.msk.bf16.mxu0 %vm5882_vm0, %v8104_v62 }
 0x2f9   : > { %v2484_v2 = vpop.f32.mrb[252].mxu1  ;;  %v2795_v19 = vpop.f32.mrb[252].mxu0 }
 0x2fa   : > { %v2584_v30 = vadd.f32 %v2484_v2, %v8223_v7  ;;  %v7769_v18 = vadd.f32 %v2795_v19, %v2582_v34  ;;  %v5378_v16 = vpop.f32.mrb[253].mxu1  ;;  %v5474_v42 = vpop.f32.mrb[253].mxu0  ;;  %v3025_v34 = vor.u32 %v3024_v35, %v3021_v58  ;;  %v3399_v2 = vrot.slane %v8228_v4, 3  ;;  %v8229_v19 = vld [vmem:[#allocation48_spill] sm:$0xff] }
 0x2fb   : > { %v2487_v52 = vpop.f32.mrb[254].mxu1  ;;  %v2798_v29 = vpop.f32.mrb[254].mxu0  ;;  %v3030_v35 = vrot.slane %v3028_v57, 2 }
 0x2fc   : > { %8224 = vst [vmem:[#allocation50_spill] sm:$0xff] %v7769_v18  ;;  %v2585_v26 = vadd.f32 %v2487_v52, %v8226_v17  ;;  %v7775_v37 = vadd.f32 %v2798_v29, %v2583_v25  ;;  %v5475_v10 = vpop.f32.mrb[255].mxu0  ;;  %v5379_v61 = vpop.f32.mrb[255].mxu1  ;;  %v3400_v58 = vsel %vm3363_vm6, %v3397_v46, %v3399_v2  ;;  %v3033_v17 = vrot.slane %v3031_v38, 3 }
 0x2fd   : > { %v8230_v10 = vld [vmem:[#allocation49_spill] sm:$0xff] }
 0x2fe   : > { %8227 = vst [vmem:[#allocation51_spill] sm:$0xff] %v7775_v37  ;;  %5601 = vmatmul.mubr.bf16.gmra.mrb[104].mxu1 %v3017_v56  ;;  %5697 = vmatmul.mubr.bf16.gmra.mrb[104].mxu0 %v3398_v60  ;;  %v3026_v60 = vsel %vm2942_vm5, %v8225_v28, %v3025_v34  ;;  %v3401_v28 = vrot.slane %v7351_v36, 3 }
 0x2ff   : > { %5604 = vmatprep.mubr.msk.bf16.mxu1 %vm5882_vm0, %v8104_v62  ;;  %5700 = vmatprep.mubr.msk.bf16.mxu0 %vm5882_vm0, %v8104_v62 }
 0x301   : > { %v2492_v45 = vpop.f32.mrb[0].mxu1  ;;  %v2803_v25 = vpop.f32.mrb[0].mxu0 }
 0x302   : > { %v2586_v7 = vadd.f32 %v2492_v45, %v8229_v19  ;;  %v7785_v16 = vadd.f32 %v2803_v25, %v2584_v30  ;;  %v5382_v42 = vpop.f32.mrb[1].mxu1  ;;  %v5478_v52 = vpop.f32.mrb[1].mxu0  ;;  %v3034_v30 = vor.u32 %v3033_v17, %v3030_v35 }
 0x303   : > { %v2495_v29 = vpop.f32.mrb[2].mxu1  ;;  %v2806_v56 = vpop.f32.mrb[2].mxu0  ;;  %v3402_v42 = vsel %vm3363_vm6, %v3399_v2, %v3401_v28 }
 0x304   : > { %v2587_v61 = vadd.f32 %v2495_v29, %v8230_v10  ;;  %v7791_v4 = vadd.f32 %v2806_v56, %v2585_v26  ;;  %v5479_v37 = vpop.f32.mrb[3].mxu0  ;;  %v5383_v18 = vpop.f32.mrb[3].mxu1  ;;  %v3035_v19 = vsel %vm2942_vm5, %v3025_v34, %v3034_v30 }
 0x306   : > { %5605 = vmatmul.mubr.bf16.gmra.mrb[108].mxu1 %v3026_v60  ;;  %5701 = vmatmul.mubr.bf16.gmra.mrb[108].mxu0 %v3400_v58 }
 0x307   : > { %5608 = vmatprep.mubr.msk.bf16.mxu1 %vm5882_vm0, %v8104_v62  ;;  %5704 = vmatprep.mubr.msk.bf16.mxu0 %vm5882_vm0, %v8104_v62 }
 0x309   : > { %v2500_v46 = vpop.f32.mrb[4].mxu1  ;;  %v2811_v57 = vpop.f32.mrb[4].mxu0 }
 0x30a   : > { %v2588_v38 = vadd.f32 %v2500_v46, %v7406_v49  ;;  %v7799_v45 = vadd.f32 %v2811_v57, %v2586_v7  ;;  %v5386_v26 = vpop.f32.mrb[5].mxu1  ;;  %v5482_v37 = vpop.f32.mrb[5].mxu0  ;;  %v3403_v49 = vrot.slane %v7766_v21, 3 }
 0x30b   : > { %v2503_v18 = vpop.f32.mrb[6].mxu1  ;;  %v2814_v25 = vpop.f32.mrb[6].mxu0 }
 0x30c   : > { %v2589_v52 = vadd.f32 %v2503_v18, %v7413_v47  ;;  %v7804_v29 = vadd.f32 %v2814_v25, %v2587_v61  ;;  %v5483_v56 = vpop.f32.mrb[7].mxu0  ;;  %v5387_v36 = vpop.f32.mrb[7].mxu1  ;;  %v3404_v10 = vsel %vm3363_vm6, %v3401_v28, %v3403_v49 }
 0x30e   : > { %5609 = vmatmul.mubr.bf16.gmra.mrb[112].mxu1 %v3035_v19  ;;  %5705 = vmatmul.mubr.bf16.gmra.mrb[112].mxu0 %v3402_v42 }
 0x30f   : > { %5612 = vmatprep.mubr.msk.bf16.mxu1 %vm5882_vm0, %v8104_v62  ;;  %5708 = vmatprep.mubr.msk.bf16.mxu0 %vm5882_vm0, %v8104_v62 }
 0x311   : > { %v2508_v7 = vpop.f32.mrb[8].mxu1  ;;  %v2819_v34 = vpop.f32.mrb[8].mxu0 }
 0x312   : > { %v2590_v2 = vadd.f32 %v2508_v7, %v7432_v24  ;;  %v7812_v60 = vadd.f32 %v2819_v34, %v2588_v38  ;;  %v5390_v47 = vpop.f32.mrb[9].mxu1  ;;  %v5486_v58 = vpop.f32.mrb[9].mxu0 }
 0x313   : > { %v2511_v35 = vpop.f32.mrb[10].mxu1  ;;  %v2822_v17 = vpop.f32.mrb[10].mxu0 }
 0x314   : > { %v2591_v61 = vadd.f32 %v2511_v35, %v7438_v6  ;;  %v7816_v46 = vadd.f32 %v2822_v17, %v2589_v52  ;;  %v5487_v57 = vpop.f32.mrb[11].mxu0  ;;  %v5391_v26 = vpop.f32.mrb[11].mxu1 }
 0x316   : > { %5613 = vmatmul.mubr.bf16.gmra.mrb[116].mxu1 %v3034_v30  ;;  %5709 = vmatmul.mubr.bf16.gmra.mrb[116].mxu0 %v3404_v10 }
 0x317   : > { %5712 = vmatprep.mubr.msk.bf16.mxu0 %vm5882_vm0, %v8104_v62 }
 0x319   : > { %v2516_v24 = vpop.f32.mrb[12].mxu1  ;;  %v2827_v21 = vpop.f32.mrb[12].mxu0 }
 0x31a   : > { %v2592_v38 = vadd.f32 %v2516_v24, %v7459_v55  ;;  %v7821_v37 = vadd.f32 %v2827_v21, %v2590_v2  ;;  %v5394_v18 = vpop.f32.mrb[13].mxu1  ;;  %v5490_v25 = vpop.f32.mrb[13].mxu0 }
 0x31b   : > { %v2519_v28 = vpop.f32.mrb[14].mxu1  ;;  %v2830_v19 = vpop.f32.mrb[14].mxu0 }
 0x31c   : > { %v2593_v6 = vadd.f32 %v2519_v28, %v7466_v63  ;;  %v7824_v42 = vadd.f32 %v2830_v19, %v2591_v61  ;;  %v5491_v52 = vpop.f32.mrb[15].mxu0  ;;  %v5395_v30 = vpop.f32.mrb[15].mxu1 }
 0x31e   : > { %5713 = vmatmul.mubr.bf16.gmra.mrb[120].mxu0 %v3403_v49 }
 0x321   : > { %v2524_v56 = vpop.f32.mrb[16].mxu1  ;;  %v2835_v36 = vpop.f32.mrb[16].mxu0 }
 0x322   : > { %v2594_v62 = vadd.f32 %v2524_v56, %v7486_v54  ;;  %v7827_v7 = vadd.f32 %v2835_v36, %v2592_v38  ;;  %v5398_v55 = vpop.f32.mrb[17].mxu1  ;;  %v5494_v34 = vpop.f32.mrb[17].mxu0 }
 0x323   : > { %v2527_v2 = vpop.f32.mrb[18].mxu1  ;;  %v2838_v47 = vpop.f32.mrb[18].mxu0 }
 0x324   : > { %v2595_v58 = vadd.f32 %v2527_v2, %v7493_v50  ;;  %v7830_v35 = vadd.f32 %v2838_v47, %v2593_v6  ;;  %v5495_v63 = vpop.f32.mrb[19].mxu0  ;;  %v5399_v17 = vpop.f32.mrb[19].mxu1 }
 0x329   : > { %v2532_v10 = vpop.f32.mrb[20].mxu1  ;;  %v2843_v61 = vpop.f32.mrb[20].mxu0 }
 0x32a   : > { %v2596_v49 = vadd.f32 %v2532_v10, %v7513_v48  ;;  %v7833_v57 = vadd.f32 %v2843_v61, %v2594_v62  ;;  %v5402_v26 = vpop.f32.mrb[21].mxu1  ;;  %v5498_v54 = vpop.f32.mrb[21].mxu0 }
 0x32b   : > { %v2535_v24 = vpop.f32.mrb[22].mxu1  ;;  %v2846_v21 = vpop.f32.mrb[22].mxu0 }
 0x32c   : > { %v2597_v38 = vadd.f32 %v2535_v24, %v7520_v32  ;;  %v7836_v18 = vadd.f32 %v2846_v21, %v2595_v58  ;;  %v5499_v25 = vpop.f32.mrb[23].mxu0  ;;  %v5403_v50 = vpop.f32.mrb[23].mxu1 }
 0x331   : > { %v2540_v28 = vpop.f32.mrb[24].mxu1  ;;  %v2851_v19 = vpop.f32.mrb[24].mxu0 }
 0x332   : > { %v2598_v6 = vadd.f32 %v2540_v28, %v7540_v27  ;;  %v7839_v52 = vadd.f32 %v2851_v19, %v2596_v49  ;;  %v5406_v30 = vpop.f32.mrb[25].mxu1  ;;  %v5502_v48 = vpop.f32.mrb[25].mxu0 }
 0x333   : > { %v2543_v56 = vpop.f32.mrb[26].mxu1  ;;  %v2854_v36 = vpop.f32.mrb[26].mxu0 }
 0x334   : > { %v2599_v62 = vadd.f32 %v2543_v56, %v7547_v33  ;;  %v7842_v55 = vadd.f32 %v2854_v36, %v2597_v38  ;;  %v5503_v34 = vpop.f32.mrb[27].mxu0  ;;  %v5407_v32 = vpop.f32.mrb[27].mxu1 }
 0x339   : > { %v2548_v2 = vpop.f32.mrb[28].mxu1  ;;  %v2859_v47 = vpop.f32.mrb[28].mxu0 }
 0x33a   : > { %v2600_v58 = vadd.f32 %v2548_v2, %v7567_v39  ;;  %v7845_v63 = vadd.f32 %v2859_v47, %v2598_v6  ;;  %v5410_v17 = vpop.f32.mrb[29].mxu1  ;;  %v5506_v27 = vpop.f32.mrb[29].mxu0 }
 0x33b   : > { %v2551_v10 = vpop.f32.mrb[30].mxu1  ;;  %v2862_v61 = vpop.f32.mrb[30].mxu0 }
 0x33c   : > { %v2601_v49 = vadd.f32 %v2551_v10, %v7573_v53  ;;  %v7848_v26 = vadd.f32 %v2862_v61, %v2599_v62  ;;  %v5507_v54 = vpop.f32.mrb[31].mxu0  ;;  %v5411_v33 = vpop.f32.mrb[31].mxu1 }
 0x33d   : > { %v3807_v27 = vpop.permute.xlu0 %3806 }
 0x341   : > { %v2556_v24 = vpop.f32.mrb[32].mxu1  ;;  %v2867_v21 = vpop.f32.mrb[32].mxu0 }
 0x342   : > { %v2602_v38 = vadd.f32 %v2556_v24, %v7592_v8  ;;  %v7851_v25 = vadd.f32 %v2867_v21, %v2600_v58  ;;  %v5510_v50 = vpop.f32.mrb[33].mxu0  ;;  %v5414_v39 = vpop.f32.mrb[33].mxu1 }
 0x343   : > { %v2870_v28 = vpop.f32.mrb[34].mxu0  ;;  %v2559_v19 = vpop.f32.mrb[34].mxu1 }
 0x344   : > { %v7853_v6 = vadd.f32 %v2870_v28, %v2601_v49  ;;  %v5511_v30 = vpop.f32.mrb[35].mxu0  ;;  %v5415_v48 = vpop.f32.mrb[35].mxu1  ;;  %v7863_v49 = vld [vmem:[%s8002_s2] ss:$0 sm:$0xff] }
 0x349   : > { %v2875_v53 = vpop.f32.mrb[36].mxu0  ;;  %v3139_v56 = vpop.f32.mrb[36].mxu1 }
 0x34a   : > { %v7855_v36 = vadd.f32 %v2875_v53, %v2602_v38  ;;  %v3305_v62 = vadd.f32 %v3139_v56, %v7615_v20  ;;  %v5514_v34 = vpop.f32.mrb[37].mxu0  ;;  %v5534_v32 = vpop.f32.mrb[37].mxu1 }
 0x34b   : > { %v2878_v8 = vpop.f32.mrb[38].mxu0  ;;  %v3142_v2 = vpop.f32.mrb[38].mxu1 }
 0x34c   : > { %v3306_v47 = vadd.f32 %v3142_v2, %v7622_v0  ;;  %v5515_v58 = vpop.f32.mrb[39].mxu0  ;;  %v5535_v17 = vpop.f32.mrb[39].mxu1 }
 0x34d   : > { %v3817_v53 = vpop.permute.xlu1 %3816 }
 0x351   : > { %v3147_v10 = vpop.f32.mrb[40].mxu1  ;;  %v3508_v61 = vpop.f32.mrb[40].mxu0 }
 0x352   : > { %v3307_v54 = vadd.f32 %v3147_v10, %v7630_v51  ;;  %v3674_v20 = vadd.f32 %v3508_v61, %v3305_v62  ;;  %v5538_v33 = vpop.f32.mrb[41].mxu1  ;;  %v5634_v24 = vpop.f32.mrb[41].mxu0 }
 0x353   : > { %v3150_v0 = vpop.f32.mrb[42].mxu1  ;;  %v3511_v21 = vpop.f32.mrb[42].mxu0 }
 0x354   : > { %v3722_v38 = vadd.f32 %v7863_v49, %v3674_v20  ;;  %v3308_v50 = vadd.f32 %v3150_v0, %v7637_v15  ;;  %v3675_v39 = vadd.f32 %v3511_v21, %v3306_v47  ;;  %v5635_v28 = vpop.f32.mrb[43].mxu0  ;;  %v5539_v19 = vpop.f32.mrb[43].mxu1 }
 0x355   : > { %v3812_v51 = vpop.permute.xlu0 %3811 }
 0x356   : > { %4186 = vst [vmem:[%s7869_s9] sm:$0xff] %v3722_v38  ;;  %v4009_v30 = vmul.f32 %v3807_v27, %v3722_v38  ;;  %v3723_v48 = vadd.f32 %v7863_v49, %v3675_v39 }
 0x358   : > { %4187 = vst [vmem:[%s7869_s9 + $0x8] sm:$0xff] %v3723_v48  ;;  %v4010_v56 = vmul.f32 %v3812_v51, %v3723_v48  ;;  %v4098_v62 = vmul.f32 %v4009_v30, %v3722_v38  ;;  %v3822_v38 = vpop.permute.xlu1 %3821 }
 0x359   : > { %v3155_v34 = vpop.f32.mrb[44].mxu1  ;;  %v3516_v32 = vpop.f32.mrb[44].mxu0 }
 0x35a   : > { %v4050_v8 = vadd.f32 %v4010_v56, %v4009_v30  ;;  %v4099_v2 = vmul.f32 %v4010_v56, %v3723_v48  ;;  %v3309_v58 = vadd.f32 %v3155_v34, %v7645_v12  ;;  %v3676_v15 = vadd.f32 %v3516_v32, %v3307_v54  ;;  %v5542_v47 = vpop.f32.mrb[45].mxu1  ;;  %v5638_v17 = vpop.f32.mrb[45].mxu0 }
 0x35b   : > { %v3158_v10 = vpop.f32.mrb[46].mxu1  ;;  %v3519_v61 = vpop.f32.mrb[46].mxu0 }
 0x35c   : > { %v4139_v27 = vadd.f32 %v4099_v2, %v4098_v62  ;;  %v3724_v20 = vadd.f32 %v7863_v49, %v3676_v15  ;;  %v3310_v33 = vadd.f32 %v3158_v10, %v7652_v31  ;;  %v3677_v24 = vadd.f32 %v3519_v61, %v3308_v50  ;;  %v5639_v0 = vpop.f32.mrb[47].mxu0  ;;  %v5543_v21 = vpop.f32.mrb[47].mxu1 }
 0x35e   : > { %4188 = vst [vmem:[%s7869_s9 + $0x10] sm:$0xff] %v3724_v20  ;;  %v4011_v39 = vmul.f32 %v3817_v53, %v3724_v20  ;;  %v3725_v28 = vadd.f32 %v7863_v49, %v3677_v24  ;;  %v3832_v24 = vpop.permute.xlu1 %3831 }
 0x360   : > { %v4051_v12 = vadd.f32 %v4050_v8, %v4011_v39  ;;  %v4100_v54 = vmul.f32 %v4011_v39, %v3724_v20  ;;  %4189 = vst [vmem:[%s7869_s9 + $0x18] sm:$0xff] %v3725_v28  ;;  %v4012_v19 = vmul.f32 %v3822_v38, %v3725_v28 }
 0x361   : > { %v3163_v51 = vpop.f32.mrb[48].mxu1  ;;  %v3524_v30 = vpop.f32.mrb[48].mxu0 }
 0x362   : > { %v4140_v48 = vadd.f32 %v4139_v27, %v4100_v54  ;;  %v4052_v56 = vadd.f32 %v4051_v12, %v4012_v19  ;;  %v4101_v62 = vmul.f32 %v4012_v19, %v3725_v28  ;;  %v3311_v31 = vadd.f32 %v3163_v51, %v7660_v1  ;;  %v5546_v50 = vpop.f32.mrb[49].mxu1  ;;  %v5642_v34 = vpop.f32.mrb[49].mxu0 }
 0x363   : > { %v3678_v32 = vadd.f32 %v3524_v30, %v3309_v58  ;;  %v3166_v2 = vpop.f32.mrb[50].mxu1  ;;  %v3527_v53 = vpop.f32.mrb[50].mxu0 }
 0x364   : > { %v4141_v15 = vadd.f32 %v4140_v48, %v4101_v62  ;;  %v3312_v8 = vadd.f32 %v3166_v2, %v7667_v5  ;;  %v3679_v47 = vadd.f32 %v3527_v53, %v3310_v33  ;;  %v5643_v17 = vpop.f32.mrb[51].mxu0  ;;  %v5547_v10 = vpop.f32.mrb[51].mxu1 }
 0x365   : > { %v3726_v61 = vadd.f32 %v7863_v49, %v3678_v32  ;;  %v3827_v27 = vpop.permute.xlu0 %3826 }
 0x366   : > { %v3727_v20 = vadd.f32 %v7863_v49, %v3679_v47 }
 0x367   : > { %4190 = vst [vmem:[%s7869_s9 + $0x20] sm:$0xff] %v3726_v61  ;;  %v4013_v1 = vmul.f32 %v3827_v27, %v3726_v61 }
 0x368   : > { %4191 = vst [vmem:[%s7869_s9 + $0x28] sm:$0xff] %v3727_v20  ;;  %v4014_v0 = vmul.f32 %v3832_v24, %v3727_v20 }
 0x369   : > { %v4053_v21 = vadd.f32 %v4052_v56, %v4013_v1  ;;  %v4102_v58 = vmul.f32 %v4013_v1, %v3726_v61  ;;  %v3171_v38 = vpop.f32.mrb[52].mxu1  ;;  %v3532_v39 = vpop.f32.mrb[52].mxu0 }
 0x36a   : > { %v4103_v28 = vmul.f32 %v4014_v0, %v3727_v20  ;;  %v3313_v5 = vadd.f32 %v3171_v38, %v7675_v43  ;;  %v3680_v33 = vadd.f32 %v3532_v39, %v3311_v31  ;;  %v5550_v12 = vpop.f32.mrb[53].mxu1  ;;  %v5646_v54 = vpop.f32.mrb[53].mxu0 }
 0x36b   : > { %v4054_v19 = vadd.f32 %v4053_v21, %v4014_v0  ;;  %v4142_v51 = vadd.f32 %v4141_v15, %v4102_v58  ;;  %v3174_v30 = vpop.f32.mrb[54].mxu1  ;;  %v3535_v48 = vpop.f32.mrb[54].mxu0 }
 0x36c   : > { %v3728_v62 = vadd.f32 %v7863_v49, %v3680_v33  ;;  %v3314_v50 = vadd.f32 %v3174_v30, %v7682_v40  ;;  %v3681_v56 = vadd.f32 %v3535_v48, %v3312_v8  ;;  %v5647_v34 = vpop.f32.mrb[55].mxu0  ;;  %v5551_v32 = vpop.f32.mrb[55].mxu1 }
 0x36d   : > { %v3837_v2 = vpop.permute.xlu0 %3836  ;;  %v4143_v53 = vadd.f32 %v4142_v51, %v4103_v28  ;;  %v3842_v31 = vpop.permute.xlu1 %3841 }
 0x36e   : > { %v4015_v47 = vmul.f32 %v3837_v2, %v3728_v62  ;;  %4192 = vst [vmem:[%s7869_s9 + $0x30] sm:$0xff] %v3728_v62  ;;  %v3729_v43 = vadd.f32 %v7863_v49, %v3681_v56 }
 0x370   : > { %v4055_v17 = vadd.f32 %v4054_v19, %v4015_v47  ;;  %v4104_v10 = vmul.f32 %v4015_v47, %v3728_v62  ;;  %v4016_v15 = vmul.f32 %v3842_v31, %v3729_v43  ;;  %4193 = vst [vmem:[%s7869_s9 + $0x38] sm:$0xff] %v3729_v43 }
 0x371   : > { %v3179_v61 = vpop.f32.mrb[56].mxu1  ;;  %v3540_v27 = vpop.f32.mrb[56].mxu0 }
 0x372   : > { %v4144_v20 = vadd.f32 %v4143_v53, %v4104_v10  ;;  %v4056_v24 = vadd.f32 %v4055_v17, %v4016_v15  ;;  %v4105_v1 = vmul.f32 %v4016_v15, %v3729_v43  ;;  %v3315_v40 = vadd.f32 %v3179_v61, %v7690_v9  ;;  %v5554_v8 = vpop.f32.mrb[57].mxu1  ;;  %v5650_v0 = vpop.f32.mrb[57].mxu0 }
 0x373   : > { %v3682_v21 = vadd.f32 %v3540_v27, %v3313_v5  ;;  %v3182_v58 = vpop.f32.mrb[58].mxu1  ;;  %v3543_v38 = vpop.f32.mrb[58].mxu0 }
 0x374   : > { %v4145_v39 = vadd.f32 %v4144_v20, %v4105_v1  ;;  %v3316_v28 = vadd.f32 %v3182_v58, %v7697_v3  ;;  %v3683_v33 = vadd.f32 %v3543_v38, %v3314_v50  ;;  %v5651_v12 = vpop.f32.mrb[59].mxu0  ;;  %v5555_v54 = vpop.f32.mrb[59].mxu1 }
 0x375   : > { %v3730_v19 = vadd.f32 %v7863_v49, %v3682_v21  ;;  %v3847_v51 = vpop.permute.xlu0 %3846  ;;  %v3852_v48 = vpop.permute.xlu1 %3851 }
 0x376   : > { %v3731_v30 = vadd.f32 %v7863_v49, %v3683_v33 }
 0x377   : > { %v4017_v9 = vmul.f32 %v3847_v51, %v3730_v19  ;;  %4194 = vst [vmem:[%s7869_s9 + $0x40] sm:$0xff] %v3730_v19 }
 0x378   : > { %v4018_v62 = vmul.f32 %v3852_v48, %v3731_v30  ;;  %4195 = vst [vmem:[%s7869_s9 + $0x48] sm:$0xff] %v3731_v30 }
 0x379   : > { %v4057_v56 = vadd.f32 %v4056_v24, %v4017_v9  ;;  %v4106_v5 = vmul.f32 %v4017_v9, %v3730_v19  ;;  %v3187_v34 = vpop.f32.mrb[60].mxu1  ;;  %v3548_v32 = vpop.f32.mrb[60].mxu0 }
 0x37a   : > { %v4107_v2 = vmul.f32 %v4018_v62, %v3731_v30  ;;  %v3317_v3 = vadd.f32 %v3187_v34, %v7705_v23  ;;  %v3684_v50 = vadd.f32 %v3548_v32, %v3315_v40  ;;  %v5558_v53 = vpop.f32.mrb[61].mxu1  ;;  %v5654_v47 = vpop.f32.mrb[61].mxu0 }
 0x37b   : > { %v4146_v43 = vadd.f32 %v4145_v39, %v4106_v5  ;;  %v4058_v31 = vadd.f32 %v4057_v56, %v4018_v62  ;;  %v3190_v17 = vpop.f32.mrb[62].mxu1  ;;  %v3551_v10 = vpop.f32.mrb[62].mxu0 }
 0x37c   : > { %v3732_v15 = vadd.f32 %v7863_v49, %v3684_v50  ;;  %v3318_v61 = vadd.f32 %v3190_v17, %v7712_v59  ;;  %v3685_v27 = vadd.f32 %v3551_v10, %v3316_v28  ;;  %v5655_v20 = vpop.f32.mrb[63].mxu0  ;;  %v5559_v24 = vpop.f32.mrb[63].mxu1 }
 0x37d   : > { %v3857_v1 = vpop.permute.xlu0 %3856  ;;  %v4147_v8 = vadd.f32 %v4146_v43, %v4107_v2  ;;  %v3862_v40 = vpop.permute.xlu1 %3861 }
 0x37e   : > { %v4019_v0 = vmul.f32 %v3857_v1, %v3732_v15  ;;  %4196 = vst [vmem:[%s7869_s9 + $0x50] sm:$0xff] %v3732_v15  ;;  %v3733_v23 = vadd.f32 %v7863_v49, %v3685_v27 }
 0x380   : > { %v4059_v21 = vadd.f32 %v4058_v31, %v4019_v0  ;;  %v4108_v58 = vmul.f32 %v4019_v0, %v3732_v15  ;;  %v4020_v38 = vmul.f32 %v3862_v40, %v3733_v23  ;;  %4197 = vst [vmem:[%s7869_s9 + $0x58] sm:$0xff] %v3733_v23 }
 0x381   : > { %v3195_v39 = vpop.f32.mrb[64].mxu1  ;;  %v3556_v33 = vpop.f32.mrb[64].mxu0 }
 0x382   : > { %v4148_v12 = vadd.f32 %v4147_v8, %v4108_v58  ;;  %v4060_v54 = vadd.f32 %v4059_v21, %v4020_v38  ;;  %v4109_v19 = vmul.f32 %v4020_v38, %v3733_v23  ;;  %v3319_v59 = vadd.f32 %v3195_v39, %v7720_v14  ;;  %v5562_v28 = vpop.f32.mrb[65].mxu1  ;;  %v5658_v51 = vpop.f32.mrb[65].mxu0 }
 0x383   : > { %v3686_v30 = vadd.f32 %v3556_v33, %v3317_v3  ;;  %v3198_v48 = vpop.f32.mrb[66].mxu1  ;;  %v3559_v9 = vpop.f32.mrb[66].mxu0 }
 0x384   : > { %v4149_v62 = vadd.f32 %v4148_v12, %v4109_v19  ;;  %v3320_v56 = vadd.f32 %v3198_v48, %v7727_v44  ;;  %v3687_v5 = vadd.f32 %v3559_v9, %v3318_v61  ;;  %v5659_v34 = vpop.f32.mrb[67].mxu0  ;;  %v5563_v32 = vpop.f32.mrb[67].mxu1 }
 0x385   : > { %v3734_v2 = vadd.f32 %v7863_v49, %v3686_v30  ;;  %v3867_v50 = vpop.permute.xlu0 %3866  ;;  %v3872_v47 = vpop.permute.xlu1 %3871 }
 0x386   : > { %v3735_v53 = vadd.f32 %v7863_v49, %v3687_v5 }
 0x387   : > { %v4021_v14 = vmul.f32 %v3867_v50, %v3734_v2  ;;  %4198 = vst [vmem:[%s7869_s9 + $0x60] sm:$0xff] %v3734_v2 }
 0x388   : > { %v4022_v43 = vmul.f32 %v3872_v47, %v3735_v53  ;;  %4199 = vst [vmem:[%s7869_s9 + $0x68] sm:$0xff] %v3735_v53 }
 0x389   : > { %v4061_v31 = vadd.f32 %v4060_v54, %v4021_v14  ;;  %v4110_v3 = vmul.f32 %v4021_v14, %v3734_v2  ;;  %v3203_v17 = vpop.f32.mrb[68].mxu1  ;;  %v3564_v10 = vpop.f32.mrb[68].mxu0 }
 0x38a   : > { %v4111_v15 = vmul.f32 %v4022_v43, %v3735_v53  ;;  %v3321_v44 = vadd.f32 %v3203_v17, %v7735_v13  ;;  %v3688_v61 = vadd.f32 %v3564_v10, %v3319_v59  ;;  %v5566_v27 = vpop.f32.mrb[69].mxu1  ;;  %v5662_v20 = vpop.f32.mrb[69].mxu0 }
 0x38b   : > { %v4150_v24 = vadd.f32 %v4149_v62, %v4110_v3  ;;  %v4062_v1 = vadd.f32 %v4061_v31, %v4022_v43  ;;  %v3206_v8 = vpop.f32.mrb[70].mxu1  ;;  %v3567_v0 = vpop.f32.mrb[70].mxu0 }
 0x38c   : > { %v3736_v23 = vadd.f32 %v7863_v49, %v3688_v61  ;;  %v3322_v40 = vadd.f32 %v3206_v8, %v7742_v41  ;;  %v3689_v21 = vadd.f32 %v3567_v0, %v3320_v56  ;;  %v5663_v58 = vpop.f32.mrb[71].mxu0  ;;  %v5567_v38 = vpop.f32.mrb[71].mxu1 }
 0x38d   : > { %v3877_v39 = vpop.permute.xlu0 %3876  ;;  %v4151_v33 = vadd.f32 %v4150_v24, %v4111_v15  ;;  %v3882_v54 = vpop.permute.xlu1 %3881 }
 0x38e   : > { %v4023_v12 = vmul.f32 %v3877_v39, %v3736_v23  ;;  %4200 = vst [vmem:[%s7869_s9 + $0x70] sm:$0xff] %v3736_v23  ;;  %v3737_v13 = vadd.f32 %v7863_v49, %v3689_v21 }
 0x390   : > { %v4063_v19 = vadd.f32 %v4062_v1, %v4023_v12  ;;  %v4112_v59 = vmul.f32 %v4023_v12, %v3736_v23  ;;  %v4024_v28 = vmul.f32 %v3882_v54, %v3737_v13  ;;  %4201 = vst [vmem:[%s7869_s9 + $0x78] sm:$0xff] %v3737_v13  ;;  %v8231_v1 = vld [vmem:[#allocation50_spill] sm:$0xff] }
 0x391   : > { %v3211_v51 = vpop.f32.mrb[72].mxu1  ;;  %v3572_v30 = vpop.f32.mrb[72].mxu0 }
 0x392   : > { %v4152_v48 = vadd.f32 %v4151_v33, %v4112_v59  ;;  %v4064_v9 = vadd.f32 %v4063_v19, %v4024_v28  ;;  %v4113_v62 = vmul.f32 %v4024_v28, %v3737_v13  ;;  %v3323_v41 = vadd.f32 %v3211_v51, %v7750_v22  ;;  %v5570_v56 = vpop.f32.mrb[73].mxu1  ;;  %v5666_v5 = vpop.f32.mrb[73].mxu0  ;;  %v8232_v33 = vld [vmem:[#allocation51_spill] sm:$0xff] }
 0x393   : > { %v3690_v34 = vadd.f32 %v3572_v30, %v3321_v44  ;;  %v3214_v32 = vpop.f32.mrb[74].mxu1  ;;  %v3575_v2 = vpop.f32.mrb[74].mxu0 }
 0x394   : > { %v4153_v50 = vadd.f32 %v4152_v48, %v4113_v62  ;;  %v3324_v53 = vadd.f32 %v3214_v32, %v7755_v11  ;;  %v3691_v47 = vadd.f32 %v3575_v2, %v3322_v40  ;;  %v5667_v14 = vpop.f32.mrb[75].mxu0  ;;  %v5571_v43 = vpop.f32.mrb[75].mxu1 }
 0x395   : > { %v3738_v31 = vadd.f32 %v7863_v49, %v3690_v34  ;;  %v3887_v3 = vpop.permute.xlu0 %3886  ;;  %v3892_v10 = vpop.permute.xlu1 %3891 }
 0x396   : > { %v3739_v17 = vadd.f32 %v7863_v49, %v3691_v47 }
 0x397   : > { %v4025_v22 = vmul.f32 %v3887_v3, %v3738_v31  ;;  %4202 = vst [vmem:[%s7869_s9 + $0x80] sm:$0xff] %v3738_v31 }
 0x398   : > { %v4026_v15 = vmul.f32 %v3892_v10, %v3739_v17  ;;  %4203 = vst [vmem:[%s7869_s9 + $0x88] sm:$0xff] %v3739_v17 }
 0x399   : > { %v4065_v61 = vadd.f32 %v4064_v9, %v4025_v22  ;;  %v4114_v44 = vmul.f32 %v4025_v22, %v3738_v31  ;;  %v3219_v27 = vpop.f32.mrb[76].mxu1  ;;  %v3580_v20 = vpop.f32.mrb[76].mxu0 }
 0x39a   : > { %v4115_v24 = vmul.f32 %v4026_v15, %v3739_v17  ;;  %v3325_v11 = vadd.f32 %v3219_v27, %v8231_v1  ;;  %v3692_v8 = vadd.f32 %v3580_v20, %v3323_v41  ;;  %v5574_v0 = vpop.f32.mrb[77].mxu1  ;;  %v5670_v23 = vpop.f32.mrb[77].mxu0 }
 0x39b   : > { %v4154_v40 = vadd.f32 %v4153_v50, %v4114_v44  ;;  %v4066_v21 = vadd.f32 %v4065_v61, %v4026_v15  ;;  %v3222_v58 = vpop.f32.mrb[78].mxu1  ;;  %v3583_v38 = vpop.f32.mrb[78].mxu0 }
 0x39c   : > { %v3740_v39 = vadd.f32 %v7863_v49, %v3692_v8  ;;  %v3326_v12 = vadd.f32 %v3222_v58, %v8232_v33  ;;  %v3693_v13 = vadd.f32 %v3583_v38, %v3324_v53  ;;  %v5671_v54 = vpop.f32.mrb[79].mxu0  ;;  %v5575_v19 = vpop.f32.mrb[79].mxu1 }
 0x39d   : > { %v3897_v59 = vpop.permute.xlu0 %3896  ;;  %v4155_v28 = vadd.f32 %v4154_v40, %v4115_v24  ;;  %v3902_v48 = vpop.permute.xlu1 %3901 }
 0x39e   : > { %v4027_v51 = vmul.f32 %v3897_v59, %v3740_v39  ;;  %4204 = vst [vmem:[%s7869_s9 + $0x90] sm:$0xff] %v3740_v39  ;;  %v3741_v30 = vadd.f32 %v7863_v49, %v3693_v13 }
 0x3a0   : > { %v4067_v9 = vadd.f32 %v4066_v21, %v4027_v51  ;;  %v4116_v62 = vmul.f32 %v4027_v51, %v3740_v39  ;;  %v4028_v41 = vmul.f32 %v3902_v48, %v3741_v30  ;;  %4205 = vst [vmem:[%s7869_s9 + $0x98] sm:$0xff] %v3741_v30 }
 0x3a1   : > { %v3227_v56 = vpop.f32.mrb[80].mxu1  ;;  %v3588_v5 = vpop.f32.mrb[80].mxu0 }
 0x3a2   : > { %v4156_v34 = vadd.f32 %v4155_v28, %v4116_v62  ;;  %v4068_v32 = vadd.f32 %v4067_v9, %v4028_v41  ;;  %v4117_v2 = vmul.f32 %v4028_v41, %v3741_v30  ;;  %v3327_v50 = vadd.f32 %v3227_v56, %v7785_v16  ;;  %v5578_v53 = vpop.f32.mrb[81].mxu1  ;;  %v5674_v47 = vpop.f32.mrb[81].mxu0 }
 0x3a3   : > { %v3694_v14 = vadd.f32 %v3588_v5, %v3325_v11  ;;  %v3230_v43 = vpop.f32.mrb[82].mxu1  ;;  %v3591_v31 = vpop.f32.mrb[82].mxu0 }
 0x3a4   : > { %v4157_v3 = vadd.f32 %v4156_v34, %v4117_v2  ;;  %v3328_v17 = vadd.f32 %v3230_v43, %v7791_v4  ;;  %v3695_v10 = vadd.f32 %v3591_v31, %v3326_v12  ;;  %v5675_v22 = vpop.f32.mrb[83].mxu0  ;;  %v5579_v15 = vpop.f32.mrb[83].mxu1 }
 0x3a5   : > { %v3742_v61 = vadd.f32 %v7863_v49, %v3694_v14  ;;  %v3907_v44 = vpop.permute.xlu0 %3906  ;;  %v3912_v20 = vpop.permute.xlu1 %3911 }
 0x3a6   : > { %v3743_v27 = vadd.f32 %v7863_v49, %v3695_v10 }
 0x3a7   : > { %v4029_v16 = vmul.f32 %v3907_v44, %v3742_v61  ;;  %4206 = vst [vmem:[%s7869_s9 + $0xa0] sm:$0xff] %v3742_v61 }
 0x3a8   : > { %v4030_v24 = vmul.f32 %v3912_v20, %v3743_v27  ;;  %4207 = vst [vmem:[%s7869_s9 + $0xa8] sm:$0xff] %v3743_v27 }
 0x3a9   : > { %v4069_v1 = vadd.f32 %v4068_v32, %v4029_v16  ;;  %v4118_v11 = vmul.f32 %v4029_v16, %v3742_v61  ;;  %v3235_v8 = vpop.f32.mrb[84].mxu1  ;;  %v3596_v0 = vpop.f32.mrb[84].mxu0 }
 0x3aa   : > { %v4119_v23 = vmul.f32 %v4030_v24, %v3743_v27  ;;  %v3329_v4 = vadd.f32 %v3235_v8, %v7799_v45  ;;  %v3696_v40 = vadd.f32 %v3596_v0, %v3327_v50  ;;  %v5582_v21 = vpop.f32.mrb[85].mxu1  ;;  %v5678_v58 = vpop.f32.mrb[85].mxu0 }
 0x3ab   : > { %v4158_v38 = vadd.f32 %v4157_v3, %v4118_v11  ;;  %v4070_v39 = vadd.f32 %v4069_v1, %v4030_v24  ;;  %v3238_v33 = vpop.f32.mrb[86].mxu1  ;;  %v3599_v12 = vpop.f32.mrb[86].mxu0 }
 0x3ac   : > { %v3744_v13 = vadd.f32 %v7863_v49, %v3696_v40  ;;  %v3330_v54 = vadd.f32 %v3238_v33, %v7804_v29  ;;  %v3697_v19 = vadd.f32 %v3599_v12, %v3328_v17  ;;  %v5679_v59 = vpop.f32.mrb[87].mxu0  ;;  %v5583_v28 = vpop.f32.mrb[87].mxu1 }
 0x3ad   : > { %v3917_v51 = vpop.permute.xlu0 %3916  ;;  %v4159_v30 = vadd.f32 %v4158_v38, %v4119_v23  ;;  %v3922_v9 = vpop.permute.xlu1 %3921 }
 0x3ae   : > { %v4031_v48 = vmul.f32 %v3917_v51, %v3744_v13  ;;  %4208 = vst [vmem:[%s7869_s9 + $0xb0] sm:$0xff] %v3744_v13  ;;  %v3745_v45 = vadd.f32 %v7863_v49, %v3697_v19 }
 0x3b0   : > { %v4071_v62 = vadd.f32 %v4070_v39, %v4031_v48  ;;  %v4120_v41 = vmul.f32 %v4031_v48, %v3744_v13  ;;  %v4032_v56 = vmul.f32 %v3922_v9, %v3745_v45  ;;  %4209 = vst [vmem:[%s7869_s9 + $0xb8] sm:$0xff] %v3745_v45 }
 0x3b1   : > { %v3243_v5 = vpop.f32.mrb[88].mxu1  ;;  %v3604_v34 = vpop.f32.mrb[88].mxu0 }
 0x3b2   : > { %v4160_v32 = vadd.f32 %v4159_v30, %v4120_v41  ;;  %v4072_v2 = vadd.f32 %v4071_v62, %v4032_v56  ;;  %v4121_v50 = vmul.f32 %v4032_v56, %v3745_v45  ;;  %v3331_v29 = vadd.f32 %v3243_v5, %v7812_v60  ;;  %v5586_v53 = vpop.f32.mrb[89].mxu1  ;;  %v5682_v47 = vpop.f32.mrb[89].mxu0 }
 0x3b3   : > { %v3698_v14 = vadd.f32 %v3604_v34, %v3329_v4  ;;  %v3246_v43 = vpop.f32.mrb[90].mxu1  ;;  %v3607_v31 = vpop.f32.mrb[90].mxu0 }
 0x3b4   : > { %v4161_v3 = vadd.f32 %v4160_v32, %v4121_v50  ;;  %v3332_v17 = vadd.f32 %v3246_v43, %v7816_v46  ;;  %v3699_v10 = vadd.f32 %v3607_v31, %v3330_v54  ;;  %v5683_v22 = vpop.f32.mrb[91].mxu0  ;;  %v5587_v15 = vpop.f32.mrb[91].mxu1 }
 0x3b5   : > { %v3746_v61 = vadd.f32 %v7863_v49, %v3698_v14  ;;  %v3927_v44 = vpop.permute.xlu0 %3926  ;;  %v3932_v20 = vpop.permute.xlu1 %3931 }
 0x3b6   : > { %v3747_v27 = vadd.f32 %v7863_v49, %v3699_v10 }
 0x3b7   : > { %v4033_v60 = vmul.f32 %v3927_v44, %v3746_v61  ;;  %4210 = vst [vmem:[%s7869_s9 + $0xc0] sm:$0xff] %v3746_v61 }
 0x3b8   : > { %v4034_v16 = vmul.f32 %v3932_v20, %v3747_v27  ;;  %4211 = vst [vmem:[%s7869_s9 + $0xc8] sm:$0xff] %v3747_v27 }
 0x3b9   : > { %v4073_v24 = vadd.f32 %v4072_v2, %v4033_v60  ;;  %v4122_v1 = vmul.f32 %v4033_v60, %v3746_v61  ;;  %v3251_v11 = vpop.f32.mrb[92].mxu1  ;;  %v3612_v8 = vpop.f32.mrb[92].mxu0 }
 0x3ba   : > { %v4123_v0 = vmul.f32 %v4034_v16, %v3747_v27  ;;  %v3333_v46 = vadd.f32 %v3251_v11, %v7821_v37  ;;  %v3700_v23 = vadd.f32 %v3612_v8, %v3331_v29  ;;  %v5590_v4 = vpop.f32.mrb[93].mxu1  ;;  %v5686_v40 = vpop.f32.mrb[93].mxu0 }
 0x3bb   : > { %v4162_v21 = vadd.f32 %v4161_v3, %v4122_v1  ;;  %v4074_v58 = vadd.f32 %v4073_v24, %v4034_v16  ;;  %v3254_v38 = vpop.f32.mrb[94].mxu1  ;;  %v3615_v39 = vpop.f32.mrb[94].mxu0 }
 0x3bc   : > { %v3748_v33 = vadd.f32 %v7863_v49, %v3700_v23  ;;  %v3334_v12 = vadd.f32 %v3254_v38, %v7824_v42  ;;  %v3701_v13 = vadd.f32 %v3615_v39, %v3332_v17  ;;  %v5687_v54 = vpop.f32.mrb[95].mxu0  ;;  %v5591_v19 = vpop.f32.mrb[95].mxu1 }
 0x3bd   : > { %v3937_v59 = vpop.permute.xlu0 %3936  ;;  %v4163_v28 = vadd.f32 %v4162_v21, %v4123_v0  ;;  %v3942_v30 = vpop.permute.xlu1 %3941 }
 0x3be   : > { %v4035_v51 = vmul.f32 %v3937_v59, %v3748_v33  ;;  %4212 = vst [vmem:[%s7869_s9 + $0xd0] sm:$0xff] %v3748_v33  ;;  %v3749_v37 = vadd.f32 %v7863_v49, %v3701_v13 }
 0x3c0   : > { %v4075_v48 = vadd.f32 %v4074_v58, %v4035_v51  ;;  %v4124_v45 = vmul.f32 %v4035_v51, %v3748_v33  ;;  %v4036_v9 = vmul.f32 %v3942_v30, %v3749_v37  ;;  %4213 = vst [vmem:[%s7869_s9 + $0xd8] sm:$0xff] %v3749_v37 }
 0x3c1   : > { %v3259_v62 = vpop.f32.mrb[96].mxu1  ;;  %v3620_v41 = vpop.f32.mrb[96].mxu0 }
 0x3c2   : > { %v4164_v56 = vadd.f32 %v4163_v28, %v4124_v45  ;;  %v4076_v5 = vadd.f32 %v4075_v48, %v4036_v9  ;;  %v4125_v34 = vmul.f32 %v4036_v9, %v3749_v37  ;;  %v3335_v42 = vadd.f32 %v3259_v62, %v7827_v7  ;;  %v5594_v32 = vpop.f32.mrb[97].mxu1  ;;  %v5690_v2 = vpop.f32.mrb[97].mxu0 }
 0x3c3   : > { %v3702_v50 = vadd.f32 %v3620_v41, %v3333_v46  ;;  %v3262_v29 = vpop.f32.mrb[98].mxu1  ;;  %v3623_v53 = vpop.f32.mrb[98].mxu0 }
 0x3c4   : > { %v4165_v47 = vadd.f32 %v4164_v56, %v4125_v34  ;;  %v3336_v14 = vadd.f32 %v3262_v29, %v7830_v35  ;;  %v3703_v43 = vadd.f32 %v3623_v53, %v3334_v12  ;;  %v5691_v31 = vpop.f32.mrb[99].mxu0  ;;  %v5595_v3 = vpop.f32.mrb[99].mxu1 }
 0x3c5   : > { %v3750_v17 = vadd.f32 %v7863_v49, %v3702_v50  ;;  %v3947_v10 = vpop.permute.xlu0 %3946  ;;  %v3952_v15 = vpop.permute.xlu1 %3951 }
 0x3c6   : > { %v3751_v22 = vadd.f32 %v7863_v49, %v3703_v43 }
 0x3c7   : > { %v4037_v7 = vmul.f32 %v3947_v10, %v3750_v17  ;;  %4214 = vst [vmem:[%s7869_s9 + $0xe0] sm:$0xff] %v3750_v17 }
 0x3c8   : > { %v4038_v61 = vmul.f32 %v3952_v15, %v3751_v22  ;;  %4215 = vst [vmem:[%s7869_s9 + $0xe8] sm:$0xff] %v3751_v22 }
 0x3c9   : > { %v4077_v44 = vadd.f32 %v4076_v5, %v4037_v7  ;;  %v4126_v27 = vmul.f32 %v4037_v7, %v3750_v17  ;;  %v3267_v20 = vpop.f32.mrb[100].mxu1  ;;  %v3628_v60 = vpop.f32.mrb[100].mxu0 }
 0x3ca   : > { %v4127_v16 = vmul.f32 %v4038_v61, %v3751_v22  ;;  %v3337_v35 = vadd.f32 %v3267_v20, %v7833_v57  ;;  %v3704_v24 = vadd.f32 %v3628_v60, %v3335_v42  ;;  %v5598_v1 = vpop.f32.mrb[101].mxu1  ;;  %v5694_v11 = vpop.f32.mrb[101].mxu0 }
 0x3cb   : > { %v4166_v8 = vadd.f32 %v4165_v47, %v4126_v27  ;;  %v4078_v0 = vadd.f32 %v4077_v44, %v4038_v61  ;;  %v3270_v46 = vpop.f32.mrb[102].mxu1  ;;  %v3631_v23 = vpop.f32.mrb[102].mxu0 }
 0x3cc   : > { %v3752_v4 = vadd.f32 %v7863_v49, %v3704_v24  ;;  %v3338_v40 = vadd.f32 %v3270_v46, %v7836_v18  ;;  %v3705_v21 = vadd.f32 %v3631_v23, %v3336_v14  ;;  %v5695_v58 = vpop.f32.mrb[103].mxu0  ;;  %v5599_v38 = vpop.f32.mrb[103].mxu1 }
 0x3cd   : > { %v3957_v39 = vpop.permute.xlu0 %3956  ;;  %v4167_v33 = vadd.f32 %v4166_v8, %v4127_v16  ;;  %v3962_v13 = vpop.permute.xlu1 %3961 }
 0x3ce   : > { %v4039_v12 = vmul.f32 %v3957_v39, %v3752_v4  ;;  %4216 = vst [vmem:[%s7869_s9 + $0xf0] sm:$0xff] %v3752_v4  ;;  %v3753_v57 = vadd.f32 %v7863_v49, %v3705_v21 }
 0x3d0   : > { %v4079_v54 = vadd.f32 %v4078_v0, %v4039_v12  ;;  %v4128_v19 = vmul.f32 %v4039_v12, %v3752_v4  ;;  %v4040_v59 = vmul.f32 %v3962_v13, %v3753_v57  ;;  %4217 = vst [vmem:[%s7869_s9 + $0xf8] sm:$0xff] %v3753_v57 }
 0x3d1   : > { %v3275_v28 = vpop.f32.mrb[104].mxu1  ;;  %v3636_v51 = vpop.f32.mrb[104].mxu0 }
 0x3d2   : > { %v4168_v37 = vadd.f32 %v4167_v33, %v4128_v19  ;;  %v4080_v30 = vadd.f32 %v4079_v54, %v4040_v59  ;;  %v4129_v48 = vmul.f32 %v4040_v59, %v3753_v57  ;;  %v3339_v18 = vadd.f32 %v3275_v28, %v7839_v52  ;;  %v5602_v45 = vpop.f32.mrb[105].mxu1  ;;  %v5698_v9 = vpop.f32.mrb[105].mxu0 }
 0x3d3   : > { %v3706_v62 = vadd.f32 %v3636_v51, %v3337_v35  ;;  %v3278_v41 = vpop.f32.mrb[106].mxu1  ;;  %v3639_v56 = vpop.f32.mrb[106].mxu0 }
 0x3d4   : > { %v4169_v5 = vadd.f32 %v4168_v37, %v4129_v48  ;;  %v3340_v34 = vadd.f32 %v3278_v41, %v7842_v55  ;;  %v3707_v42 = vadd.f32 %v3639_v56, %v3338_v40  ;;  %v5699_v32 = vpop.f32.mrb[107].mxu0  ;;  %v5603_v2 = vpop.f32.mrb[107].mxu1 }
 0x3d5   : > { %v3754_v50 = vadd.f32 %v7863_v49, %v3706_v62  ;;  %v3967_v29 = vpop.permute.xlu0 %3966  ;;  %v3972_v47 = vpop.permute.xlu1 %3971 }
 0x3d6   : > { %v3755_v53 = vadd.f32 %v7863_v49, %v3707_v42 }
 0x3d7   : > { %v4041_v52 = vmul.f32 %v3967_v29, %v3754_v50  ;;  %4218 = vst [vmem:[%s7869_s9 + $0x100] sm:$0xff] %v3754_v50 }
 0x3d8   : > { %v4042_v14 = vmul.f32 %v3972_v47, %v3755_v53  ;;  %4219 = vst [vmem:[%s7869_s9 + $0x108] sm:$0xff] %v3755_v53 }
 0x3d9   : > { %v4081_v43 = vadd.f32 %v4080_v30, %v4041_v52  ;;  %v4130_v31 = vmul.f32 %v4041_v52, %v3754_v50  ;;  %v3283_v3 = vpop.f32.mrb[108].mxu1  ;;  %v3644_v17 = vpop.f32.mrb[108].mxu0 }
 0x3da   : > { %v4131_v10 = vmul.f32 %v4042_v14, %v3755_v53  ;;  %v3341_v55 = vadd.f32 %v3283_v3, %v7845_v63  ;;  %v3708_v22 = vadd.f32 %v3644_v17, %v3339_v18  ;;  %v5606_v15 = vpop.f32.mrb[109].mxu1  ;;  %v5702_v7 = vpop.f32.mrb[109].mxu0 }
 0x3db   : > { %v4170_v61 = vadd.f32 %v4169_v5, %v4130_v31  ;;  %v4082_v44 = vadd.f32 %v4081_v43, %v4042_v14  ;;  %v3286_v27 = vpop.f32.mrb[110].mxu1  ;;  %v3647_v20 = vpop.f32.mrb[110].mxu0 }
 0x3dc   : > { %v3756_v60 = vadd.f32 %v7863_v49, %v3708_v22  ;;  %v3342_v16 = vadd.f32 %v3286_v27, %v7848_v26  ;;  %v3709_v35 = vadd.f32 %v3647_v20, %v3340_v34  ;;  %v5703_v24 = vpop.f32.mrb[111].mxu0  ;;  %v5607_v1 = vpop.f32.mrb[111].mxu1 }
 0x3dd   : > { %v3977_v11 = vpop.permute.xlu0 %3976  ;;  %v4171_v8 = vadd.f32 %v4170_v61, %v4131_v10  ;;  %v3982_v46 = vpop.permute.xlu1 %3981 }
 0x3de   : > { %v4043_v0 = vmul.f32 %v3977_v11, %v3756_v60  ;;  %4220 = vst [vmem:[%s7869_s9 + $0x110] sm:$0xff] %v3756_v60  ;;  %v3757_v63 = vadd.f32 %v7863_v49, %v3709_v35  ;;  %v5872_v11 = vld [vmem:[%s8002_s2] ss:$0 sm:$0xff] }
 0x3e0   : > { %v4083_v23 = vadd.f32 %v4082_v44, %v4043_v0  ;;  %v4132_v4 = vmul.f32 %v4043_v0, %v3756_v60  ;;  %v4044_v40 = vmul.f32 %v3982_v46, %v3757_v63  ;;  %4221 = vst [vmem:[%s7869_s9 + $0x118] sm:$0xff] %v3757_v63 }
 0x3e1   : > { %v3291_v21 = vpop.f32.mrb[112].mxu1  ;;  %v3652_v58 = vpop.f32.mrb[112].mxu0 }
 0x3e2   : > { %v4172_v38 = vadd.f32 %v4171_v8, %v4132_v4  ;;  %v4084_v39 = vadd.f32 %v4083_v23, %v4044_v40  ;;  %v4133_v33 = vmul.f32 %v4044_v40, %v3757_v63  ;;  %v3343_v26 = vadd.f32 %v3291_v21, %v7851_v25  ;;  %v5610_v12 = vpop.f32.mrb[113].mxu1  ;;  %v5706_v57 = vpop.f32.mrb[113].mxu0 }
 0x3e3   : > { %v3710_v13 = vadd.f32 %v3652_v58, %v3341_v55  ;;  %v3294_v54 = vpop.f32.mrb[114].mxu1  ;;  %v3655_v19 = vpop.f32.mrb[114].mxu0 }
 0x3e4   : > { %v4173_v59 = vadd.f32 %v4172_v38, %v4133_v33  ;;  %v3344_v28 = vadd.f32 %v3294_v54, %v7853_v6  ;;  %v3711_v51 = vadd.f32 %v3655_v19, %v3342_v16  ;;  %v5707_v37 = vpop.f32.mrb[115].mxu0  ;;  %v5611_v30 = vpop.f32.mrb[115].mxu1 }
 0x3e5   : > { %v3758_v48 = vadd.f32 %v7863_v49, %v3710_v13  ;;  %v3987_v18 = vpop.permute.xlu0 %3986  ;;  %v3992_v9 = vpop.permute.xlu1 %3991 }
 0x3e6   : > { %v3759_v45 = vadd.f32 %v7863_v49, %v3711_v51 }
 0x3e7   : > { %v4045_v25 = vmul.f32 %v3987_v18, %v3758_v48  ;;  %4222 = vst [vmem:[%s7869_s9 + $0x120] sm:$0xff] %v3758_v48 }
 0x3e8   : > { %v4046_v62 = vmul.f32 %v3992_v9, %v3759_v45  ;;  %4223 = vst [vmem:[%s7869_s9 + $0x128] sm:$0xff] %v3759_v45 }
 0x3e9   : > { %v4085_v41 = vadd.f32 %v4084_v39, %v4045_v25  ;;  %v4134_v56 = vmul.f32 %v4045_v25, %v3758_v48  ;;  %v3299_v5 = vpop.f32.mrb[116].mxu1  ;;  %v3660_v34 = vpop.f32.mrb[116].mxu0 }
 0x3ea   : > { %v4135_v42 = vmul.f32 %v4046_v62, %v3759_v45  ;;  %v3345_v6 = vadd.f32 %v3299_v5, %v7855_v36  ;;  %v3712_v32 = vadd.f32 %v3660_v34, %v3343_v26  ;;  %v5710_v2 = vpop.f32.mrb[117].mxu0  ;;  %v5614_v50 = vpop.f32.mrb[117].mxu1 }
 0x3eb   : > { %v4174_v29 = vadd.f32 %v4173_v59, %v4134_v56  ;;  %v4086_v53 = vadd.f32 %v4085_v41, %v4046_v62  ;;  %v3663_v47 = vpop.f32.mrb[118].mxu0  ;;  %v3302_v52 = vpop.f32.mrb[118].mxu1 }
 0x3ec   : > { %v3760_v14 = vadd.f32 %v7863_v49, %v3712_v32  ;;  %v3713_v43 = vadd.f32 %v3663_v47, %v3344_v28  ;;  %v5711_v31 = vpop.f32.mrb[119].mxu0  ;;  %v5615_v3 = vpop.f32.mrb[119].mxu1 }
 0x3ed   : > { %v3997_v17 = vpop.permute.xlu0 %3996  ;;  %v4175_v10 = vadd.f32 %v4174_v29, %v4135_v42  ;;  %v4002_v36 = vpop.permute.xlu1 %4001 }
 0x3ee   : > { %v4047_v55 = vmul.f32 %v3997_v17, %v3760_v14  ;;  %4224 = vst [vmem:[%s7869_s9 + $0x130] sm:$0xff] %v3760_v14  ;;  %v3761_v22 = vadd.f32 %v7863_v49, %v3713_v43 }
 0x3f0   : > { %v4087_v15 = vadd.f32 %v4086_v53, %v4047_v55  ;;  %v4136_v7 = vmul.f32 %v4047_v55, %v3760_v14  ;;  %v4048_v61 = vmul.f32 %v4002_v36, %v3761_v22  ;;  %4225 = vst [vmem:[%s7869_s9 + $0x138] sm:$0xff] %v3761_v22 }
 0x3f1   : > { %v3668_v44 = vpop.f32.mrb[120].mxu0  ;;  %v4007_v0 = vpop.permute.xlu0 %4006 }
 0x3f2   : > { %v4176_v27 = vadd.f32 %v4175_v10, %v4136_v7  ;;  %v4088_v20 = vadd.f32 %v4087_v15, %v4048_v61  ;;  %v4137_v60 = vmul.f32 %v4048_v61, %v3761_v22  ;;  %v3714_v16 = vadd.f32 %v3668_v44, %v3345_v6  ;;  %v5714_v35 = vpop.f32.mrb[121].mxu0 }
 0x3f3   : > { %v3671_v24 = vpop.f32.mrb[122].mxu0 }
 0x3f4   : > { %v4177_v1 = vadd.f32 %v4176_v27, %v4137_v60  ;;  %v3762_v8 = vadd.f32 %v5872_v11, %v3714_v16  ;;  %v5715_v49 = vpop.f32.mrb[123].mxu0 }
 0x3f6   : > { %v4049_v63 = vmul.f32 %v4007_v0, %v3762_v8  ;;  %4226 = vst [vmem:[%s7869_s9 + $0x140] sm:$0xf] %v3762_v8 }
 0x3f8   : > { %v4090_v46 = vsel %vm4089_vm7, %v4049_v63, 0.0  ;;  %v4138_v23 = vmul.f32 %v4049_v63, %v3762_v8 }
 0x3f9   : > { %v4091_v4 = vadd.f32 %v4090_v46, %v4088_v20 }
 0x3fa   : > { %v4178_v40 = vsel %vm4089_vm7, %v4138_v23, 0.0 }
 0x3fb   : > { %v4092_v21 = vrot.slane %v4091_v4, 4  ;;  %v4179_v58 = vadd.f32 %v4178_v40, %v4177_v1 }
 0x3fd   : > { %v4093_v38 = vadd.f32 %v4092_v21, %v4091_v4  ;;  %v4180_v39 = vrot.slane %v4179_v58, 4 }
 0x3ff   : > { %v4094_v33 = vrot.slane %v4093_v38, 2  ;;  %v4181_v26 = vadd.f32 %v4180_v39, %v4179_v58 }
 0x401   : > { %v4095_v12 = vadd.f32 %v4094_v33, %v4093_v38  ;;  %v4182_v57 = vrot.slane %v4181_v26, 2 }
 0x403   : > { %v4096_v13 = vrot.slane %v4095_v12, 1  ;;  %v4183_v54 = vadd.f32 %v4182_v57, %v4181_v26 }
 0x405   : > { %v4184_v19 = vrot.slane %v4183_v54, 1  ;;  %v4097_v59 = vadd.f32 %v4096_v13, %v4095_v12 }
 0x407   : > { %v4185_v28 = vadd.f32 %v4184_v19, %v4183_v54 }
 0x409   : > { %v4228_v51 = vsel %vm4227_vm8, %v4097_v59, %v4185_v28 }
 0x40a   : > { %v4230_v37 = vsel %vm4229_vm9, %v4228_v51, 0.0 }
 0x40b   : > { %4231 = vst [vmem:[%s235_s15] sm:$0xff] %v4230_v37 }
 0x40c PF: > { %s16_s18 = sadd.s32 1, %s5879_s18  }
 0x40d   : > { %p13_p4 = scmp.ge.s32.totalorder %s16_s18, 4  }
 0x40f   :  { %15 = sbr.rel (!%p13_p4) target bundleno = 1 (0x1), region = 86 }

// kernel: _residual_forward.4
= control target key start
LH: loop header
LB: loop body
LE: loop exit
PB: predicated region body
PF: predicated region fallthrough
CT: control target
= control target key end

     0   :  { %s6155_s24 = smov 0   ;;  %s8897_s0 = inlined_call_operand.vmem [shape: f32[2,324,128], index: 0, kind: input, shape index: {}]   ;;  %s8898_s1 = inlined_call_operand.vmem [shape: f32[1,128], index: 1, kind: input, shape index: {}]   ;;  %s8899_s2 = inlined_call_operand.vmem [shape: f32[1,128], index: 2, kind: input, shape index: {}]   ;;  %s8900_s3 = inlined_call_operand.vmem [shape: bf16[9,128,128], index: 3, kind: input, shape index: {}]   ;;  %s8901_s4 = inlined_call_operand.vmem [shape: f32[1,128], index: 4, kind: input, shape index: {}]   ;;  %s8902_s5 = inlined_call_operand.vmem [shape: f32[1,324,1], index: 5, kind: input, shape index: {}]   ;;  %s8903_s6 = inlined_call_operand.vmem [shape: f32[2,324,128], index: 6, kind: output, shape index: {0}]   ;;  %s8904_s7 = inlined_call_operand.vmem [shape: f32[2,8,128], index: 7, kind: output, shape index: {1}]  }
   0x1 LB: > { %s4626_s25 = sadd.s32 4294967295, %s6110_s24   ;;  %p4630_p0 = scmp.ge.s32.totalorder %s6110_s24, 1  ;;  %s6110_s24 = sphi %s6155_s24, %s18_s24  }
   0x2   : > { %p240_p1 = scmp.lt.s32.totalorder %s6110_s24, 3 }
   0x4   : > { %p241_p2 = pnand %p4630_p0, %p240_p1 }
   0x6   : > { %244 = sbr.rel (%p241_p2) target bundleno = 1163 (0x48b), region = 44 }
   0xd   : > { %v309_v0 = vld [vmem:[%s8902_s5 + $0x90] sm:$0xff]  ;;  %v291_v1 = vld [vmem:[%s8902_s5] sm:$0xff]  ;;  %v8905_v2 = vmov 0   ;;  %v310_v3 = vld [vmem:[%s8902_s5 + $0x98] sm:$0xff]  ;;  %v8908_v5 = vmov 0.0   ;;  %vm6114_vm0 = vmmov 0  }
   0xe   : > { %6029 = vset.pattern.permute.xlu1 %v8905_v2  ;;  %6028 = vset.pattern.permute.xlu0 %v8905_v2  ;;  %v292_v4 = vld [vmem:[%s8902_s5 + $0x8] sm:$0xff]  ;;  %v311_v7 = vld [vmem:[%s8902_s5 + $0xa0] sm:$0xff]  ;;  %v314_v8 = vld [vmem:[%s8902_s5 + $0xb8] sm:$0xff]  ;;  %p276_p3 = scmp.lt.s32.totalorder %s4626_s25, 1  ;;  %vm777_vm1 = vsmask.f32 1280 }
   0xf   : > { %602 = vperm.xlu1 %6029, %v309_v0   ;;  %512 = vperm.xlu0 %6028, %v291_v1   ;;  %v312_v6 = vld [vmem:[%s8902_s5 + $0xa8] sm:$0xff]  ;;  %v313_v9 = vld [vmem:[%s8902_s5 + $0xb0] sm:$0xff]  ;;  %v294_v10 = vld [vmem:[%s8902_s5 + $0x18] sm:$0xff]  ;;  %vm987_vm2 = vcmask 1041408   ;;  %vm1027_vm3 = vsmask.f32 7424 }
  0x10   : > { %5100 = vmatprep.subr.bf16.mxu0 %v8908_v5  ;;  %6000 = vmatprep.subr.bf16.mxu1 %v8908_v5  ;;  %v6030_v11 = vld [vmem:[%s8900_s3 + $0x40] sm:$0xff]   ;;  %v293_v12 = vld [vmem:[%s8902_s5 + $0x10] sm:$0xff]  ;;  %v6031_v13 = vld [vmem:[%s8900_s3 + $0x48] sm:$0xff]   ;;  %s9343_s25 = smov (!%p276_p3, %s4626_s25), 1  ;;  %vm1731_vm5 = vcmask 1046528   ;;  %vm990_vm7 = vcmask 1043456  }
  0x11   : > { %5101 = vmatpush3.bf16.msra.mxu0 %v6030_v11  ;;  %6008 = vmatpush3.bf16.msra.mxu1 %v6030_v11  ;;  %v316_v14 = vld [vmem:[%s8902_s5 + $0xc8] sm:$0xff]  ;;  %v315_v15 = vld [vmem:[%s8902_s5 + $0xc0] sm:$0xff]  ;;  %v6032_v16 = vld [vmem:[%s8900_s3 + $0x50] sm:$0xff]   ;;  %s6016_s17 = smul.u32 328, %s9343_s25  ;;  %vm2411_vm6 = vsmask.f32 6400 }
  0x12   : > { %5102 = vmatprep.subr.bf16.mxu0 %v8908_v5  ;;  %6001 = vmatprep.subr.bf16.mxu1 %v8908_v5  ;;  %v296_v17 = vld [vmem:[%s8902_s5 + $0x28] sm:$0xff]  ;;  %v295_v18 = vld [vmem:[%s8902_s5 + $0x20] sm:$0xff]  ;;  %v6033_v19 = vld [vmem:[%s8900_s3 + $0x58] sm:$0xff]   ;;  %vm991_vm8 = vsmask.f32 3328  ;;  %vm2827_vm10 = vcmask 1045504  }
  0x13   : > { %607 = vperm.xlu1 %6029, %v310_v3   ;;  %517 = vperm.xlu0 %6028, %v292_v4   ;;  %v318_v20 = vld [vmem:[%s8902_s5 + $0xd8] sm:$0xff]  ;;  %v317_v21 = vld [vmem:[%s8902_s5 + $0xd0] sm:$0xff]  ;;  %v6034_v22 = vld [vmem:[%s8900_s3 + $0x60] sm:$0xff]   ;;  %s6346_s20 = scalar_lea.vmem %s8897_s0, %s6016_s17  ;;  %vm3506_vm11 = vsmask.f32 5376  ;;  %vm3917_vm12 = vcmask 1044480   ;;  %s8723_s22 = scalar_lea.vmem %s8903_s6, %s6016_s17 }
  0x14   : > { %5116 = vmatprep.mubr.msk.bf16.mxu0 %vm6114_vm0, %v8908_v5  ;;  %5160 = vmatprep.mubr.msk.bf16.mxu1 %vm6114_vm0, %v8908_v5  ;;  %v298_v23 = vld [vmem:[%s8902_s5 + $0x38] sm:$0xff]  ;;  %v297_v24 = vld [vmem:[%s8902_s5 + $0x30] sm:$0xff]  ;;  %v6035_v25 = vld [vmem:[%s8900_s3 + $0x68] sm:$0xff]   ;;  %s4633_s17 = sshll.u32 %s9343_s25, 3  ;;  %vm4535_vm13 = vcmask 1040384  }
  0x15   : > { %5103 = vmatpush3.bf16.msra.mxu0 %v6031_v13  ;;  %6009 = vmatpush3.bf16.msra.mxu1 %v6031_v13  ;;  %v320_v26 = vld [vmem:[%s8902_s5 + $0xe8] sm:$0xff]  ;;  %v319_v27 = vld [vmem:[%s8902_s5 + $0xe0] sm:$0xff]  ;;  %v6036_v28 = vld [vmem:[%s8900_s3 + $0x70] sm:$0xff]   ;;  %s289_s27 = scalar_lea.vmem %s8904_s7, %s4633_s17 }
  0x16   : > { %5104 = vmatprep.subr.bf16.mxu0 %v8908_v5  ;;  %6002 = vmatprep.subr.bf16.mxu1 %v8908_v5  ;;  %v300_v29 = vld [vmem:[%s8902_s5 + $0x48] sm:$0xff]  ;;  %v299_v30 = vld [vmem:[%s8902_s5 + $0x40] sm:$0xff]  ;;  %v6037_v31 = vld [vmem:[%s8900_s3 + $0x78] sm:$0xff]  }
  0x17   : > { %617 = vperm.xlu1 %6029, %v312_v6   ;;  %612 = vperm.xlu0 %6028, %v311_v7   ;;  %v322_v32 = vld [vmem:[%s8902_s5 + $0xf8] sm:$0xff]  ;;  %v321_v33 = vld [vmem:[%s8902_s5 + $0xf0] sm:$0xff]  ;;  %v324_v36 = vld [vmem:[%s8902_s5 + $0x108] sm:$0xff] }
  0x18   : > { %v302_v34 = vld [vmem:[%s8902_s5 + $0x58] sm:$0xff]  ;;  %v301_v35 = vld [vmem:[%s8902_s5 + $0x50] sm:$0xff]  ;;  %v323_v37 = vld [vmem:[%s8902_s5 + $0x100] sm:$0xff] }
  0x19   : > { %5105 = vmatpush3.bf16.msra.mxu0 %v6032_v16  ;;  %6010 = vmatpush3.bf16.msra.mxu1 %v6032_v16  ;;  %v304_v38 = vld [vmem:[%s8902_s5 + $0x68] sm:$0xff]  ;;  %v303_v39 = vld [vmem:[%s8902_s5 + $0x60] sm:$0xff]  ;;  %v326_v40 = vld [vmem:[%s8902_s5 + $0x118] sm:$0xff]  ;;  %v6394_v16 = vrot.slane %v8905_v2, 1 }
  0x1a   : > { %5106 = vmatprep.subr.bf16.mxu0 %v8908_v5  ;;  %6003 = vmatprep.subr.bf16.mxu1 %v8908_v5  ;;  %v325_v41 = vld [vmem:[%s8902_s5 + $0x110] sm:$0xff]  ;;  %v306_v42 = vld [vmem:[%s8902_s5 + $0x78] sm:$0xff]  ;;  %v328_v44 = vld [vmem:[%s8902_s5 + $0x128] sm:$0xff] }
  0x1b   : > { %627 = vperm.xlu1 %6029, %v314_v8   ;;  %622 = vperm.xlu0 %6028, %v313_v9   ;;  %v305_v43 = vld [vmem:[%s8902_s5 + $0x70] sm:$0xff]  ;;  %v327_v45 = vld [vmem:[%s8902_s5 + $0x120] sm:$0xff]  ;;  %v308_v46 = vld [vmem:[%s8902_s5 + $0x88] sm:$0xff] }
  0x1c   : > { %v307_v47 = vld [vmem:[%s8902_s5 + $0x80] sm:$0xff]  ;;  %v330_v48 = vld [vmem:[%s8902_s5 + $0x138] sm:$0xff]  ;;  %v329_v49 = vld [vmem:[%s8902_s5 + $0x130] sm:$0xff] }
  0x1d   : > { %5107 = vmatpush3.bf16.msra.mxu0 %v6033_v19  ;;  %6011 = vmatpush3.bf16.msra.mxu1 %v6033_v19  ;;  %v331_v50 = vld [vmem:[%s8902_s5 + $0x140] sm:$0xf]  ;;  %v350_v52 = vld [vmem:[%s6346_s20 + $0x90] sm:$0xff]  ;;  %v351_v56 = vld [vmem:[%s6346_s20 + $0x98] sm:$0xff] }
  0x1e   : > { %5108 = vmatprep.subr.bf16.mxu0 %v8908_v5  ;;  %6004 = vmatprep.subr.bf16.mxu1 %v8908_v5  ;;  %v6351_v51 = vld [vmem:[%s8898_s1] ss:$0 sm:$0xff]  ;;  %v333_v57 = vld [vmem:[%s6346_s20 + $0x8] sm:$0xff]  ;;  %v355_v61 = vld [vmem:[%s6346_s20 + $0xb8] sm:$0xff] }
  0x1f   : > { %527 = vperm.xlu1 %6029, %v294_v10   ;;  %522 = vperm.xlu0 %6028, %v293_v12   ;;  %v332_v53 = vld [vmem:[%s6346_s20] sm:$0xff]  ;;  %v398_v54 = vmul.f32 %v6351_v51, %v350_v52  ;;  %v353_v58 = vld [vmem:[%s6346_s20 + $0xa8] sm:$0xff]  ;;  %v399_v62 = vmul.f32 %v6351_v51, %v351_v56  ;;  %v381_v63 = vmul.f32 %v6351_v51, %v333_v57  ;;  %v354_v1 = vld [vmem:[%s6346_s20 + $0xb0] sm:$0xff] }
  0x20   : > { %v380_v55 = vmul.f32 %v6351_v51, %v332_v53  ;;  %v6363_v59 = vld [vmem:[%s8899_s2] ss:$0 sm:$0xff]  ;;  %v401_v0 = vmul.f32 %v6351_v51, %v353_v58  ;;  %v403_v7 = vmul.f32 %v6351_v51, %v355_v61  ;;  %v335_v8 = vld [vmem:[%s6346_s20 + $0x18] sm:$0xff]  ;;  %v402_v9 = vmul.f32 %v6351_v51, %v354_v1  ;;  %v334_v10 = vld [vmem:[%s6346_s20 + $0x10] sm:$0xff] }
  0x21   : > { %5109 = vmatpush3.bf16.msra.mxu0 %v6034_v22  ;;  %6012 = vmatpush3.bf16.msra.mxu1 %v6034_v22  ;;  %v352_v60 = vld [vmem:[%s6346_s20 + $0xa0] sm:$0xff]  ;;  %v6372_v3 = vadd.f32 %v6363_v59, %v398_v54  ;;  %v357_v11 = vld [vmem:[%s6346_s20 + $0xc8] sm:$0xff]  ;;  %v6385_v13 = vadd.f32 %v6363_v59, %v399_v62  ;;  %v359_v19 = vld [vmem:[%s6346_s20 + $0xd8] sm:$0xff] }
  0x22   : > { %5110 = vmatprep.subr.bf16.mxu0 %v8908_v5  ;;  %6005 = vmatprep.subr.bf16.mxu1 %v8908_v5  ;;  %v6375_v4 = vadd.f32 %v6363_v59, %v380_v55  ;;  %v400_v6 = vmul.f32 %v6351_v51, %v352_v60  ;;  %v356_v12 = vld [vmem:[%s6346_s20 + $0xc0] sm:$0xff]  ;;  %v363_v56 = vld [vmem:[%s6346_s20 + $0xf8] sm:$0xff]  ;;  %vm6555_vm4 = vmand %vm987_vm2, %vm777_vm1 }
  0x23   : > { %637 = vperm.xlu1 %6029, %v316_v14   ;;  %632 = vperm.xlu0 %6028, %v315_v15   ;;  %v6388_v14 = vadd.f32 %v6363_v59, %v381_v63  ;;  %v6391_v15 = vadd.f32 %v6363_v59, %v401_v0  ;;  %vm7263_vm9 = vmand %vm990_vm7, %vm991_vm8 }
  0x24   : > { %v6402_v22 = vadd.f32 %v6363_v59, %v400_v6 }
  0x25   : > { %5111 = vmatpush3.bf16.msra.mxu0 %v6035_v25  ;;  %6013 = vmatpush3.bf16.msra.mxu1 %v6035_v25  ;;  %v6407_v25 = vadd.f32 %v6363_v59, %v403_v7 }
  0x26   : > { %5112 = vmatprep.subr.bf16.mxu0 %v8908_v5  ;;  %6006 = vmatprep.subr.bf16.mxu1 %v8908_v5 }
  0x27   : > { %537 = vperm.xlu1 %6029, %v296_v17   ;;  %532 = vperm.xlu0 %6028, %v295_v18   ;;  %v337_v17 = vld [vmem:[%s6346_s20 + $0x28] sm:$0xff]  ;;  %v336_v18 = vld [vmem:[%s6346_s20 + $0x20] sm:$0xff] }
  0x29   : > { %5113 = vmatpush3.bf16.msra.mxu0 %v6036_v28  ;;  %6014 = vmatpush3.bf16.msra.mxu1 %v6036_v28  ;;  %v404_v28 = vmul.f32 %v6351_v51, %v356_v12  ;;  %v362_v12 = vld [vmem:[%s6346_s20 + $0xf0] sm:$0xff] }
  0x2a   : > { %5114 = vmatprep.subr.bf16.mxu0 %v8908_v5  ;;  %6007 = vmatprep.subr.bf16.mxu1 %v8908_v5 }
  0x2b   : > { %647 = vperm.xlu1 %6029, %v318_v20   ;;  %642 = vperm.xlu0 %6028, %v317_v21   ;;  %v487_v20 = vmax.f32 %v6372_v3, 0.0  ;;  %v469_v21 = vmax.f32 %v6375_v4, 0.0 }
  0x2d   : > { %5115 = vmatpush3.bf16.msra.mxu0 %v6037_v31  ;;  %6015 = vmatpush3.bf16.msra.mxu1 %v6037_v31  ;;  %v6415_v31 = vadd.f32 %v6363_v59, %v402_v9 }
  0x2e   : > { %5300 = vmatprep.subr.bf16.mxu0 %v8908_v5  ;;  %5200 = vmatprep.subr.bf16.mxu1 %v8908_v5 }
  0x2f   : > { %547 = vperm.xlu1 %6029, %v298_v23   ;;  %542 = vperm.xlu0 %6028, %v297_v24   ;;  %v383_v23 = vmul.f32 %v6351_v51, %v335_v8  ;;  %v358_v24 = vld [vmem:[%s6346_s20 + $0xd0] sm:$0xff]  ;;  %v491_v52 = vmax.f32 %v6415_v31, 0.0 }
  0x33   : > { %657 = vperm.xlu1 %6029, %v320_v26   ;;  %652 = vperm.xlu0 %6028, %v319_v27   ;;  %v382_v26 = vmul.f32 %v6351_v51, %v334_v10  ;;  %v405_v27 = vmul.f32 %v6351_v51, %v357_v11  ;;  %v411_v11 = vmul.f32 %v6351_v51, %v363_v56 }
  0x37   : > { %557 = vperm.xlu1 %6029, %v300_v29   ;;  %552 = vperm.xlu0 %6028, %v299_v30   ;;  %v339_v29 = vld [vmem:[%s6346_s20 + $0x38] sm:$0xff]  ;;  %v338_v30 = vld [vmem:[%s6346_s20 + $0x30] sm:$0xff] }
  0x3b   : > { %667 = vperm.xlu1 %6029, %v322_v32   ;;  %662 = vperm.xlu0 %6028, %v321_v33   ;;  %v385_v32 = vmul.f32 %v6351_v51, %v337_v17  ;;  %v384_v33 = vmul.f32 %v6351_v51, %v336_v18  ;;  %v343_v18 = vld [vmem:[%s6346_s20 + $0x58] sm:$0xff] }
  0x3d   : > { %v6446_v53 = vadd.f32 %v6363_v59, %v385_v32  ;;  %v6449_v54 = vadd.f32 %v6363_v59, %v384_v33  ;;  %v410_v33 = vmul.f32 %v6351_v51, %v362_v12 }
  0x3f   : > { %567 = vperm.xlu1 %6029, %v302_v34   ;;  %562 = vperm.xlu0 %6028, %v301_v35   ;;  %v407_v34 = vmul.f32 %v6351_v51, %v359_v19  ;;  %v488_v35 = vmax.f32 %v6385_v13, 0.0  ;;  %v474_v13 = vmax.f32 %v6446_v53, 0.0  ;;  %v342_v19 = vld [vmem:[%s6346_s20 + $0x50] sm:$0xff]  ;;  %v6525_v4 = vadd.f32 %v6363_v59, %v410_v33  ;;  %v6039_v53 = vld [vmem:[%s8900_s3] sm:$0xff]  }
  0x41   : > { %v6452_v55 = vadd.f32 %v6363_v59, %v407_v34  ;;  %v364_v34 = vld [vmem:[%s6346_s20 + $0x100] sm:$0xff] }
  0x42   : > { %v412_v12 = vmul.f32 %v6351_v51, %v364_v34 }
  0x43   : > { %677 = vperm.xlu1 %6029, %v324_v36   ;;  %672 = vperm.xlu0 %6028, %v323_v37   ;;  %v470_v36 = vmax.f32 %v6388_v14, 0.0  ;;  %v490_v37 = vmax.f32 %v6391_v15, 0.0  ;;  %v473_v14 = vmax.f32 %v6449_v54, 0.0 }
  0x47   : > { %577 = vperm.xlu1 %6029, %v304_v38   ;;  %572 = vperm.xlu0 %6028, %v303_v39   ;;  %v406_v38 = vmul.f32 %v6351_v51, %v358_v24  ;;  %v489_v39 = vmax.f32 %v6402_v22, 0.0 }
  0x49   : > { %v6456_v57 = vadd.f32 %v6363_v59, %v406_v38 }
  0x4b   : > { %687 = vperm.xlu1 %6029, %v326_v40   ;;  %682 = vperm.xlu0 %6028, %v325_v41   ;;  %v6426_v40 = vadd.f32 %v6363_v59, %v383_v23  ;;  %v387_v41 = vmul.f32 %v6351_v51, %v339_v29  ;;  %v365_v23 = vld [vmem:[%s6346_s20 + $0x108] sm:$0xff] }
  0x4d   : > { %v472_v62 = vmax.f32 %v6426_v40, 0.0  ;;  %v6463_v63 = vadd.f32 %v6363_v59, %v387_v41 }
  0x4f   : > { %587 = vperm.xlu1 %6029, %v306_v42   ;;  %582 = vperm.xlu0 %6028, %v305_v43   ;;  %v386_v42 = vmul.f32 %v6351_v51, %v338_v30  ;;  %v361_v43 = vld [vmem:[%s6346_s20 + $0xe8] sm:$0xff] }
  0x50   : > { %v409_v58 = vmul.f32 %v6351_v51, %v361_v43  ;;  %v391_v43 = vmul.f32 %v6351_v51, %v343_v18 }
  0x51   : > { %v6466_v0 = vadd.f32 %v6363_v59, %v386_v42  ;;  %v6506_v42 = vadd.f32 %v6363_v59, %v411_v11 }
  0x53   : > { %697 = vperm.xlu1 %6029, %v328_v44   ;;  %692 = vperm.xlu0 %6028, %v327_v45   ;;  %v360_v44 = vld [vmem:[%s6346_s20 + $0xe0] sm:$0xff]  ;;  %v341_v45 = vld [vmem:[%s6346_s20 + $0x48] sm:$0xff] }
  0x54   : > { %v408_v60 = vmul.f32 %v6351_v51, %v360_v44  ;;  %v389_v61 = vmul.f32 %v6351_v51, %v341_v45  ;;  %v390_v44 = vmul.f32 %v6351_v51, %v342_v19  ;;  %v413_v45 = vmul.f32 %v6351_v51, %v365_v23 }
  0x55   : > { %v6534_v23 = vadd.f32 %v6363_v59, %v391_v43 }
  0x56   : > { %v6537_v34 = vadd.f32 %v6363_v59, %v390_v44 }
  0x57   : > { %597 = vperm.xlu1 %6029, %v308_v46   ;;  %592 = vperm.xlu0 %6028, %v307_v47   ;;  %v492_v46 = vmax.f32 %v6407_v25, 0.0  ;;  %v6435_v47 = vadd.f32 %v6363_v59, %v382_v26  ;;  %v6486_v26 = vadd.f32 %v6363_v59, %v409_v58 }
  0x59   : > { %v471_v8 = vmax.f32 %v6435_v47, 0.0 }
  0x5b   : > { %707 = vperm.xlu1 %6029, %v330_v48   ;;  %702 = vperm.xlu0 %6028, %v329_v49   ;;  %v6438_v48 = vadd.f32 %v6363_v59, %v405_v27  ;;  %v6441_v49 = vadd.f32 %v6363_v59, %v404_v28  ;;  %v6489_v27 = vadd.f32 %v6363_v59, %v408_v60 }
  0x5c   : > { %v6492_v28 = vadd.f32 %v6363_v59, %v389_v61  ;;  %v6038_v61 = vld [vmem:[%s8900_s3 + $0x80] sm:$0xff]  }
  0x5d   : > { %v494_v9 = vmax.f32 %v6438_v48, 0.0  ;;  %v493_v10 = vmax.f32 %v6441_v49, 0.0  ;;  %v346_v48 = vld [vmem:[%s6346_s20 + $0x70] sm:$0xff] }
  0x5f   : > { %712 = vperm.xlu0 %6028, %v331_v50   ;;  %v340_v50 = vld [vmem:[%s6346_s20 + $0x40] sm:$0xff] }
  0x60   : > { %v388_v1 = vmul.f32 %v6351_v51, %v340_v50 }
  0x62   : > { %v6497_v32 = vadd.f32 %v6363_v59, %v388_v1  ;;  %v344_v1 = vld [vmem:[%s6346_s20 + $0x60] sm:$0xff] }
  0x8e   : > { %v6469_v6 = vpop.permute.xlu1 %602  ;;  %v6471_v7 = vpop.permute.xlu0 %512 }
  0x8f   : > { %9031 = vst [vmem:[#allocation2_spill] sm:$0xff] %v6469_v6  ;;  %9032 = vst [vmem:[#allocation3_spill] sm:$0xff] %v6471_v7  ;;  %v733_v50 = vmul.f32 %v6469_v6, %v487_v20  ;;  %v715_v56 = vmul.f32 %v6471_v7, %v469_v21  ;;  %v345_v21 = vld [vmem:[%s6346_s20 + $0x68] sm:$0xff] }
  0x90   : > { %v393_v44 = vmul.f32 %v6351_v51, %v345_v21 }
  0x92   : > { %v6501_v38 = vpop.permute.xlu1 %607  ;;  %v6503_v41 = vpop.permute.xlu0 %517 }
  0x93   : > { %9033 = vst [vmem:[#allocation4_spill] sm:$0xff] %v6501_v38  ;;  %9034 = vst [vmem:[#allocation5_spill] sm:$0xff] %v6503_v41  ;;  %v734_v58 = vmul.f32 %v6501_v38, %v488_v35  ;;  %v716_v60 = vmul.f32 %v6503_v41, %v470_v36  ;;  %v6549_v36 = vadd.f32 %v6363_v59, %v412_v12 }
  0x95   : > { %v765_v18 = vpack.c.bf16 %v734_v58, %v733_v50  ;;  %v756_v3 = vpack.c.bf16 %v716_v60, %v715_v56  ;;  %v6540_v50 = vadd.f32 %v6363_v59, %v413_v45 }
  0x96   : > { %v6528_v19 = vpop.permute.xlu1 %617  ;;  %v6530_v35 = vpop.permute.xlu0 %612 }
  0x97   : > { %9035 = vst [vmem:[#allocation6_spill] sm:$0xff] %v6528_v19  ;;  %9036 = vst [vmem:[#allocation7_spill] sm:$0xff] %v6530_v35  ;;  %v859_v56 = vshrl.u32 %v765_v18, 16  ;;  %v862_v33 = vshll.u32 %v765_v18, 16  ;;  %v779_v58 = vshrl.u32 %v756_v3, 16  ;;  %v782_v60 = vshll.u32 %v756_v3, 16 }
  0x98   : > { %v736_v2 = vmul.f32 %v6528_v19, %v490_v37  ;;  %v735_v43 = vmul.f32 %v6530_v35, %v489_v39  ;;  %v392_v3 = vmul.f32 %v6351_v51, %v344_v1  ;;  %v9057_v19 = vmax.f32 %v6452_v55, 0.0 }
  0x99   : > { %v861_v45 = vrot.slane %v859_v56, 6  ;;  %v864_v20 = vrot.slane %v862_v33, 7  ;;  %v781_v11 = vrot.slane %v779_v58, 6  ;;  %v784_v18 = vrot.slane %v782_v60, 7 }
  0x9a   : > { %v766_v37 = vpack.c.bf16 %v736_v2, %v735_v43  ;;  %v6559_v22 = vpop.permute.xlu1 %627  ;;  %v6561_v39 = vpop.permute.xlu0 %622  ;;  %v9064_v55 = vmax.f32 %v6463_v63, 0.0 }
  0x9b   : > { %9039 = vst [vmem:[#allocation8_spill] sm:$0xff] %v6559_v22  ;;  %9040 = vst [vmem:[#allocation9_spill] sm:$0xff] %v6561_v39  ;;  %v6566_v56 = vor.u32 %v784_v18, %v781_v11  ;;  %v738_v33 = vmul.f32 %v6559_v22, %v492_v46  ;;  %v737_v2 = vmul.f32 %v6561_v39, %v491_v52 }
  0x9c   : > { %v868_v60 = vshrl.u32 %v766_v37, 16  ;;  %v871_v43 = vshll.u32 %v766_v37, 16  ;;  %v6577_v11 = vor.u32 %v864_v20, %v861_v45  ;;  %v6585_v46 = vadd.f32 %v6363_v59, %v393_v44  ;;  %v367_v45 = vld [vmem:[%s6346_s20 + $0x118] sm:$0xff] }
  0x9d   : > { %v6582_v25 = vsel %vm6555_vm4, 0, %v6566_v56  ;;  %v767_v31 = vpack.c.bf16 %v738_v33, %v737_v2  ;;  %v366_v33 = vld [vmem:[%s6346_s20 + $0x110] sm:$0xff]  ;;  %v415_v47 = vmul.f32 %v6351_v51, %v367_v45 }
  0x9e   : > { %9041 = vst [vmem:[#allocation10_spill] sm:$0xff] %v6582_v25  ;;  %v870_v52 = vrot.slane %v868_v60, 6  ;;  %v873_v18 = vrot.slane %v871_v43, 7  ;;  %v6587_v58 = vpop.permute.xlu1 %527  ;;  %v6589_v37 = vpop.permute.xlu0 %522  ;;  %v1036_v1 = vshll.u32 %v6582_v25, 16  ;;  %v8907_v20 = vshrl.u32 %v6582_v25, 16 }
  0x9f   : > { %9042 = vst [vmem:[#allocation11_spill] sm:$0xff] %v6587_v58  ;;  %9043 = vst [vmem:[#allocation12_spill] sm:$0xff] %v6589_v37  ;;  %v877_v12 = vshrl.u32 %v767_v31, 16  ;;  %v880_v21 = vshll.u32 %v767_v31, 16  ;;  %v718_v15 = vmul.f32 %v6587_v58, %v472_v62  ;;  %v717_v44 = vmul.f32 %v6589_v37, %v471_v8 }
  0xa0   : > { %v874_v2 = vor.u32 %v873_v18, %v870_v52  ;;  %v6601_v60 = vrot.slane %v1036_v1, 1  ;;  %v6603_v43 = vrot.slane %v1036_v1, 2  ;;  %v6610_v31 = vrot.slane %v8907_v20, 1 }
  0xa1   : > { %v879_v40 = vrot.slane %v877_v12, 6  ;;  %v882_v62 = vrot.slane %v880_v21, 7  ;;  %v757_v30 = vpack.c.bf16 %v718_v15, %v717_v44  ;;  %v414_v29 = vmul.f32 %v6351_v51, %v366_v33 }
  0xa2   : > { %9044 = vst [vmem:[#allocation13_spill] sm:$0xff] %v6603_v43  ;;  %9045 = vst [vmem:[#allocation14_spill] sm:$0xff] %v6610_v31  ;;  %v6615_v8 = vsel %vm777_vm1, %v6577_v11, %v874_v2  ;;  %v6617_v52 = vpop.permute.xlu1 %637  ;;  %v6619_v18 = vpop.permute.xlu0 %632  ;;  %v1039_v1 = vsel %vm1027_vm3, %v6394_v16, %v6601_v60  ;;  %v6653_v33 = vadd.f32 %v6363_v59, %v415_v47 }
  0xa3   : > { %9046 = vst [vmem:[#allocation15_spill] sm:$0xff] %v6615_v8  ;;  %9047 = vst [vmem:[#allocation16_spill] sm:$0xff] %v6617_v52  ;;  %v6627_v21 = vor.u32 %v882_v62, %v879_v40  ;;  %v787_v45 = vshrl.u32 %v757_v30, 16  ;;  %v790_v15 = vshll.u32 %v757_v30, 16  ;;  %v740_v44 = vmul.f32 %v6617_v52, %v494_v9  ;;  %5117 = vmatmul.mubr.bf16.vlgmr.msra.gmra.mrb[0].mxu0 %v1039_v1  ;;  %v6040_v30 = vld [vmem:[%s8900_s3 + $0x88] sm:$0xff]  }
  0xa4   : > { %9048 = vst [vmem:[#allocation17_spill] sm:$0xff] %v6619_v18  ;;  %v739_v20 = vmul.f32 %v6619_v18, %v493_v10  ;;  %5301 = vmatpush3.bf16.msra.mxu0 %v6038_v61  ;;  %v6636_v24 = vshll.u32 %v6615_v8, 16  ;;  %5120 = vmatprep.mubr.msk.bf16.mxu0 %vm6114_vm0, %v8908_v5  ;;  %v6645_v9 = vadd.f32 %v6363_v59, %v392_v3  ;;  %v6661_v12 = vshrl.u32 %v6615_v8, 16 }
  0xa5   : > { %v6649_v49 = vsel %vm777_vm1, %v874_v2, %v6627_v21  ;;  %v789_v10 = vrot.slane %v787_v45, 6  ;;  %v792_v61 = vrot.slane %v790_v15, 7  ;;  %5302 = vmatprep.subr.bf16.mxu0 %v8908_v5  ;;  %v347_v45 = vld [vmem:[%s6346_s20 + $0x78] sm:$0xff] }
  0xa6   : > { %9049 = vst [vmem:[#allocation18_spill] sm:$0xff] %v6649_v49  ;;  %v768_v40 = vpack.c.bf16 %v740_v44, %v739_v20  ;;  %v6655_v62 = vpop.permute.xlu1 %537  ;;  %v6657_v1 = vpop.permute.xlu0 %532  ;;  %v8911_v3 = vrot.slane %v6636_v24, 1  ;;  %v6664_v2 = vshll.u32 %v6649_v49, 16  ;;  %v6674_v44 = vadd.f32 %v6363_v59, %v414_v29  ;;  %v6042_v29 = vld [vmem:[%s8900_s3 + $0x90] sm:$0xff]  }
  0xa7   : > { %9050 = vst [vmem:[#allocation19_spill] sm:$0xff] %v6655_v62  ;;  %9051 = vst [vmem:[#allocation20_spill] sm:$0xff] %v6657_v1  ;;  %v793_v15 = vor.u32 %v792_v61, %v789_v10  ;;  %v720_v47 = vmul.f32 %v6655_v62, %v474_v13  ;;  %v719_v20 = vmul.f32 %v6657_v1, %v473_v14  ;;  %v9054_v14 = vmov 0.0  }
  0xa8   : > { %9052 = vst [vmem:[#allocation21_spill] sm:$0xff] %v6664_v2  ;;  %v886_v17 = vshrl.u32 %v768_v40, 16  ;;  %v889_v5 = vshll.u32 %v768_v40, 16  ;;  %v1122_v52 = vor.u32 %v6661_v12, %v8911_v3  ;;  %v1126_v10 = vrot.slane %v6664_v2, 1  ;;  %5303 = vmatpush3.bf16.msra.mxu0 %v6040_v30 }
  0xa9   : > { %v6686_v54 = vsel %vm777_vm1, %v6566_v56, %v793_v15  ;;  %v758_v13 = vpack.c.bf16 %v720_v47, %v719_v20  ;;  %5304 = vmatprep.subr.bf16.mxu0 %v9054_v14  ;;  %v395_v40 = vmul.f32 %v6351_v51, %v347_v45  ;;  %v394_v47 = vmul.f32 %v6351_v51, %v346_v48 }
  0xaa   : > { %9053 = vst [vmem:[#allocation22_spill] sm:$0xff] %v6686_v54  ;;  %v888_v3 = vrot.slane %v886_v17, 6  ;;  %v891_v18 = vrot.slane %v889_v5, 7  ;;  %v6694_v22 = vpop.permute.xlu1 %647  ;;  %v6696_v30 = vpop.permute.xlu0 %642  ;;  %v1127_v56 = vsel %vm1027_vm3, %v1122_v52, %v1126_v10  ;;  %v9058_v61 = vmax.f32 %v6456_v57, 0.0  ;;  %v6041_v52 = vld [vmem:[%s8900_s3 + $0x8] sm:$0xff]  }
  0xab   : > { %9055 = vst [vmem:[#allocation23_spill] sm:$0xff] %v6694_v22  ;;  %9056 = vst [vmem:[#allocation24_spill] sm:$0xff] %v6696_v30  ;;  %v796_v20 = vshrl.u32 %v758_v13, 16  ;;  %v799_v39 = vshll.u32 %v758_v13, 16  ;;  %v742_v35 = vmul.f32 %v6694_v22, %v9057_v19  ;;  %5161 = vmatmul.mubr.bf16.vlgmr.msra.gmra.mrb[0].mxu1 %v1127_v56  ;;  %v6707_v17 = vshll.u32 %v6686_v54, 16 }
  0xac   : > { %v741_v45 = vmul.f32 %v6696_v30, %v9058_v61  ;;  %v892_v5 = vor.u32 %v891_v18, %v888_v3  ;;  %5201 = vmatpush3.bf16.msra.mxu1 %v6039_v53  ;;  %5164 = vmatprep.mubr.msk.bf16.mxu1 %vm6114_vm0, %v9054_v14  ;;  %v6718_v18 = vadd.f32 %v6363_v59, %v395_v40  ;;  %v9063_v56 = vshrl.u32 %v6582_v25, 16 }
  0xad   : > { %9059 = vst [vmem:[#allocation25_spill] sm:$0xff] %v6707_v17  ;;  %v798_v19 = vrot.slane %v796_v20, 6  ;;  %v801_v48 = vrot.slane %v799_v39, 7  ;;  %5202 = vmatprep.subr.bf16.mxu1 %v9054_v14  ;;  %5305 = vmatpush3.bf16.msra.mxu0 %v6042_v29  ;;  %v6044_v39 = vld [vmem:[%s8900_s3 + $0x98] sm:$0xff]   ;;  %v6737_v29 = vadd.f32 %v6363_v59, %v394_v47  ;;  %v6750_v38 = vshrl.u32 %v6649_v49, 16 }
  0xae   : > { %v769_v13 = vpack.c.bf16 %v742_v35, %v741_v45  ;;  %v6722_v3 = vsel %vm777_vm1, %v6627_v21, %v892_v5  ;;  %v6724_v53 = vpop.permute.xlu1 %547  ;;  %v6726_v61 = vpop.permute.xlu0 %542  ;;  %v1042_v20 = vor.u32 %v9063_v56, %v6601_v60  ;;  %v1046_v35 = vrot.slane %v6707_v17, 1  ;;  %5306 = vmatprep.subr.bf16.mxu0 %v9054_v14  ;;  %v369_v21 = vld [vmem:[%s6346_s20 + $0x128] sm:$0xff] }
  0xaf   : > { %9060 = vst [vmem:[#allocation26_spill] sm:$0xff] %v6722_v3  ;;  %9061 = vst [vmem:[#allocation27_spill] sm:$0xff] %v6724_v53  ;;  %v6740_v40 = vor.u32 %v801_v48, %v798_v19  ;;  %v722_v60 = vmul.f32 %v6724_v53, %v9064_v55  ;;  %v9065_v56 = vmax.f32 %v6466_v0, 0.0  ;;  %v6753_v47 = vshll.u32 %v6722_v3, 16  ;;  %v6043_v19 = vld [vmem:[%s8900_s3 + $0x10] sm:$0xff]  }
  0xb0   : > { %9062 = vst [vmem:[#allocation28_spill] sm:$0xff] %v6726_v61  ;;  %v895_v45 = vshrl.u32 %v769_v13, 16  ;;  %v898_v57 = vshll.u32 %v769_v13, 16  ;;  %v1047_v30 = vsel %vm1027_vm3, %v1042_v20, %v1046_v35  ;;  %9066 = vst [vmem:[#allocation29_spill] sm:$0xff] %v6750_v38  ;;  %5203 = vmatpush3.bf16.msra.mxu1 %v6041_v52  ;;  %v417_v48 = vmul.f32 %v6351_v51, %v369_v21  ;;  %v368_v13 = vld [vmem:[%s6346_s20 + $0x120] sm:$0xff] }
  0xb1   : > { %v721_v22 = vmul.f32 %v6726_v61, %v9065_v56  ;;  %9067 = vst [vmem:[#allocation30_spill] sm:$0xff] %v6753_v47  ;;  %v6760_v63 = vsel %vm777_vm1, %v793_v15, %v6740_v40  ;;  %5121 = vmatmul.mubr.bf16.gmra.mrb[4].mxu0 %v1047_v30  ;;  %5204 = vmatprep.subr.bf16.mxu1 %v9054_v14  ;;  %v1134_v53 = vrot.slane %v6753_v47, 1  ;;  %v6774_v15 = vshrl.u32 %v6686_v54, 16  ;;  %v6046_v30 = vld [vmem:[%s8900_s3 + $0xa0] sm:$0xff]  }
  0xb2   : > { %9068 = vst [vmem:[#allocation31_spill] sm:$0xff] %v6760_v63  ;;  %v897_v0 = vrot.slane %v895_v45, 6  ;;  %v900_v55 = vrot.slane %v898_v57, 7  ;;  %v6765_v56 = vpop.permute.xlu1 %657  ;;  %v6767_v52 = vpop.permute.xlu0 %652  ;;  %v1130_v6 = vor.u32 %v6750_v38, %v1126_v10  ;;  %5124 = vmatprep.mubr.msk.bf16.mxu0 %vm6114_vm0, %v9054_v14  ;;  %5307 = vmatpush3.bf16.msra.mxu0 %v6044_v39  ;;  %v9072_v57 = vmax.f32 %v6486_v26, 0.0  ;;  %v6045_v26 = vld [vmem:[%s8900_s3 + $0x18] sm:$0xff]  }
  0xb3   : > { %v759_v20 = vpack.c.bf16 %v722_v60, %v721_v22  ;;  %9069 = vst [vmem:[#allocation32_spill] sm:$0xff] %v6765_v56  ;;  %9070 = vst [vmem:[#allocation33_spill] sm:$0xff] %v6767_v52  ;;  %v9073_v10 = vmax.f32 %v6489_v27, 0.0  ;;  %v6788_v60 = vshll.u32 %v6760_v63, 16  ;;  %5308 = vmatprep.subr.bf16.mxu0 %v9054_v14 }
  0xb4   : > { %9071 = vst [vmem:[#allocation34_spill] sm:$0xff] %v6774_v15  ;;  %v6779_v22 = vor.u32 %v900_v55, %v897_v0  ;;  %v744_v21 = vmul.f32 %v6765_v56, %v9072_v57  ;;  %v1135_v62 = vsel %vm1027_vm3, %v1130_v6, %v1134_v53  ;;  %5205 = vmatpush3.bf16.msra.mxu1 %v6043_v19 }
  0xb5   : > { %v743_v45 = vmul.f32 %v6767_v52, %v9073_v10  ;;  %v805_v39 = vshrl.u32 %v759_v20, 16  ;;  %v808_v61 = vshll.u32 %v759_v20, 16  ;;  %v416_v0 = vmul.f32 %v6351_v51, %v368_v13  ;;  %5165 = vmatmul.mubr.bf16.gmra.mrb[4].mxu1 %v1135_v62  ;;  %5206 = vmatprep.subr.bf16.mxu1 %v9054_v14 }
  0xb6   : > { %v6798_v27 = vsel %vm777_vm1, %v892_v5, %v6779_v22  ;;  %v1050_v57 = vor.u32 %v6774_v15, %v1046_v35  ;;  %v1054_v10 = vrot.slane %v6788_v60, 1  ;;  %v6803_v20 = vpop.permute.xlu1 %557  ;;  %v6805_v56 = vpop.permute.xlu0 %552  ;;  %5168 = vmatprep.mubr.msk.bf16.mxu1 %vm6114_vm0, %v9054_v14  ;;  %v6810_v5 = vshrl.u32 %v6722_v3, 16  ;;  %5309 = vmatpush3.bf16.msra.mxu0 %v6046_v30  ;;  %v6048_v35 = vld [vmem:[%s8900_s3 + $0xa8] sm:$0xff]  }
  0xb7   : > { %9074 = vst [vmem:[#allocation35_spill] sm:$0xff] %v6798_v27  ;;  %v770_v55 = vpack.c.bf16 %v744_v21, %v743_v45  ;;  %v807_v6 = vrot.slane %v805_v39, 6  ;;  %v810_v19 = vrot.slane %v808_v61, 7  ;;  %9075 = vst [vmem:[#allocation36_spill] sm:$0xff] %v6803_v20  ;;  %v6813_v62 = vshll.u32 %v6798_v27, 16  ;;  %5310 = vmatprep.subr.bf16.mxu0 %v9054_v14 }
  0xb8   : > { %9076 = vst [vmem:[#allocation37_spill] sm:$0xff] %v6805_v56  ;;  %9077 = vst [vmem:[#allocation38_spill] sm:$0xff] %v6810_v5  ;;  %v9078_v21 = vmax.f32 %v6492_v28, 0.0  ;;  %v9079_v39 = vmax.f32 %v6497_v32, 0.0  ;;  %v1055_v58 = vsel %vm1027_vm3, %v1050_v57, %v1054_v10  ;;  %v1138_v30 = vor.u32 %v6810_v5, %v1134_v53  ;;  %5207 = vmatpush3.bf16.msra.mxu1 %v6045_v26  ;;  %v6047_v28 = vld [vmem:[%s8900_s3 + $0x20] sm:$0xff]  }
  0xb9   : > { %v904_v13 = vshrl.u32 %v770_v55, 16  ;;  %v907_v61 = vshll.u32 %v770_v55, 16  ;;  %v811_v1 = vor.u32 %v810_v19, %v807_v6  ;;  %v8930_v37 = vrot.slane %v6813_v62, 1  ;;  %5125 = vmatmul.mubr.bf16.gmra.mrb[8].mxu0 %v1055_v58  ;;  %5208 = vmatprep.subr.bf16.mxu1 %v9054_v14 }
  0xba   : > { %v724_v45 = vmul.f32 %v6803_v20, %v9078_v21  ;;  %v723_v52 = vmul.f32 %v6805_v56, %v9079_v39  ;;  %v6832_v32 = vadd.f32 %v6363_v59, %v417_v48  ;;  %v6839_v57 = vpop.permute.xlu1 %667  ;;  %v6841_v26 = vpop.permute.xlu0 %662  ;;  %5128 = vmatprep.mubr.msk.bf16.mxu0 %vm6114_vm0, %v9054_v14  ;;  %5311 = vmatpush3.bf16.msra.mxu0 %v6048_v35  ;;  %v349_v39 = vld [vmem:[%s6346_s20 + $0x88] sm:$0xff]  ;;  %v6864_v35 = vshrl.u32 %v6760_v63, 16 }
  0xbb   : > { %v906_v55 = vrot.slane %v904_v13, 6  ;;  %v909_v21 = vrot.slane %v907_v61, 7  ;;  %v6837_v53 = vsel %vm777_vm1, %v6740_v40, %v811_v1  ;;  %9081 = vst [vmem:[#allocation40_spill] sm:$0xff] %v6839_v57  ;;  %9082 = vst [vmem:[#allocation41_spill] sm:$0xff] %v6841_v26  ;;  %v1143_v6 = vsel %vm1027_vm3, %v1138_v30, %v8930_v37  ;;  %v6051_v40 = vld [vmem:[%s8900_s3 + $0xb0] sm:$0xff]   ;;  %5312 = vmatprep.subr.bf16.mxu0 %v9054_v14 }
  0xbc   : > { %v760_v20 = vpack.c.bf16 %v724_v45, %v723_v52  ;;  %9080 = vst [vmem:[#allocation39_spill] sm:$0xff] %v6837_v53  ;;  %v9083_v61 = vmax.f32 %v6506_v42, 0.0  ;;  %v9084_v30 = vmax.f32 %v6525_v4, 0.0  ;;  %v6867_v58 = vshll.u32 %v6837_v53, 16  ;;  %5209 = vmatpush3.bf16.msra.mxu1 %v6047_v28  ;;  %v6049_v42 = vld [vmem:[%s8900_s3 + $0x28] sm:$0xff]  }
  0xbd   : > { %v6853_v52 = vor.u32 %v909_v21, %v906_v55  ;;  %v6870_v55 = vadd.f32 %v6363_v59, %v416_v0  ;;  %5169 = vmatmul.mubr.bf16.gmra.mrb[8].mxu1 %v1143_v6  ;;  %5210 = vmatprep.subr.bf16.mxu1 %v9054_v14  ;;  %v1058_v37 = vor.u32 %v6864_v35, %v1054_v10  ;;  %v6053_v6 = vld [vmem:[%s8900_s3 + $0xb8] sm:$0xff]   ;;  %v9089_v10 = vmax.f32 %v6537_v34, 0.0 }
  0xbe   : > { %v814_v19 = vshrl.u32 %v760_v20, 16  ;;  %v817_v13 = vshll.u32 %v760_v20, 16  ;;  %v746_v45 = vmul.f32 %v6839_v57, %v9083_v61  ;;  %v745_v48 = vmul.f32 %v6841_v26, %v9084_v30  ;;  %v6882_v30 = vpop.permute.xlu1 %567  ;;  %v6884_v28 = vpop.permute.xlu0 %562  ;;  %5172 = vmatprep.mubr.msk.bf16.mxu1 %vm6114_vm0, %v9054_v14  ;;  %5313 = vmatpush3.bf16.msra.mxu0 %v6051_v40 }
  0xbf   : > { %v6878_v4 = vsel %vm777_vm1, %v6779_v22, %v6853_v52  ;;  %9086 = vst [vmem:[#allocation43_spill] sm:$0xff] %v6882_v30  ;;  %9087 = vst [vmem:[#allocation44_spill] sm:$0xff] %v6884_v28  ;;  %v1062_v57 = vrot.slane %v6867_v58, 1  ;;  %v397_v22 = vmul.f32 %v6351_v51, %v349_v39  ;;  %v725_v61 = vmul.f32 %v6884_v28, %v9089_v10 }
  0xc0   : > { %9085 = vst [vmem:[#allocation42_spill] sm:$0xff] %v6878_v4  ;;  %v816_v20 = vrot.slane %v814_v19, 6  ;;  %v819_v21 = vrot.slane %v817_v13, 7  ;;  %v771_v0 = vpack.c.bf16 %v746_v45, %v745_v48  ;;  %v348_v19 = vld [vmem:[%s6346_s20 + $0x80] sm:$0xff]  ;;  %v9088_v13 = vmax.f32 %v6534_v23, 0.0  ;;  %5314 = vmatprep.subr.bf16.mxu0 %v9054_v14  ;;  %5211 = vmatpush3.bf16.msra.mxu1 %v6049_v42  ;;  %v6050_v23 = vld [vmem:[%s8900_s3 + $0x30] sm:$0xff]  }
  0xc1   : > { %v6902_v26 = vshrl.u32 %v6798_v27, 16  ;;  %v1063_v56 = vsel %vm1027_vm3, %v1058_v37, %v1062_v57  ;;  %v6907_v41 = vshll.u32 %v6878_v4, 16  ;;  %5212 = vmatprep.subr.bf16.mxu1 %v9054_v14  ;;  %v6937_v7 = vshrl.u32 %v6837_v53, 16 }
  0xc2   : > { %v820_v48 = vor.u32 %v819_v21, %v816_v20  ;;  %v726_v45 = vmul.f32 %v6882_v30, %v9088_v13  ;;  %v913_v39 = vshrl.u32 %v771_v0, 16  ;;  %v916_v40 = vshll.u32 %v771_v0, 16  ;;  %5129 = vmatmul.mubr.bf16.gmra.mrb[12].mxu0 %v1063_v56  ;;  %v6918_v10 = vpop.permute.xlu1 %677  ;;  %v6920_v42 = vpop.permute.xlu0 %672 }
  0xc3   : > { %v396_v13 = vmul.f32 %v6351_v51, %v348_v19  ;;  %9091 = vst [vmem:[#allocation46_spill] sm:$0xff] %v6918_v10  ;;  %9092 = vst [vmem:[#allocation47_spill] sm:$0xff] %v6920_v42  ;;  %v9093_v30 = vrot.slane %v6813_v62, 1  ;;  %5132 = vmatprep.mubr.msk.bf16.mxu0 %vm6114_vm0, %v9054_v14  ;;  %5315 = vmatpush3.bf16.msra.mxu0 %v6053_v6  ;;  %v9094_v19 = vmax.f32 %v6540_v50, 0.0  ;;  %v6052_v50 = vld [vmem:[%s8900_s3 + $0x38] sm:$0xff]   ;;  %v6972_v47 = vshrl.u32 %v6878_v4, 16 }
  0xc4   : > { %v6913_v34 = vsel %vm777_vm1, %v811_v1, %v820_v48  ;;  %v761_v20 = vpack.c.bf16 %v726_v45, %v725_v61  ;;  %v915_v37 = vrot.slane %v913_v39, 6  ;;  %v918_v0 = vrot.slane %v916_v40, 7  ;;  %5500 = vmatprep.subr.bf16.mxu0 %v9054_v14  ;;  %5213 = vmatpush3.bf16.msra.mxu1 %v6050_v23 }
  0xc5   : > { %9090 = vst [vmem:[#allocation45_spill] sm:$0xff] %v6913_v34  ;;  %v1146_v28 = vor.u32 %v6902_v26, %v9093_v30  ;;  %v1150_v1 = vrot.slane %v6907_v41, 1  ;;  %v748_v45 = vmul.f32 %v6918_v10, %v9094_v19  ;;  %v9095_v39 = vmax.f32 %v6549_v36, 0.0  ;;  %5214 = vmatprep.subr.bf16.mxu1 %v9054_v14 }
  0xc6   : > { %v823_v56 = vshrl.u32 %v761_v20, 16  ;;  %v826_v61 = vshll.u32 %v761_v20, 16  ;;  %v919_v21 = vor.u32 %v918_v0, %v915_v37  ;;  %v6940_v6 = vshll.u32 %v6913_v34, 16  ;;  %v6953_v37 = vpop.permute.xlu1 %577  ;;  %v6955_v23 = vpop.permute.xlu0 %572 }
  0xc7   : > { %v747_v40 = vmul.f32 %v6920_v42, %v9095_v39  ;;  %v1151_v30 = vsel %vm1027_vm3, %v1146_v28, %v1150_v1  ;;  %v6946_v39 = vadd.f32 %v6363_v59, %v397_v22  ;;  %9097 = vst [vmem:[#allocation49_spill] sm:$0xff] %v6953_v37  ;;  %9098 = vst [vmem:[#allocation50_spill] sm:$0xff] %v6955_v23  ;;  %v9100_v10 = vmax.f32 %v6645_v9, 0.0 }
  0xc8   : > { %v825_v20 = vrot.slane %v823_v56, 6  ;;  %v828_v36 = vrot.slane %v826_v61, 7  ;;  %5173 = vmatmul.mubr.bf16.gmra.mrb[12].mxu1 %v1151_v30  ;;  %v6951_v28 = vsel %vm777_vm1, %v6853_v52, %v919_v21  ;;  %v1066_v0 = vor.u32 %v6937_v7, %v1062_v57 }
  0xc9   : > { %v772_v19 = vpack.c.bf16 %v748_v45, %v747_v40  ;;  %9096 = vst [vmem:[#allocation48_spill] sm:$0xff] %v6951_v28  ;;  %v1070_v56 = vrot.slane %v6940_v6, 1  ;;  %5176 = vmatprep.mubr.msk.bf16.mxu1 %vm6114_vm0, %v9054_v14  ;;  %v6962_v22 = vadd.f32 %v6363_v59, %v396_v13  ;;  %v9099_v52 = vmax.f32 %v6585_v46, 0.0  ;;  %5215 = vmatpush3.bf16.msra.mxu1 %v6052_v50 }
  0xca   : > { %v829_v61 = vor.u32 %v828_v36, %v825_v20  ;;  %v727_v42 = vmul.f32 %v6955_v23, %v9100_v10  ;;  %v6975_v13 = vshll.u32 %v6951_v28, 16  ;;  %5400 = vmatprep.subr.bf16.mxu1 %v9054_v14 }
  0xcb   : > { %v922_v45 = vshrl.u32 %v772_v19, 16  ;;  %v925_v40 = vshll.u32 %v772_v19, 16  ;;  %v728_v30 = vmul.f32 %v6953_v37, %v9099_v52  ;;  %v1071_v57 = vsel %vm1027_vm3, %v1066_v0, %v1070_v56  ;;  %v6982_v19 = vpop.permute.xlu1 %687  ;;  %v6984_v0 = vpop.permute.xlu0 %682 }
  0xcc   : > { %v6978_v20 = vsel %vm777_vm1, %v820_v48, %v829_v61  ;;  %5133 = vmatmul.mubr.bf16.gmra.mrb[16].mxu0 %v1071_v57  ;;  %9102 = vst [vmem:[#allocation52_spill] sm:$0xff] %v6982_v19  ;;  %9103 = vst [vmem:[#allocation53_spill] sm:$0xff] %v6984_v0  ;;  %v1154_v52 = vor.u32 %v6972_v47, %v1150_v1  ;;  %v1158_v50 = vrot.slane %v6975_v13, 1  ;;  %v9104_v57 = vmax.f32 %v6653_v33, 0.0  ;;  %v370_v1 = vld [vmem:[%s6346_s20 + $0x130] sm:$0xff] }
  0xcd   : > { %9101 = vst [vmem:[#allocation51_spill] sm:$0xff] %v6978_v20  ;;  %v924_v46 = vrot.slane %v922_v45, 6  ;;  %v927_v36 = vrot.slane %v925_v40, 7  ;;  %v762_v10 = vpack.c.bf16 %v728_v30, %v727_v42  ;;  %5136 = vmatprep.mubr.msk.bf16.mxu0 %vm6114_vm0, %v9054_v14  ;;  %v371_v45 = vld [vmem:[%s6346_s20 + $0x138] sm:$0xff]  ;;  %v9105_v42 = vmax.f32 %v6674_v44, 0.0 }
  0xce   : > { %v750_v9 = vmul.f32 %v6982_v19, %v9104_v57  ;;  %v6999_v37 = vshll.u32 %v6978_v20, 16  ;;  %v1159_v2 = vsel %vm1027_vm3, %v1154_v52, %v1158_v50  ;;  %v7004_v48 = vshrl.u32 %v6913_v34, 16 }
  0xcf   : > { %v928_v40 = vor.u32 %v927_v36, %v924_v46  ;;  %v749_v30 = vmul.f32 %v6984_v0, %v9105_v42  ;;  %v832_v23 = vshrl.u32 %v762_v10, 16  ;;  %v835_v5 = vshll.u32 %v762_v10, 16  ;;  %v7011_v19 = vpop.permute.xlu1 %587  ;;  %v7013_v0 = vpop.permute.xlu0 %582 }
  0xd0   : > { %5177 = vmatmul.mubr.bf16.gmra.mrb[16].mxu1 %v1159_v2  ;;  %v1078_v44 = vrot.slane %v6999_v37, 1  ;;  %v419_v36 = vmul.f32 %v6351_v51, %v371_v45  ;;  %9107 = vst [vmem:[#allocation55_spill] sm:$0xff] %v7011_v19  ;;  %9108 = vst [vmem:[#allocation56_spill] sm:$0xff] %v7013_v0  ;;  %v1074_v10 = vor.u32 %v7004_v48, %v1070_v56  ;;  %v9109_v2 = vmax.f32 %v6718_v18, 0.0 }
  0xd1   : > { %v7007_v46 = vsel %vm777_vm1, %v919_v21, %v928_v40  ;;  %v773_v33 = vpack.c.bf16 %v750_v9, %v749_v30  ;;  %v834_v57 = vrot.slane %v832_v23, 6  ;;  %v837_v42 = vrot.slane %v835_v5, 7  ;;  %5180 = vmatprep.mubr.msk.bf16.mxu1 %vm6114_vm0, %v9054_v14 }
  0xd2   : > { %9106 = vst [vmem:[#allocation54_spill] sm:$0xff] %v7007_v46  ;;  %v418_v21 = vmul.f32 %v6351_v51, %v370_v1  ;;  %v730_v30 = vmul.f32 %v7011_v19, %v9109_v2  ;;  %v9110_v23 = vmax.f32 %v6737_v29, 0.0  ;;  %v1079_v38 = vsel %vm1027_vm3, %v1074_v10, %v1078_v44 }
  0xd3   : > { %v931_v52 = vshrl.u32 %v773_v33, 16  ;;  %v934_v9 = vshll.u32 %v773_v33, 16  ;;  %v838_v45 = vor.u32 %v837_v42, %v834_v57  ;;  %v7027_v56 = vshrl.u32 %v6951_v28, 16  ;;  %v7036_v29 = vpop.permute.xlu1 %697  ;;  %v7038_v57 = vpop.permute.xlu0 %692 }
  0xd4   : > { %v729_v5 = vmul.f32 %v7013_v0, %v9110_v23  ;;  %v7030_v31 = vshll.u32 %v7007_v46, 16  ;;  %5137 = vmatmul.mubr.bf16.gmra.mrb[20].mxu0 %v1079_v38  ;;  %v467_v18 = vadd.f32 %v6363_v59, %v419_v36  ;;  %9112 = vst [vmem:[#allocation58_spill] sm:$0xff] %v7036_v29  ;;  %9113 = vst [vmem:[#allocation59_spill] sm:$0xff] %v7038_v57  ;;  %v9114_v36 = vmax.f32 %v6832_v32, 0.0 }
  0xd5   : > { %v933_v51 = vrot.slane %v931_v52, 6  ;;  %v936_v1 = vrot.slane %v934_v9, 7  ;;  %v7034_v2 = vsel %vm777_vm1, %v829_v61, %v838_v45  ;;  %v1162_v42 = vor.u32 %v7027_v56, %v1158_v50  ;;  %5140 = vmatprep.mubr.msk.bf16.mxu0 %vm6114_vm0, %v9054_v14 }
  0xd6   : > { %v763_v33 = vpack.c.bf16 %v730_v30, %v729_v5  ;;  %9111 = vst [vmem:[#allocation57_spill] sm:$0xff] %v7034_v2  ;;  %v1166_v10 = vrot.slane %v7030_v31, 1  ;;  %v466_v52 = vadd.f32 %v6363_v59, %v418_v21  ;;  %v752_v61 = vmul.f32 %v7036_v29, %v9114_v36 }
  0xd7   : > { %v937_v9 = vor.u32 %v936_v1, %v933_v51  ;;  %v9115_v23 = vmax.f32 %v6870_v55, 0.0  ;;  %v7053_v19 = vshrl.u32 %v6978_v20, 16  ;;  %v7056_v0 = vshll.u32 %v7034_v2, 16  ;;  %v7063_v55 = vpop.permute.xlu0 %592 }
  0xd8   : > { %v841_v38 = vshrl.u32 %v763_v33, 16  ;;  %v844_v30 = vshll.u32 %v763_v33, 16  ;;  %v1167_v50 = vsel %vm1027_vm3, %v1162_v42, %v1166_v10  ;;  %v508_v32 = vmax.f32 %v467_v18, 0.0  ;;  %v7061_v33 = vpop.permute.xlu1 %597  ;;  %9118 = vst [vmem:[#allocation62_spill] sm:$0xff] %v7063_v55 }
  0xd9   : > { %v751_v5 = vmul.f32 %v7038_v57, %v9115_v23  ;;  %v7059_v59 = vsel %vm777_vm1, %v928_v40, %v937_v9  ;;  %5181 = vmatmul.mubr.bf16.gmra.mrb[20].mxu1 %v1167_v50  ;;  %9117 = vst [vmem:[#allocation61_spill] sm:$0xff] %v7061_v33  ;;  %v1082_v42 = vor.u32 %v7053_v19, %v1078_v44  ;;  %v1086_v36 = vrot.slane %v7056_v0, 1 }
  0xda   : > { %9116 = vst [vmem:[#allocation60_spill] sm:$0xff] %v7059_v59  ;;  %v843_v21 = vrot.slane %v841_v38, 6  ;;  %v846_v51 = vrot.slane %v844_v30, 7  ;;  %v507_v23 = vmax.f32 %v466_v52, 0.0  ;;  %5184 = vmatprep.mubr.msk.bf16.mxu1 %vm6114_vm0, %v9054_v14  ;;  %v9119_v40 = vmax.f32 %v6946_v39, 0.0 }
  0xdb   : > { %v774_v1 = vpack.c.bf16 %v752_v61, %v751_v5  ;;  %v9120_v18 = vmax.f32 %v6962_v22, 0.0  ;;  %v7076_v61 = vshll.u32 %v7059_v59, 16  ;;  %v1087_v52 = vsel %vm1027_vm3, %v1082_v42, %v1086_v36  ;;  %v7088_v57 = vpop.permute.xlu0 %702 }
  0xdc   : > { %v847_v29 = vor.u32 %v846_v51, %v843_v21  ;;  %v732_v38 = vmul.f32 %v7061_v33, %v9119_v40  ;;  %v7080_v50 = vshrl.u32 %v7007_v46, 16  ;;  %5141 = vmatmul.mubr.bf16.gmra.mrb[24].mxu0 %v1087_v52  ;;  %9123 = vst [vmem:[#allocation65_spill] sm:$0xff] %v7088_v57  ;;  %v372_v33 = vld [vmem:[%s6346_s20 + $0x140] sm:$0xf]  ;;  %v2431_v4 = vrot.slane %v7053_v19, 1 }
  0xdd   : > { %v731_v30 = vmul.f32 %v7063_v55, %v9120_v18  ;;  %v940_v44 = vshrl.u32 %v774_v1, 16  ;;  %v943_v5 = vshll.u32 %v774_v1, 16  ;;  %v1174_v22 = vrot.slane %v7076_v61, 1  ;;  %v7086_v18 = vpop.permute.xlu1 %707  ;;  %5144 = vmatprep.mubr.msk.bf16.mxu0 %vm6114_vm0, %v9054_v14 }
  0xde   : > { %v7083_v21 = vsel %vm777_vm1, %v838_v45, %v847_v29  ;;  %9122 = vst [vmem:[#allocation64_spill] sm:$0xff] %v7086_v18  ;;  %v1170_v1 = vor.u32 %v7080_v50, %v1166_v10  ;;  %v754_v45 = vmul.f32 %v7086_v18, %v508_v32  ;;  %v2432_v3 = vrot.slane %v6999_v37, 2 }
  0xdf   : > { %9121 = vst [vmem:[#allocation63_spill] sm:$0xff] %v7083_v21  ;;  %v764_v39 = vpack.c.bf16 %v732_v38, %v731_v30  ;;  %v942_v51 = vrot.slane %v940_v44, 6  ;;  %v945_v40 = vrot.slane %v943_v5, 7  ;;  %v753_v38 = vmul.f32 %v7088_v57, %v507_v23 }
  0xe0   : > { %v1175_v44 = vsel %vm1027_vm3, %v1170_v1, %v1174_v22  ;;  %v7098_v5 = vshrl.u32 %v7034_v2, 16  ;;  %v7101_v52 = vshll.u32 %v7083_v21, 16 }
  0xe1   : > { %v850_v42 = vshrl.u32 %v764_v39, 16  ;;  %v853_v55 = vshll.u32 %v764_v39, 16  ;;  %v946_v30 = vor.u32 %v945_v40, %v942_v51  ;;  %v775_v17 = vpack.c.bf16 %v754_v45, %v753_v38  ;;  %5185 = vmatmul.mubr.bf16.gmra.mrb[24].mxu1 %v1175_v44  ;;  %v6102_v39 = vld [vmem:[%s8898_s1] ss:$0 sm:$0xff] }
  0xe2   : > { %v420_v32 = vmul.f32 %v6102_v39, %v372_v33  ;;  %v1090_v51 = vor.u32 %v7098_v5, %v1086_v36  ;;  %v1094_v40 = vrot.slane %v7101_v52, 1  ;;  %5188 = vmatprep.mubr.msk.bf16.mxu1 %vm6114_vm0, %v9054_v14  ;;  %v7115_v38 = vshrl.u32 %v7059_v59, 16  ;;  %v6103_v39 = vld [vmem:[%s8899_s2] ss:$0 sm:$0xff] }
  0xe3   : > { %v852_v10 = vrot.slane %v850_v42, 6  ;;  %v855_v43 = vrot.slane %v853_v55, 7  ;;  %v7107_v23 = vsel %vm777_vm1, %v937_v9, %v946_v30  ;;  %v949_v42 = vshrl.u32 %v775_v17, 16 }
  0xe4   : > { %9124 = vst [vmem:[#allocation66_spill] sm:$0xff] %v7107_v23  ;;  %v952_v55 = vshll.u32 %v775_v17, 16  ;;  %v1095_v45 = vsel %vm1027_vm3, %v1090_v51, %v1094_v40  ;;  %v7118_v33 = vshll.u32 %v7107_v23, 16  ;;  %v1178_v17 = vor.u32 %v7115_v38, %v1174_v22 }
  0xe5   : > { %v856_v1 = vor.u32 %v855_v43, %v852_v10  ;;  %v951_v36 = vrot.slane %v949_v42, 6  ;;  %v468_v43 = vadd.f32 %v6103_v39, %v420_v32  ;;  %5145 = vmatmul.mubr.bf16.gmra.mrb[28].mxu0 %v1095_v45  ;;  %v2435_v49 = vrot.slane %v7098_v5, 1 }
  0xe6   : > { %v954_v44 = vrot.slane %v952_v55, 7  ;;  %v1182_v10 = vrot.slane %v7118_v33, 1  ;;  %5148 = vmatprep.mubr.msk.bf16.mxu0 %vm6114_vm0, %v9054_v14 }
  0xe7   : > { %v7121_v9 = vsel %vm777_vm1, %v847_v29, %v856_v1  ;;  %v7133_v29 = vshrl.u32 %v7083_v21, 16  ;;  %v509_v22 = vmax.f32 %v468_v43, 0.0  ;;  %v6054_v21 = vld [vmem:[%s8900_s3 + $0xc0] sm:$0xff]  }
  0xe8   : > { %9125 = vst [vmem:[#allocation67_spill] sm:$0xff] %v7121_v9  ;;  %v7130_v51 = vor.u32 %v954_v44, %v951_v36  ;;  %v7136_v42 = vshll.u32 %v7121_v9, 16  ;;  %v1183_v55 = vsel %vm1027_vm3, %v1178_v17, %v1182_v10  ;;  %v7145_v36 = vpop.permute.xlu0 %712  ;;  %v7150_v44 = vshrl.u32 %v7107_v23, 16 }
  0xe9   : > { %5189 = vmatmul.mubr.bf16.gmra.mrb[28].mxu1 %v1183_v55  ;;  %v1098_v45 = vor.u32 %v7133_v29, %v1094_v40  ;;  %9127 = vst [vmem:[#allocation69_spill] sm:$0xff] %v7145_v36  ;;  %v755_v18 = vmul.f32 %v7145_v36, %v509_v22 }
  0xea   : > { %v7141_v32 = vsel %vm777_vm1, %v946_v30, %v7130_v51  ;;  %v1102_v39 = vrot.slane %v7136_v42, 1  ;;  %5192 = vmatprep.mubr.msk.bf16.mxu1 %vm6114_vm0, %v9054_v14  ;;  %v7157_v30 = vsel %vm777_vm1, %v856_v1, %v6577_v11  ;;  %v1186_v40 = vor.u32 %v7150_v44, %v1182_v10 }
  0xeb   : > { %9126 = vst [vmem:[#allocation68_spill] sm:$0xff] %v7141_v32  ;;  %v7153_v17 = vshll.u32 %v7141_v32, 16  ;;  %9128 = vst [vmem:[#allocation70_spill] sm:$0xff] %v7157_v30  ;;  %v7165_v15 = vshrl.u32 %v7141_v32, 16  ;;  %v7171_v11 = vshrl.u32 %v7121_v9, 16  ;;  %v7174_v1 = vshll.u32 %v7157_v30, 16 }
  0xec   : > { %v1103_v43 = vsel %vm1027_vm3, %v1098_v45, %v1102_v39  ;;  %v776_v45 = vpack.c.bf16 %v755_v18, %v755_v18  ;;  %v7185_v46 = vshrl.u32 %v7157_v30, 16  ;;  %v2436_v9 = vrot.slane %v7056_v0, 2 }
  0xed   : > { %v1190_v55 = vrot.slane %v7153_v17, 1  ;;  %5149 = vmatmul.mubr.bf16.gmra.mrb[32].mxu0 %v1103_v43  ;;  %v3579_v57 = vrot.slane %v7153_v17, 3  ;;  %v3578_v10 = vrot.slane %v7165_v15, 2  ;;  %v1106_v22 = vor.u32 %v7171_v11, %v1102_v39 }
  0xee   : > { %5152 = vmatprep.mubr.msk.bf16.mxu0 %vm6114_vm0, %v9054_v14  ;;  %v1110_v36 = vrot.slane %v7174_v1, 1  ;;  %v958_v59 = vshrl.u32 %v776_v45, 16  ;;  %v961_v28 = vshll.u32 %v776_v45, 16  ;;  %v2419_v39 = vrot.slane %v6864_v35, 1 }
  0xef   : > { %v1191_v23 = vsel %vm1027_vm3, %v1186_v40, %v1190_v55  ;;  %v7178_v43 = vor.u32 %v3579_v57, %v3578_v10  ;;  %v1194_v18 = vor.u32 %v7165_v15, %v1190_v55  ;;  %v2423_v45 = vrot.slane %v6937_v7, 1 }
  0xf0   : > { %v1111_v40 = vsel %vm1027_vm3, %v1106_v22, %v1110_v36  ;;  %v1114_v57 = vor.u32 %v7185_v46, %v1110_v36  ;;  %v963_v10 = vrot.slane %v961_v28, 7  ;;  %v2420_v22 = vrot.slane %v6788_v60, 2 }
  0xf1   : > { %5193 = vmatmul.mubr.bf16.gmra.mrb[32].mxu1 %v1191_v23  ;;  %v960_v23 = vrot.slane %v958_v59, 6  ;;  %v9129_v55 = vrot.slane %v6636_v24, 1  ;;  %v2427_v59 = vrot.slane %v7004_v48, 1  ;;  %v2447_v8 = vrot.slane %v7185_v46, 1 }
  0xf2   : > { %5196 = vmatprep.mubr.msk.bf16.mxu1 %vm6114_vm0, %v9054_v14  ;;  %v7203_v28 = vor.u32 %v2420_v22, %v2419_v39  ;;  %v2433_v22 = vor.u32 %v2432_v3, %v2431_v4  ;;  %v2452_v4 = vrot.slane %v6636_v24, 2 }
  0xf3   : > { %v1119_v36 = vsel %vm1027_vm3, %v1114_v57, %v9129_v55  ;;  %v2439_v57 = vrot.slane %v7133_v29, 1  ;;  %v964_v55 = vor.u32 %v963_v10, %v960_v23  ;;  %v2443_v23 = vrot.slane %v7171_v11, 1 }
  0xf4   : > { %9130 = vst [vmem:[#allocation71_spill] sm:$0xff] %v7203_v28  ;;  %v2444_v10 = vrot.slane %v7136_v42, 2 }
  0xf5   : > { %5153 = vmatmul.mubr.bf16.gmra.mrb[36].mxu0 %v1111_v40  ;;  %v2424_v40 = vrot.slane %v6867_v58, 2 }
  0xf6   : > { %5156 = vmatprep.mubr.msk.bf16.mxu0 %vm6114_vm0, %v9054_v14 }
  0xf7   : > { %v2425_v27 = vor.u32 %v2424_v40, %v2423_v45  ;;  %v2440_v45 = vrot.slane %v7101_v52, 2 }
  0xf9   : > { %5197 = vmatmul.mubr.bf16.gmra.mrb[36].mxu1 %v1194_v18  ;;  %v2428_v18 = vrot.slane %v6940_v6, 2  ;;  %v7217_v39 = vsel %vm2411_vm6, %v7203_v28, %v2425_v27  ;;  %v2448_v28 = vrot.slane %v7174_v1, 2 }
  0xfa   : > { %5216 = vmatprep.mubr.msk.bf16.mxu1 %vm6114_vm0, %v9054_v14  ;;  %9131 = vst [vmem:[#allocation72_spill] sm:$0xff] %v7217_v39  ;;  %v9132_v39 = vmov 0  }
  0xfb   : > { %v2429_v30 = vor.u32 %v2428_v18, %v2427_v59  ;;  %v2441_v18 = vor.u32 %v2440_v45, %v2439_v57  ;;  %v2449_v57 = vor.u32 %v2448_v28, %v2447_v8  ;;  %v2463_v8 = vrot.slane %v6902_v26, 1 }
  0xfc   : > { %v2464_v28 = vrot.slane %v6813_v62, 2 }
  0xfd   : > { %5157 = vmatmul.mubr.bf16.gmra.mrb[40].mxu0 %v1119_v36  ;;  %v7221_v40 = vsel %vm2411_vm6, %v2425_v27, %v2429_v30  ;;  %v2437_v36 = vor.u32 %v2436_v9, %v2435_v49  ;;  %v7226_v59 = vsel %vm2411_vm6, %v2429_v30, %v2433_v22  ;;  %v2445_v27 = vor.u32 %v2444_v10, %v2443_v23  ;;  %v6055_v9 = vld [vmem:[%s8900_s3 + $0x100] sm:$0xff]  }
  0xfe   : > { %5316 = vmatprep.mubr.msk.bf16.mxu0 %vm6114_vm0, %v9054_v14  ;;  %v2451_v49 = vrot.slane %v6661_v12, 1  ;;  %v9136_v23 = vrot.slane %v6582_v25, 1 }
  0xff   : > { %v7232_v3 = vsel %vm2411_vm6, %v2433_v22, %v2437_v36  ;;  %v7242_v30 = vsel %vm2411_vm6, %v2437_v36, %v2441_v18  ;;  %v6056_v22 = vld [vmem:[%s8900_s3 + $0xc8] sm:$0xff]   ;;  %v7249_v45 = vsel %vm2411_vm6, %v2441_v18, %v2445_v27  ;;  %v7258_v36 = vsel %vm2411_vm6, %v2445_v27, %v2449_v57 }
 0x100   : > { %9133 = vst [vmem:[#allocation73_spill] sm:$0xff] %v7242_v30  ;;  %9134 = vst [vmem:[#allocation74_spill] sm:$0xff] %v7249_v45  ;;  %v1734_v10 = vsel %vm1731_vm5, %v6394_v16, %v9136_v23  ;;  %v965_v18 = vsel %vm777_vm1, %v7130_v51, %v964_v55  ;;  %v2467_v16 = vrot.slane %v6972_v47, 1  ;;  %v2468_v27 = vrot.slane %v6907_v41, 2  ;;  %v6057_v23 = vld [vmem:[%s8900_s3 + $0x108] sm:$0xff]  }
 0x101   : > { %5217 = vmatmul.mubr.bf16.vlgmr.msra.gmra.mrb[40].mxu1 %v9132_v39  ;;  %9137 = vst [vmem:[#allocation76_spill] sm:$0xff] %v7258_v36  ;;  %v2471_v51 = vrot.slane %v7027_v56, 1  ;;  %v2472_v55 = vrot.slane %v6975_v13, 2  ;;  %v2479_v36 = vrot.slane %v7115_v38, 1  ;;  %v2480_v45 = vrot.slane %v7076_v61, 2 }
 0x102   : > { %5401 = vmatpush3.bf16.msra.mxu1 %v6054_v21  ;;  %5220 = vmatprep.mubr.msk.bf16.mxu1 %vm6114_vm0, %v9054_v14  ;;  %v7251_v21 = vor.u32 %v2452_v4, %v2451_v49  ;;  %v2475_v4 = vrot.slane %v7080_v50, 1  ;;  %v2484_v30 = vrot.slane %v7118_v33, 2 }
 0x103   : > { %5402 = vmatprep.subr.bf16.mxu1 %v9054_v14 }
 0x104   : > { %9135 = vst [vmem:[#allocation75_spill] sm:$0xff] %v7251_v21  ;;  %v7271_v49 = vsel %vm2411_vm6, %v2449_v57, %v7251_v21  ;;  %v7287_v57 = vor.u32 %v2464_v28, %v2463_v8  ;;  %v2476_v21 = vrot.slane %v7030_v31, 2 }
 0x105   : > { %5317 = vmatmul.mubr.bf16.vlgmr.msra.gmra.mrb[44].mxu0 %v1734_v10  ;;  %9140 = vst [vmem:[#allocation77_spill] sm:$0xff] %v7271_v49  ;;  %v2469_v10 = vor.u32 %v2468_v27, %v2467_v16  ;;  %v7293_v49 = vsel %vm7263_vm9, %v965_v18, 0  ;;  %v2483_v16 = vrot.slane %v7150_v44, 1  ;;  %v6059_v18 = vld [vmem:[%s8900_s3 + $0x110] sm:$0xff]  }
 0x106   : > { %5501 = vmatpush3.bf16.msra.mxu0 %v6055_v9  ;;  %5320 = vmatprep.mubr.msk.bf16.mxu0 %vm6114_vm0, %v9054_v14  ;;  %v6058_v9 = vld [vmem:[%s8900_s3 + $0xd0] sm:$0xff]   ;;  %9141 = vst [vmem:[#allocation78_spill] sm:$0xff] %v7287_v57  ;;  %v2477_v28 = vor.u32 %v2476_v21, %v2475_v4  ;;  %v2488_v21 = vrot.slane %v7153_v17, 2  ;;  %v6060_v4 = vld [vmem:[%s8900_s3 + $0xd8] sm:$0xff]  }
 0x107   : > { %5403 = vmatpush3.bf16.msra.mxu1 %v6056_v22  ;;  %5502 = vmatprep.subr.bf16.mxu0 %v9054_v14  ;;  %v2473_v22 = vor.u32 %v2472_v55, %v2471_v51  ;;  %v7301_v8 = vsel %vm2411_vm6, %v7287_v57, %v2469_v10  ;;  %v2481_v51 = vor.u32 %v2480_v45, %v2479_v36  ;;  %v2487_v55 = vrot.slane %v7165_v15, 1 }
 0x108   : > { %5404 = vmatprep.subr.bf16.mxu1 %v9054_v14  ;;  %9142 = vst [vmem:[#allocation79_spill] sm:$0xff] %v7301_v8  ;;  %v2485_v8 = vor.u32 %v2484_v30, %v2483_v16  ;;  %v2492_v57 = vshrl.u32 %v7293_v49, 16  ;;  %v9144_v45 = vrot.slane %v6582_v25, 1 }
 0x109   : > { %5221 = vmatmul.mubr.bf16.gmra.mrb[44].mxu1 %v6582_v25  ;;  %v7311_v27 = vsel %vm2411_vm6, %v2469_v10, %v2473_v22  ;;  %v9143_v10 = vrot.slane %v6686_v54, 1  ;;  %v7332_v17 = vsel %vm2411_vm6, %v2477_v28, %v2481_v51  ;;  %v2489_v36 = vor.u32 %v2488_v21, %v2487_v55 }
 0x10a   : > { %5224 = vmatprep.mubr.msk.bf16.mxu1 %vm6114_vm0, %v9054_v14  ;;  %5503 = vmatpush3.bf16.msra.mxu0 %v6057_v23  ;;  %v7320_v23 = vsel %vm2411_vm6, %v2473_v22, %v2477_v28  ;;  %v7337_v22 = vsel %vm2411_vm6, %v2481_v51, %v2485_v8  ;;  %v2494_v16 = vrot.slane %v2492_v57, 1  ;;  %v3582_v30 = vrot.slane %v2492_v57, 2  ;;  %v6062_v57 = vld [vmem:[%s8900_s3 + $0xe0] sm:$0xff]  }
 0x10b   : > { %5405 = vmatpush3.bf16.msra.mxu1 %v6058_v9  ;;  %5504 = vmatprep.subr.bf16.mxu0 %v9054_v14  ;;  %v7328_v15 = vsel %vm1731_vm5, %v9144_v45, %v9143_v10  ;;  %v2495_v9 = vshll.u32 %v7293_v49, 16  ;;  %v6061_v10 = vld [vmem:[%s8900_s3 + $0x118] sm:$0xff]   ;;  %v7345_v28 = vsel %vm2411_vm6, %v2485_v8, %v2489_v36  ;;  %v1737_v51 = vrot.slane %v6760_v63, 1  ;;  %v6063_v8 = vld [vmem:[%s8900_s3 + $0x120] sm:$0xff]  }
 0x10c   : > { %5406 = vmatprep.subr.bf16.mxu1 %v9054_v14  ;;  %v3519_v25 = vrot.slane %v6940_v6, 3  ;;  %v7398_v6 = vrot.slane %v7293_v49, 2 }
 0x10d   : > { %5321 = vmatmul.mubr.bf16.gmra.mrb[48].mxu0 %v7328_v15  ;;  %v2497_v55 = vrot.slane %v2495_v9, 2  ;;  %v3583_v21 = vrot.slane %v2495_v9, 3  ;;  %v6064_v9 = vld [vmem:[%s8900_s3 + $0xe8] sm:$0xff]  }
 0x10e   : > { %5324 = vmatprep.mubr.msk.bf16.mxu0 %vm6114_vm0, %v9054_v14  ;;  %5505 = vmatpush3.bf16.msra.mxu0 %v6059_v18  ;;  %9147 = vst [vmem:[#allocation81_spill] sm:$0xff] %v7398_v6 }
 0x10f   : > { %5407 = vmatpush3.bf16.msra.mxu1 %v6060_v4  ;;  %5506 = vmatprep.subr.bf16.mxu0 %v9054_v14  ;;  %v7353_v18 = vor.u32 %v2497_v55, %v2494_v16  ;;  %v7355_v45 = vor.u32 %v3583_v21, %v3582_v30  ;;  %v9146_v16 = vrot.slane %v6686_v54, 1  ;;  %v3510_v55 = vrot.slane %v6864_v35, 2 }
 0x110   : > { %5408 = vmatprep.subr.bf16.mxu1 %v9054_v14  ;;  %v3515_v21 = vrot.slane %v6867_v58, 3  ;;  %v3523_v35 = vrot.slane %v6999_v37, 3  ;;  %v3530_v58 = vrot.slane %v7133_v29, 2  ;;  %v3535_v37 = vrot.slane %v7136_v42, 3 }
 0x111   : > { %9145 = vst [vmem:[#allocation80_spill] sm:$0xff] %v7353_v18  ;;  %5225 = vmatmul.mubr.bf16.gmra.mrb[48].mxu1 %v6686_v54  ;;  %v7365_v4 = vsel %vm2411_vm6, %v2489_v36, %v7353_v18  ;;  %v7374_v30 = vsel %vm1731_vm5, %v9146_v16, %v1737_v51  ;;  %v3511_v36 = vrot.slane %v6788_v60, 3  ;;  %v3518_v16 = vrot.slane %v7004_v48, 2  ;;  %v6065_v60 = vld [vmem:[%s8900_s3 + $0x128] sm:$0xff]  }
 0x112   : > { %5228 = vmatprep.mubr.msk.bf16.mxu1 %vm6114_vm0, %v9054_v14  ;;  %5507 = vmatpush3.bf16.msra.mxu0 %v6061_v10  ;;  %v3522_v10 = vrot.slane %v7053_v19, 2  ;;  %v3527_v48 = vrot.slane %v7056_v0, 3  ;;  %v7405_v19 = vrot.slane %v9132_v39, 2  ;;  %v3531_v18 = vrot.slane %v7101_v52, 3  ;;  %v6067_v52 = vld [vmem:[%s8900_s3 + $0x130] sm:$0xff]  }
 0x113   : > { %5409 = vmatpush3.bf16.msra.mxu1 %v6062_v57  ;;  %5508 = vmatprep.subr.bf16.mxu0 %v9054_v14  ;;  %v3514_v57 = vrot.slane %v6937_v7, 2  ;;  %v6066_v7 = vld [vmem:[%s8900_s3 + $0xf0] sm:$0xff]   ;;  %v9150_v0 = vrot.slane %v7141_v32, 2  ;;  %v3534_v54 = vrot.slane %v7171_v11, 2  ;;  %v3538_v42 = vrot.slane %v7185_v46, 2  ;;  %v6068_v11 = vld [vmem:[%s8900_s3 + $0xf8] sm:$0xff]  }
 0x114   : > { %5410 = vmatprep.subr.bf16.mxu1 %v9054_v14  ;;  %9148 = vst [vmem:[#allocation82_spill] sm:$0xff] %v7405_v19  ;;  %v7428_v29 = vsel %vm2827_vm10, %v7398_v6, %v7405_v19 }
 0x115   : > { %5325 = vmatmul.mubr.bf16.gmra.mrb[52].mxu0 %v7374_v30  ;;  %9152 = vst [vmem:[#allocation85_spill] sm:$0xff] %v7428_v29 }
 0x116   : > { %5328 = vmatprep.mubr.msk.bf16.mxu0 %vm6114_vm0, %v9054_v14  ;;  %5509 = vmatpush3.bf16.msra.mxu0 %v6063_v8  ;;  %v3526_v8 = vrot.slane %v7098_v5, 2  ;;  %v7416_v5 = vsel %vm2827_vm10, %v9150_v0, %v7398_v6  ;;  %v3524_v0 = vor.u32 %v3523_v35, %v3522_v10  ;;  %v3532_v10 = vor.u32 %v3531_v18, %v3530_v58 }
 0x117   : > { %5411 = vmatpush3.bf16.msra.mxu1 %v6064_v9  ;;  %5510 = vmatprep.subr.bf16.mxu0 %v9054_v14  ;;  %v7407_v9 = vor.u32 %v3511_v36, %v3510_v55  ;;  %9151 = vst [vmem:[#allocation84_spill] sm:$0xff] %v7416_v5  ;;  %v3516_v36 = vor.u32 %v3515_v21, %v3514_v57  ;;  %v3539_v55 = vrot.slane %v7174_v1, 3  ;;  %v3543_v5 = vrot.slane %v6636_v24, 3 }
 0x118   : > { %5412 = vmatprep.subr.bf16.mxu1 %v9054_v14  ;;  %v3528_v1 = vor.u32 %v3527_v48, %v3526_v8  ;;  %v3555_v24 = vrot.slane %v6813_v62, 3  ;;  %v3554_v57 = vrot.slane %v6902_v26, 2  ;;  %v3536_v62 = vor.u32 %v3535_v37, %v3534_v54 }
 0x119   : > { %9149 = vst [vmem:[#allocation83_spill] sm:$0xff] %v7407_v9  ;;  %5229 = vmatmul.mubr.bf16.gmra.mrb[52].mxu1 %v6760_v63  ;;  %v9153_v63 = vrot.slane %v6837_v53, 1  ;;  %v7445_v46 = vsel %vm3506_vm11, %v7407_v9, %v3516_v36  ;;  %v3540_v35 = vor.u32 %v3539_v55, %v3538_v42  ;;  %v1741_v48 = vrot.slane %v6913_v34, 1 }
 0x11a   : > { %5232 = vmatprep.mubr.msk.bf16.mxu1 %vm6114_vm0, %v9054_v14  ;;  %5511 = vmatpush3.bf16.msra.mxu0 %v6065_v60  ;;  %v3520_v60 = vor.u32 %v3519_v25, %v3518_v16  ;;  %9154 = vst [vmem:[#allocation86_spill] sm:$0xff] %v7445_v46  ;;  %v3559_v16 = vrot.slane %v6907_v41, 3  ;;  %v7470_v8 = vsel %vm3506_vm11, %v3528_v1, %v3532_v10  ;;  %v9159_v18 = vrot.slane %v6661_v12, 2 }
 0x11b   : > { %5413 = vmatpush3.bf16.msra.mxu1 %v6066_v7  ;;  %5512 = vmatprep.subr.bf16.mxu0 %v9054_v14  ;;  %v7440_v6 = vsel %vm1731_vm5, %v1737_v51, %v9153_v63  ;;  %v6069_v63 = vld [vmem:[%s8900_s3 + $0x138] sm:$0xff]   ;;  %v7461_v51 = vsel %vm3506_vm11, %v3524_v0, %v3528_v1  ;;  %v3558_v7 = vrot.slane %v6972_v47, 2  ;;  %9158 = vst [vmem:[#allocation90_spill] sm:$0xff] %v7470_v8  ;;  %v3563_v47 = vrot.slane %v6975_v13, 3 }
 0x11c   : > { %5414 = vmatprep.subr.bf16.mxu1 %v9054_v14  ;;  %v7449_v21 = vsel %vm3506_vm11, %v3516_v36, %v3520_v60  ;;  %v7452_v25 = vsel %vm3506_vm11, %v3520_v60, %v3524_v0  ;;  %9157 = vst [vmem:[#allocation89_spill] sm:$0xff] %v7461_v51  ;;  %v7474_v58 = vor.u32 %v3543_v5, %v9159_v18  ;;  %v3562_v26 = vrot.slane %v7027_v56, 2 }
 0x11d   : > { %5329 = vmatmul.mubr.bf16.gmra.mrb[56].mxu0 %v7440_v6  ;;  %9155 = vst [vmem:[#allocation87_spill] sm:$0xff] %v7449_v21  ;;  %9156 = vst [vmem:[#allocation88_spill] sm:$0xff] %v7452_v25  ;;  %v7478_v41 = vsel %vm3506_vm11, %v3532_v10, %v3536_v62  ;;  %v7481_v54 = vsel %vm3506_vm11, %v3536_v62, %v3540_v35  ;;  %v3567_v37 = vrot.slane %v7030_v31, 3  ;;  %v3566_v5 = vrot.slane %v7080_v50, 2  ;;  %v9189_v25 = vld [vmem:[#allocation66_spill] sm:$0xff] }
 0x11e   : > { %5332 = vmatprep.mubr.msk.bf16.mxu0 %vm6114_vm0, %v9054_v14  ;;  %5513 = vmatpush3.bf16.msra.mxu0 %v6067_v52  ;;  %9160 = vst [vmem:[#allocation91_spill] sm:$0xff] %v7474_v58  ;;  %9161 = vst [vmem:[#allocation92_spill] sm:$0xff] %v7478_v41  ;;  %v7490_v12 = vsel %vm3506_vm11, %v3540_v35, %v7474_v58  ;;  %v3571_v52 = vrot.slane %v7076_v61, 3  ;;  %v3570_v36 = vrot.slane %v7115_v38, 2  ;;  %v3575_v13 = vrot.slane %v7118_v33, 3 }
 0x11f   : > { %5415 = vmatpush3.bf16.msra.mxu1 %v6068_v11  ;;  %5514 = vmatprep.subr.bf16.mxu0 %v9054_v14  ;;  %9162 = vst [vmem:[#allocation93_spill] sm:$0xff] %v7481_v54  ;;  %9163 = vst [vmem:[#allocation94_spill] sm:$0xff] %v7490_v12  ;;  %v3574_v31 = vrot.slane %v7150_v44, 2  ;;  %v9164_v56 = vrot.slane %v6837_v53, 1  ;;  %v7503_v42 = vor.u32 %v3555_v24, %v3554_v57  ;;  %v1743_v44 = vrot.slane %v6978_v20, 1 }
 0x120   : > { %5600 = vmatprep.subr.bf16.mxu1 %v9054_v14  ;;  %v3560_v11 = vor.u32 %v3559_v16, %v3558_v7  ;;  %v3564_v50 = vor.u32 %v3563_v47, %v3562_v26  ;;  %v3568_v38 = vor.u32 %v3567_v37, %v3566_v5  ;;  %v3572_v33 = vor.u32 %v3571_v52, %v3570_v36  ;;  %v9179_v52 = vld [vmem:[#allocation67_spill] sm:$0xff] }
 0x121   : > { %5233 = vmatmul.mubr.bf16.gmra.mrb[56].mxu1 %v6837_v53  ;;  %v7501_v55 = vsel %vm1731_vm5, %v9164_v56, %v1741_v48  ;;  %9165 = vst [vmem:[#allocation95_spill] sm:$0xff] %v7503_v42  ;;  %v3576_v0 = vor.u32 %v3575_v13, %v3574_v31  ;;  %v7517_v1 = vrot.slane %v9132_v39, 3  ;;  %v9002_v39 = vrot.slane %v7141_v32, 3  ;;  %v9180_v31 = vld [vmem:[#allocation70_spill] sm:$0xff] }
 0x122   : > { %5236 = vmatprep.mubr.msk.bf16.mxu1 %vm6114_vm0, %v9054_v14  ;;  %5515 = vmatpush3.bf16.msra.mxu0 %v6069_v63  ;;  %v7510_v61 = vsel %vm3506_vm11, %v7503_v42, %v3560_v11  ;;  %v7514_v60 = vsel %vm3506_vm11, %v3560_v11, %v3564_v50  ;;  %v7521_v24 = vsel %vm3506_vm11, %v3564_v50, %v3568_v38  ;;  %v3955_v62 = vrot.slane %v7293_v49, 3  ;;  %v9181_v50 = vld [vmem:[#allocation15_spill] sm:$0xff]  ;;  %v9188_v42 = vld [vmem:[#allocation60_spill] sm:$0xff] }
 0x123   : > { %5700 = vmatprep.subr.bf16.mxu0 %v9054_v14  ;;  %9166 = vst [vmem:[#allocation96_spill] sm:$0xff] %v7510_v61  ;;  %9167 = vst [vmem:[#allocation97_spill] sm:$0xff] %v7514_v60  ;;  %v7524_v63 = vsel %vm3506_vm11, %v3568_v38, %v3572_v33  ;;  %v7529_v10 = vsel %vm3506_vm11, %v3572_v33, %v3576_v0  ;;  %v7533_v57 = vsel %vm3506_vm11, %v3576_v0, %v7178_v43 }
 0x124   : > { %9168 = vst [vmem:[#allocation98_spill] sm:$0xff] %v7517_v1  ;;  %9169 = vst [vmem:[#allocation99_spill] sm:$0xff] %v7521_v24  ;;  %v7539_v16 = vsel %vm3506_vm11, %v7178_v43, %v7355_v45  ;;  %v7544_v35 = vor.u32 %v7517_v1, %v7405_v19  ;;  %v7547_v7 = vsel %vm1731_vm5, %v1741_v48, %v1743_v44  ;;  %v1745_v48 = vrot.slane %v7034_v2, 1 }
 0x125   : > { %5333 = vmatmul.mubr.bf16.gmra.mrb[60].mxu0 %v7501_v55  ;;  %9170 = vst [vmem:[#allocation100_spill] sm:$0xff] %v7524_v63  ;;  %9171 = vst [vmem:[#allocation101_spill] sm:$0xff] %v7529_v10  ;;  %v7553_v18 = vsel %vm3917_vm12, %v9002_v39, %v3955_v62  ;;  %v7562_v47 = vsel %vm3917_vm12, %v3955_v62, %v7517_v1  ;;  %v1749_v36 = vrot.slane %v9179_v52, 1  ;;  %v1751_v56 = vrot.slane %v9180_v31, 1  ;;  %v9187_v10 = vld [vmem:[#allocation54_spill] sm:$0xff] }
 0x126   : > { %5336 = vmatprep.mubr.msk.bf16.mxu0 %vm6114_vm0, %v9054_v14  ;;  %9172 = vst [vmem:[#allocation102_spill] sm:$0xff] %v7533_v57  ;;  %9173 = vst [vmem:[#allocation103_spill] sm:$0xff] %v7539_v16  ;;  %v7558_v43 = vsel %vm3506_vm11, %v7355_v45, %v7544_v35  ;;  %v7571_v26 = vsel %vm1731_vm5, %v1743_v44, %v1745_v48  ;;  %v9178_v45 = vld [vmem:[#allocation63_spill] sm:$0xff]  ;;  %v1753_v38 = vrot.slane %v9181_v50, 1  ;;  %v9182_v44 = vld [vmem:[#allocation18_spill] sm:$0xff]  ;;  %v1765_v63 = vrot.slane %v9187_v10, 1 }
 0x127   : > { %9174 = vst [vmem:[#allocation104_spill] sm:$0xff] %v7544_v35  ;;  %9175 = vst [vmem:[#allocation105_spill] sm:$0xff] %v7553_v18  ;;  %v1747_v37 = vrot.slane %v9178_v45, 1  ;;  %v7601_v11 = vsel %vm1731_vm5, %v1749_v36, %v1751_v56  ;;  %v1755_v0 = vrot.slane %v9182_v44, 1  ;;  %v1767_v58 = vrot.slane %v9188_v42, 1 }
 0x128   : > { %9176 = vst [vmem:[#allocation106_spill] sm:$0xff] %v7558_v43  ;;  %9177 = vst [vmem:[#allocation107_spill] sm:$0xff] %v7562_v47  ;;  %v7611_v33 = vsel %vm1731_vm5, %v1751_v56, %v1753_v38  ;;  %v9184_v56 = vld [vmem:[#allocation35_spill] sm:$0xff]  ;;  %v1769_v21 = vrot.slane %v9189_v25, 1 }
 0x129   : > { %5237 = vmatmul.mubr.bf16.gmra.mrb[60].mxu1 %v6913_v34  ;;  %v7581_v5 = vsel %vm1731_vm5, %v1745_v48, %v1747_v37  ;;  %v7591_v13 = vsel %vm1731_vm5, %v1747_v37, %v1749_v36  ;;  %v7621_v62 = vsel %vm1731_vm5, %v1753_v38, %v1755_v0  ;;  %v9183_v48 = vld [vmem:[#allocation26_spill] sm:$0xff]  ;;  %v1759_v38 = vrot.slane %v9184_v56, 1 }
 0x12a   : > { %5240 = vmatprep.mubr.msk.bf16.mxu1 %vm6114_vm0, %v9054_v14  ;;  %v1757_v37 = vrot.slane %v9183_v48, 1  ;;  %v7713_v9 = vsel %vm1731_vm5, %v1767_v58, %v1769_v21 }
 0x12c   : > { %v7631_v36 = vsel %vm1731_vm5, %v1755_v0, %v1757_v37  ;;  %v7641_v39 = vsel %vm1731_vm5, %v1757_v37, %v1759_v38  ;;  %v9185_v0 = vld [vmem:[#allocation42_spill] sm:$0xff]  ;;  %v9186_v37 = vld [vmem:[#allocation48_spill] sm:$0xff] }
 0x12d   : > { %5337 = vmatmul.mubr.bf16.gmra.mrb[64].mxu0 %v7547_v7  ;;  %v1761_v1 = vrot.slane %v9185_v0, 1  ;;  %v1763_v47 = vrot.slane %v9186_v37, 1 }
 0x12e   : > { %5340 = vmatprep.mubr.msk.bf16.mxu0 %vm6114_vm0, %v9054_v14 }
 0x12f   : > { %v7651_v35 = vsel %vm1731_vm5, %v1759_v38, %v1761_v1  ;;  %v7663_v16 = vsel %vm1731_vm5, %v1761_v1, %v1763_v47  ;;  %v7677_v1 = vsel %vm1731_vm5, %v1763_v47, %v1765_v63 }
 0x131   : > { %5241 = vmatmul.mubr.bf16.gmra.mrb[64].mxu1 %v6978_v20 }
 0x132   : > { %5244 = vmatprep.mubr.msk.bf16.mxu1 %vm6114_vm0, %v9054_v14 }
 0x135   : > { %5341 = vmatmul.mubr.bf16.gmra.mrb[68].mxu0 %v7571_v26 }
 0x136   : > { %5344 = vmatprep.mubr.msk.bf16.mxu0 %vm6114_vm0, %v9054_v14 }
 0x139   : > { %5245 = vmatmul.mubr.bf16.gmra.mrb[68].mxu1 %v7034_v2 }
 0x13a   : > { %5248 = vmatprep.mubr.msk.bf16.mxu1 %vm6114_vm0, %v9054_v14 }
 0x13d   : > { %5345 = vmatmul.mubr.bf16.gmra.mrb[72].mxu0 %v7581_v5 }
 0x13e   : > { %5348 = vmatprep.mubr.msk.bf16.mxu0 %vm6114_vm0, %v9054_v14 }
 0x141   : > { %5249 = vmatmul.mubr.bf16.gmra.mrb[72].mxu1 %v9178_v45 }
 0x142   : > { %5252 = vmatprep.mubr.msk.bf16.mxu1 %vm6114_vm0, %v9054_v14 }
 0x145   : > { %5349 = vmatmul.mubr.bf16.gmra.mrb[76].mxu0 %v7591_v13 }
 0x146   : > { %5352 = vmatprep.mubr.msk.bf16.mxu0 %vm6114_vm0, %v9054_v14 }
 0x149   : > { %5253 = vmatmul.mubr.bf16.gmra.mrb[76].mxu1 %v9179_v52 }
 0x14a   : > { %5256 = vmatprep.mubr.msk.bf16.mxu1 %vm6114_vm0, %v9054_v14 }
 0x14d   : > { %5353 = vmatmul.mubr.bf16.gmra.mrb[80].mxu0 %v7601_v11 }
 0x14e   : > { %5356 = vmatprep.mubr.msk.bf16.mxu0 %vm6114_vm0, %v9054_v14 }
 0x151   : > { %5257 = vmatmul.mubr.bf16.gmra.mrb[80].mxu1 %v9180_v31 }
 0x152   : > { %5260 = vmatprep.mubr.msk.bf16.mxu1 %vm6114_vm0, %v9054_v14 }
 0x155   : > { %5357 = vmatmul.mubr.bf16.gmra.mrb[84].mxu0 %v7611_v33 }
 0x156   : > { %5360 = vmatprep.mubr.msk.bf16.mxu0 %vm6114_vm0, %v9054_v14 }
 0x159   : > { %5261 = vmatmul.mubr.bf16.gmra.mrb[84].mxu1 %v9181_v50  ;;  %v9193_v50 = vld [vmem:[#allocation25_spill] sm:$0xff] }
 0x15a   : > { %5264 = vmatprep.mubr.msk.bf16.mxu1 %vm6114_vm0, %v9054_v14  ;;  %v2416_v31 = vrot.slane %v9193_v50, 2 }
 0x15d   : > { %5361 = vmatmul.mubr.bf16.gmra.mrb[88].mxu0 %v7621_v62 }
 0x15e   : > { %5364 = vmatprep.mubr.msk.bf16.mxu0 %vm6114_vm0, %v9054_v14 }
 0x161   : > { %5265 = vmatmul.mubr.bf16.gmra.mrb[88].mxu1 %v9182_v44 }
 0x162   : > { %5268 = vmatprep.mubr.msk.bf16.mxu1 %vm6114_vm0, %v9054_v14 }
 0x165   : > { %5365 = vmatmul.mubr.bf16.gmra.mrb[92].mxu0 %v7631_v36 }
 0x166   : > { %5368 = vmatprep.mubr.msk.bf16.mxu0 %vm6114_vm0, %v9054_v14 }
 0x169   : > { %5269 = vmatmul.mubr.bf16.gmra.mrb[92].mxu1 %v9183_v48  ;;  %v9192_v48 = vld [vmem:[#allocation34_spill] sm:$0xff] }
 0x16a   : > { %5272 = vmatprep.mubr.msk.bf16.mxu1 %vm6114_vm0, %v9054_v14  ;;  %v2415_v44 = vrot.slane %v9192_v48, 1 }
 0x16c   : > { %v2417_v45 = vor.u32 %v2416_v31, %v2415_v44  ;;  %v9197_v31 = vld [vmem:[#allocation14_spill] sm:$0xff] }
 0x16d   : > { %5369 = vmatmul.mubr.bf16.gmra.mrb[96].mxu0 %v7641_v39 }
 0x16e   : > { %5372 = vmatprep.mubr.msk.bf16.mxu0 %vm6114_vm0, %v9054_v14 }
 0x171   : > { %5273 = vmatmul.mubr.bf16.gmra.mrb[96].mxu1 %v9184_v56 }
 0x172   : > { %5276 = vmatprep.mubr.msk.bf16.mxu1 %vm6114_vm0, %v9054_v14 }
 0x175   : > { %5373 = vmatmul.mubr.bf16.gmra.mrb[100].mxu0 %v7651_v35 }
 0x176   : > { %5376 = vmatprep.mubr.msk.bf16.mxu0 %vm6114_vm0, %v9054_v14  ;;  %v7658_v43 = vpop.f32.mrb[0].mxu0 }
 0x177   : > { %v5118_v18 = vpop.f32.mrb[1].mxu0 }
 0x178   : > { %v7665_v38 = vpop.f32.mrb[2].mxu0 }
 0x179   : > { %5277 = vmatmul.mubr.bf16.gmra.mrb[100].mxu1 %v9185_v0  ;;  %v5119_v57 = vpop.f32.mrb[3].mxu0 }
 0x17a   : > { %5280 = vmatprep.mubr.msk.bf16.mxu1 %vm6114_vm0, %v9054_v14 }
 0x17d   : > { %5377 = vmatmul.mubr.bf16.gmra.mrb[104].mxu0 %v7663_v16 }
 0x17e   : > { %5380 = vmatprep.mubr.msk.bf16.mxu0 %vm6114_vm0, %v9054_v14  ;;  %v7672_v24 = vpop.f32.mrb[0].mxu1 }
 0x17f   : > { %v5162_v18 = vpop.f32.mrb[1].mxu1 }
 0x180   : > { %v7679_v60 = vpop.f32.mrb[2].mxu1 }
 0x181   : > { %5281 = vmatmul.mubr.bf16.gmra.mrb[104].mxu1 %v9186_v37  ;;  %v5163_v57 = vpop.f32.mrb[3].mxu1 }
 0x182   : > { %5284 = vmatprep.mubr.msk.bf16.mxu1 %vm6114_vm0, %v9054_v14  ;;  %v7695_v57 = vsel %vm1731_vm5, %v1765_v63, %v1767_v58 }
 0x184   : > { %v7684_v61 = vpop.f32.mrb[4].mxu0 }
 0x185   : > { %5381 = vmatmul.mubr.bf16.gmra.mrb[108].mxu0 %v7677_v1  ;;  %v5122_v12 = vpop.f32.mrb[5].mxu0 }
 0x186   : > { %5384 = vmatprep.mubr.msk.bf16.mxu0 %vm6114_vm0, %v9054_v14  ;;  %v7688_v54 = vpop.f32.mrb[6].mxu0 }
 0x187   : > { %v5123_v47 = vpop.f32.mrb[7].mxu0 }
 0x188   : > { %v7692_v18 = vpop.f32.mrb[4].mxu1 }
 0x189   : > { %5285 = vmatmul.mubr.bf16.gmra.mrb[108].mxu1 %v9187_v10  ;;  %v5166_v41 = vpop.f32.mrb[5].mxu1 }
 0x18a   : > { %5288 = vmatprep.mubr.msk.bf16.mxu1 %vm6114_vm0, %v9054_v14  ;;  %v7698_v8 = vpop.f32.mrb[6].mxu1 }
 0x18b   : > { %v5167_v12 = vpop.f32.mrb[7].mxu1 }
 0x18c   : > { %v7702_v51 = vpop.f32.mrb[8].mxu0 }
 0x18d   : > { %5385 = vmatmul.mubr.bf16.gmra.mrb[112].mxu0 %v7695_v57  ;;  %v5126_v46 = vpop.f32.mrb[9].mxu0 }
 0x18e   : > { %5388 = vmatprep.mubr.msk.bf16.mxu0 %vm6114_vm0, %v9054_v14  ;;  %v7706_v47 = vpop.f32.mrb[10].mxu0 }
 0x18f   : > { %v5127_v41 = vpop.f32.mrb[11].mxu0 }
 0x190   : > { %v7710_v63 = vpop.f32.mrb[8].mxu1 }
 0x191   : > { %5289 = vmatmul.mubr.bf16.gmra.mrb[112].mxu1 %v9188_v42  ;;  %v5170_v19 = vpop.f32.mrb[9].mxu1  ;;  %v7723_v42 = vrot.slane %v7141_v32, 1 }
 0x192   : > { %5292 = vmatprep.mubr.msk.bf16.mxu1 %vm6114_vm0, %v9054_v14  ;;  %v7716_v12 = vpop.f32.mrb[10].mxu1 }
 0x193   : > { %v5171_v46 = vpop.f32.mrb[11].mxu1  ;;  %v7734_v37 = vsel %vm1731_vm5, %v1769_v21, %v7723_v42 }
 0x195   : > { %5389 = vmatmul.mubr.bf16.gmra.mrb[116].mxu0 %v7713_v9  ;;  %v7720_v29 = vpop.f32.mrb[12].mxu0 }
 0x196   : > { %5392 = vmatprep.mubr.msk.bf16.mxu0 %vm6114_vm0, %v9054_v14  ;;  %v5130_v41 = vpop.f32.mrb[13].mxu0 }
 0x197   : > { %v7726_v10 = vpop.f32.mrb[14].mxu0 }
 0x198   : > { %v5131_v19 = vpop.f32.mrb[15].mxu0 }
 0x199   : > { %5293 = vmatmul.mubr.bf16.gmra.mrb[116].mxu1 %v9189_v25 }
 0x19a   : > { %5296 = vmatprep.mubr.msk.bf16.mxu1 %vm6114_vm0, %v9054_v14 }
 0x19b   : > { %v7730_v58 = vpop.f32.mrb[12].mxu1 }
 0x19c   : > { %v5174_v46 = vpop.f32.mrb[13].mxu1 }
 0x19d   : > { %5393 = vmatmul.mubr.bf16.gmra.mrb[120].mxu0 %v7734_v37  ;;  %v7737_v0 = vpop.f32.mrb[14].mxu1 }
 0x19e   : > { %9190 = vst [vmem:[#allocation108_spill] sm:$0xff] %v7737_v0  ;;  %5396 = vmatprep.mubr.msk.bf16.mxu0 %vm6114_vm0, %v9054_v14  ;;  %v5175_v41 = vpop.f32.mrb[15].mxu1  ;;  %v9209_v0 = vld [vmem:[#allocation73_spill] sm:$0xff] }
 0x19f   : > { %v7741_v25 = vpop.f32.mrb[16].mxu0 }
 0x1a0   : > { %v5134_v56 = vpop.f32.mrb[17].mxu0 }
 0x1a1   : > { %5297 = vmatmul.mubr.bf16.gmra.mrb[120].mxu1 %v7141_v32  ;;  %v7744_v19 = vpop.f32.mrb[18].mxu0  ;;  %v6070_v56 = vld [vmem:[%s8900_s3 + $0x140] sm:$0xff]  }
 0x1a2   : > { %5416 = vmatprep.mubr.msk.bf16.mxu1 %vm6114_vm0, %v9054_v14  ;;  %v5135_v21 = vpop.f32.mrb[19].mxu0 }
 0x1a3   : > { %v7748_v46 = vpop.f32.mrb[16].mxu1 }
 0x1a4   : > { %9191 = vst [vmem:[#allocation109_spill] sm:$0xff] %v7748_v46  ;;  %v5178_v52 = vpop.f32.mrb[17].mxu1 }
 0x1a5   : > { %5397 = vmatmul.mubr.bf16.gmra.mrb[124].mxu0 %v7723_v42  ;;  %v7753_v41 = vpop.f32.mrb[18].mxu1  ;;  %v6071_v52 = vld [vmem:[%s8900_s3 + $0x180] sm:$0xff]  }
 0x1a6   : > { %9194 = vst [vmem:[#allocation110_spill] sm:$0xff] %v7753_v41  ;;  %5516 = vmatprep.mubr.msk.bf16.mxu0 %vm6114_vm0, %v9054_v14  ;;  %v5179_v32 = vpop.f32.mrb[19].mxu1 }
 0x1a7   : > { %v7760_v21 = vpop.f32.mrb[20].mxu0  ;;  %v6072_v32 = vld [vmem:[%s8900_s3 + $0x148] sm:$0xff]  }
 0x1a8   : > { %v5138_v2 = vpop.f32.mrb[21].mxu0 }
 0x1a9   : > { %5417 = vmatmul.mubr.bf16.vlgmr.msra.gmra.mrb[124].mxu1 %v7328_v15  ;;  %v7763_v48 = vpop.f32.mrb[22].mxu0  ;;  %v9196_v15 = vld [vmem:[#allocation13_spill] sm:$0xff] }
 0x1aa   : > { %5601 = vmatpush3.bf16.msra.mxu1 %v6070_v56  ;;  %5420 = vmatprep.mubr.msk.bf16.mxu1 %vm6114_vm0, %v9054_v14  ;;  %v5139_v50 = vpop.f32.mrb[23].mxu0  ;;  %v9198_v44 = vor.u32 %v9196_v15, %v9197_v31  ;;  %v6074_v15 = vld [vmem:[%s8900_s3 + $0x150] sm:$0xff]  }
 0x1ab   : > { %5602 = vmatprep.subr.bf16.mxu1 %v9054_v14  ;;  %v6073_v50 = vld [vmem:[%s8900_s3 + $0x188] sm:$0xff]  }
 0x1ac   : > { %v7774_v2 = vpop.f32.mrb[20].mxu1  ;;  %v2418_v56 = vsel %vm2411_vm6, %v9198_v44, %v2417_v45  ;;  %v6076_v44 = vld [vmem:[%s8900_s3 + $0x158] sm:$0xff]  }
 0x1ad   : > { %9195 = vst [vmem:[#allocation111_spill] sm:$0xff] %v7774_v2  ;;  %v5182_v20 = vpop.f32.mrb[21].mxu1  ;;  %5517 = vmatmul.mubr.bf16.vlgmr.msra.gmra.mrb[128].mxu0 %v2418_v56 }
 0x1ae   : > { %5701 = vmatpush3.bf16.msra.mxu0 %v6071_v52  ;;  %v7780_v34 = vpop.f32.mrb[22].mxu1  ;;  %5520 = vmatprep.mubr.msk.bf16.mxu0 %vm6114_vm0, %v9054_v14 }
 0x1af   : > { %9199 = vst [vmem:[#allocation13_spill] sm:$0xff] %v7780_v34  ;;  %v5183_v53 = vpop.f32.mrb[23].mxu1  ;;  %5603 = vmatpush3.bf16.msra.mxu1 %v6072_v32  ;;  %5702 = vmatprep.subr.bf16.mxu0 %v9054_v14  ;;  %v7791_v20 = vpop.f32.mrb[24].mxu0 }
 0x1b0   : > { %5604 = vmatprep.subr.bf16.mxu1 %v9054_v14  ;;  %v5142_v52 = vpop.f32.mrb[25].mxu0  ;;  %v6075_v53 = vld [vmem:[%s8900_s3 + $0x190] sm:$0xff]  }
 0x1b1   : > { %5421 = vmatmul.mubr.bf16.gmra.mrb[128].mxu1 %v7374_v30  ;;  %v7795_v31 = vpop.f32.mrb[26].mxu0  ;;  %v9201_v30 = vld [vmem:[#allocation71_spill] sm:$0xff] }
 0x1b2   : > { %5424 = vmatprep.mubr.msk.bf16.mxu1 %vm6114_vm0, %v9054_v14  ;;  %5703 = vmatpush3.bf16.msra.mxu0 %v6073_v50  ;;  %v5143_v32 = vpop.f32.mrb[27].mxu0  ;;  %v2422_v52 = vsel %vm2411_vm6, %v2417_v45, %v9201_v30  ;;  %v6078_v45 = vld [vmem:[%s8900_s3 + $0x160] sm:$0xff]  }
 0x1b3   : > { %5605 = vmatpush3.bf16.msra.mxu1 %v6074_v15  ;;  %5704 = vmatprep.subr.bf16.mxu0 %v9054_v14  ;;  %v6077_v15 = vld [vmem:[%s8900_s3 + $0x198] sm:$0xff]  }
 0x1b4   : > { %v7806_v56 = vpop.f32.mrb[24].mxu1  ;;  %5606 = vmatprep.subr.bf16.mxu1 %v9054_v14 }
 0x1b5   : > { %9200 = vst [vmem:[#allocation14_spill] sm:$0xff] %v7806_v56  ;;  %v5186_v50 = vpop.f32.mrb[25].mxu1  ;;  %5521 = vmatmul.mubr.bf16.gmra.mrb[132].mxu0 %v2422_v52 }
 0x1b6   : > { %v7811_v34 = vpop.f32.mrb[26].mxu1  ;;  %5524 = vmatprep.mubr.msk.bf16.mxu0 %vm6114_vm0, %v9054_v14  ;;  %5705 = vmatpush3.bf16.msra.mxu0 %v6075_v53 }
 0x1b7   : > { %9202 = vst [vmem:[#allocation71_spill] sm:$0xff] %v7811_v34  ;;  %v5187_v32 = vpop.f32.mrb[27].mxu1  ;;  %5607 = vmatpush3.bf16.msra.mxu1 %v6076_v44  ;;  %5706 = vmatprep.subr.bf16.mxu0 %v9054_v14  ;;  %v6079_v44 = vld [vmem:[%s8900_s3 + $0x1a0] sm:$0xff]   ;;  %v9204_v34 = vld [vmem:[#allocation72_spill] sm:$0xff] }
 0x1b8   : > { %v7822_v30 = vpop.f32.mrb[28].mxu0  ;;  %5608 = vmatprep.subr.bf16.mxu1 %v9054_v14  ;;  %v6080_v32 = vld [vmem:[%s8900_s3 + $0x168] sm:$0xff]  }
 0x1b9   : > { %v5146_v52 = vpop.f32.mrb[29].mxu0  ;;  %5425 = vmatmul.mubr.bf16.gmra.mrb[132].mxu1 %v7440_v6 }
 0x1ba   : > { %v7826_v53 = vpop.f32.mrb[30].mxu0  ;;  %5428 = vmatprep.mubr.msk.bf16.mxu1 %vm6114_vm0, %v9054_v14  ;;  %5707 = vmatpush3.bf16.msra.mxu0 %v6077_v15 }
 0x1bb   : > { %v5147_v50 = vpop.f32.mrb[31].mxu0  ;;  %5609 = vmatpush3.bf16.msra.mxu1 %v6078_v45  ;;  %5708 = vmatprep.subr.bf16.mxu0 %v9054_v14  ;;  %v6081_v45 = vld [vmem:[%s8900_s3 + $0x1a8] sm:$0xff]  }
 0x1bc   : > { %v7837_v52 = vpop.f32.mrb[28].mxu1  ;;  %5610 = vmatprep.subr.bf16.mxu1 %v9054_v14 }
 0x1bd   : > { %9203 = vst [vmem:[#allocation112_spill] sm:$0xff] %v7837_v52  ;;  %v5190_v6 = vpop.f32.mrb[29].mxu1  ;;  %5525 = vmatmul.mubr.bf16.gmra.mrb[136].mxu0 %v9204_v34 }
 0x1be   : > { %v7841_v15 = vpop.f32.mrb[30].mxu1  ;;  %5528 = vmatprep.mubr.msk.bf16.mxu0 %vm6114_vm0, %v9054_v14  ;;  %5709 = vmatpush3.bf16.msra.mxu0 %v6079_v44  ;;  %v6082_v6 = vld [vmem:[%s8900_s3 + $0x170] sm:$0xff]  }
 0x1bf   : > { %9205 = vst [vmem:[#allocation72_spill] sm:$0xff] %v7841_v15  ;;  %v5191_v50 = vpop.f32.mrb[31].mxu1  ;;  %5611 = vmatpush3.bf16.msra.mxu1 %v6080_v32  ;;  %5710 = vmatprep.subr.bf16.mxu0 %v9054_v14  ;;  %v6083_v32 = vld [vmem:[%s8900_s3 + $0x1b0] sm:$0xff]  }
 0x1c0   : > { %v7852_v52 = vpop.f32.mrb[32].mxu0  ;;  %5612 = vmatprep.subr.bf16.mxu1 %v9054_v14 }
 0x1c1   : > { %v5150_v34 = vpop.f32.mrb[33].mxu0  ;;  %5429 = vmatmul.mubr.bf16.gmra.mrb[136].mxu1 %v7501_v55 }
 0x1c2   : > { %v7856_v44 = vpop.f32.mrb[34].mxu0  ;;  %5432 = vmatprep.mubr.msk.bf16.mxu1 %vm6114_vm0, %v9054_v14  ;;  %5711 = vmatpush3.bf16.msra.mxu0 %v6081_v45  ;;  %v6084_v34 = vld [vmem:[%s8900_s3 + $0x178] sm:$0xff]  }
 0x1c3   : > { %v5151_v50 = vpop.f32.mrb[35].mxu0  ;;  %5613 = vmatpush3.bf16.msra.mxu1 %v6082_v6  ;;  %5712 = vmatprep.subr.bf16.mxu0 %v9054_v14  ;;  %v6085_v6 = vld [vmem:[%s8900_s3 + $0x1b8] sm:$0xff]  }
 0x1c4   : > { %v7867_v15 = vpop.f32.mrb[32].mxu1  ;;  %5614 = vmatprep.subr.bf16.mxu1 %v9054_v14 }
 0x1c5   : > { %9206 = vst [vmem:[#allocation113_spill] sm:$0xff] %v7867_v15  ;;  %v5194_v55 = vpop.f32.mrb[33].mxu1  ;;  %5529 = vmatmul.mubr.bf16.gmra.mrb[140].mxu0 %v7221_v40 }
 0x1c6   : > { %v7871_v45 = vpop.f32.mrb[34].mxu1  ;;  %5532 = vmatprep.mubr.msk.bf16.mxu0 %vm6114_vm0, %v9054_v14  ;;  %5713 = vmatpush3.bf16.msra.mxu0 %v6083_v32 }
 0x1c7   : > { %9207 = vst [vmem:[#allocation114_spill] sm:$0xff] %v7871_v45  ;;  %v5195_v50 = vpop.f32.mrb[35].mxu1  ;;  %5615 = vmatpush3.bf16.msra.mxu1 %v6084_v34  ;;  %5714 = vmatprep.subr.bf16.mxu0 %v9054_v14 }
 0x1c8   : > { %v7879_v15 = vpop.f32.mrb[36].mxu0  ;;  %5800 = vmatprep.subr.bf16.mxu1 %v9054_v14 }
 0x1c9   : > { %v5154_v55 = vpop.f32.mrb[37].mxu0  ;;  %5433 = vmatmul.mubr.bf16.gmra.mrb[140].mxu1 %v7547_v7 }
 0x1ca   : > { %v7883_v40 = vpop.f32.mrb[38].mxu0  ;;  %5436 = vmatprep.mubr.msk.bf16.mxu1 %vm6114_vm0, %v9054_v14  ;;  %5715 = vmatpush3.bf16.msra.mxu0 %v6085_v6 }
 0x1cb   : > { %v5155_v32 = vpop.f32.mrb[39].mxu0  ;;  %5900 = vmatprep.subr.bf16.mxu0 %v9054_v14 }
 0x1cc   : > { %v7888_v50 = vpop.f32.mrb[36].mxu1 }
 0x1cd   : > { %9208 = vst [vmem:[#allocation115_spill] sm:$0xff] %v7888_v50  ;;  %v5198_v34 = vpop.f32.mrb[37].mxu1  ;;  %5533 = vmatmul.mubr.bf16.gmra.mrb[144].mxu0 %v7226_v59 }
 0x1ce   : > { %v1461_v45 = vpop.f32.mrb[38].mxu1  ;;  %5536 = vmatprep.mubr.msk.bf16.mxu0 %vm6114_vm0, %v9054_v14 }
 0x1cf   : > { %v5199_v55 = vpop.f32.mrb[39].mxu1 }
 0x1d0   : > { %v7893_v7 = vpop.f32.mrb[40].mxu0 }
 0x1d1   : > { %v5158_v56 = vpop.f32.mrb[41].mxu0  ;;  %5437 = vmatmul.mubr.bf16.gmra.mrb[144].mxu1 %v7571_v26 }
 0x1d2   : > { %v7896_v2 = vpop.f32.mrb[42].mxu0  ;;  %5440 = vmatprep.mubr.msk.bf16.mxu1 %vm6114_vm0, %v9054_v14 }
 0x1d3   : > { %v5159_v6 = vpop.f32.mrb[43].mxu0 }
 0x1d4   : > { %v1546_v32 = vpop.f32.mrb[40].mxu1 }
 0x1d5   : > { %v1547_v34 = vadd.f32 %v1546_v32, %v7658_v43  ;;  %v5218_v59 = vpop.f32.mrb[41].mxu1  ;;  %5537 = vmatmul.mubr.bf16.gmra.mrb[148].mxu0 %v7232_v3 }
 0x1d6   : > { %v1549_v45 = vpop.f32.mrb[42].mxu1  ;;  %5540 = vmatprep.mubr.msk.bf16.mxu0 %vm6114_vm0, %v9054_v14 }
 0x1d7   : > { %v1550_v56 = vadd.f32 %v1549_v45, %v7665_v38  ;;  %v5219_v55 = vpop.f32.mrb[43].mxu1 }
 0x1d8   : > { %v1876_v26 = vpop.f32.mrb[44].mxu0 }
 0x1d9   : > { %v5318_v50 = vpop.f32.mrb[45].mxu0  ;;  %5441 = vmatmul.mubr.bf16.gmra.mrb[148].mxu1 %v7581_v5  ;;  %v7906_v41 = vadd.f32 %v1876_v26, %v1547_v34 }
 0x1da   : > { %v1879_v6 = vpop.f32.mrb[46].mxu0  ;;  %5444 = vmatprep.mubr.msk.bf16.mxu1 %vm6114_vm0, %v9054_v14 }
 0x1db   : > { %v5319_v43 = vpop.f32.mrb[47].mxu0  ;;  %v7910_v32 = vadd.f32 %v1879_v6, %v1550_v56 }
 0x1dc   : > { %v1554_v3 = vpop.f32.mrb[44].mxu1  ;;  %v9210_v43 = vld [vmem:[#allocation74_spill] sm:$0xff] }
 0x1dd   : > { %v1555_v59 = vadd.f32 %v1554_v3, %v7684_v61  ;;  %v5222_v46 = vpop.f32.mrb[45].mxu1  ;;  %5541 = vmatmul.mubr.bf16.gmra.mrb[152].mxu0 %v9209_v0 }
 0x1de   : > { %v1557_v38 = vpop.f32.mrb[46].mxu1  ;;  %5544 = vmatprep.mubr.msk.bf16.mxu0 %vm6114_vm0, %v9054_v14 }
 0x1df   : > { %v1558_v5 = vadd.f32 %v1557_v38, %v7688_v54  ;;  %v5223_v50 = vpop.f32.mrb[47].mxu1 }
 0x1e0   : > { %v1884_v34 = vpop.f32.mrb[48].mxu0 }
 0x1e1   : > { %v5322_v45 = vpop.f32.mrb[49].mxu0  ;;  %5445 = vmatmul.mubr.bf16.gmra.mrb[152].mxu1 %v7591_v13  ;;  %v7918_v55 = vadd.f32 %v1884_v34, %v1555_v59 }
 0x1e2   : > { %v1887_v56 = vpop.f32.mrb[50].mxu0  ;;  %5448 = vmatprep.mubr.msk.bf16.mxu1 %vm6114_vm0, %v9054_v14 }
 0x1e3   : > { %v5323_v61 = vpop.f32.mrb[51].mxu0  ;;  %v7922_v46 = vadd.f32 %v1887_v56, %v1558_v5 }
 0x1e4   : > { %v1562_v0 = vpop.f32.mrb[48].mxu1 }
 0x1e5   : > { %v1563_v26 = vadd.f32 %v1562_v0, %v7702_v51  ;;  %v5226_v6 = vpop.f32.mrb[49].mxu1  ;;  %5545 = vmatmul.mubr.bf16.gmra.mrb[156].mxu0 %v9210_v43  ;;  %v9211_v0 = vld [vmem:[#allocation76_spill] sm:$0xff] }
 0x1e6   : > { %v1565_v54 = vpop.f32.mrb[50].mxu1  ;;  %5548 = vmatprep.mubr.msk.bf16.mxu0 %vm6114_vm0, %v9054_v14 }
 0x1e7   : > { %v1566_v13 = vadd.f32 %v1565_v54, %v7706_v47  ;;  %v5227_v3 = vpop.f32.mrb[51].mxu1 }
 0x1e8   : > { %v1892_v59 = vpop.f32.mrb[52].mxu0 }
 0x1e9   : > { %v5326_v38 = vpop.f32.mrb[53].mxu0  ;;  %5449 = vmatmul.mubr.bf16.gmra.mrb[156].mxu1 %v7601_v11  ;;  %v7930_v50 = vadd.f32 %v1892_v59, %v1563_v26 }
 0x1ea   : > { %v1895_v5 = vpop.f32.mrb[54].mxu0  ;;  %5452 = vmatprep.mubr.msk.bf16.mxu1 %vm6114_vm0, %v9054_v14  ;;  %v9212_v38 = vld [vmem:[#allocation29_spill] sm:$0xff] }
 0x1eb   : > { %v5327_v51 = vpop.f32.mrb[55].mxu0  ;;  %v7934_v34 = vadd.f32 %v1895_v5, %v1566_v13  ;;  %v2455_v5 = vrot.slane %v9212_v38, 1 }
 0x1ec   : > { %v1570_v45 = vpop.f32.mrb[52].mxu1  ;;  %v9213_v51 = vld [vmem:[#allocation21_spill] sm:$0xff] }
 0x1ed   : > { %v1571_v56 = vadd.f32 %v1570_v45, %v7720_v29  ;;  %v5230_v61 = vpop.f32.mrb[53].mxu1  ;;  %5549 = vmatmul.mubr.bf16.gmra.mrb[160].mxu0 %v9211_v0  ;;  %v2456_v45 = vrot.slane %v9213_v51, 2  ;;  %v9214_v0 = vld [vmem:[#allocation77_spill] sm:$0xff] }
 0x1ee   : > { %v1573_v47 = vpop.f32.mrb[54].mxu1  ;;  %5552 = vmatprep.mubr.msk.bf16.mxu0 %vm6114_vm0, %v9054_v14 }
 0x1ef   : > { %v1574_v11 = vadd.f32 %v1573_v47, %v7726_v10  ;;  %v5231_v26 = vpop.f32.mrb[55].mxu1 }
 0x1f0   : > { %v1900_v6 = vpop.f32.mrb[56].mxu0 }
 0x1f1   : > { %v5330_v43 = vpop.f32.mrb[57].mxu0  ;;  %5453 = vmatmul.mubr.bf16.gmra.mrb[160].mxu1 %v7611_v33  ;;  %v7942_v54 = vadd.f32 %v1900_v6, %v1571_v56 }
 0x1f2   : > { %v1903_v13 = vpop.f32.mrb[58].mxu0  ;;  %5456 = vmatprep.mubr.msk.bf16.mxu1 %vm6114_vm0, %v9054_v14 }
 0x1f3   : > { %v5331_v29 = vpop.f32.mrb[59].mxu0  ;;  %v7946_v3 = vadd.f32 %v1903_v13, %v1574_v11  ;;  %v2457_v11 = vor.u32 %v2456_v45, %v2455_v5 }
 0x1f4   : > { %v1578_v59 = vpop.f32.mrb[56].mxu1 }
 0x1f5   : > { %v1579_v10 = vadd.f32 %v1578_v59, %v7741_v25  ;;  %v5234_v61 = vpop.f32.mrb[57].mxu1  ;;  %5553 = vmatmul.mubr.bf16.gmra.mrb[164].mxu0 %v9214_v0 }
 0x1f6   : > { %v1581_v33 = vpop.f32.mrb[58].mxu1  ;;  %5556 = vmatprep.mubr.msk.bf16.mxu0 %vm6114_vm0, %v9054_v14  ;;  %v9215_v61 = vld [vmem:[#allocation75_spill] sm:$0xff] }
 0x1f7   : > { %v1582_v56 = vadd.f32 %v1581_v33, %v7744_v19  ;;  %v5235_v47 = vpop.f32.mrb[59].mxu1  ;;  %v2458_v0 = vsel %vm2411_vm6, %v9215_v61, %v2457_v11  ;;  %v9216_v19 = vld [vmem:[#allocation38_spill] sm:$0xff] }
 0x1f8   : > { %v1908_v26 = vpop.f32.mrb[60].mxu0  ;;  %v2459_v33 = vrot.slane %v9216_v19, 1  ;;  %v9217_v47 = vld [vmem:[#allocation30_spill] sm:$0xff] }
 0x1f9   : > { %v5334_v6 = vpop.f32.mrb[61].mxu0  ;;  %5457 = vmatmul.mubr.bf16.gmra.mrb[164].mxu1 %v7621_v62  ;;  %v7956_v43 = vadd.f32 %v1908_v26, %v1579_v10  ;;  %v2460_v5 = vrot.slane %v9217_v47, 2 }
 0x1fa   : > { %v1911_v13 = vpop.f32.mrb[62].mxu0  ;;  %5460 = vmatprep.mubr.msk.bf16.mxu1 %vm6114_vm0, %v9054_v14 }
 0x1fb   : > { %v5335_v25 = vpop.f32.mrb[63].mxu0  ;;  %v7960_v29 = vadd.f32 %v1911_v13, %v1582_v56  ;;  %v2461_v13 = vor.u32 %v2460_v5, %v2459_v33 }
 0x1fc   : > { %v1586_v59 = vpop.f32.mrb[60].mxu1 }
 0x1fd   : > { %v1587_v45 = vadd.f32 %v1586_v59, %v7760_v21  ;;  %v5238_v62 = vpop.f32.mrb[61].mxu1  ;;  %5557 = vmatmul.mubr.bf16.gmra.mrb[168].mxu0 %v2458_v0 }
 0x1fe   : > { %v1589_v10 = vpop.f32.mrb[62].mxu1  ;;  %5560 = vmatprep.mubr.msk.bf16.mxu0 %vm6114_vm0, %v9054_v14  ;;  %v2462_v62 = vsel %vm2411_vm6, %v2457_v11, %v2461_v13 }
 0x1ff   : > { %v1590_v26 = vadd.f32 %v1589_v10, %v7763_v48  ;;  %v5239_v56 = vpop.f32.mrb[63].mxu1 }
 0x200   : > { %v1916_v6 = vpop.f32.mrb[64].mxu0 }
 0x201   : > { %v5338_v25 = vpop.f32.mrb[65].mxu0  ;;  %5461 = vmatmul.mubr.bf16.gmra.mrb[168].mxu1 %v7631_v36  ;;  %v7971_v61 = vadd.f32 %v1916_v6, %v1587_v45 }
 0x202   : > { %v1919_v19 = vpop.f32.mrb[66].mxu0  ;;  %5464 = vmatprep.mubr.msk.bf16.mxu1 %vm6114_vm0, %v9054_v14  ;;  %v9218_v25 = vld [vmem:[#allocation78_spill] sm:$0xff] }
 0x203   : > { %v5339_v21 = vpop.f32.mrb[67].mxu0  ;;  %v7975_v59 = vadd.f32 %v1919_v19, %v1590_v26 }
 0x204   : > { %v1594_v0 = vpop.f32.mrb[64].mxu1  ;;  %v2466_v21 = vsel %vm2411_vm6, %v2461_v13, %v9218_v25 }
 0x205   : > { %v1595_v48 = vadd.f32 %v1594_v0, %v7791_v20  ;;  %v5242_v10 = vpop.f32.mrb[65].mxu1  ;;  %5561 = vmatmul.mubr.bf16.gmra.mrb[172].mxu0 %v2462_v62 }
 0x206   : > { %v1597_v33 = vpop.f32.mrb[66].mxu1  ;;  %5564 = vmatprep.mubr.msk.bf16.mxu0 %vm6114_vm0, %v9054_v14 }
 0x207   : > { %v1598_v36 = vadd.f32 %v1597_v33, %v7795_v31  ;;  %v5243_v5 = vpop.f32.mrb[67].mxu1 }
 0x208   : > { %v1924_v45 = vpop.f32.mrb[68].mxu0 }
 0x209   : > { %v5342_v56 = vpop.f32.mrb[69].mxu0  ;;  %5465 = vmatmul.mubr.bf16.gmra.mrb[172].mxu1 %v7641_v39  ;;  %v7983_v19 = vadd.f32 %v1924_v45, %v1595_v48 }
 0x20a   : > { %v1927_v26 = vpop.f32.mrb[70].mxu0  ;;  %5468 = vmatprep.mubr.msk.bf16.mxu1 %vm6114_vm0, %v9054_v14 }
 0x20b   : > { %v5343_v20 = vpop.f32.mrb[71].mxu0  ;;  %v7987_v11 = vadd.f32 %v1927_v26, %v1598_v36 }
 0x20c   : > { %v1602_v6 = vpop.f32.mrb[68].mxu1  ;;  %v9219_v20 = vld [vmem:[#allocation79_spill] sm:$0xff] }
 0x20d   : > { %v1603_v31 = vadd.f32 %v1602_v6, %v7822_v30  ;;  %v5246_v0 = vpop.f32.mrb[69].mxu1  ;;  %5565 = vmatmul.mubr.bf16.gmra.mrb[176].mxu0 %v2466_v21 }
 0x20e   : > { %v1605_v62 = vpop.f32.mrb[70].mxu1  ;;  %5568 = vmatprep.mubr.msk.bf16.mxu0 %vm6114_vm0, %v9054_v14 }
 0x20f   : > { %v1606_v39 = vadd.f32 %v1605_v62, %v7826_v53  ;;  %v5247_v48 = vpop.f32.mrb[71].mxu1 }
 0x210   : > { %v1932_v10 = vpop.f32.mrb[72].mxu0 }
 0x211   : > { %v5346_v33 = vpop.f32.mrb[73].mxu0  ;;  %5469 = vmatmul.mubr.bf16.gmra.mrb[176].mxu1 %v7651_v35  ;;  %v7996_v36 = vadd.f32 %v1932_v10, %v1603_v31 }
 0x212   : > { %v1935_v5 = vpop.f32.mrb[74].mxu0  ;;  %5472 = vmatprep.mubr.msk.bf16.mxu1 %vm6114_vm0, %v9054_v14 }
 0x213   : > { %v5347_v30 = vpop.f32.mrb[75].mxu0  ;;  %v8000_v13 = vadd.f32 %v1935_v5, %v1606_v39 }
 0x214   : > { %v1610_v45 = vpop.f32.mrb[72].mxu1 }
 0x215   : > { %v1611_v56 = vadd.f32 %v1610_v45, %v7852_v52  ;;  %v5250_v26 = vpop.f32.mrb[73].mxu1  ;;  %5569 = vmatmul.mubr.bf16.gmra.mrb[180].mxu0 %v9219_v20 }
 0x216   : > { %v1613_v53 = vpop.f32.mrb[74].mxu1  ;;  %5572 = vmatprep.mubr.msk.bf16.mxu0 %vm6114_vm0, %v9054_v14 }
 0x217   : > { %v1614_v35 = vadd.f32 %v1613_v53, %v7856_v44  ;;  %v5251_v6 = vpop.f32.mrb[75].mxu1 }
 0x218   : > { %v1940_v25 = vpop.f32.mrb[76].mxu0 }
 0x219   : > { %v5350_v21 = vpop.f32.mrb[77].mxu0  ;;  %5473 = vmatmul.mubr.bf16.gmra.mrb[180].mxu1 %v7663_v16  ;;  %v8008_v31 = vadd.f32 %v1940_v25, %v1611_v56 }
 0x21a   : > { %v1943_v0 = vpop.f32.mrb[78].mxu0  ;;  %5476 = vmatprep.mubr.msk.bf16.mxu1 %vm6114_vm0, %v9054_v14 }
 0x21b   : > { %v5351_v52 = vpop.f32.mrb[79].mxu0  ;;  %v8012_v62 = vadd.f32 %v1943_v0, %v1614_v35 }
 0x21c   : > { %v1618_v39 = vpop.f32.mrb[76].mxu1 }
 0x21d   : > { %v1619_v48 = vadd.f32 %v1618_v39, %v7879_v15  ;;  %v5254_v10 = vpop.f32.mrb[77].mxu1  ;;  %5573 = vmatmul.mubr.bf16.gmra.mrb[184].mxu0 %v7311_v27 }
 0x21e   : > { %v1621_v44 = vpop.f32.mrb[78].mxu1  ;;  %5576 = vmatprep.mubr.msk.bf16.mxu0 %vm6114_vm0, %v9054_v14 }
 0x21f   : > { %v1622_v16 = vadd.f32 %v1621_v44, %v7883_v40  ;;  %v5255_v33 = vpop.f32.mrb[79].mxu1 }
 0x220   : > { %v1948_v5 = vpop.f32.mrb[80].mxu0 }
 0x221   : > { %v5354_v30 = vpop.f32.mrb[81].mxu0  ;;  %5477 = vmatmul.mubr.bf16.gmra.mrb[184].mxu1 %v7677_v1  ;;  %v8020_v45 = vadd.f32 %v1948_v5, %v1619_v48 }
 0x222   : > { %v1951_v56 = vpop.f32.mrb[82].mxu0  ;;  %5480 = vmatprep.mubr.msk.bf16.mxu1 %vm6114_vm0, %v9054_v14 }
 0x223   : > { %v5355_v15 = vpop.f32.mrb[83].mxu0  ;;  %v8024_v26 = vadd.f32 %v1951_v56, %v1622_v16 }
 0x224   : > { %v1626_v27 = vpop.f32.mrb[80].mxu1 }
 0x225   : > { %v1627_v20 = vadd.f32 %v1626_v27, %v7893_v7  ;;  %v5258_v53 = vpop.f32.mrb[81].mxu1  ;;  %5577 = vmatmul.mubr.bf16.gmra.mrb[188].mxu0 %v7320_v23 }
 0x226   : > { %v1629_v40 = vpop.f32.mrb[82].mxu1  ;;  %5580 = vmatprep.mubr.msk.bf16.mxu0 %vm6114_vm0, %v9054_v14 }
 0x227   : > { %v1630_v1 = vadd.f32 %v1629_v40, %v7896_v2  ;;  %v5259_v35 = vpop.f32.mrb[83].mxu1 }
 0x228   : > { %v1956_v6 = vpop.f32.mrb[84].mxu0 }
 0x229   : > { %v5358_v25 = vpop.f32.mrb[85].mxu0  ;;  %5481 = vmatmul.mubr.bf16.gmra.mrb[188].mxu1 %v7695_v57  ;;  %v8032_v21 = vadd.f32 %v1956_v6, %v1627_v20  ;;  %v2101_v6 = vrot.slane %v7293_v49, 1 }
 0x22a   : > { %v1959_v0 = vpop.f32.mrb[86].mxu0  ;;  %5484 = vmatprep.mubr.msk.bf16.mxu1 %vm6114_vm0, %v9054_v14 }
 0x22b   : > { %v5359_v7 = vpop.f32.mrb[87].mxu0  ;;  %v8036_v52 = vadd.f32 %v1959_v0, %v1630_v1 }
 0x22c   : > { %v1634_v23 = vpop.f32.mrb[84].mxu1 }
 0x22d   : > { %v1635_v39 = vadd.f32 %v1634_v23, %v7672_v24  ;;  %v5262_v48 = vpop.f32.mrb[85].mxu1  ;;  %5581 = vmatmul.mubr.bf16.gmra.mrb[192].mxu0 %v7332_v17 }
 0x22e   : > { %v1637_v2 = vpop.f32.mrb[86].mxu1  ;;  %5584 = vmatprep.mubr.msk.bf16.mxu0 %vm6114_vm0, %v9054_v14 }
 0x22f   : > { %v1638_v57 = vadd.f32 %v1637_v2, %v7679_v60  ;;  %v5263_v10 = vpop.f32.mrb[87].mxu1 }
 0x230   : > { %v1964_v44 = vpop.f32.mrb[88].mxu0 }
 0x231   : > { %v5362_v16 = vpop.f32.mrb[89].mxu0  ;;  %5485 = vmatmul.mubr.bf16.gmra.mrb[192].mxu1 %v7713_v9  ;;  %v8044_v33 = vadd.f32 %v1964_v44, %v1635_v39  ;;  %v2102_v39 = vsel %vm1731_vm5, %v7723_v42, %v2101_v6  ;;  %v9220_v42 = vld [vmem:[#allocation108_spill] sm:$0xff] }
 0x232   : > { %v1967_v5 = vpop.f32.mrb[90].mxu0  ;;  %5488 = vmatprep.mubr.msk.bf16.mxu1 %vm6114_vm0, %v9054_v14 }
 0x233   : > { %v5363_v24 = vpop.f32.mrb[91].mxu0  ;;  %v8048_v30 = vadd.f32 %v1967_v5, %v1638_v57 }
 0x234   : > { %v1642_v17 = vpop.f32.mrb[88].mxu1 }
 0x235   : > { %v1643_v56 = vadd.f32 %v1642_v17, %v7692_v18  ;;  %v5266_v15 = vpop.f32.mrb[89].mxu1  ;;  %5585 = vmatmul.mubr.bf16.gmra.mrb[196].mxu0 %v7337_v22 }
 0x236   : > { %v1645_v60 = vpop.f32.mrb[90].mxu1  ;;  %5588 = vmatprep.mubr.msk.bf16.mxu0 %vm6114_vm0, %v9054_v14 }
 0x237   : > { %v1646_v9 = vadd.f32 %v1645_v60, %v7698_v8  ;;  %v5267_v27 = vpop.f32.mrb[91].mxu1 }
 0x238   : > { %v1972_v20 = vpop.f32.mrb[92].mxu0 }
 0x239   : > { %v5366_v53 = vpop.f32.mrb[93].mxu0  ;;  %5489 = vmatmul.mubr.bf16.gmra.mrb[196].mxu1 %v7734_v37  ;;  %v8056_v40 = vadd.f32 %v1972_v20, %v1643_v56  ;;  %v9222_v20 = vld [vmem:[#allocation109_spill] sm:$0xff] }
 0x23a   : > { %v1975_v1 = vpop.f32.mrb[94].mxu0  ;;  %5492 = vmatprep.mubr.msk.bf16.mxu1 %vm6114_vm0, %v9054_v14 }
 0x23b   : > { %v5367_v18 = vpop.f32.mrb[95].mxu0  ;;  %v8060_v35 = vadd.f32 %v1975_v1, %v1646_v9  ;;  %v9221_v9 = vld [vmem:[#allocation22_spill] sm:$0xff] }
 0x23c   : > { %v1650_v22 = vpop.f32.mrb[92].mxu1  ;;  %v2829_v27 = vrot.slane %v9221_v9, 2  ;;  %v9223_v18 = vld [vmem:[#allocation80_spill] sm:$0xff] }
 0x23d   : > { %v1651_v25 = vadd.f32 %v1650_v22, %v7710_v63  ;;  %v5270_v8 = vpop.f32.mrb[93].mxu1  ;;  %5589 = vmatmul.mubr.bf16.gmra.mrb[200].mxu0 %v7345_v28 }
 0x23e   : > { %v1653_v0 = vpop.f32.mrb[94].mxu1  ;;  %5592 = vmatprep.mubr.msk.bf16.mxu0 %vm6114_vm0, %v9054_v14  ;;  %v6086_v8 = vld [vmem:[%s8900_s3 + $0x1c0] sm:$0xff]  }
 0x23f   : > { %v1654_v37 = vadd.f32 %v1653_v0, %v7716_v12  ;;  %v5271_v7 = vpop.f32.mrb[95].mxu1  ;;  %v9225_v0 = vld [vmem:[#allocation110_spill] sm:$0xff] }
 0x240   : > { %v1980_v23 = vpop.f32.mrb[96].mxu0 }
 0x241   : > { %v5370_v48 = vpop.f32.mrb[97].mxu0  ;;  %5493 = vmatmul.mubr.bf16.gmra.mrb[200].mxu1 %v2102_v39  ;;  %v8070_v2 = vadd.f32 %v1980_v23, %v1651_v25  ;;  %v9224_v25 = vld [vmem:[#allocation10_spill] sm:$0xff] }
 0x242   : > { %v1983_v49 = vpop.f32.mrb[98].mxu0  ;;  %5496 = vmatprep.mubr.msk.bf16.mxu1 %vm6114_vm0, %v9054_v14  ;;  %v9226_v48 = vld [vmem:[#allocation31_spill] sm:$0xff] }
 0x243   : > { %v5371_v28 = vpop.f32.mrb[99].mxu0  ;;  %v8074_v63 = vadd.f32 %v1983_v49, %v1654_v37  ;;  %v2831_v49 = vrot.slane %v9226_v48, 2 }
 0x244   : > { %v1658_v57 = vpop.f32.mrb[96].mxu1 }
 0x245   : > { %v1659_v10 = vadd.f32 %v1658_v57, %v7730_v58  ;;  %v5274_v12 = vpop.f32.mrb[97].mxu1  ;;  %5593 = vmatmul.mubr.bf16.gmra.mrb[204].mxu0 %v7365_v4 }
 0x246   : > { %v1661_v44 = vpop.f32.mrb[98].mxu1  ;;  %5596 = vmatprep.mubr.msk.bf16.mxu0 %vm6114_vm0, %v9054_v14  ;;  %v6087_v12 = vld [vmem:[%s8900_s3 + $0x200] sm:$0xff]  }
 0x247   : > { %v1662_v16 = vadd.f32 %v1661_v44, %v9220_v42  ;;  %v5275_v5 = vpop.f32.mrb[99].mxu1  ;;  %v6088_v42 = vld [vmem:[%s8900_s3 + $0x1c8] sm:$0xff]  }
 0x248   : > { %v1988_v24 = vpop.f32.mrb[100].mxu0 }
 0x249   : > { %v5374_v17 = vpop.f32.mrb[101].mxu0  ;;  %5497 = vmatmul.mubr.bf16.gmra.mrb[204].mxu1 %v2101_v6  ;;  %v8081_v56 = vadd.f32 %v1988_v24, %v1659_v10  ;;  %v2828_v6 = vrot.slane %v9224_v25, 2  ;;  %v2832_v24 = vsel %vm2827_vm10, %v2829_v27, %v2831_v49  ;;  %v9229_v25 = vld [vmem:[#allocation39_spill] sm:$0xff] }
 0x24a   : > { %v1991_v15 = vpop.f32.mrb[102].mxu0  ;;  %5616 = vmatprep.mubr.msk.bf16.mxu1 %vm6114_vm0, %v9054_v14  ;;  %v9227_v17 = vld [vmem:[#allocation111_spill] sm:$0xff] }
 0x24b   : > { %v5375_v58 = vpop.f32.mrb[103].mxu0  ;;  %v8085_v60 = vadd.f32 %v1991_v15, %v1662_v16  ;;  %v2830_v39 = vsel %vm2827_vm10, %v2828_v6, %v2829_v27  ;;  %v6090_v27 = vld [vmem:[%s8900_s3 + $0x1d0] sm:$0xff]   ;;  %v2833_v6 = vrot.slane %v9229_v25, 2 }
 0x24c   : > { %v1666_v4 = vpop.f32.mrb[100].mxu1 }
 0x24d   : > { %v1667_v53 = vadd.f32 %v1666_v4, %v9222_v20  ;;  %v5278_v1 = vpop.f32.mrb[101].mxu1  ;;  %5597 = vmatmul.mubr.bf16.gmra.mrb[208].mxu0 %v9223_v18  ;;  %v6089_v20 = vld [vmem:[%s8900_s3 + $0x208] sm:$0xff]  }
 0x24e   : > { %v1669_v22 = vpop.f32.mrb[102].mxu1  ;;  %5716 = vmatprep.mubr.msk.bf16.mxu0 %vm6114_vm0, %v9054_v14 }
 0x24f   : > { %v1670_v37 = vadd.f32 %v1669_v22, %v9225_v0  ;;  %v5279_v7 = vpop.f32.mrb[103].mxu1 }
 0x250   : > { %v1996_v23 = vpop.f32.mrb[104].mxu0  ;;  %v6091_v7 = vld [vmem:[%s8900_s3 + $0x210] sm:$0xff]  }
 0x251   : > { %v5378_v28 = vpop.f32.mrb[105].mxu0  ;;  %5617 = vmatmul.mubr.bf16.vlgmr.msra.gmra.mrb[208].mxu1 %v2830_v39  ;;  %v8099_v57 = vadd.f32 %v1996_v23, %v1667_v53  ;;  %v9228_v53 = vld [vmem:[#allocation13_spill] sm:$0xff] }
 0x252   : > { %v1999_v10 = vpop.f32.mrb[106].mxu0  ;;  %5801 = vmatpush3.bf16.msra.mxu1 %v6086_v8  ;;  %5620 = vmatprep.mubr.msk.bf16.mxu1 %vm6114_vm0, %v9054_v14  ;;  %v6092_v39 = vld [vmem:[%s8900_s3 + $0x1d8] sm:$0xff]  }
 0x253   : > { %v5379_v44 = vpop.f32.mrb[107].mxu0  ;;  %5802 = vmatprep.subr.bf16.mxu1 %v9054_v14  ;;  %v8110_v16 = vadd.f32 %v1999_v10, %v1670_v37 }
 0x254   : > { %v1674_v5 = vpop.f32.mrb[104].mxu1  ;;  %v9230_v44 = vld [vmem:[#allocation14_spill] sm:$0xff] }
 0x255   : > { %v1675_v15 = vadd.f32 %v1674_v5, %v9227_v17  ;;  %v5282_v58 = vpop.f32.mrb[105].mxu1  ;;  %5717 = vmatmul.mubr.bf16.vlgmr.msra.gmra.mrb[212].mxu0 %v2832_v24  ;;  %v6093_v17 = vld [vmem:[%s8900_s3 + $0x218] sm:$0xff]  }
 0x256   : > { %5901 = vmatpush3.bf16.msra.mxu0 %v6087_v12  ;;  %v1677_v4 = vpop.f32.mrb[106].mxu1  ;;  %5720 = vmatprep.mubr.msk.bf16.mxu0 %vm6114_vm0, %v9054_v14  ;;  %v2834_v12 = vsel %vm2827_vm10, %v2831_v49, %v2833_v6  ;;  %v6094_v49 = vld [vmem:[%s8900_s3 + $0x1e0] sm:$0xff]  }
 0x257   : > { %v1678_v1 = vadd.f32 %v1677_v4, %v9228_v53  ;;  %v5283_v18 = vpop.f32.mrb[107].mxu1  ;;  %5803 = vmatpush3.bf16.msra.mxu1 %v6088_v42  ;;  %5902 = vmatprep.subr.bf16.mxu0 %v9054_v14  ;;  %v9232_v53 = vld [vmem:[#allocation45_spill] sm:$0xff] }
 0x258   : > { %v2004_v22 = vpop.f32.mrb[108].mxu0  ;;  %5804 = vmatprep.subr.bf16.mxu1 %v9054_v14 }
 0x259   : > { %v5382_v8 = vpop.f32.mrb[109].mxu0  ;;  %5621 = vmatmul.mubr.bf16.gmra.mrb[212].mxu1 %v2832_v24  ;;  %v8126_v0 = vadd.f32 %v2004_v22, %v1675_v15  ;;  %v9231_v15 = vld [vmem:[#allocation71_spill] sm:$0xff] }
 0x25a   : > { %v2007_v37 = vpop.f32.mrb[110].mxu0  ;;  %5624 = vmatprep.mubr.msk.bf16.mxu1 %vm6114_vm0, %v9054_v14  ;;  %5903 = vmatpush3.bf16.msra.mxu0 %v6089_v20  ;;  %v6095_v8 = vld [vmem:[%s8900_s3 + $0x220] sm:$0xff]  }
 0x25b   : > { %v5383_v23 = vpop.f32.mrb[111].mxu0  ;;  %5805 = vmatpush3.bf16.msra.mxu1 %v6090_v27  ;;  %5904 = vmatprep.subr.bf16.mxu0 %v9054_v14  ;;  %v8137_v28 = vadd.f32 %v2007_v37, %v1678_v1  ;;  %v2835_v1 = vrot.slane %v9232_v53, 2 }
 0x25c   : > { %v1682_v10 = vpop.f32.mrb[108].mxu1  ;;  %5806 = vmatprep.subr.bf16.mxu1 %v9054_v14 }
 0x25d   : > { %v1683_v42 = vadd.f32 %v1682_v10, %v9230_v44  ;;  %v5286_v5 = vpop.f32.mrb[109].mxu1  ;;  %5721 = vmatmul.mubr.bf16.gmra.mrb[216].mxu0 %v2834_v12  ;;  %v2836_v10 = vsel %vm2827_vm10, %v2833_v6, %v2835_v1  ;;  %v6098_v6 = vld [vmem:[%s8900_s3 + $0x1f0] sm:$0xff]  }
 0x25e   : > { %v1685_v24 = vpop.f32.mrb[110].mxu1  ;;  %5724 = vmatprep.mubr.msk.bf16.mxu0 %vm6114_vm0, %v9054_v14  ;;  %5905 = vmatpush3.bf16.msra.mxu0 %v6091_v7  ;;  %v6096_v7 = vld [vmem:[%s8900_s3 + $0x1e8] sm:$0xff]  }
 0x25f   : > { %v1686_v58 = vadd.f32 %v1685_v24, %v9231_v15  ;;  %v5287_v4 = vpop.f32.mrb[111].mxu1  ;;  %5807 = vmatpush3.bf16.msra.mxu1 %v6092_v39  ;;  %5906 = vmatprep.subr.bf16.mxu0 %v9054_v14  ;;  %v6097_v24 = vld [vmem:[%s8900_s3 + $0x228] sm:$0xff]  }
 0x260   : > { %v2012_v20 = vpop.f32.mrb[112].mxu0  ;;  %5808 = vmatprep.subr.bf16.mxu1 %v9054_v14 }
 0x261   : > { %v5386_v18 = vpop.f32.mrb[113].mxu0  ;;  %5625 = vmatmul.mubr.bf16.gmra.mrb[216].mxu1 %v2834_v12  ;;  %v8154_v27 = vadd.f32 %v2012_v20, %v1683_v42  ;;  %v9233_v12 = vld [vmem:[#allocation112_spill] sm:$0xff] }
 0x262   : > { %v2015_v22 = vpop.f32.mrb[114].mxu0  ;;  %5628 = vmatprep.mubr.msk.bf16.mxu1 %vm6114_vm0, %v9054_v14  ;;  %5907 = vmatpush3.bf16.msra.mxu0 %v6093_v17  ;;  %v9234_v17 = vld [vmem:[#allocation72_spill] sm:$0xff] }
 0x263   : > { %v5387_v37 = vpop.f32.mrb[115].mxu0  ;;  %5809 = vmatpush3.bf16.msra.mxu1 %v6094_v49  ;;  %5908 = vmatprep.subr.bf16.mxu0 %v9054_v14  ;;  %v8165_v23 = vadd.f32 %v2015_v22, %v1686_v58  ;;  %v9235_v49 = vld [vmem:[#allocation51_spill] sm:$0xff] }
 0x264   : > { %v1690_v39 = vpop.f32.mrb[112].mxu1  ;;  %5810 = vmatprep.subr.bf16.mxu1 %v9054_v14  ;;  %v2837_v20 = vrot.slane %v9235_v49, 2  ;;  %v6099_v37 = vld [vmem:[%s8900_s3 + $0x230] sm:$0xff]  }
 0x265   : > { %v1691_v44 = vadd.f32 %v1690_v39, %v9233_v12  ;;  %v5290_v42 = vpop.f32.mrb[113].mxu1  ;;  %5725 = vmatmul.mubr.bf16.gmra.mrb[220].mxu0 %v2836_v10  ;;  %v6100_v39 = vld [vmem:[%s8900_s3 + $0x1f8] sm:$0xff]  }
 0x266   : > { %v1693_v5 = vpop.f32.mrb[114].mxu1  ;;  %5728 = vmatprep.mubr.msk.bf16.mxu0 %vm6114_vm0, %v9054_v14  ;;  %5909 = vmatpush3.bf16.msra.mxu0 %v6095_v8  ;;  %v9236_v42 = vld [vmem:[#allocation113_spill] sm:$0xff] }
 0x267   : > { %v1694_v15 = vadd.f32 %v1693_v5, %v9234_v17  ;;  %v5291_v58 = vpop.f32.mrb[115].mxu1  ;;  %5811 = vmatpush3.bf16.msra.mxu1 %v6096_v7  ;;  %5910 = vmatprep.subr.bf16.mxu0 %v9054_v14 }
 0x268   : > { %v2020_v4 = vpop.f32.mrb[116].mxu0  ;;  %5812 = vmatprep.subr.bf16.mxu1 %v9054_v14  ;;  %v6101_v58 = vld [vmem:[%s8900_s3 + $0x238] sm:$0xff]  }
 0x269   : > { %v5390_v18 = vpop.f32.mrb[117].mxu0  ;;  %5629 = vmatmul.mubr.bf16.gmra.mrb[220].mxu1 %v2836_v10  ;;  %v8182_v22 = vadd.f32 %v2020_v4, %v1691_v44  ;;  %v2838_v44 = vsel %vm2827_vm10, %v2835_v1, %v2837_v20 }
 0x26a   : > { %v2023_v8 = vpop.f32.mrb[118].mxu0  ;;  %5632 = vmatprep.mubr.msk.bf16.mxu1 %vm6114_vm0, %v9054_v14  ;;  %5911 = vmatpush3.bf16.msra.mxu0 %v6097_v24  ;;  %v9238_v18 = vld [vmem:[#allocation57_spill] sm:$0xff] }
 0x26b   : > { %v5391_v7 = vpop.f32.mrb[119].mxu0  ;;  %5813 = vmatpush3.bf16.msra.mxu1 %v6098_v6  ;;  %5912 = vmatprep.subr.bf16.mxu0 %v9054_v14  ;;  %v8193_v10 = vadd.f32 %v2023_v8, %v1694_v15  ;;  %v9237_v15 = vld [vmem:[#allocation114_spill] sm:$0xff]  ;;  %v2839_v8 = vrot.slane %v9238_v18, 2 }
 0x26c   : > { %v1698_v12 = vpop.f32.mrb[116].mxu1  ;;  %5814 = vmatprep.subr.bf16.mxu1 %v9054_v14 }
 0x26d   : > { %v1699_v5 = vadd.f32 %v1698_v12, %v9236_v42  ;;  %v5294_v24 = vpop.f32.mrb[117].mxu1  ;;  %5729 = vmatmul.mubr.bf16.gmra.mrb[224].mxu0 %v2838_v44 }
 0x26e   : > { %v1701_v17 = vpop.f32.mrb[118].mxu1  ;;  %5732 = vmatprep.mubr.msk.bf16.mxu0 %vm6114_vm0, %v9054_v14  ;;  %5913 = vmatpush3.bf16.msra.mxu0 %v6099_v37 }
 0x26f   : > { %v1702_v6 = vadd.f32 %v1701_v17, %v9237_v15  ;;  %v5295_v4 = vpop.f32.mrb[119].mxu1  ;;  %5815 = vmatpush3.bf16.msra.mxu1 %v6100_v39  ;;  %5914 = vmatprep.subr.bf16.mxu0 %v9054_v14  ;;  %v2840_v39 = vsel %vm2827_vm10, %v2837_v20, %v2839_v8  ;;  %v9239_v15 = vld [vmem:[#allocation115_spill] sm:$0xff] }
 0x270   : > { %v2028_v1 = vpop.f32.mrb[120].mxu0 }
 0x271   : > { %v5394_v7 = vpop.f32.mrb[121].mxu0  ;;  %5633 = vmatmul.mubr.bf16.gmra.mrb[224].mxu1 %v2838_v44  ;;  %v8206_v12 = vadd.f32 %v2028_v1, %v1699_v5  ;;  %v9240_v1 = vld [vmem:[#allocation63_spill] sm:$0xff] }
 0x272   : > { %v2031_v42 = vpop.f32.mrb[122].mxu0  ;;  %5636 = vmatprep.mubr.msk.bf16.mxu1 %vm6114_vm0, %v9054_v14  ;;  %5915 = vmatpush3.bf16.msra.mxu0 %v6101_v58  ;;  %v2841_v7 = vrot.slane %v9240_v1, 2 }
 0x273   : > { %v5395_v37 = vpop.f32.mrb[123].mxu0  ;;  %v8210_v24 = vadd.f32 %v2031_v42, %v1702_v6 }
 0x274   : > { %v1706_v17 = vpop.f32.mrb[120].mxu1 }
 0x275   : > { %v1707_v4 = vadd.f32 %v1706_v17, %v9239_v15  ;;  %v5298_v47 = vpop.f32.mrb[121].mxu1  ;;  %5733 = vmatmul.mubr.bf16.gmra.mrb[228].mxu0 %v2840_v39 }
 0x276   : > { %v1709_v38 = vpop.f32.mrb[122].mxu1  ;;  %5736 = vmatprep.mubr.msk.bf16.mxu0 %vm6114_vm0, %v9054_v14  ;;  %v2842_v47 = vsel %vm2827_vm10, %v2839_v8, %v2841_v7 }
 0x277   : > { %v5299_v44 = vpop.f32.mrb[123].mxu1 }
 0x278   : > { %v2036_v5 = vpop.f32.mrb[124].mxu0  ;;  %v9241_v44 = vld [vmem:[#allocation67_spill] sm:$0xff] }
 0x279   : > { %v8217_v51 = vadd.f32 %v2036_v5, %v1707_v4  ;;  %v5398_v58 = vpop.f32.mrb[125].mxu0  ;;  %5637 = vmatmul.mubr.bf16.gmra.mrb[228].mxu1 %v2840_v39  ;;  %v2843_v5 = vrot.slane %v9241_v44, 2 }
 0x27a   : > { %v2039_v6 = vpop.f32.mrb[126].mxu0  ;;  %5640 = vmatprep.mubr.msk.bf16.mxu1 %vm6114_vm0, %v9054_v14 }
 0x27b   : > { %v5399_v20 = vpop.f32.mrb[127].mxu0 }
 0x27c   : > { %v2187_v42 = vpop.f32.mrb[124].mxu1 }
 0x27d   : > { %v2353_v38 = vadd.f32 %v2187_v42, %v7906_v41  ;;  %v5418_v37 = vpop.f32.mrb[125].mxu1  ;;  %5737 = vmatmul.mubr.bf16.gmra.mrb[232].mxu0 %v2842_v47 }
 0x27e   : > { %v2190_v17 = vpop.f32.mrb[126].mxu1  ;;  %5740 = vmatprep.mubr.msk.bf16.mxu0 %vm6114_vm0, %v9054_v14  ;;  %v2844_v37 = vsel %vm2827_vm10, %v2841_v7, %v2843_v5 }
 0x27f   : > { %v2354_v15 = vadd.f32 %v2190_v17, %v7910_v32  ;;  %v5419_v4 = vpop.f32.mrb[127].mxu1 }
 0x280   : > { %v2603_v39 = vpop.f32.mrb[128].mxu0 }
 0x281   : > { %v8227_v58 = vadd.f32 %v2603_v39, %v2353_v38  ;;  %v5518_v6 = vpop.f32.mrb[129].mxu0  ;;  %5641 = vmatmul.mubr.bf16.gmra.mrb[232].mxu1 %v2842_v47 }
 0x282   : > { %v2606_v20 = vpop.f32.mrb[130].mxu0  ;;  %5644 = vmatprep.mubr.msk.bf16.mxu1 %vm6114_vm0, %v9054_v14  ;;  %v9242_v6 = vld [vmem:[#allocation70_spill] sm:$0xff] }
 0x283   : > { %v8231_v41 = vadd.f32 %v2606_v20, %v2354_v15  ;;  %v5519_v8 = vpop.f32.mrb[131].mxu0  ;;  %v2845_v44 = vrot.slane %v9242_v6, 2 }
 0x284   : > { %v2195_v42 = vpop.f32.mrb[128].mxu1 }
 0x285   : > { %v2355_v32 = vadd.f32 %v2195_v42, %v7918_v55  ;;  %v5422_v17 = vpop.f32.mrb[129].mxu1  ;;  %5741 = vmatmul.mubr.bf16.gmra.mrb[236].mxu0 %v2844_v37 }
 0x286   : > { %v2198_v4 = vpop.f32.mrb[130].mxu1  ;;  %5744 = vmatprep.mubr.msk.bf16.mxu0 %vm6114_vm0, %v9054_v14  ;;  %v2846_v17 = vsel %vm2827_vm10, %v2843_v5, %v2845_v44 }
 0x287   : > { %v2356_v47 = vadd.f32 %v2198_v4, %v7922_v46  ;;  %v5423_v38 = vpop.f32.mrb[131].mxu1 }
 0x288   : > { %v2611_v39 = vpop.f32.mrb[132].mxu0 }
 0x289   : > { %v8239_v15 = vadd.f32 %v2611_v39, %v2355_v32  ;;  %v5522_v20 = vpop.f32.mrb[133].mxu0  ;;  %5645 = vmatmul.mubr.bf16.gmra.mrb[236].mxu1 %v2844_v37 }
 0x28a   : > { %v2614_v8 = vpop.f32.mrb[134].mxu0  ;;  %5648 = vmatprep.mubr.msk.bf16.mxu1 %vm6114_vm0, %v9054_v14 }
 0x28b   : > { %v8243_v55 = vadd.f32 %v2614_v8, %v2356_v47  ;;  %v5523_v7 = vpop.f32.mrb[135].mxu0 }
 0x28c   : > { %v2203_v42 = vpop.f32.mrb[132].mxu1  ;;  %v9243_v7 = vld [vmem:[#allocation15_spill] sm:$0xff] }
 0x28d   : > { %v2357_v46 = vadd.f32 %v2203_v42, %v7930_v50  ;;  %v5426_v4 = vpop.f32.mrb[133].mxu1  ;;  %5745 = vmatmul.mubr.bf16.gmra.mrb[240].mxu0 %v2846_v17  ;;  %v2847_v6 = vrot.slane %v9243_v7, 2 }
 0x28e   : > { %v2206_v38 = vpop.f32.mrb[134].mxu1  ;;  %5748 = vmatprep.mubr.msk.bf16.mxu0 %vm6114_vm0, %v9054_v14 }
 0x28f   : > { %v2358_v37 = vadd.f32 %v2206_v38, %v7934_v34  ;;  %v5427_v32 = vpop.f32.mrb[135].mxu1  ;;  %v2848_v4 = vsel %vm2827_vm10, %v2845_v44, %v2847_v6 }
 0x290   : > { %v2619_v39 = vpop.f32.mrb[136].mxu0 }
 0x291   : > { %v8250_v20 = vadd.f32 %v2619_v39, %v2357_v46  ;;  %v5526_v47 = vpop.f32.mrb[137].mxu0  ;;  %5649 = vmatmul.mubr.bf16.gmra.mrb[240].mxu1 %v2846_v17 }
 0x292   : > { %v2622_v8 = vpop.f32.mrb[138].mxu0  ;;  %5652 = vmatprep.mubr.msk.bf16.mxu1 %vm6114_vm0, %v9054_v14  ;;  %v9244_v47 = vld [vmem:[#allocation18_spill] sm:$0xff] }
 0x293   : > { %v8255_v50 = vadd.f32 %v2622_v8, %v2358_v37  ;;  %v5527_v5 = vpop.f32.mrb[139].mxu0  ;;  %v2849_v7 = vrot.slane %v9244_v47, 2 }
 0x294   : > { %v2211_v42 = vpop.f32.mrb[136].mxu1 }
 0x295   : > { %v2359_v34 = vadd.f32 %v2211_v42, %v7942_v54  ;;  %v5430_v38 = vpop.f32.mrb[137].mxu1  ;;  %5749 = vmatmul.mubr.bf16.gmra.mrb[244].mxu0 %v2848_v4 }
 0x296   : > { %v2214_v46 = vpop.f32.mrb[138].mxu1  ;;  %5752 = vmatprep.mubr.msk.bf16.mxu0 %vm6114_vm0, %v9054_v14  ;;  %v2850_v38 = vsel %vm2827_vm10, %v2847_v6, %v2849_v7 }
 0x297   : > { %v2360_v17 = vadd.f32 %v2214_v46, %v7946_v3  ;;  %v5431_v32 = vpop.f32.mrb[139].mxu1 }
 0x298   : > { %v2627_v39 = vpop.f32.mrb[140].mxu0 }
 0x299   : > { %v8263_v37 = vadd.f32 %v2627_v39, %v2359_v34  ;;  %v5530_v8 = vpop.f32.mrb[141].mxu0  ;;  %5653 = vmatmul.mubr.bf16.gmra.mrb[244].mxu1 %v2848_v4 }
 0x29a   : > { %v2630_v5 = vpop.f32.mrb[142].mxu0  ;;  %5656 = vmatprep.mubr.msk.bf16.mxu1 %vm6114_vm0, %v9054_v14  ;;  %v9245_v8 = vld [vmem:[#allocation26_spill] sm:$0xff] }
 0x29b   : > { %v8267_v54 = vadd.f32 %v2630_v5, %v2360_v17  ;;  %v5531_v44 = vpop.f32.mrb[143].mxu0  ;;  %v2851_v47 = vrot.slane %v9245_v8, 2 }
 0x29c   : > { %v2219_v42 = vpop.f32.mrb[140].mxu1 }
 0x29d   : > { %v2361_v3 = vadd.f32 %v2219_v42, %v7956_v43  ;;  %v5434_v46 = vpop.f32.mrb[141].mxu1  ;;  %5753 = vmatmul.mubr.bf16.gmra.mrb[248].mxu0 %v2850_v38 }
 0x29e   : > { %v2222_v32 = vpop.f32.mrb[142].mxu1  ;;  %5756 = vmatprep.mubr.msk.bf16.mxu0 %vm6114_vm0, %v9054_v14  ;;  %v2852_v46 = vsel %vm2827_vm10, %v2849_v7, %v2851_v47 }
 0x29f   : > { %v2362_v4 = vadd.f32 %v2222_v32, %v7960_v29  ;;  %v5435_v34 = vpop.f32.mrb[143].mxu1 }
 0x2a0   : > { %v2635_v39 = vpop.f32.mrb[144].mxu0 }
 0x2a1   : > { %v8275_v17 = vadd.f32 %v2635_v39, %v2361_v3  ;;  %v5534_v5 = vpop.f32.mrb[145].mxu0  ;;  %5657 = vmatmul.mubr.bf16.gmra.mrb[248].mxu1 %v2850_v38  ;;  %v9246_v39 = vld [vmem:[#allocation35_spill] sm:$0xff] }
 0x2a2   : > { %v2638_v44 = vpop.f32.mrb[146].mxu0  ;;  %5660 = vmatprep.mubr.msk.bf16.mxu1 %vm6114_vm0, %v9054_v14  ;;  %v2853_v5 = vrot.slane %v9246_v39, 2 }
 0x2a3   : > { %v8279_v43 = vadd.f32 %v2638_v44, %v2362_v4  ;;  %v5535_v6 = vpop.f32.mrb[147].mxu0 }
 0x2a4   : > { %v2227_v42 = vpop.f32.mrb[144].mxu1 }
 0x2a5   : > { %v2363_v29 = vadd.f32 %v2227_v42, %v7971_v61  ;;  %v5438_v32 = vpop.f32.mrb[145].mxu1  ;;  %5757 = vmatmul.mubr.bf16.gmra.mrb[252].mxu0 %v2852_v46  ;;  %v2854_v42 = vsel %vm2827_vm10, %v2851_v47, %v2853_v5 }
 0x2a6   : > { %v2230_v34 = vpop.f32.mrb[146].mxu1  ;;  %5760 = vmatprep.mubr.msk.bf16.mxu0 %vm6114_vm0, %v9054_v14 }
 0x2a7   : > { %v2364_v38 = vadd.f32 %v2230_v34, %v7975_v59  ;;  %v5439_v3 = vpop.f32.mrb[147].mxu1 }
 0x2a8   : > { %v2643_v8 = vpop.f32.mrb[148].mxu0 }
 0x2a9   : > { %v8287_v4 = vadd.f32 %v2643_v8, %v2363_v29  ;;  %v5538_v44 = vpop.f32.mrb[149].mxu0  ;;  %5661 = vmatmul.mubr.bf16.gmra.mrb[252].mxu1 %v2852_v46 }
 0x2aa   : > { %v2646_v6 = vpop.f32.mrb[150].mxu0  ;;  %5664 = vmatprep.mubr.msk.bf16.mxu1 %vm6114_vm0, %v9054_v14  ;;  %v9247_v44 = vld [vmem:[#allocation42_spill] sm:$0xff] }
 0x2ab   : > { %v8291_v61 = vadd.f32 %v2646_v6, %v2364_v38  ;;  %v5539_v7 = vpop.f32.mrb[151].mxu0  ;;  %v2855_v39 = vrot.slane %v9247_v44, 2 }
 0x2ac   : > { %v2235_v32 = vpop.f32.mrb[148].mxu1 }
 0x2ad   : > { %v2365_v59 = vadd.f32 %v2235_v32, %v7983_v19  ;;  %v5442_v34 = vpop.f32.mrb[149].mxu1  ;;  %5761 = vmatmul.mubr.bf16.gmra.mrb[0].mxu0 %v2854_v42 }
 0x2ae   : > { %v2238_v3 = vpop.f32.mrb[150].mxu1  ;;  %5764 = vmatprep.mubr.msk.bf16.mxu0 %vm6114_vm0, %v9054_v14  ;;  %v2856_v34 = vsel %vm2827_vm10, %v2853_v5, %v2855_v39 }
 0x2af   : > { %v2366_v8 = vadd.f32 %v2238_v3, %v7987_v11  ;;  %v5443_v46 = vpop.f32.mrb[151].mxu1 }
 0x2b0   : > { %v2651_v29 = vpop.f32.mrb[152].mxu0 }
 0x2b1   : > { %v8299_v38 = vadd.f32 %v2651_v29, %v2365_v59  ;;  %v5542_v6 = vpop.f32.mrb[153].mxu0  ;;  %5665 = vmatmul.mubr.bf16.gmra.mrb[0].mxu1 %v2854_v42 }
 0x2b2   : > { %v2654_v47 = vpop.f32.mrb[154].mxu0  ;;  %5668 = vmatprep.mubr.msk.bf16.mxu1 %vm6114_vm0, %v9054_v14  ;;  %v9248_v6 = vld [vmem:[#allocation48_spill] sm:$0xff] }
 0x2b3   : > { %v8303_v19 = vadd.f32 %v2654_v47, %v2366_v8  ;;  %v5543_v7 = vpop.f32.mrb[155].mxu0  ;;  %v2857_v44 = vrot.slane %v9248_v6, 2 }
 0x2b4   : > { %v2243_v32 = vpop.f32.mrb[152].mxu1 }
 0x2b5   : > { %v2367_v11 = vadd.f32 %v2243_v32, %v7996_v36  ;;  %v5446_v3 = vpop.f32.mrb[153].mxu1  ;;  %5765 = vmatmul.mubr.bf16.gmra.mrb[4].mxu0 %v2856_v34 }
 0x2b6   : > { %v2246_v46 = vpop.f32.mrb[154].mxu1  ;;  %5768 = vmatprep.mubr.msk.bf16.mxu0 %vm6114_vm0, %v9054_v14  ;;  %v2858_v3 = vsel %vm2827_vm10, %v2855_v39, %v2857_v44 }
 0x2b7   : > { %v2368_v42 = vadd.f32 %v2246_v46, %v8000_v13  ;;  %v5447_v59 = vpop.f32.mrb[155].mxu1 }
 0x2b8   : > { %v2659_v29 = vpop.f32.mrb[156].mxu0 }
 0x2b9   : > { %v8311_v8 = vadd.f32 %v2659_v29, %v2367_v11  ;;  %v5546_v47 = vpop.f32.mrb[157].mxu0  ;;  %5669 = vmatmul.mubr.bf16.gmra.mrb[4].mxu1 %v2856_v34 }
 0x2ba   : > { %v2662_v7 = vpop.f32.mrb[158].mxu0  ;;  %5672 = vmatprep.mubr.msk.bf16.mxu1 %vm6114_vm0, %v9054_v14  ;;  %v9249_v47 = vld [vmem:[#allocation54_spill] sm:$0xff] }
 0x2bb   : > { %v8315_v36 = vadd.f32 %v2662_v7, %v2368_v42  ;;  %v5547_v5 = vpop.f32.mrb[159].mxu0  ;;  %v2859_v6 = vrot.slane %v9249_v47, 2 }
 0x2bc   : > { %v2251_v32 = vpop.f32.mrb[156].mxu1 }
 0x2bd   : > { %v2369_v13 = vadd.f32 %v2251_v32, %v8008_v31  ;;  %v5450_v46 = vpop.f32.mrb[157].mxu1  ;;  %5769 = vmatmul.mubr.bf16.gmra.mrb[8].mxu0 %v2858_v3 }
 0x2be   : > { %v2254_v59 = vpop.f32.mrb[158].mxu1  ;;  %5772 = vmatprep.mubr.msk.bf16.mxu0 %vm6114_vm0, %v9054_v14  ;;  %v2860_v46 = vsel %vm2827_vm10, %v2857_v44, %v2859_v6 }
 0x2bf   : > { %v2370_v34 = vadd.f32 %v2254_v59, %v8012_v62  ;;  %v5451_v11 = vpop.f32.mrb[159].mxu1 }
 0x2c0   : > { %v2667_v29 = vpop.f32.mrb[160].mxu0 }
 0x2c1   : > { %v8323_v42 = vadd.f32 %v2667_v29, %v2369_v13  ;;  %v5550_v7 = vpop.f32.mrb[161].mxu0  ;;  %5673 = vmatmul.mubr.bf16.gmra.mrb[8].mxu1 %v2858_v3 }
 0x2c2   : > { %v2670_v5 = vpop.f32.mrb[162].mxu0  ;;  %5676 = vmatprep.mubr.msk.bf16.mxu1 %vm6114_vm0, %v9054_v14  ;;  %v9250_v7 = vld [vmem:[#allocation60_spill] sm:$0xff] }
 0x2c3   : > { %v8327_v31 = vadd.f32 %v2670_v5, %v2370_v34  ;;  %v5551_v39 = vpop.f32.mrb[163].mxu0  ;;  %v2861_v47 = vrot.slane %v9250_v7, 2 }
 0x2c4   : > { %v2259_v32 = vpop.f32.mrb[160].mxu1 }
 0x2c5   : > { %v2371_v62 = vadd.f32 %v2259_v32, %v8020_v45  ;;  %v5454_v59 = vpop.f32.mrb[161].mxu1  ;;  %5773 = vmatmul.mubr.bf16.gmra.mrb[12].mxu0 %v2860_v46 }
 0x2c6   : > { %v2262_v11 = vpop.f32.mrb[162].mxu1  ;;  %5776 = vmatprep.mubr.msk.bf16.mxu0 %vm6114_vm0, %v9054_v14  ;;  %v2862_v59 = vsel %vm2827_vm10, %v2859_v6, %v2861_v47 }
 0x2c7   : > { %v2372_v3 = vadd.f32 %v2262_v11, %v8024_v26  ;;  %v5455_v13 = vpop.f32.mrb[163].mxu1 }
 0x2c8   : > { %v2675_v29 = vpop.f32.mrb[164].mxu0 }
 0x2c9   : > { %v8335_v34 = vadd.f32 %v2675_v29, %v2371_v62  ;;  %v5554_v5 = vpop.f32.mrb[165].mxu0  ;;  %5677 = vmatmul.mubr.bf16.gmra.mrb[12].mxu1 %v2860_v46 }
 0x2ca   : > { %v2678_v39 = vpop.f32.mrb[166].mxu0  ;;  %5680 = vmatprep.mubr.msk.bf16.mxu1 %vm6114_vm0, %v9054_v14  ;;  %v9251_v5 = vld [vmem:[#allocation66_spill] sm:$0xff] }
 0x2cb   : > { %v8339_v45 = vadd.f32 %v2678_v39, %v2372_v3  ;;  %v5555_v44 = vpop.f32.mrb[167].mxu0  ;;  %v2863_v7 = vrot.slane %v9251_v5, 2 }
 0x2cc   : > { %v2267_v32 = vpop.f32.mrb[164].mxu1 }
 0x2cd   : > { %v2373_v26 = vadd.f32 %v2267_v32, %v8032_v21  ;;  %v5458_v11 = vpop.f32.mrb[165].mxu1  ;;  %5777 = vmatmul.mubr.bf16.gmra.mrb[16].mxu0 %v2862_v59 }
 0x2ce   : > { %v2270_v13 = vpop.f32.mrb[166].mxu1  ;;  %5780 = vmatprep.mubr.msk.bf16.mxu0 %vm6114_vm0, %v9054_v14  ;;  %v2864_v11 = vsel %vm2827_vm10, %v2861_v47, %v2863_v7 }
 0x2cf   : > { %v2374_v46 = vadd.f32 %v2270_v13, %v8036_v52  ;;  %v5459_v62 = vpop.f32.mrb[167].mxu1 }
 0x2d0   : > { %v2683_v29 = vpop.f32.mrb[168].mxu0 }
 0x2d1   : > { %v8347_v3 = vadd.f32 %v2683_v29, %v2373_v26  ;;  %v5558_v39 = vpop.f32.mrb[169].mxu0  ;;  %5681 = vmatmul.mubr.bf16.gmra.mrb[16].mxu1 %v2862_v59 }
 0x2d2   : > { %v2686_v44 = vpop.f32.mrb[170].mxu0  ;;  %5684 = vmatprep.mubr.msk.bf16.mxu1 %vm6114_vm0, %v9054_v14 }
 0x2d3   : > { %v8351_v21 = vadd.f32 %v2686_v44, %v2374_v46  ;;  %v5559_v6 = vpop.f32.mrb[171].mxu0 }
 0x2d4   : > { %v2275_v32 = vpop.f32.mrb[168].mxu1 }
 0x2d5   : > { %v2375_v52 = vadd.f32 %v2275_v32, %v8044_v33  ;;  %v5462_v13 = vpop.f32.mrb[169].mxu1  ;;  %5781 = vmatmul.mubr.bf16.gmra.mrb[20].mxu0 %v2864_v11  ;;  %v9252_v32 = vld [vmem:[#allocation68_spill] sm:$0xff] }
 0x2d6   : > { %v2278_v62 = vpop.f32.mrb[170].mxu1  ;;  %5784 = vmatprep.mubr.msk.bf16.mxu0 %vm6114_vm0, %v9054_v14  ;;  %v9253_v13 = vrot.slane %v9252_v32, 2 }
 0x2d7   : > { %v2376_v59 = vadd.f32 %v2278_v62, %v8048_v30  ;;  %v5463_v26 = vpop.f32.mrb[171].mxu1 }
 0x2d8   : > { %v2691_v29 = vpop.f32.mrb[172].mxu0  ;;  %v2866_v5 = vsel %vm2827_vm10, %v2863_v7, %v9253_v13 }
 0x2d9   : > { %v8358_v39 = vadd.f32 %v2691_v29, %v2375_v52  ;;  %v5562_v46 = vpop.f32.mrb[173].mxu0  ;;  %5685 = vmatmul.mubr.bf16.gmra.mrb[20].mxu1 %v2864_v11 }
 0x2da   : > { %v2694_v44 = vpop.f32.mrb[174].mxu0  ;;  %5688 = vmatprep.mubr.msk.bf16.mxu1 %vm6114_vm0, %v9054_v14 }
 0x2db   : > { %v8362_v47 = vadd.f32 %v2694_v44, %v2376_v59  ;;  %v5563_v33 = vpop.f32.mrb[175].mxu0 }
 0x2dc   : > { %v2283_v6 = vpop.f32.mrb[172].mxu1 }
 0x2dd   : > { %v2377_v30 = vadd.f32 %v2283_v6, %v8056_v40  ;;  %v5466_v62 = vpop.f32.mrb[173].mxu1  ;;  %5785 = vmatmul.mubr.bf16.gmra.mrb[24].mxu0 %v2866_v5 }
 0x2de   : > { %v2286_v52 = vpop.f32.mrb[174].mxu1  ;;  %5788 = vmatprep.mubr.msk.bf16.mxu0 %vm6114_vm0, %v9054_v14  ;;  %v9254_v62 = vld [vmem:[#allocation84_spill] sm:$0xff] }
 0x2df   : > { %v2378_v11 = vadd.f32 %v2286_v52, %v8060_v35  ;;  %v5467_v26 = vpop.f32.mrb[175].mxu1 }
 0x2e0   : > { %v2699_v29 = vpop.f32.mrb[176].mxu0 }
 0x2e1   : > { %v8371_v59 = vadd.f32 %v2699_v29, %v2377_v30  ;;  %v5566_v46 = vpop.f32.mrb[177].mxu0  ;;  %5689 = vmatmul.mubr.bf16.gmra.mrb[24].mxu1 %v2866_v5 }
 0x2e2   : > { %v2702_v44 = vpop.f32.mrb[178].mxu0  ;;  %5692 = vmatprep.mubr.msk.bf16.mxu1 %vm6114_vm0, %v9054_v14 }
 0x2e3   : > { %v8375_v7 = vadd.f32 %v2702_v44, %v2378_v11  ;;  %v5567_v40 = vpop.f32.mrb[179].mxu0 }
 0x2e4   : > { %v2291_v33 = vpop.f32.mrb[176].mxu1 }
 0x2e5   : > { %v2379_v6 = vadd.f32 %v2291_v33, %v8070_v2  ;;  %v5470_v13 = vpop.f32.mrb[177].mxu1  ;;  %5789 = vmatmul.mubr.bf16.gmra.mrb[28].mxu0 %v9254_v62 }
 0x2e6   : > { %v2294_v35 = vpop.f32.mrb[178].mxu1  ;;  %5792 = vmatprep.mubr.msk.bf16.mxu0 %vm6114_vm0, %v9054_v14  ;;  %v9256_v13 = vld [vmem:[#allocation85_spill] sm:$0xff] }
 0x2e7   : > { %v2380_v30 = vadd.f32 %v2294_v35, %v8074_v63  ;;  %v5471_v5 = vpop.f32.mrb[179].mxu1 }
 0x2e8   : > { %v2707_v52 = vpop.f32.mrb[180].mxu0 }
 0x2e9   : > { %v8382_v26 = vadd.f32 %v2707_v52, %v2379_v6  ;;  %v5570_v29 = vpop.f32.mrb[181].mxu0  ;;  %5693 = vmatmul.mubr.bf16.gmra.mrb[28].mxu1 %v9254_v62 }
 0x2ea   : > { %v2710_v11 = vpop.f32.mrb[182].mxu0  ;;  %5696 = vmatprep.mubr.msk.bf16.mxu1 %vm6114_vm0, %v9054_v14  ;;  %v9258_v29 = vld [vmem:[#allocation25_spill] sm:$0xff] }
 0x2eb   : > { %v8387_v2 = vadd.f32 %v2710_v11, %v2380_v30  ;;  %v5571_v46 = vpop.f32.mrb[183].mxu0  ;;  %v9257_v30 = vld [vmem:[#allocation81_spill] sm:$0xff]  ;;  %v3508_v11 = vrot.slane %v9258_v29, 3  ;;  %v3919_v29 = vrot.slane %v9226_v48, 3 }
 0x2ec   : > { %v2299_v44 = vpop.f32.mrb[180].mxu1  ;;  %v9259_v46 = vld [vmem:[#allocation34_spill] sm:$0xff] }
 0x2ed   : > { %9255 = vst [vmem:[#allocation73_spill] sm:$0xff] %v8387_v2  ;;  %v2381_v40 = vadd.f32 %v2299_v44, %v8081_v56  ;;  %v5474_v33 = vpop.f32.mrb[181].mxu1  ;;  %5793 = vmatmul.mubr.bf16.gmra.mrb[32].mxu0 %v9256_v13  ;;  %v3507_v56 = vrot.slane %v9259_v46, 2 }
 0x2ee   : > { %v2302_v63 = vpop.f32.mrb[182].mxu1  ;;  %5796 = vmatprep.mubr.msk.bf16.mxu0 %vm6114_vm0, %v9054_v14 }
 0x2ef   : > { %v2382_v6 = vadd.f32 %v2302_v63, %v8085_v60  ;;  %v5475_v62 = vpop.f32.mrb[183].mxu1 }
 0x2f0   : > { %v2715_v35 = vpop.f32.mrb[184].mxu0  ;;  %v3509_v62 = vor.u32 %v3508_v11, %v3507_v56 }
 0x2f1   : > { %v8394_v5 = vadd.f32 %v2715_v35, %v2381_v40  ;;  %v5574_v52 = vpop.f32.mrb[185].mxu0  ;;  %5697 = vmatmul.mubr.bf16.gmra.mrb[32].mxu1 %v9257_v30  ;;  %v9260_v40 = vld [vmem:[#allocation82_spill] sm:$0xff] }
 0x2f2   : > { %v2718_v44 = vpop.f32.mrb[186].mxu0  ;;  %5816 = vmatprep.mubr.msk.bf16.mxu1 %vm6114_vm0, %v9054_v14 }
 0x2f3   : > { %v8401_v33 = vadd.f32 %v2718_v44, %v2382_v6  ;;  %v5575_v13 = vpop.f32.mrb[187].mxu0  ;;  %v9261_v6 = vld [vmem:[#allocation83_spill] sm:$0xff] }
 0x2f4   : > { %v2307_v2 = vpop.f32.mrb[184].mxu1  ;;  %v3513_v44 = vsel %vm3506_vm11, %v3509_v62, %v9261_v6 }
 0x2f5   : > { %v2383_v60 = vadd.f32 %v2307_v2, %v8099_v57  ;;  %v5478_v63 = vpop.f32.mrb[185].mxu1  ;;  %5797 = vmatmul.mubr.bf16.gmra.mrb[36].mxu0 %v9260_v40  ;;  %v3918_v2 = vrot.slane %v9221_v9, 3 }
 0x2f6   : > { %v2310_v35 = vpop.f32.mrb[186].mxu1  ;;  %5916 = vmatprep.mubr.msk.bf16.mxu0 %vm6114_vm0, %v9054_v14 }
 0x2f7   : > { %v2384_v52 = vadd.f32 %v2310_v35, %v8110_v16  ;;  %v5479_v30 = vpop.f32.mrb[187].mxu1  ;;  %v3920_v48 = vsel %vm3917_vm12, %v3918_v2, %v3919_v29 }
 0x2f8   : > { %v2723_v46 = vpop.f32.mrb[188].mxu0 }
 0x2f9   : > { %v8411_v13 = vadd.f32 %v2723_v46, %v2383_v60  ;;  %v5578_v57 = vpop.f32.mrb[189].mxu0  ;;  %5817 = vmatmul.mubr.bf16.vlgmr.msra.gmra.mrb[36].mxu1 %v3513_v44  ;;  %v3921_v46 = vrot.slane %v9229_v25, 3  ;;  %v9262_v44 = vld [vmem:[#allocation86_spill] sm:$0xff] }
 0x2fa   : > { %v2726_v11 = vpop.f32.mrb[190].mxu0  ;;  %5820 = vmatprep.mubr.msk.bf16.mxu1 %vm6114_vm0, %v9054_v14 }
 0x2fb   : > { %v8416_v56 = vadd.f32 %v2726_v11, %v2384_v52  ;;  %v5579_v16 = vpop.f32.mrb[191].mxu0 }
 0x2fc   : > { %v2315_v63 = vpop.f32.mrb[188].mxu1  ;;  %v3922_v16 = vsel %vm3917_vm12, %v3919_v29, %v3921_v46 }
 0x2fd   : > { %v2385_v40 = vadd.f32 %v2315_v63, %v8126_v0  ;;  %v5482_v35 = vpop.f32.mrb[189].mxu1  ;;  %5917 = vmatmul.mubr.bf16.vlgmr.msra.gmra.mrb[40].mxu0 %v3920_v48 }
 0x2fe   : > { %v2318_v60 = vpop.f32.mrb[190].mxu1  ;;  %5920 = vmatprep.mubr.msk.bf16.mxu0 %vm6114_vm0, %v9054_v14 }
 0x2ff   : > { %v2386_v9 = vadd.f32 %v2318_v60, %v8137_v28  ;;  %v5483_v62 = vpop.f32.mrb[191].mxu1  ;;  %v3923_v60 = vrot.slane %v9232_v53, 3 }
 0x300   : > { %v2731_v30 = vpop.f32.mrb[192].mxu0 }
 0x301   : > { %v8424_v52 = vadd.f32 %v2731_v30, %v2385_v40  ;;  %v5582_v6 = vpop.f32.mrb[193].mxu0  ;;  %5821 = vmatmul.mubr.bf16.gmra.mrb[40].mxu1 %v9262_v44  ;;  %v9263_v30 = vld [vmem:[#allocation87_spill] sm:$0xff] }
 0x302   : > { %v2734_v57 = vpop.f32.mrb[194].mxu0  ;;  %5824 = vmatprep.mubr.msk.bf16.mxu1 %vm6114_vm0, %v9054_v14 }
 0x303   : > { %v8429_v0 = vadd.f32 %v2734_v57, %v2386_v9  ;;  %v5583_v2 = vpop.f32.mrb[195].mxu0  ;;  %v3924_v57 = vsel %vm3917_vm12, %v3921_v46, %v3923_v60 }
 0x304   : > { %v2323_v11 = vpop.f32.mrb[192].mxu1 }
 0x305   : > { %v2387_v28 = vadd.f32 %v2323_v11, %v8154_v27  ;;  %v5486_v63 = vpop.f32.mrb[193].mxu1  ;;  %5921 = vmatmul.mubr.bf16.gmra.mrb[44].mxu0 %v3922_v16 }
 0x306   : > { %v2326_v25 = vpop.f32.mrb[194].mxu1  ;;  %5924 = vmatprep.mubr.msk.bf16.mxu0 %vm6114_vm0, %v9054_v14  ;;  %v3925_v63 = vrot.slane %v9235_v49, 3 }
 0x307   : > { %v2388_v48 = vadd.f32 %v2326_v25, %v8165_v23  ;;  %v5487_v40 = vpop.f32.mrb[195].mxu1 }
 0x308   : > { %v2739_v35 = vpop.f32.mrb[196].mxu0  ;;  %v9264_v40 = vld [vmem:[#allocation88_spill] sm:$0xff] }
 0x309   : > { %v8437_v9 = vadd.f32 %v2739_v35, %v2387_v28  ;;  %v5586_v62 = vpop.f32.mrb[197].mxu0  ;;  %5825 = vmatmul.mubr.bf16.gmra.mrb[44].mxu1 %v9263_v30  ;;  %v3926_v30 = vsel %vm3917_vm12, %v3923_v60, %v3925_v63 }
 0x30a   : > { %v2742_v29 = vpop.f32.mrb[198].mxu0  ;;  %5828 = vmatprep.mubr.msk.bf16.mxu1 %vm6114_vm0, %v9054_v14 }
 0x30b   : > { %v8442_v27 = vadd.f32 %v2742_v29, %v2388_v48  ;;  %v5587_v6 = vpop.f32.mrb[199].mxu0 }
 0x30c   : > { %v2331_v44 = vpop.f32.mrb[196].mxu1 }
 0x30d   : > { %v2389_v23 = vadd.f32 %v2331_v44, %v8182_v22  ;;  %v5490_v2 = vpop.f32.mrb[197].mxu1  ;;  %5925 = vmatmul.mubr.bf16.gmra.mrb[48].mxu0 %v3924_v57 }
 0x30e   : > { %v2334_v53 = vpop.f32.mrb[198].mxu1  ;;  %5928 = vmatprep.mubr.msk.bf16.mxu0 %vm6114_vm0, %v9054_v14 }
 0x30f   : > { %v2390_v11 = vadd.f32 %v2334_v53, %v8193_v10  ;;  %v5491_v16 = vpop.f32.mrb[199].mxu1 }
 0x310   : > { %v2747_v28 = vpop.f32.mrb[200].mxu0 }
 0x311   : > { %v8450_v25 = vadd.f32 %v2747_v28, %v2389_v23  ;;  %v5590_v48 = vpop.f32.mrb[201].mxu0  ;;  %5829 = vmatmul.mubr.bf16.gmra.mrb[48].mxu1 %v9264_v40  ;;  %v3927_v23 = vrot.slane %v9238_v18, 3 }
 0x312   : > { %v2750_v46 = vpop.f32.mrb[202].mxu0  ;;  %5832 = vmatprep.mubr.msk.bf16.mxu1 %vm6114_vm0, %v9054_v14 }
 0x313   : > { %v8455_v22 = vadd.f32 %v2750_v46, %v2390_v11  ;;  %v5591_v35 = vpop.f32.mrb[203].mxu0  ;;  %v9265_v11 = vld [vmem:[#allocation89_spill] sm:$0xff]  ;;  %v3928_v48 = vsel %vm3917_vm12, %v3925_v63, %v3927_v23 }
 0x314   : > { %v2339_v62 = vpop.f32.mrb[200].mxu1 }
 0x315   : > { %v2391_v10 = vadd.f32 %v2339_v62, %v8206_v12  ;;  %v5494_v29 = vpop.f32.mrb[201].mxu1  ;;  %5929 = vmatmul.mubr.bf16.gmra.mrb[52].mxu0 %v3926_v30  ;;  %v3929_v62 = vrot.slane %v9240_v1, 3 }
 0x316   : > { %v2342_v49 = vpop.f32.mrb[202].mxu1  ;;  %5932 = vmatprep.mubr.msk.bf16.mxu0 %vm6114_vm0, %v9054_v14  ;;  %v9266_v29 = vld [vmem:[#allocation90_spill] sm:$0xff] }
 0x317   : > { %v2392_v6 = vadd.f32 %v2342_v49, %v8210_v24  ;;  %v5495_v44 = vpop.f32.mrb[203].mxu1 }
 0x318   : > { %v2755_v57 = vpop.f32.mrb[204].mxu0 }
 0x319   : > { %v8463_v2 = vadd.f32 %v2755_v57, %v2391_v10  ;;  %v5594_v53 = vpop.f32.mrb[205].mxu0  ;;  %5833 = vmatmul.mubr.bf16.gmra.mrb[52].mxu1 %v9265_v11 }
 0x31a   : > { %v2758_v60 = vpop.f32.mrb[206].mxu0  ;;  %5836 = vmatprep.mubr.msk.bf16.mxu1 %vm6114_vm0, %v9054_v14 }
 0x31b   : > { %v8468_v12 = vadd.f32 %v2758_v60, %v2392_v6  ;;  %v5595_v16 = vpop.f32.mrb[207].mxu0  ;;  %v3930_v6 = vsel %vm3917_vm12, %v3927_v23, %v3929_v62 }
 0x31c   : > { %v2347_v28 = vpop.f32.mrb[204].mxu1  ;;  %v9267_v16 = vld [vmem:[#allocation67_spill] sm:$0xff] }
 0x31d   : > { %v2393_v24 = vadd.f32 %v2347_v28, %v8217_v51  ;;  %v5498_v40 = vpop.f32.mrb[205].mxu1  ;;  %5933 = vmatmul.mubr.bf16.gmra.mrb[56].mxu0 %v3928_v48  ;;  %v3931_v28 = vrot.slane %v9267_v16, 3 }
 0x31e   : > { %v2350_v18 = vpop.f32.mrb[206].mxu1  ;;  %5936 = vmatprep.mubr.msk.bf16.mxu0 %vm6114_vm0, %v9054_v14  ;;  %v9268_v40 = vld [vmem:[#allocation92_spill] sm:$0xff] }
 0x31f   : > { %v5499_v46 = vpop.f32.mrb[207].mxu1 }
 0x320   : > { %v2763_v35 = vpop.f32.mrb[208].mxu0 }
 0x321   : > { %v8475_v30 = vadd.f32 %v2763_v35, %v2393_v24  ;;  %v5598_v10 = vpop.f32.mrb[209].mxu0  ;;  %5837 = vmatmul.mubr.bf16.gmra.mrb[56].mxu1 %v9266_v29  ;;  %v3932_v35 = vsel %vm3917_vm12, %v3929_v62, %v3931_v28 }
 0x322   : > { %v2766_v49 = vpop.f32.mrb[210].mxu0  ;;  %5840 = vmatprep.mubr.msk.bf16.mxu1 %vm6114_vm0, %v9054_v14 }
 0x323   : > { %v5599_v51 = vpop.f32.mrb[211].mxu0 }
 0x324   : > { %v2972_v63 = vpop.f32.mrb[208].mxu1 }
 0x325   : > { %v3138_v44 = vadd.f32 %v2972_v63, %v8227_v58  ;;  %v5618_v57 = vpop.f32.mrb[209].mxu1  ;;  %5937 = vmatmul.mubr.bf16.gmra.mrb[60].mxu0 %v3930_v6  ;;  %v9269_v6 = vld [vmem:[#allocation70_spill] sm:$0xff] }
 0x326   : > { %v2975_v53 = vpop.f32.mrb[210].mxu1  ;;  %5940 = vmatprep.mubr.msk.bf16.mxu0 %vm6114_vm0, %v9054_v14 }
 0x327   : > { %v3139_v1 = vadd.f32 %v2975_v53, %v8231_v41  ;;  %v5619_v11 = vpop.f32.mrb[211].mxu1 }
 0x328   : > { %v3282_v60 = vpop.f32.mrb[212].mxu0 }
 0x329   : > { %v8486_v48 = vadd.f32 %v3282_v60, %v3138_v44  ;;  %v5718_v24 = vpop.f32.mrb[213].mxu0  ;;  %5841 = vmatmul.mubr.bf16.gmra.mrb[60].mxu1 %v9268_v40  ;;  %v3933_v44 = vrot.slane %v9269_v6, 3 }
 0x32a   : > { %v3285_v23 = vpop.f32.mrb[214].mxu0  ;;  %5844 = vmatprep.mubr.msk.bf16.mxu1 %vm6114_vm0, %v9054_v14 }
 0x32b   : > { %v8491_v58 = vadd.f32 %v3285_v23, %v3139_v1  ;;  %v5719_v18 = vpop.f32.mrb[215].mxu0  ;;  %v9270_v1 = vld [vmem:[#allocation93_spill] sm:$0xff]  ;;  %v3934_v16 = vsel %vm3917_vm12, %v3931_v28, %v3933_v44  ;;  %v9273_v28 = vld [vmem:[#allocation94_spill] sm:$0xff] }
 0x32c   : > { %v2980_v46 = vpop.f32.mrb[212].mxu1 }
 0x32d   : > { %v3140_v41 = vadd.f32 %v2980_v46, %v8239_v15  ;;  %v5622_v10 = vpop.f32.mrb[213].mxu1  ;;  %5941 = vmatmul.mubr.bf16.gmra.mrb[64].mxu0 %v3932_v35  ;;  %v9271_v46 = vld [vmem:[#allocation21_spill] sm:$0xff] }
 0x32e   : > { %v2983_v29 = vpop.f32.mrb[214].mxu1  ;;  %5944 = vmatprep.mubr.msk.bf16.mxu0 %vm6114_vm0, %v9054_v14  ;;  %v3547_v35 = vrot.slane %v9271_v46, 3 }
 0x32f   : > { %v3141_v49 = vadd.f32 %v2983_v29, %v8243_v55  ;;  %v5623_v51 = vpop.f32.mrb[215].mxu1 }
 0x330   : > { %v3290_v63 = vpop.f32.mrb[216].mxu0 }
 0x331   : > { %v8499_v57 = vadd.f32 %v3290_v63, %v3140_v41  ;;  %v5722_v53 = vpop.f32.mrb[217].mxu0  ;;  %5845 = vmatmul.mubr.bf16.gmra.mrb[64].mxu1 %v9270_v1  ;;  %v9272_v41 = vld [vmem:[#allocation29_spill] sm:$0xff]  ;;  %v9274_v63 = vld [vmem:[#allocation15_spill] sm:$0xff] }
 0x332   : > { %v3293_v62 = vpop.f32.mrb[218].mxu0  ;;  %5848 = vmatprep.mubr.msk.bf16.mxu1 %vm6114_vm0, %v9054_v14  ;;  %v3546_v10 = vrot.slane %v9272_v41, 2  ;;  %v3935_v6 = vrot.slane %v9274_v63, 3 }
 0x333   : > { %v8504_v15 = vadd.f32 %v3293_v62, %v3141_v49  ;;  %v5723_v11 = vpop.f32.mrb[219].mxu0 }
 0x334   : > { %v2988_v60 = vpop.f32.mrb[216].mxu1  ;;  %v3936_v62 = vsel %vm3917_vm12, %v3933_v44, %v3935_v6  ;;  %v3548_v11 = vor.u32 %v3547_v35, %v3546_v10  ;;  %v9278_v35 = vld [vmem:[#allocation18_spill] sm:$0xff] }
 0x335   : > { %v3142_v55 = vadd.f32 %v2988_v60, %v8250_v20  ;;  %v5626_v24 = vpop.f32.mrb[217].mxu1  ;;  %5945 = vmatmul.mubr.bf16.gmra.mrb[68].mxu0 %v3934_v16  ;;  %v3937_v10 = vrot.slane %v9278_v35, 3 }
 0x336   : > { %v2991_v40 = vpop.f32.mrb[218].mxu1  ;;  %5948 = vmatprep.mubr.msk.bf16.mxu0 %vm6114_vm0, %v9054_v14 }
 0x337   : > { %v3143_v23 = vadd.f32 %v2991_v40, %v8255_v50  ;;  %v5627_v18 = vpop.f32.mrb[219].mxu1 }
 0x338   : > { %v3298_v29 = vpop.f32.mrb[220].mxu0  ;;  %v9275_v18 = vld [vmem:[#allocation30_spill] sm:$0xff] }
 0x339   : > { %v8513_v49 = vadd.f32 %v3298_v29, %v3142_v55  ;;  %v5726_v51 = vpop.f32.mrb[221].mxu0  ;;  %5849 = vmatmul.mubr.bf16.gmra.mrb[68].mxu1 %v9273_v28  ;;  %v3551_v46 = vrot.slane %v9275_v18, 3 }
 0x33a   : > { %v3301_v20 = vpop.f32.mrb[222].mxu0  ;;  %5852 = vmatprep.mubr.msk.bf16.mxu1 %vm6114_vm0, %v9054_v14  ;;  %v9277_v51 = vld [vmem:[#allocation91_spill] sm:$0xff] }
 0x33b   : > { %v8519_v53 = vadd.f32 %v3301_v20, %v3143_v23  ;;  %v5727_v50 = vpop.f32.mrb[223].mxu0  ;;  %v9276_v23 = vld [vmem:[#allocation38_spill] sm:$0xff]  ;;  %v3549_v44 = vsel %vm3506_vm11, %v9277_v51, %v3548_v11 }
 0x33c   : > { %v2996_v1 = vpop.f32.mrb[220].mxu1  ;;  %v3550_v41 = vrot.slane %v9276_v23, 2 }
 0x33d   : > { %v3144_v60 = vadd.f32 %v2996_v1, %v8263_v37  ;;  %v5630_v16 = vpop.f32.mrb[221].mxu1  ;;  %5949 = vmatmul.mubr.bf16.gmra.mrb[72].mxu0 %v3936_v62  ;;  %v3938_v1 = vsel %vm3917_vm12, %v3935_v6, %v3937_v10 }
 0x33e   : > { %v2999_v55 = vpop.f32.mrb[222].mxu1  ;;  %5952 = vmatprep.mubr.msk.bf16.mxu0 %vm6114_vm0, %v9054_v14  ;;  %v3552_v62 = vor.u32 %v3551_v46, %v3550_v41 }
 0x33f   : > { %v3145_v24 = vadd.f32 %v2999_v55, %v8267_v54  ;;  %v5631_v40 = vpop.f32.mrb[223].mxu1 }
 0x340   : > { %v3306_v29 = vpop.f32.mrb[224].mxu0 }
 0x341   : > { %v8531_v37 = vadd.f32 %v3306_v29, %v3144_v60  ;;  %v5730_v28 = vpop.f32.mrb[225].mxu0  ;;  %5853 = vmatmul.mubr.bf16.gmra.mrb[72].mxu1 %v3549_v44  ;;  %v9279_v29 = vld [vmem:[#allocation26_spill] sm:$0xff] }
 0x342   : > { %v3309_v20 = vpop.f32.mrb[226].mxu0  ;;  %5856 = vmatprep.mubr.msk.bf16.mxu1 %vm6114_vm0, %v9054_v14  ;;  %v3939_v51 = vrot.slane %v9279_v29, 3 }
 0x343   : > { %v8535_v54 = vadd.f32 %v3309_v20, %v3145_v24  ;;  %v5731_v63 = vpop.f32.mrb[227].mxu0  ;;  %v3553_v24 = vsel %vm3506_vm11, %v3548_v11, %v3552_v62 }
 0x344   : > { %v3004_v50 = vpop.f32.mrb[224].mxu1 }
 0x345   : > { %v3146_v16 = vadd.f32 %v3004_v50, %v8275_v17  ;;  %v5634_v55 = vpop.f32.mrb[225].mxu1  ;;  %5953 = vmatmul.mubr.bf16.gmra.mrb[76].mxu0 %v3938_v1 }
 0x346   : > { %v3007_v40 = vpop.f32.mrb[226].mxu1  ;;  %5956 = vmatprep.mubr.msk.bf16.mxu0 %vm6114_vm0, %v9054_v14 }
 0x347   : > { %v3147_v60 = vadd.f32 %v3007_v40, %v8279_v43  ;;  %v5635_v18 = vpop.f32.mrb[227].mxu1  ;;  %v3940_v43 = vsel %vm3917_vm12, %v3937_v10, %v3939_v51  ;;  %v9281_v40 = vld [vmem:[#allocation35_spill] sm:$0xff] }
 0x348   : > { %v3314_v23 = vpop.f32.mrb[228].mxu0 }
 0x349   : > { %v8544_v44 = vadd.f32 %v3314_v23, %v3146_v16  ;;  %v5734_v6 = vpop.f32.mrb[229].mxu0  ;;  %5857 = vmatmul.mubr.bf16.gmra.mrb[76].mxu1 %v3553_v24  ;;  %v9280_v16 = vld [vmem:[#allocation95_spill] sm:$0xff] }
 0x34a   : > { %v3317_v46 = vpop.f32.mrb[230].mxu0  ;;  %5860 = vmatprep.mubr.msk.bf16.mxu1 %vm6114_vm0, %v9054_v14  ;;  %v3557_v55 = vsel %vm3506_vm11, %v3552_v62, %v9280_v16 }
 0x34b   : > { %v8548_v17 = vadd.f32 %v3317_v46, %v3147_v60  ;;  %v5735_v41 = vpop.f32.mrb[231].mxu0  ;;  %v3941_v60 = vrot.slane %v9281_v40, 3 }
 0x34c   : > { %v3012_v35 = vpop.f32.mrb[228].mxu1 }
 0x34d   : > { %v3148_v28 = vadd.f32 %v3012_v35, %v8287_v4  ;;  %v5638_v20 = vpop.f32.mrb[229].mxu1  ;;  %5957 = vmatmul.mubr.bf16.gmra.mrb[80].mxu0 %v3940_v43 }
 0x34e   : > { %v3015_v11 = vpop.f32.mrb[230].mxu1  ;;  %5960 = vmatprep.mubr.msk.bf16.mxu0 %vm6114_vm0, %v9054_v14 }
 0x34f   : > { %v3149_v63 = vadd.f32 %v3015_v11, %v8291_v61  ;;  %v5639_v50 = vpop.f32.mrb[231].mxu1  ;;  %v3942_v61 = vsel %vm3917_vm12, %v3939_v51, %v3941_v60 }
 0x350   : > { %v3322_v1 = vpop.f32.mrb[232].mxu0  ;;  %v9283_v50 = vld [vmem:[#allocation96_spill] sm:$0xff] }
 0x351   : > { %v8558_v18 = vadd.f32 %v3322_v1, %v3148_v28  ;;  %v5738_v10 = vpop.f32.mrb[233].mxu0  ;;  %5861 = vmatmul.mubr.bf16.gmra.mrb[80].mxu1 %v3557_v55  ;;  %v9282_v28 = vld [vmem:[#allocation42_spill] sm:$0xff] }
 0x352   : > { %v3325_v4 = vpop.f32.mrb[234].mxu0  ;;  %5864 = vmatprep.mubr.msk.bf16.mxu1 %vm6114_vm0, %v9054_v14  ;;  %v3943_v20 = vrot.slane %v9282_v28, 3 }
 0x353   : > { %v8562_v23 = vadd.f32 %v3325_v4, %v3149_v63  ;;  %v5739_v24 = vpop.f32.mrb[235].mxu0 }
 0x354   : > { %v3020_v29 = vpop.f32.mrb[232].mxu1  ;;  %v3944_v55 = vsel %vm3917_vm12, %v3941_v60, %v3943_v20 }
 0x355   : > { %v3150_v6 = vadd.f32 %v3020_v29, %v8299_v38  ;;  %v5642_v46 = vpop.f32.mrb[233].mxu1  ;;  %5961 = vmatmul.mubr.bf16.gmra.mrb[84].mxu0 %v3942_v61  ;;  %v9284_v61 = vld [vmem:[#allocation48_spill] sm:$0xff] }
 0x356   : > { %v3023_v62 = vpop.f32.mrb[234].mxu1  ;;  %5964 = vmatprep.mubr.msk.bf16.mxu0 %vm6114_vm0, %v9054_v14 }
 0x357   : > { %v3151_v41 = vadd.f32 %v3023_v62, %v8303_v19  ;;  %v5643_v35 = vpop.f32.mrb[235].mxu1 }
 0x358   : > { %v3330_v43 = vpop.f32.mrb[236].mxu0 }
 0x359   : > { %v8570_v11 = vadd.f32 %v3330_v43, %v3150_v6  ;;  %v5742_v63 = vpop.f32.mrb[237].mxu0  ;;  %5865 = vmatmul.mubr.bf16.gmra.mrb[84].mxu1 %v9283_v50  ;;  %v3945_v6 = vrot.slane %v9284_v61, 3 }
 0x35a   : > { %v3333_v51 = vpop.f32.mrb[238].mxu0  ;;  %5868 = vmatprep.mubr.msk.bf16.mxu1 %vm6114_vm0, %v9054_v14 }
 0x35b   : > { %v8575_v38 = vadd.f32 %v3333_v51, %v3151_v41  ;;  %v5743_v1 = vpop.f32.mrb[239].mxu0  ;;  %v9285_v41 = vld [vmem:[#allocation97_spill] sm:$0xff]  ;;  %v3946_v28 = vsel %vm3917_vm12, %v3943_v20, %v3945_v6 }
 0x35c   : > { %v3028_v16 = vpop.f32.mrb[236].mxu1 }
 0x35d   : > { %v3152_v19 = vadd.f32 %v3028_v16, %v8311_v8  ;;  %v5646_v40 = vpop.f32.mrb[237].mxu1  ;;  %5965 = vmatmul.mubr.bf16.gmra.mrb[88].mxu0 %v3944_v55  ;;  %v9286_v55 = vld [vmem:[#allocation54_spill] sm:$0xff] }
 0x35e   : > { %v3031_v10 = vpop.f32.mrb[238].mxu1  ;;  %5968 = vmatprep.mubr.msk.bf16.mxu0 %vm6114_vm0, %v9054_v14 }
 0x35f   : > { %v3153_v4 = vadd.f32 %v3031_v10, %v8315_v36  ;;  %v5647_v24 = vpop.f32.mrb[239].mxu1 }
 0x360   : > { %v3338_v29 = vpop.f32.mrb[240].mxu0 }
 0x361   : > { %v8583_v46 = vadd.f32 %v3338_v29, %v3152_v19  ;;  %v5746_v62 = vpop.f32.mrb[241].mxu0  ;;  %5869 = vmatmul.mubr.bf16.gmra.mrb[88].mxu1 %v9285_v41  ;;  %v3947_v19 = vrot.slane %v9286_v55, 3 }
 0x362   : > { %v3341_v60 = vpop.f32.mrb[242].mxu0  ;;  %5872 = vmatprep.mubr.msk.bf16.mxu1 %vm6114_vm0, %v9054_v14 }
 0x363   : > { %v8588_v8 = vadd.f32 %v3341_v60, %v3153_v4  ;;  %v5747_v35 = vpop.f32.mrb[243].mxu0  ;;  %v9287_v4 = vld [vmem:[#allocation99_spill] sm:$0xff]  ;;  %v3948_v61 = vsel %vm3917_vm12, %v3945_v6, %v3947_v19 }
 0x364   : > { %v3036_v43 = vpop.f32.mrb[240].mxu1 }
 0x365   : > { %v3154_v36 = vadd.f32 %v3036_v43, %v8323_v42  ;;  %v5650_v63 = vpop.f32.mrb[241].mxu1  ;;  %5969 = vmatmul.mubr.bf16.gmra.mrb[92].mxu0 %v3946_v28  ;;  %v9288_v28 = vld [vmem:[#allocation60_spill] sm:$0xff] }
 0x366   : > { %v3039_v50 = vpop.f32.mrb[242].mxu1  ;;  %5972 = vmatprep.mubr.msk.bf16.mxu0 %vm6114_vm0, %v9054_v14 }
 0x367   : > { %v3155_v51 = vadd.f32 %v3039_v50, %v8327_v31  ;;  %v5651_v1 = vpop.f32.mrb[243].mxu1 }
 0x368   : > { %v3346_v16 = vpop.f32.mrb[244].mxu0 }
 0x369   : > { %v8596_v40 = vadd.f32 %v3346_v16, %v3154_v36  ;;  %v5750_v10 = vpop.f32.mrb[245].mxu0  ;;  %5873 = vmatmul.mubr.bf16.gmra.mrb[92].mxu1 %v9287_v4  ;;  %v3949_v36 = vrot.slane %v9288_v28, 3 }
 0x36a   : > { %v3349_v20 = vpop.f32.mrb[246].mxu0  ;;  %5876 = vmatprep.mubr.msk.bf16.mxu1 %vm6114_vm0, %v9054_v14 }
 0x36b   : > { %v8601_v42 = vadd.f32 %v3349_v20, %v3155_v51  ;;  %v5751_v24 = vpop.f32.mrb[247].mxu0  ;;  %v9289_v51 = vld [vmem:[#allocation100_spill] sm:$0xff]  ;;  %v3950_v55 = vsel %vm3917_vm12, %v3947_v19, %v3949_v36 }
 0x36c   : > { %v3044_v29 = vpop.f32.mrb[244].mxu1 }
 0x36d   : > { %v3156_v31 = vadd.f32 %v3044_v29, %v8335_v34  ;;  %v5654_v62 = vpop.f32.mrb[245].mxu1  ;;  %5973 = vmatmul.mubr.bf16.gmra.mrb[96].mxu0 %v3948_v61  ;;  %v9290_v61 = vld [vmem:[#allocation66_spill] sm:$0xff] }
 0x36e   : > { %v3047_v41 = vpop.f32.mrb[246].mxu1  ;;  %5976 = vmatprep.mubr.msk.bf16.mxu0 %vm6114_vm0, %v9054_v14 }
 0x36f   : > { %v3157_v60 = vadd.f32 %v3047_v41, %v8339_v45  ;;  %v5655_v35 = vpop.f32.mrb[247].mxu1 }
 0x370   : > { %v3354_v43 = vpop.f32.mrb[248].mxu0 }
 0x371   : > { %v8609_v63 = vadd.f32 %v3354_v43, %v3156_v31  ;;  %v5754_v50 = vpop.f32.mrb[249].mxu0  ;;  %5877 = vmatmul.mubr.bf16.gmra.mrb[96].mxu1 %v9289_v51  ;;  %v3951_v31 = vrot.slane %v9290_v61, 3 }
 0x372   : > { %v3357_v6 = vpop.f32.mrb[250].mxu0  ;;  %5880 = vmatprep.mubr.msk.bf16.mxu1 %vm6114_vm0, %v9054_v14 }
 0x373   : > { %v8614_v34 = vadd.f32 %v3357_v6, %v3157_v60  ;;  %v5755_v1 = vpop.f32.mrb[251].mxu0  ;;  %v9291_v60 = vld [vmem:[#allocation101_spill] sm:$0xff]  ;;  %v3952_v28 = vsel %vm3917_vm12, %v3949_v36, %v3951_v31 }
 0x374   : > { %v3052_v16 = vpop.f32.mrb[248].mxu1 }
 0x375   : > { %v3158_v45 = vadd.f32 %v3052_v16, %v8347_v3  ;;  %v5658_v10 = vpop.f32.mrb[249].mxu1  ;;  %5977 = vmatmul.mubr.bf16.gmra.mrb[100].mxu0 %v3950_v55 }
 0x376   : > { %v3055_v4 = vpop.f32.mrb[250].mxu1  ;;  %5980 = vmatprep.mubr.msk.bf16.mxu0 %vm6114_vm0, %v9054_v14  ;;  %v9292_v10 = vld [vmem:[#allocation102_spill] sm:$0xff] }
 0x377   : > { %v3159_v20 = vadd.f32 %v3055_v4, %v8351_v21  ;;  %v5659_v24 = vpop.f32.mrb[251].mxu1 }
 0x378   : > { %v3362_v29 = vpop.f32.mrb[252].mxu0  ;;  %v9293_v24 = vrot.slane %v9252_v32, 3 }
 0x379   : > { %v8622_v62 = vadd.f32 %v3362_v29, %v3158_v45  ;;  %v5758_v41 = vpop.f32.mrb[253].mxu0  ;;  %5881 = vmatmul.mubr.bf16.gmra.mrb[100].mxu1 %v9291_v60 }
 0x37a   : > { %v3365_v19 = vpop.f32.mrb[254].mxu0  ;;  %5884 = vmatprep.mubr.msk.bf16.mxu1 %vm6114_vm0, %v9054_v14  ;;  %v3954_v29 = vsel %vm3917_vm12, %v3951_v31, %v9293_v24  ;;  %v9297_v24 = vld [vmem:[#allocation106_spill] sm:$0xff] }
 0x37b   : > { %v8627_v3 = vadd.f32 %v3365_v19, %v3159_v20  ;;  %v5759_v35 = vpop.f32.mrb[255].mxu0 }
 0x37c   : > { %v3060_v43 = vpop.f32.mrb[252].mxu1 }
 0x37d   : > { %v3160_v21 = vadd.f32 %v3060_v43, %v8358_v39  ;;  %v5662_v50 = vpop.f32.mrb[253].mxu1  ;;  %5981 = vmatmul.mubr.bf16.gmra.mrb[104].mxu0 %v3952_v28 }
 0x37e   : > { %v3063_v51 = vpop.f32.mrb[254].mxu1  ;;  %5984 = vmatprep.mubr.msk.bf16.mxu0 %vm6114_vm0, %v9054_v14 }
 0x37f   : > { %v3161_v6 = vadd.f32 %v3063_v51, %v8362_v47  ;;  %v5663_v1 = vpop.f32.mrb[255].mxu1 }
 0x380   : > { %v3370_v16 = vpop.f32.mrb[0].mxu0  ;;  %v9295_v1 = vld [vmem:[#allocation105_spill] sm:$0xff] }
 0x381   : > { %v8634_v55 = vadd.f32 %v3370_v16, %v3160_v21  ;;  %v5762_v45 = vpop.f32.mrb[1].mxu0  ;;  %5885 = vmatmul.mubr.bf16.gmra.mrb[104].mxu1 %v9292_v10  ;;  %v9294_v21 = vld [vmem:[#allocation103_spill] sm:$0xff]  ;;  %v9296_v16 = vld [vmem:[#allocation73_spill] sm:$0xff] }
 0x382   : > { %v3373_v4 = vpop.f32.mrb[2].mxu0  ;;  %5888 = vmatprep.mubr.msk.bf16.mxu1 %vm6114_vm0, %v9054_v14 }
 0x383   : > { %v8639_v39 = vadd.f32 %v3373_v4, %v3161_v6  ;;  %v5763_v36 = vpop.f32.mrb[3].mxu0 }
 0x384   : > { %v3068_v20 = vpop.f32.mrb[0].mxu1 }
 0x385   : > { %v3162_v47 = vadd.f32 %v3068_v20, %v8371_v59  ;;  %v5666_v61 = vpop.f32.mrb[1].mxu1  ;;  %5985 = vmatmul.mubr.bf16.gmra.mrb[108].mxu0 %v3954_v29 }
 0x386   : > { %v3071_v41 = vpop.f32.mrb[2].mxu1  ;;  %5988 = vmatprep.mubr.msk.bf16.mxu0 %vm6114_vm0, %v9054_v14 }
 0x387   : > { %v3163_v60 = vadd.f32 %v3071_v41, %v8375_v7  ;;  %v5667_v19 = vpop.f32.mrb[3].mxu1 }
 0x388   : > { %v3378_v35 = vpop.f32.mrb[4].mxu0  ;;  %v9298_v19 = vld [vmem:[#allocation107_spill] sm:$0xff] }
 0x389   : > { %v8648_v43 = vadd.f32 %v3378_v35, %v3162_v47  ;;  %v5766_v28 = vpop.f32.mrb[5].mxu0  ;;  %5889 = vmatmul.mubr.bf16.gmra.mrb[108].mxu1 %v9294_v21 }
 0x38a   : > { %v3381_v32 = vpop.f32.mrb[6].mxu0  ;;  %5892 = vmatprep.mubr.msk.bf16.mxu1 %vm6114_vm0, %v9054_v14 }
 0x38b   : > { %v8653_v59 = vadd.f32 %v3381_v32, %v3163_v60  ;;  %v5767_v31 = vpop.f32.mrb[7].mxu0 }
 0x38c   : > { %v3076_v50 = vpop.f32.mrb[4].mxu1 }
 0x38d   : > { %v3164_v51 = vadd.f32 %v3076_v50, %v8382_v26  ;;  %v5670_v6 = vpop.f32.mrb[5].mxu1  ;;  %5989 = vmatmul.mubr.bf16.gmra.mrb[112].mxu0 %v9295_v1 }
 0x38e   : > { %v3079_v7 = vpop.f32.mrb[6].mxu1  ;;  %5992 = vmatprep.mubr.msk.bf16.mxu0 %vm6114_vm0, %v9054_v14 }
 0x38f   : > { %v3165_v45 = vadd.f32 %v3079_v7, %v9296_v16  ;;  %v5671_v10 = vpop.f32.mrb[7].mxu1 }
 0x390   : > { %v3386_v4 = vpop.f32.mrb[8].mxu0  ;;  %v9300_v10 = vld [vmem:[#allocation98_spill] sm:$0xff] }
 0x391   : > { %v8660_v36 = vadd.f32 %v3386_v4, %v3164_v51  ;;  %v5770_v20 = vpop.f32.mrb[9].mxu0  ;;  %5893 = vmatmul.mubr.bf16.gmra.mrb[112].mxu1 %v9297_v24  ;;  %v9299_v51 = vld [vmem:[#allocation104_spill] sm:$0xff] }
 0x392   : > { %v3389_v29 = vpop.f32.mrb[10].mxu0  ;;  %5896 = vmatprep.mubr.msk.bf16.mxu1 %vm6114_vm0, %v9054_v14 }
 0x393   : > { %v8665_v26 = vadd.f32 %v3389_v29, %v3165_v45  ;;  %v5771_v47 = vpop.f32.mrb[11].mxu0 }
 0x394   : > { %v3084_v61 = vpop.f32.mrb[8].mxu1 }
 0x395   : > { %v3166_v41 = vadd.f32 %v3084_v61, %v8394_v5  ;;  %v5674_v60 = vpop.f32.mrb[9].mxu1  ;;  %5993 = vmatmul.mubr.bf16.gmra.mrb[116].mxu0 %v9298_v19 }
 0x396   : > { %v3087_v35 = vpop.f32.mrb[10].mxu1  ;;  %5996 = vmatprep.mubr.msk.bf16.mxu0 %vm6114_vm0, %v9054_v14 }
 0x397   : > { %v3167_v28 = vadd.f32 %v3087_v35, %v8401_v33  ;;  %v5675_v21 = vpop.f32.mrb[11].mxu1 }
 0x398   : > { %v3394_v32 = vpop.f32.mrb[12].mxu0 }
 0x399   : > { %v8672_v31 = vadd.f32 %v3394_v32, %v3166_v41  ;;  %v5774_v50 = vpop.f32.mrb[13].mxu0  ;;  %5897 = vmatmul.mubr.bf16.gmra.mrb[116].mxu1 %v9299_v51 }
 0x39a   : > { %v3397_v6 = vpop.f32.mrb[14].mxu0 }
 0x39b   : > { %v8675_v1 = vadd.f32 %v3397_v6, %v3167_v28  ;;  %v5775_v5 = vpop.f32.mrb[15].mxu0 }
 0x39c   : > { %v3092_v7 = vpop.f32.mrb[12].mxu1 }
 0x39d   : > { %v3168_v16 = vadd.f32 %v3092_v7, %v8411_v13  ;;  %v5678_v45 = vpop.f32.mrb[13].mxu1  ;;  %5997 = vmatmul.mubr.bf16.gmra.mrb[120].mxu0 %v9300_v10 }
 0x39e   : > { %v3095_v14 = vpop.f32.mrb[14].mxu1 }
 0x39f   : > { %v3169_v33 = vadd.f32 %v3095_v14, %v8416_v56  ;;  %v5679_v4 = vpop.f32.mrb[15].mxu1 }
 0x3a0   : > { %v3402_v20 = vpop.f32.mrb[16].mxu0 }
 0x3a1   : > { %v8680_v24 = vadd.f32 %v3402_v20, %v3168_v16  ;;  %v5778_v29 = vpop.f32.mrb[17].mxu0 }
 0x3a2   : > { %v3405_v47 = vpop.f32.mrb[18].mxu0 }
 0x3a3   : > { %v8682_v61 = vadd.f32 %v3405_v47, %v3169_v33  ;;  %v5779_v41 = vpop.f32.mrb[19].mxu0 }
 0x3a4   : > { %v3100_v60 = vpop.f32.mrb[16].mxu1 }
 0x3a5   : > { %v3170_v19 = vadd.f32 %v3100_v60, %v8424_v52  ;;  %v5682_v35 = vpop.f32.mrb[17].mxu1 }
 0x3a6   : > { %v3103_v13 = vpop.f32.mrb[18].mxu1 }
 0x3a7   : > { %v3171_v28 = vadd.f32 %v3103_v13, %v8429_v0  ;;  %v5683_v21 = vpop.f32.mrb[19].mxu1 }
 0x3a8   : > { %v3410_v32 = vpop.f32.mrb[20].mxu0 }
 0x3a9   : > { %v8686_v50 = vadd.f32 %v3410_v32, %v3170_v19  ;;  %v5782_v56 = vpop.f32.mrb[21].mxu0 }
 0x3aa   : > { %v3413_v51 = vpop.f32.mrb[22].mxu0 }
 0x3ab   : > { %v8688_v6 = vadd.f32 %v3413_v51, %v3171_v28  ;;  %v5783_v5 = vpop.f32.mrb[23].mxu0 }
 0x3ac   : > { %v3108_v7 = vpop.f32.mrb[20].mxu1 }
 0x3ad   : > { %v3172_v16 = vadd.f32 %v3108_v7, %v8437_v9  ;;  %v5686_v45 = vpop.f32.mrb[21].mxu1 }
 0x3ae   : > { %v3111_v10 = vpop.f32.mrb[22].mxu1 }
 0x3af   : > { %v3173_v52 = vadd.f32 %v3111_v10, %v8442_v27  ;;  %v5687_v14 = vpop.f32.mrb[23].mxu1 }
 0x3b0   : > { %v3418_v33 = vpop.f32.mrb[24].mxu0 }
 0x3b1   : > { %v8692_v4 = vadd.f32 %v3418_v33, %v3172_v16  ;;  %v5786_v0 = vpop.f32.mrb[25].mxu0 }
 0x3b2   : > { %v3421_v20 = vpop.f32.mrb[26].mxu0 }
 0x3b3   : > { %v8694_v29 = vadd.f32 %v3421_v20, %v3173_v52  ;;  %v5787_v47 = vpop.f32.mrb[27].mxu0 }
 0x3b4   : > { %v3116_v41 = vpop.f32.mrb[24].mxu1 }
 0x3b5   : > { %v3174_v60 = vadd.f32 %v3116_v41, %v8450_v25  ;;  %v5690_v19 = vpop.f32.mrb[25].mxu1 }
 0x3b6   : > { %v3119_v35 = vpop.f32.mrb[26].mxu1 }
 0x3b7   : > { %v3175_v9 = vadd.f32 %v3119_v35, %v8455_v22  ;;  %v5691_v13 = vpop.f32.mrb[27].mxu1 }
 0x3b8   : > { %v3426_v28 = vpop.f32.mrb[28].mxu0 }
 0x3b9   : > { %v8698_v21 = vadd.f32 %v3426_v28, %v3174_v60  ;;  %v5790_v27 = vpop.f32.mrb[29].mxu0 }
 0x3ba   : > { %v3429_v32 = vpop.f32.mrb[30].mxu0 }
 0x3bb   : > { %v8700_v56 = vadd.f32 %v3429_v32, %v3175_v9  ;;  %v5791_v51 = vpop.f32.mrb[31].mxu0 }
 0x3bc   : > { %v3124_v5 = vpop.f32.mrb[28].mxu1 }
 0x3bd   : > { %v3176_v7 = vadd.f32 %v3124_v5, %v8463_v2  ;;  %v5694_v16 = vpop.f32.mrb[29].mxu1 }
 0x3be   : > { %v3127_v45 = vpop.f32.mrb[30].mxu1 }
 0x3bf   : > { %v3177_v25 = vadd.f32 %v3127_v45, %v8468_v12  ;;  %v5695_v10 = vpop.f32.mrb[31].mxu1 }
 0x3c0   : > { %v3434_v52 = vpop.f32.mrb[32].mxu0 }
 0x3c1   : > { %v8704_v14 = vadd.f32 %v3434_v52, %v3176_v7  ;;  %v5794_v22 = vpop.f32.mrb[33].mxu0 }
 0x3c2   : > { %v3437_v33 = vpop.f32.mrb[34].mxu0 }
 0x3c3   : > { %v8706_v0 = vadd.f32 %v3437_v33, %v3177_v25  ;;  %v5795_v20 = vpop.f32.mrb[35].mxu0 }
 0x3c4   : > { %v3132_v47 = vpop.f32.mrb[32].mxu1  ;;  %v9301_v20 = vld [vmem:[#allocation3_spill] sm:$0xff] }
 0x3c5   : > { %v3178_v41 = vadd.f32 %v3132_v47, %v8475_v30  ;;  %v5698_v60 = vpop.f32.mrb[33].mxu1  ;;  %v8716_v30 = vld [vmem:[%s8901_s4] ss:$0 sm:$0xff] }
 0x3c6   : > { %v3135_v19 = vpop.f32.mrb[34].mxu1 }
 0x3c7   : > { %v5699_v35 = vpop.f32.mrb[35].mxu1 }
 0x3c8   : > { %v3442_v2 = vpop.f32.mrb[36].mxu0 }
 0x3c9   : > { %v8709_v9 = vadd.f32 %v3442_v2, %v3178_v41  ;;  %v5798_v12 = vpop.f32.mrb[37].mxu0  ;;  %v9302_v2 = vld [vmem:[#allocation5_spill] sm:$0xff] }
 0x3ca   : > { %v3445_v13 = vpop.f32.mrb[38].mxu0 }
 0x3cb   : > { %v5799_v28 = vpop.f32.mrb[39].mxu0 }
 0x3cc   : > { %v3693_v27 = vpop.f32.mrb[36].mxu1 }
 0x3cd   : > { %v3859_v32 = vadd.f32 %v3693_v27, %v8486_v48  ;;  %v5818_v51 = vpop.f32.mrb[37].mxu1 }
 0x3ce   : > { %v3696_v5 = vpop.f32.mrb[38].mxu1 }
 0x3cf   : > { %v3860_v7 = vadd.f32 %v3696_v5, %v8491_v58  ;;  %v5819_v16 = vpop.f32.mrb[39].mxu1 }
 0x3d0   : > { %v4062_v45 = vpop.f32.mrb[40].mxu0 }
 0x3d1   : > { %v4228_v25 = vadd.f32 %v4062_v45, %v3859_v32  ;;  %v5918_v10 = vpop.f32.mrb[41].mxu0 }
 0x3d2   : > { %v4065_v48 = vpop.f32.mrb[42].mxu0 }
 0x3d3   : > { %v4276_v58 = vadd.f32 %v8716_v30, %v4228_v25  ;;  %v4229_v52 = vadd.f32 %v4065_v48, %v3860_v7  ;;  %v5919_v22 = vpop.f32.mrb[43].mxu0 }
 0x3d4   : > { %v3701_v33 = vpop.f32.mrb[40].mxu1  ;;  %v9303_v22 = vld [vmem:[#allocation12_spill] sm:$0xff] }
 0x3d5   : > { %v4317_v47 = vmul.f32 %v4276_v58, %v9301_v20  ;;  %4494 = vst [vmem:[%s8723_s22] sm:$0xff] %v4276_v58  ;;  %v4277_v41 = vadd.f32 %v8716_v30, %v4229_v52  ;;  %v3861_v60 = vadd.f32 %v3701_v33, %v8499_v57  ;;  %v5822_v19 = vpop.f32.mrb[41].mxu1 }
 0x3d6   : > { %v3704_v35 = vpop.f32.mrb[42].mxu1  ;;  %v9304_v19 = vld [vmem:[#allocation11_spill] sm:$0xff] }
 0x3d7   : > { %v4318_v12 = vmul.f32 %v4277_v41, %v9302_v2  ;;  %4495 = vst [vmem:[%s8723_s22 + $0x8] sm:$0xff] %v4277_v41  ;;  %v3862_v13 = vadd.f32 %v3704_v35, %v8504_v15  ;;  %v5823_v28 = vpop.f32.mrb[43].mxu1  ;;  %v4406_v32 = vmul.f32 %v4317_v47, %v4276_v58 }
 0x3d8   : > { %v4070_v27 = vpop.f32.mrb[44].mxu0 }
 0x3d9   : > { %v4358_v51 = vadd.f32 %v4318_v12, %v4317_v47  ;;  %v4407_v5 = vmul.f32 %v4318_v12, %v4277_v41  ;;  %v4230_v7 = vadd.f32 %v4070_v27, %v3861_v60  ;;  %v5922_v16 = vpop.f32.mrb[45].mxu0 }
 0x3da   : > { %v4073_v45 = vpop.f32.mrb[46].mxu0 }
 0x3db   : > { %v4447_v25 = vadd.f32 %v4407_v5, %v4406_v32  ;;  %v4278_v57 = vadd.f32 %v8716_v30, %v4230_v7  ;;  %v4231_v10 = vadd.f32 %v4073_v45, %v3862_v13  ;;  %v5923_v48 = vpop.f32.mrb[47].mxu0 }
 0x3dc   : > { %v3709_v52 = vpop.f32.mrb[44].mxu1  ;;  %v9305_v48 = vld [vmem:[#allocation20_spill] sm:$0xff] }
 0x3dd   : > { %v4319_v33 = vmul.f32 %v4278_v57, %v9303_v22  ;;  %4496 = vst [vmem:[%s8723_s22 + $0x10] sm:$0xff] %v4278_v57  ;;  %v4279_v15 = vadd.f32 %v8716_v30, %v4231_v10  ;;  %v3863_v20 = vadd.f32 %v3709_v52, %v8513_v49  ;;  %v5826_v58 = vpop.f32.mrb[45].mxu1 }
 0x3de   : > { %v3712_v47 = vpop.f32.mrb[46].mxu1  ;;  %v9306_v58 = vld [vmem:[#allocation19_spill] sm:$0xff] }
 0x3df   : > { %v4359_v41 = vadd.f32 %v4358_v51, %v4319_v33  ;;  %v4408_v60 = vmul.f32 %v4319_v33, %v4278_v57  ;;  %v4320_v35 = vmul.f32 %v4279_v15, %v9304_v19  ;;  %4497 = vst [vmem:[%s8723_s22 + $0x18] sm:$0xff] %v4279_v15  ;;  %v3864_v2 = vadd.f32 %v3712_v47, %v8519_v53  ;;  %v5827_v12 = vpop.f32.mrb[47].mxu1 }
 0x3e0   : > { %v4078_v13 = vpop.f32.mrb[48].mxu0 }
 0x3e1   : > { %v4448_v28 = vadd.f32 %v4447_v25, %v4408_v60  ;;  %v4360_v27 = vadd.f32 %v4359_v41, %v4320_v35  ;;  %v4409_v32 = vmul.f32 %v4320_v35, %v4279_v15  ;;  %v4232_v5 = vadd.f32 %v4078_v13, %v3863_v20  ;;  %v5926_v7 = vpop.f32.mrb[49].mxu0 }
 0x3e2   : > { %v4081_v16 = vpop.f32.mrb[50].mxu0 }
 0x3e3   : > { %v4449_v49 = vadd.f32 %v4448_v28, %v4409_v32  ;;  %v4280_v45 = vadd.f32 %v8716_v30, %v4232_v5  ;;  %v4233_v51 = vadd.f32 %v4081_v16, %v3864_v2  ;;  %v5927_v57 = vpop.f32.mrb[51].mxu0 }
 0x3e4   : > { %v3717_v10 = vpop.f32.mrb[48].mxu1 }
 0x3e5   : > { %v4321_v52 = vmul.f32 %v4280_v45, %v9305_v48  ;;  %4498 = vst [vmem:[%s8723_s22 + $0x20] sm:$0xff] %v4280_v45  ;;  %v4281_v53 = vadd.f32 %v8716_v30, %v4233_v51  ;;  %v3865_v22 = vadd.f32 %v3717_v10, %v8531_v37  ;;  %v5830_v25 = vpop.f32.mrb[49].mxu1 }
 0x3e6   : > { %v3720_v33 = vpop.f32.mrb[50].mxu1 }
 0x3e7   : > { %v4361_v15 = vadd.f32 %v4360_v27, %v4321_v52  ;;  %v4410_v20 = vmul.f32 %v4321_v52, %v4280_v45  ;;  %v4322_v47 = vmul.f32 %v4281_v53, %v9306_v58  ;;  %4499 = vst [vmem:[%s8723_s22 + $0x28] sm:$0xff] %v4281_v53  ;;  %v3866_v41 = vadd.f32 %v3720_v33, %v8535_v54  ;;  %v5831_v60 = vpop.f32.mrb[51].mxu1  ;;  %v9307_v45 = vld [vmem:[#allocation28_spill] sm:$0xff] }
 0x3e8   : > { %v4086_v19 = vpop.f32.mrb[52].mxu0 }
 0x3e9   : > { %v4450_v35 = vadd.f32 %v4449_v49, %v4410_v20  ;;  %v4362_v2 = vadd.f32 %v4361_v15, %v4322_v47  ;;  %v4411_v12 = vmul.f32 %v4322_v47, %v4281_v53  ;;  %v4234_v13 = vadd.f32 %v4086_v19, %v3865_v22  ;;  %v5930_v28 = vpop.f32.mrb[53].mxu0  ;;  %v9308_v53 = vld [vmem:[#allocation27_spill] sm:$0xff] }
 0x3ea   : > { %v4089_v32 = vpop.f32.mrb[54].mxu0  ;;  %v9309_v28 = vld [vmem:[#allocation37_spill] sm:$0xff] }
 0x3eb   : > { %v4451_v37 = vadd.f32 %v4450_v35, %v4411_v12  ;;  %v4282_v5 = vadd.f32 %v8716_v30, %v4234_v13  ;;  %v4235_v27 = vadd.f32 %v4089_v32, %v3866_v41  ;;  %v5931_v7 = vpop.f32.mrb[55].mxu0 }
 0x3ec   : > { %v3725_v16 = vpop.f32.mrb[52].mxu1 }
 0x3ed   : > { %v4323_v51 = vmul.f32 %v4282_v5, %v9307_v45  ;;  %4500 = vst [vmem:[%s8723_s22 + $0x30] sm:$0xff] %v4282_v5  ;;  %v4283_v54 = vadd.f32 %v8716_v30, %v4235_v27  ;;  %v3867_v57 = vadd.f32 %v3725_v16, %v8544_v44  ;;  %v5834_v49 = vpop.f32.mrb[53].mxu1  ;;  %v9310_v45 = vld [vmem:[#allocation36_spill] sm:$0xff] }
 0x3ee   : > { %v3728_v10 = vpop.f32.mrb[54].mxu1 }
 0x3ef   : > { %v4363_v48 = vadd.f32 %v4362_v2, %v4323_v51  ;;  %v4412_v52 = vmul.f32 %v4323_v51, %v4282_v5  ;;  %v4324_v22 = vmul.f32 %v4283_v54, %v9308_v53  ;;  %4501 = vst [vmem:[%s8723_s22 + $0x38] sm:$0xff] %v4283_v54  ;;  %v3868_v25 = vadd.f32 %v3728_v10, %v8548_v17  ;;  %v5835_v33 = vpop.f32.mrb[55].mxu1 }
 0x3f0   : > { %v4094_v15 = vpop.f32.mrb[56].mxu0 }
 0x3f1   : > { %v4452_v20 = vadd.f32 %v4451_v37, %v4412_v52  ;;  %v4364_v58 = vadd.f32 %v4363_v48, %v4324_v22  ;;  %v4413_v47 = vmul.f32 %v4324_v22, %v4283_v54  ;;  %v4236_v41 = vadd.f32 %v4094_v15, %v3867_v57  ;;  %v5934_v60 = vpop.f32.mrb[57].mxu0 }
 0x3f2   : > { %v4097_v19 = vpop.f32.mrb[58].mxu0 }
 0x3f3   : > { %v4453_v44 = vadd.f32 %v4452_v20, %v4413_v47  ;;  %v4284_v35 = vadd.f32 %v8716_v30, %v4236_v41  ;;  %v4237_v2 = vadd.f32 %v4097_v19, %v3868_v25  ;;  %v5935_v12 = vpop.f32.mrb[59].mxu0  ;;  %v9311_v47 = vld [vmem:[#allocation44_spill] sm:$0xff] }
 0x3f4   : > { %v3733_v13 = vpop.f32.mrb[56].mxu1  ;;  %v9312_v12 = vld [vmem:[#allocation43_spill] sm:$0xff] }
 0x3f5   : > { %v4325_v32 = vmul.f32 %v4284_v35, %v9309_v28  ;;  %4502 = vst [vmem:[%s8723_s22 + $0x40] sm:$0xff] %v4284_v35  ;;  %v4285_v17 = vadd.f32 %v8716_v30, %v4237_v2  ;;  %v3869_v5 = vadd.f32 %v3733_v13, %v8558_v18  ;;  %v5838_v37 = vpop.f32.mrb[57].mxu1 }
 0x3f6   : > { %v3736_v27 = vpop.f32.mrb[58].mxu1 }
 0x3f7   : > { %v4365_v7 = vadd.f32 %v4364_v58, %v4325_v32  ;;  %v4414_v16 = vmul.f32 %v4325_v32, %v4284_v35  ;;  %v4326_v51 = vmul.f32 %v4285_v17, %v9310_v45  ;;  %4503 = vst [vmem:[%s8723_s22 + $0x48] sm:$0xff] %v4285_v17  ;;  %v3870_v54 = vadd.f32 %v3736_v27, %v8562_v23  ;;  %v5839_v57 = vpop.f32.mrb[59].mxu1 }
 0x3f8   : > { %v4102_v49 = vpop.f32.mrb[60].mxu0 }
 0x3f9   : > { %v4454_v10 = vadd.f32 %v4453_v44, %v4414_v16  ;;  %v4366_v48 = vadd.f32 %v4365_v7, %v4326_v51  ;;  %v4415_v52 = vmul.f32 %v4326_v51, %v4285_v17  ;;  %v4238_v53 = vadd.f32 %v4102_v49, %v3869_v5  ;;  %v5938_v22 = vpop.f32.mrb[61].mxu0 }
 0x3fa   : > { %v4105_v25 = vpop.f32.mrb[62].mxu0 }
 0x3fb   : > { %v4455_v18 = vadd.f32 %v4454_v10, %v4415_v52  ;;  %v4286_v33 = vadd.f32 %v8716_v30, %v4238_v53  ;;  %v4239_v15 = vadd.f32 %v4105_v25, %v3870_v54  ;;  %v5939_v20 = vpop.f32.mrb[63].mxu0  ;;  %v9313_v10 = vld [vmem:[#allocation50_spill] sm:$0xff] }
 0x3fc   : > { %v3741_v58 = vpop.f32.mrb[60].mxu1 }
 0x3fd   : > { %v4327_v41 = vmul.f32 %v4286_v33, %v9311_v47  ;;  %4504 = vst [vmem:[%s8723_s22 + $0x50] sm:$0xff] %v4286_v33  ;;  %v4287_v23 = vadd.f32 %v8716_v30, %v4239_v15  ;;  %v3871_v60 = vadd.f32 %v3741_v58, %v8570_v11  ;;  %v5842_v19 = vpop.f32.mrb[61].mxu1 }
 0x3fe   : > { %v3744_v44 = vpop.f32.mrb[62].mxu1 }
 0x3ff   : > { %v4367_v35 = vadd.f32 %v4366_v48, %v4327_v41  ;;  %v4416_v2 = vmul.f32 %v4327_v41, %v4286_v33  ;;  %v4328_v13 = vmul.f32 %v4287_v23, %v9312_v12  ;;  %4505 = vst [vmem:[%s8723_s22 + $0x58] sm:$0xff] %v4287_v23  ;;  %v3872_v28 = vadd.f32 %v3744_v44, %v8575_v38  ;;  %v5843_v32 = vpop.f32.mrb[63].mxu1  ;;  %v9314_v33 = vld [vmem:[#allocation49_spill] sm:$0xff] }
 0x400   : > { %v4110_v17 = vpop.f32.mrb[64].mxu0  ;;  %v9315_v32 = vld [vmem:[#allocation56_spill] sm:$0xff] }
 0x401   : > { %v4456_v5 = vadd.f32 %v4455_v18, %v4416_v2  ;;  %v4368_v37 = vadd.f32 %v4367_v35, %v4328_v13  ;;  %v4417_v27 = vmul.f32 %v4328_v13, %v4287_v23  ;;  %v4240_v7 = vadd.f32 %v4110_v17, %v3871_v60  ;;  %v5942_v16 = vpop.f32.mrb[65].mxu0 }
 0x402   : > { %v4113_v45 = vpop.f32.mrb[66].mxu0 }
 0x403   : > { %v4457_v11 = vadd.f32 %v4456_v5, %v4417_v27  ;;  %v4288_v51 = vadd.f32 %v8716_v30, %v4240_v7  ;;  %v4241_v54 = vadd.f32 %v4113_v45, %v3872_v28  ;;  %v5943_v57 = vpop.f32.mrb[67].mxu0  ;;  %v9316_v45 = vld [vmem:[#allocation55_spill] sm:$0xff] }
 0x404   : > { %v3749_v49 = vpop.f32.mrb[64].mxu1 }
 0x405   : > { %v4329_v48 = vmul.f32 %v4288_v51, %v9313_v10  ;;  %4506 = vst [vmem:[%s8723_s22 + $0x60] sm:$0xff] %v4288_v51  ;;  %v4289_v38 = vadd.f32 %v8716_v30, %v4241_v54  ;;  %v3873_v52 = vadd.f32 %v3749_v49, %v8583_v46  ;;  %v5846_v53 = vpop.f32.mrb[65].mxu1 }
 0x406   : > { %v3752_v22 = vpop.f32.mrb[66].mxu1 }
 0x407   : > { %v4369_v25 = vadd.f32 %v4368_v37, %v4329_v48  ;;  %v4418_v18 = vmul.f32 %v4329_v48, %v4288_v51  ;;  %v4330_v15 = vmul.f32 %v4289_v38, %v9314_v33  ;;  %4507 = vst [vmem:[%s8723_s22 + $0x68] sm:$0xff] %v4289_v38  ;;  %v3874_v20 = vadd.f32 %v3752_v22, %v8588_v8  ;;  %v5847_v58 = vpop.f32.mrb[67].mxu1 }
 0x408   : > { %v4118_v47 = vpop.f32.mrb[68].mxu0 }
 0x409   : > { %v4458_v41 = vadd.f32 %v4457_v11, %v4418_v18  ;;  %v4370_v23 = vadd.f32 %v4369_v25, %v4330_v15  ;;  %v4419_v60 = vmul.f32 %v4330_v15, %v4289_v38  ;;  %v4242_v19 = vadd.f32 %v4118_v47, %v3873_v52  ;;  %v5946_v44 = vpop.f32.mrb[69].mxu0  ;;  %v9317_v15 = vld [vmem:[#allocation62_spill] sm:$0xff] }
 0x40a   : > { %v4121_v35 = vpop.f32.mrb[70].mxu0 }
 0x40b   : > { %v4459_v46 = vadd.f32 %v4458_v41, %v4419_v60  ;;  %v4290_v2 = vadd.f32 %v8716_v30, %v4242_v19  ;;  %v4243_v12 = vadd.f32 %v4121_v35, %v3874_v20  ;;  %v5947_v13 = vpop.f32.mrb[71].mxu0  ;;  %v9318_v19 = vld [vmem:[#allocation61_spill] sm:$0xff] }
 0x40c   : > { %v3757_v28 = vpop.f32.mrb[68].mxu1 }
 0x40d   : > { %v4331_v17 = vmul.f32 %v4290_v2, %v9315_v32  ;;  %4508 = vst [vmem:[%s8723_s22 + $0x70] sm:$0xff] %v4290_v2  ;;  %v4291_v8 = vadd.f32 %v8716_v30, %v4243_v12  ;;  %v3875_v5 = vadd.f32 %v3757_v28, %v8596_v40  ;;  %v5850_v37 = vpop.f32.mrb[69].mxu1 }
 0x40e   : > { %v3760_v27 = vpop.f32.mrb[70].mxu1 }
 0x40f   : > { %v4371_v7 = vadd.f32 %v4370_v23, %v4331_v17  ;;  %v4420_v16 = vmul.f32 %v4331_v17, %v4290_v2  ;;  %v4332_v11 = vmul.f32 %v4291_v8, %v9316_v45  ;;  %4509 = vst [vmem:[%s8723_s22 + $0x78] sm:$0xff] %v4291_v8  ;;  %v3876_v51 = vadd.f32 %v3760_v27, %v8601_v42  ;;  %v5851_v54 = vpop.f32.mrb[71].mxu1 }
 0x410   : > { %v4126_v57 = vpop.f32.mrb[72].mxu0 }
 0x411   : > { %v4460_v49 = vadd.f32 %v4459_v46, %v4420_v16  ;;  %v4372_v10 = vadd.f32 %v4371_v7, %v4332_v11  ;;  %v4421_v48 = vmul.f32 %v4332_v11, %v4291_v8  ;;  %v4244_v38 = vadd.f32 %v4126_v57, %v3875_v5  ;;  %v5950_v52 = vpop.f32.mrb[73].mxu0  ;;  %v9319_v16 = vld [vmem:[#allocation2_spill] sm:$0xff] }
 0x412   : > { %v4129_v53 = vpop.f32.mrb[74].mxu0 }
 0x413   : > { %v4461_v40 = vadd.f32 %v4460_v49, %v4421_v48  ;;  %v4292_v22 = vadd.f32 %v8716_v30, %v4244_v38  ;;  %v4245_v25 = vadd.f32 %v4129_v53, %v3876_v51  ;;  %v5951_v18 = vpop.f32.mrb[75].mxu0 }
 0x414   : > { %v3765_v33 = vpop.f32.mrb[72].mxu1 }
 0x415   : > { %v4333_v20 = vmul.f32 %v4292_v22, %v9317_v15  ;;  %4510 = vst [vmem:[%s8723_s22 + $0x80] sm:$0xff] %v4292_v22  ;;  %v4293_v42 = vadd.f32 %v8716_v30, %v4245_v25  ;;  %v3877_v58 = vadd.f32 %v3765_v33, %v8609_v63  ;;  %v5854_v47 = vpop.f32.mrb[73].mxu1 }
 0x416   : > { %v3768_v41 = vpop.f32.mrb[74].mxu1 }
 0x417   : > { %v4373_v23 = vadd.f32 %v4372_v10, %v4333_v20  ;;  %v4422_v60 = vmul.f32 %v4333_v20, %v4292_v22  ;;  %v4334_v44 = vmul.f32 %v4293_v42, %v9318_v19  ;;  %4511 = vst [vmem:[%s8723_s22 + $0x88] sm:$0xff] %v4293_v42  ;;  %v3878_v35 = vadd.f32 %v3768_v41, %v8614_v34  ;;  %v5855_v46 = vpop.f32.mrb[75].mxu1  ;;  %v9320_v10 = vld [vmem:[#allocation4_spill] sm:$0xff]  ;;  %v9321_v41 = vld [vmem:[#allocation7_spill] sm:$0xff] }
 0x418   : > { %v4134_v2 = vpop.f32.mrb[76].mxu0 }
 0x419   : > { %v4462_v12 = vadd.f32 %v4461_v40, %v4422_v60  ;;  %v4374_v13 = vadd.f32 %v4373_v23, %v4334_v44  ;;  %v4423_v28 = vmul.f32 %v4334_v44, %v4293_v42  ;;  %v4246_v32 = vadd.f32 %v4134_v2, %v3877_v58  ;;  %v5954_v17 = vpop.f32.mrb[77].mxu0  ;;  %v9322_v2 = vld [vmem:[#allocation6_spill] sm:$0xff] }
 0x41a   : > { %v4137_v8 = vpop.f32.mrb[78].mxu0 }
 0x41b   : > { %v4463_v63 = vadd.f32 %v4462_v12, %v4423_v28  ;;  %v4294_v5 = vadd.f32 %v8716_v30, %v4246_v32  ;;  %v4247_v37 = vadd.f32 %v4137_v8, %v3878_v35  ;;  %v5955_v27 = vpop.f32.mrb[79].mxu0 }
 0x41c   : > { %v3773_v7 = vpop.f32.mrb[76].mxu1 }
 0x41d   : > { %v4335_v45 = vmul.f32 %v4294_v5, %v9319_v16  ;;  %4512 = vst [vmem:[%s8723_s22 + $0x90] sm:$0xff] %v4294_v5  ;;  %v4295_v34 = vadd.f32 %v8716_v30, %v4247_v37  ;;  %v3879_v11 = vadd.f32 %v3773_v7, %v8622_v62  ;;  %v5858_v51 = vpop.f32.mrb[77].mxu1 }
 0x41e   : > { %v3776_v54 = vpop.f32.mrb[78].mxu1 }
 0x41f   : > { %v4375_v57 = vadd.f32 %v4374_v13, %v4335_v45  ;;  %v4424_v49 = vmul.f32 %v4335_v45, %v4294_v5  ;;  %v4336_v48 = vmul.f32 %v4295_v34, %v9320_v10  ;;  %4513 = vst [vmem:[%s8723_s22 + $0x98] sm:$0xff] %v4295_v34  ;;  %v3880_v38 = vadd.f32 %v3776_v54, %v8627_v3  ;;  %v5859_v52 = vpop.f32.mrb[79].mxu1 }
 0x420   : > { %v4142_v53 = vpop.f32.mrb[80].mxu0 }
 0x421   : > { %v4464_v40 = vadd.f32 %v4463_v63, %v4424_v49  ;;  %v4376_v22 = vadd.f32 %v4375_v57, %v4336_v48  ;;  %v4425_v25 = vmul.f32 %v4336_v48, %v4295_v34  ;;  %v4248_v18 = vadd.f32 %v4142_v53, %v3879_v11  ;;  %v5958_v33 = vpop.f32.mrb[81].mxu0  ;;  %v9323_v11 = vld [vmem:[#allocation9_spill] sm:$0xff] }
 0x422   : > { %v4145_v15 = vpop.f32.mrb[82].mxu0 }
 0x423   : > { %v4465_v62 = vadd.f32 %v4464_v40, %v4425_v25  ;;  %v4296_v20 = vadd.f32 %v8716_v30, %v4248_v18  ;;  %v4249_v42 = vadd.f32 %v4145_v15, %v3880_v38  ;;  %v5959_v58 = vpop.f32.mrb[83].mxu0  ;;  %v9324_v38 = vld [vmem:[#allocation8_spill] sm:$0xff] }
 0x424   : > { %v3781_v47 = vpop.f32.mrb[80].mxu1 }
 0x425   : > { %v4337_v23 = vmul.f32 %v4296_v20, %v9321_v41  ;;  %4514 = vst [vmem:[%s8723_s22 + $0xa0] sm:$0xff] %v4296_v20  ;;  %v4297_v3 = vadd.f32 %v8716_v30, %v4249_v42  ;;  %v3881_v60 = vadd.f32 %v3781_v47, %v8634_v55  ;;  %v5862_v19 = vpop.f32.mrb[81].mxu1 }
 0x426   : > { %v3784_v44 = vpop.f32.mrb[82].mxu1 }
 0x427   : > { %v4377_v35 = vadd.f32 %v4376_v22, %v4337_v23  ;;  %v4426_v46 = vmul.f32 %v4337_v23, %v4296_v20  ;;  %v4338_v12 = vmul.f32 %v4297_v3, %v9322_v2  ;;  %4515 = vst [vmem:[%s8723_s22 + $0xa8] sm:$0xff] %v4297_v3  ;;  %v3882_v13 = vadd.f32 %v3784_v44, %v8639_v39  ;;  %v5863_v28 = vpop.f32.mrb[83].mxu1  ;;  %v9325_v23 = vld [vmem:[#allocation17_spill] sm:$0xff]  ;;  %v9326_v2 = vld [vmem:[#allocation16_spill] sm:$0xff] }
 0x428   : > { %v4150_v32 = vpop.f32.mrb[84].mxu0 }
 0x429   : > { %v4466_v17 = vadd.f32 %v4465_v62, %v4426_v46  ;;  %v4378_v8 = vadd.f32 %v4377_v35, %v4338_v12  ;;  %v4427_v63 = vmul.f32 %v4338_v12, %v4297_v3  ;;  %v4250_v5 = vadd.f32 %v4150_v32, %v3881_v60  ;;  %v5962_v37 = vpop.f32.mrb[85].mxu0 }
 0x42a   : > { %v4153_v27 = vpop.f32.mrb[86].mxu0 }
 0x42b   : > { %v4467_v55 = vadd.f32 %v4466_v17, %v4427_v63  ;;  %v4298_v7 = vadd.f32 %v8716_v30, %v4250_v5  ;;  %v4251_v16 = vadd.f32 %v4153_v27, %v3882_v13  ;;  %v5963_v45 = vpop.f32.mrb[87].mxu0 }
 0x42c   : > { %v3789_v34 = vpop.f32.mrb[84].mxu1 }
 0x42d   : > { %v4339_v51 = vmul.f32 %v4298_v7, %v9323_v11  ;;  %4516 = vst [vmem:[%s8723_s22 + $0xb0] sm:$0xff] %v4298_v7  ;;  %v4299_v39 = vadd.f32 %v8716_v30, %v4251_v16  ;;  %v3883_v54 = vadd.f32 %v3789_v34, %v8648_v43  ;;  %v5866_v57 = vpop.f32.mrb[85].mxu1  ;;  %v9327_v34 = vld [vmem:[#allocation24_spill] sm:$0xff] }
 0x42e   : > { %v3792_v49 = vpop.f32.mrb[86].mxu1 }
 0x42f   : > { %v4379_v10 = vadd.f32 %v4378_v8, %v4339_v51  ;;  %v4428_v48 = vmul.f32 %v4339_v51, %v4298_v7  ;;  %v4340_v52 = vmul.f32 %v4299_v39, %v9324_v38  ;;  %4517 = vst [vmem:[%s8723_s22 + $0xb8] sm:$0xff] %v4299_v39  ;;  %v3884_v53 = vadd.f32 %v3792_v49, %v8653_v59  ;;  %v5867_v40 = vpop.f32.mrb[87].mxu1 }
 0x430   : > { %v4158_v22 = vpop.f32.mrb[88].mxu0 }
 0x431   : > { %v4468_v25 = vadd.f32 %v4467_v55, %v4428_v48  ;;  %v4380_v18 = vadd.f32 %v4379_v10, %v4340_v52  ;;  %v4429_v33 = vmul.f32 %v4340_v52, %v4299_v39  ;;  %v4252_v15 = vadd.f32 %v4158_v22, %v3883_v54  ;;  %v5966_v62 = vpop.f32.mrb[89].mxu0  ;;  %v9328_v10 = vld [vmem:[#allocation23_spill] sm:$0xff] }
 0x432   : > { %v4161_v20 = vpop.f32.mrb[90].mxu0 }
 0x433   : > { %v4469_v43 = vadd.f32 %v4468_v25, %v4429_v33  ;;  %v4300_v42 = vadd.f32 %v8716_v30, %v4252_v15  ;;  %v4253_v58 = vadd.f32 %v4161_v20, %v3884_v53  ;;  %v5967_v47 = vpop.f32.mrb[91].mxu0 }
 0x434   : > { %v3797_v41 = vpop.f32.mrb[88].mxu1 }
 0x435   : > { %v4341_v3 = vmul.f32 %v4300_v42, %v9325_v23  ;;  %4518 = vst [vmem:[%s8723_s22 + $0xc0] sm:$0xff] %v4300_v42  ;;  %v4301_v59 = vadd.f32 %v8716_v30, %v4253_v58  ;;  %v3885_v60 = vadd.f32 %v3797_v41, %v8660_v36  ;;  %v5870_v19 = vpop.f32.mrb[89].mxu1  ;;  %v9329_v58 = vld [vmem:[#allocation33_spill] sm:$0xff] }
 0x436   : > { %v3800_v44 = vpop.f32.mrb[90].mxu1  ;;  %v9330_v19 = vld [vmem:[#allocation32_spill] sm:$0xff] }
 0x437   : > { %v4381_v35 = vadd.f32 %v4380_v18, %v4341_v3  ;;  %v4430_v46 = vmul.f32 %v4341_v3, %v4300_v42  ;;  %v4342_v12 = vmul.f32 %v4301_v59, %v9326_v2  ;;  %4519 = vst [vmem:[%s8723_s22 + $0xc8] sm:$0xff] %v4301_v59  ;;  %v3886_v13 = vadd.f32 %v3800_v44, %v8665_v26  ;;  %v5871_v28 = vpop.f32.mrb[91].mxu1 }
 0x438   : > { %v4166_v32 = vpop.f32.mrb[92].mxu0 }
 0x439   : > { %v4470_v17 = vadd.f32 %v4469_v43, %v4430_v46  ;;  %v4382_v8 = vadd.f32 %v4381_v35, %v4342_v12  ;;  %v4431_v63 = vmul.f32 %v4342_v12, %v4301_v59  ;;  %v4254_v5 = vadd.f32 %v4166_v32, %v3885_v60  ;;  %v5970_v37 = vpop.f32.mrb[93].mxu0 }
 0x43a   : > { %v4169_v27 = vpop.f32.mrb[94].mxu0 }
 0x43b   : > { %v4471_v36 = vadd.f32 %v4470_v17, %v4431_v63  ;;  %v4302_v55 = vadd.f32 %v8716_v30, %v4254_v5  ;;  %v4255_v7 = vadd.f32 %v4169_v27, %v3886_v13  ;;  %v5971_v16 = vpop.f32.mrb[95].mxu0 }
 0x43c   : > { %v3805_v45 = vpop.f32.mrb[92].mxu1 }
 0x43d   : > { %v4343_v11 = vmul.f32 %v4302_v55, %v9327_v34  ;;  %4520 = vst [vmem:[%s8723_s22 + $0xd0] sm:$0xff] %v4302_v55  ;;  %v4303_v26 = vadd.f32 %v8716_v30, %v4255_v7  ;;  %v3887_v51 = vadd.f32 %v3805_v45, %v8672_v31  ;;  %v5874_v39 = vpop.f32.mrb[93].mxu1 }
 0x43e   : > { %v3808_v54 = vpop.f32.mrb[94].mxu1 }
 0x43f   : > { %v4383_v57 = vadd.f32 %v4382_v8, %v4343_v11  ;;  %v4432_v49 = vmul.f32 %v4343_v11, %v4302_v55  ;;  %v4344_v48 = vmul.f32 %v4303_v26, %v9328_v10  ;;  %4521 = vst [vmem:[%s8723_s22 + $0xd8] sm:$0xff] %v4303_v26  ;;  %v3888_v38 = vadd.f32 %v3808_v54, %v8675_v1  ;;  %v5875_v52 = vpop.f32.mrb[95].mxu1 }
 0x440   : > { %v4174_v53 = vpop.f32.mrb[96].mxu0 }
 0x441   : > { %v4472_v40 = vadd.f32 %v4471_v36, %v4432_v49  ;;  %v4384_v22 = vadd.f32 %v4383_v57, %v4344_v48  ;;  %v4433_v25 = vmul.f32 %v4344_v48, %v4303_v26  ;;  %v4256_v18 = vadd.f32 %v4174_v53, %v3887_v51  ;;  %v5974_v33 = vpop.f32.mrb[97].mxu0  ;;  %v9331_v36 = vld [vmem:[#allocation41_spill] sm:$0xff]  ;;  %v9332_v26 = vld [vmem:[#allocation40_spill] sm:$0xff] }
 0x442   : > { %v4177_v15 = vpop.f32.mrb[98].mxu0  ;;  %v9333_v33 = vld [vmem:[#allocation47_spill] sm:$0xff] }
 0x443   : > { %v4473_v31 = vadd.f32 %v4472_v40, %v4433_v25  ;;  %v4304_v62 = vadd.f32 %v8716_v30, %v4256_v18  ;;  %v4257_v20 = vadd.f32 %v4177_v15, %v3888_v38  ;;  %v5975_v43 = vpop.f32.mrb[99].mxu0 }
 0x444   : > { %v3813_v42 = vpop.f32.mrb[96].mxu1 }
 0x445   : > { %v4345_v47 = vmul.f32 %v4304_v62, %v9329_v58  ;;  %4522 = vst [vmem:[%s8723_s22 + $0xe0] sm:$0xff] %v4304_v62  ;;  %v4305_v1 = vadd.f32 %v8716_v30, %v4257_v20  ;;  %v3889_v41 = vadd.f32 %v3813_v42, %v8680_v24  ;;  %v5878_v23 = vpop.f32.mrb[97].mxu1  ;;  %v9334_v58 = vld [vmem:[#allocation46_spill] sm:$0xff] }
 0x446   : > { %v3816_v3 = vpop.f32.mrb[98].mxu1 }
 0x447   : > { %v4385_v59 = vadd.f32 %v4384_v22, %v4345_v47  ;;  %v4434_v60 = vmul.f32 %v4345_v47, %v4304_v62  ;;  %v4346_v44 = vmul.f32 %v4305_v1, %v9330_v19  ;;  %4523 = vst [vmem:[%s8723_s22 + $0xe8] sm:$0xff] %v4305_v1  ;;  %v3890_v35 = vadd.f32 %v3816_v3, %v8682_v61  ;;  %v5879_v46 = vpop.f32.mrb[99].mxu1 }
 0x448   : > { %v4182_v2 = vpop.f32.mrb[100].mxu0 }
 0x449   : > { %v4474_v12 = vadd.f32 %v4473_v31, %v4434_v60  ;;  %v4386_v13 = vadd.f32 %v4385_v59, %v4346_v44  ;;  %v4435_v28 = vmul.f32 %v4346_v44, %v4305_v1  ;;  %v4258_v32 = vadd.f32 %v4182_v2, %v3889_v41  ;;  %v5978_v17 = vpop.f32.mrb[101].mxu0 }
 0x44a   : > { %v4185_v8 = vpop.f32.mrb[102].mxu0 }
 0x44b   : > { %v4475_v24 = vadd.f32 %v4474_v12, %v4435_v28  ;;  %v4306_v63 = vadd.f32 %v8716_v30, %v4258_v32  ;;  %v4259_v5 = vadd.f32 %v4185_v8, %v3890_v35  ;;  %v5979_v37 = vpop.f32.mrb[103].mxu0  ;;  %v9335_v28 = vld [vmem:[#allocation53_spill] sm:$0xff] }
 0x44c   : > { %v3821_v27 = vpop.f32.mrb[100].mxu1  ;;  %v9336_v37 = vld [vmem:[#allocation52_spill] sm:$0xff] }
 0x44d   : > { %v4347_v55 = vmul.f32 %v4306_v63, %v9331_v36  ;;  %4524 = vst [vmem:[%s8723_s22 + $0xf0] sm:$0xff] %v4306_v63  ;;  %v4307_v61 = vadd.f32 %v8716_v30, %v4259_v5  ;;  %v3891_v7 = vadd.f32 %v3821_v27, %v8686_v50  ;;  %v5882_v16 = vpop.f32.mrb[101].mxu1 }
 0x44e   : > { %v3824_v45 = vpop.f32.mrb[102].mxu1 }
 0x44f   : > { %v4387_v34 = vadd.f32 %v4386_v13, %v4347_v55  ;;  %v4436_v11 = vmul.f32 %v4347_v55, %v4306_v63  ;;  %v4348_v51 = vmul.f32 %v4307_v61, %v9332_v26  ;;  %4525 = vst [vmem:[%s8723_s22 + $0xf8] sm:$0xff] %v4307_v61  ;;  %v3892_v39 = vadd.f32 %v3824_v45, %v8688_v6  ;;  %v5883_v54 = vpop.f32.mrb[103].mxu1 }
 0x450   : > { %v4190_v57 = vpop.f32.mrb[104].mxu0 }
 0x451   : > { %v4476_v49 = vadd.f32 %v4475_v24, %v4436_v11  ;;  %v4388_v10 = vadd.f32 %v4387_v34, %v4348_v51  ;;  %v4437_v48 = vmul.f32 %v4348_v51, %v4307_v61  ;;  %v4260_v38 = vadd.f32 %v4190_v57, %v3891_v7  ;;  %v5982_v52 = vpop.f32.mrb[105].mxu0 }
 0x452   : > { %v4193_v53 = vpop.f32.mrb[106].mxu0 }
 0x453   : > { %v4477_v50 = vadd.f32 %v4476_v49, %v4437_v48  ;;  %v4308_v40 = vadd.f32 %v8716_v30, %v4260_v38  ;;  %v4261_v22 = vadd.f32 %v4193_v53, %v3892_v39  ;;  %v5983_v25 = vpop.f32.mrb[107].mxu0  ;;  %v9337_v49 = vld [vmem:[#allocation59_spill] sm:$0xff] }
 0x454   : > { %v3829_v18 = vpop.f32.mrb[104].mxu1 }
 0x455   : > { %v4349_v15 = vmul.f32 %v4308_v40, %v9333_v33  ;;  %4526 = vst [vmem:[%s8723_s22 + $0x100] sm:$0xff] %v4308_v40  ;;  %v4309_v6 = vadd.f32 %v8716_v30, %v4261_v22  ;;  %v3893_v31 = vadd.f32 %v3829_v18, %v8692_v4  ;;  %v5886_v62 = vpop.f32.mrb[105].mxu1 }
 0x456   : > { %v3832_v20 = vpop.f32.mrb[106].mxu1 }
 0x457   : > { %v4389_v43 = vadd.f32 %v4388_v10, %v4349_v15  ;;  %v4438_v42 = vmul.f32 %v4349_v15, %v4308_v40  ;;  %v4350_v47 = vmul.f32 %v4309_v6, %v9334_v58  ;;  %4527 = vst [vmem:[%s8723_s22 + $0x108] sm:$0xff] %v4309_v6  ;;  %v3894_v1 = vadd.f32 %v3832_v20, %v8694_v29  ;;  %v5887_v41 = vpop.f32.mrb[107].mxu1  ;;  %v9338_v40 = vld [vmem:[#allocation58_spill] sm:$0xff] }
 0x458   : > { %v4198_v23 = vpop.f32.mrb[108].mxu0  ;;  %v9339_v41 = vld [vmem:[#allocation65_spill] sm:$0xff] }
 0x459   : > { %v4478_v3 = vadd.f32 %v4477_v50, %v4438_v42  ;;  %v4390_v59 = vadd.f32 %v4389_v43, %v4350_v47  ;;  %v4439_v60 = vmul.f32 %v4350_v47, %v4309_v6  ;;  %v4262_v19 = vadd.f32 %v4198_v23, %v3893_v31  ;;  %v5986_v44 = vpop.f32.mrb[109].mxu0 }
 0x45a   : > { %v4201_v35 = vpop.f32.mrb[110].mxu0 }
 0x45b   : > { %v4479_v4 = vadd.f32 %v4478_v3, %v4439_v60  ;;  %v4310_v46 = vadd.f32 %v8716_v30, %v4262_v19  ;;  %v4263_v2 = vadd.f32 %v4201_v35, %v3894_v1  ;;  %v5987_v12 = vpop.f32.mrb[111].mxu0  ;;  %v9340_v35 = vld [vmem:[#allocation64_spill] sm:$0xff] }
 0x45c   : > { %v3837_v13 = vpop.f32.mrb[108].mxu1 }
 0x45d   : > { %v4351_v32 = vmul.f32 %v4310_v46, %v9335_v28  ;;  %4528 = vst [vmem:[%s8723_s22 + $0x110] sm:$0xff] %v4310_v46  ;;  %v4311_v29 = vadd.f32 %v8716_v30, %v4263_v2  ;;  %v3895_v17 = vadd.f32 %v3837_v13, %v8698_v21  ;;  %v5890_v8 = vpop.f32.mrb[109].mxu1 }
 0x45e   : > { %v3840_v24 = vpop.f32.mrb[110].mxu1 }
 0x45f   : > { %v4391_v63 = vadd.f32 %v4390_v59, %v4351_v32  ;;  %v4440_v5 = vmul.f32 %v4351_v32, %v4310_v46  ;;  %v4352_v27 = vmul.f32 %v4311_v29, %v9336_v37  ;;  %4529 = vst [vmem:[%s8723_s22 + $0x118] sm:$0xff] %v4311_v29  ;;  %v3896_v36 = vadd.f32 %v3840_v24, %v8700_v56  ;;  %v5891_v55 = vpop.f32.mrb[111].mxu1 }
 0x460   : > { %v4206_v61 = vpop.f32.mrb[112].mxu0 }
 0x461   : > { %v4480_v7 = vadd.f32 %v4479_v4, %v4440_v5  ;;  %v4392_v16 = vadd.f32 %v4391_v63, %v4352_v27  ;;  %v4441_v45 = vmul.f32 %v4352_v27, %v4311_v29  ;;  %v4264_v34 = vadd.f32 %v4206_v61, %v3895_v17  ;;  %v5990_v11 = vpop.f32.mrb[113].mxu0  ;;  %v9341_v63 = vld [vmem:[#allocation69_spill] sm:$0xff] }
 0x462   : > { %v4209_v26 = vpop.f32.mrb[114].mxu0 }
 0x463   : > { %v4481_v21 = vadd.f32 %v4480_v7, %v4441_v45  ;;  %v4312_v51 = vadd.f32 %v8716_v30, %v4264_v34  ;;  %v4265_v39 = vadd.f32 %v4209_v26, %v3896_v36  ;;  %v5991_v54 = vpop.f32.mrb[115].mxu0 }
 0x464   : > { %v3845_v57 = vpop.f32.mrb[112].mxu1 }
 0x465   : > { %v4353_v10 = vmul.f32 %v4312_v51, %v9337_v49  ;;  %4530 = vst [vmem:[%s8723_s22 + $0x120] sm:$0xff] %v4312_v51  ;;  %v4313_v56 = vadd.f32 %v8716_v30, %v4265_v39  ;;  %v3897_v48 = vadd.f32 %v3845_v57, %v8704_v14  ;;  %v5894_v38 = vpop.f32.mrb[113].mxu1 }
 0x466   : > { %v3848_v52 = vpop.f32.mrb[114].mxu1 }
 0x467   : > { %v4393_v53 = vadd.f32 %v4392_v16, %v4353_v10  ;;  %v4442_v50 = vmul.f32 %v4353_v10, %v4312_v51  ;;  %v4354_v22 = vmul.f32 %v4313_v56, %v9338_v40  ;;  %4531 = vst [vmem:[%s8723_s22 + $0x128] sm:$0xff] %v4313_v56  ;;  %v3898_v25 = vadd.f32 %v3848_v52, %v8706_v0  ;;  %v5895_v18 = vpop.f32.mrb[115].mxu1 }
 0x468   : > { %v4214_v33 = vpop.f32.mrb[116].mxu0 }
 0x469   : > { %v4482_v15 = vadd.f32 %v4481_v21, %v4442_v50  ;;  %v4394_v6 = vadd.f32 %v4393_v53, %v4354_v22  ;;  %v4443_v31 = vmul.f32 %v4354_v22, %v4313_v56  ;;  %v4266_v62 = vadd.f32 %v4214_v33, %v3897_v48  ;;  %v5994_v20 = vpop.f32.mrb[117].mxu0 }
 0x46a   : > { %v4217_v43 = vpop.f32.mrb[118].mxu0 }
 0x46b   : > { %v4483_v14 = vadd.f32 %v4482_v15, %v4443_v31  ;;  %v4314_v42 = vadd.f32 %v8716_v30, %v4266_v62  ;;  %v4267_v58 = vadd.f32 %v4217_v43, %v3898_v25  ;;  %v5995_v47 = vpop.f32.mrb[119].mxu0 }
 0x46c   : > { %v3853_v1 = vpop.f32.mrb[116].mxu1 }
 0x46d   : > { %v4355_v23 = vmul.f32 %v4314_v42, %v9339_v41  ;;  %4532 = vst [vmem:[%s8723_s22 + $0x130] sm:$0xff] %v4314_v42  ;;  %v4315_v0 = vadd.f32 %v8716_v30, %v4267_v58  ;;  %v3899_v3 = vadd.f32 %v3853_v1, %v8709_v9  ;;  %v5898_v59 = vpop.f32.mrb[117].mxu1 }
 0x46e   : > { %v3856_v60 = vpop.f32.mrb[118].mxu1 }
 0x46f   : > { %v4395_v19 = vadd.f32 %v4394_v6, %v4355_v23  ;;  %v4444_v44 = vmul.f32 %v4355_v23, %v4314_v42  ;;  %v4356_v4 = vmul.f32 %v4315_v0, %v9340_v35  ;;  %4533 = vst [vmem:[%s8723_s22 + $0x138] sm:$0xff] %v4315_v0  ;;  %v5899_v46 = vpop.f32.mrb[119].mxu1 }
 0x470   : > { %v4222_v2 = vpop.f32.mrb[120].mxu0 }
 0x471   : > { %v4484_v12 = vadd.f32 %v4483_v14, %v4444_v44  ;;  %v4396_v13 = vadd.f32 %v4395_v19, %v4356_v4  ;;  %v4445_v28 = vmul.f32 %v4356_v4, %v4315_v0  ;;  %v4268_v32 = vadd.f32 %v4222_v2, %v3899_v3  ;;  %v5998_v29 = vpop.f32.mrb[121].mxu0 }
 0x472   : > { %v4225_v17 = vpop.f32.mrb[122].mxu0 }
 0x473   : > { %v4485_v8 = vadd.f32 %v4484_v12, %v4445_v28  ;;  %v4316_v24 = vadd.f32 %v8716_v30, %v4268_v32  ;;  %v5999_v9 = vpop.f32.mrb[123].mxu0 }
 0x475   : > { %v4357_v5 = vmul.f32 %v4316_v24, %v9341_v63  ;;  %4534 = vst [vmem:[%s8723_s22 + $0x140] sm:$0xf] %v4316_v24 }
 0x477   : > { %v4398_v37 = vsel %vm990_vm7, %v4357_v5, 0.0  ;;  %v4446_v27 = vmul.f32 %v4357_v5, %v4316_v24 }
 0x478   : > { %v4399_v36 = vadd.f32 %v4398_v37, %v4396_v13 }
 0x479   : > { %v4486_v55 = vsel %vm990_vm7, %v4446_v27, 0.0 }
 0x47a   : > { %v4400_v61 = vrot.slane %v4399_v36, 4  ;;  %v4487_v7 = vadd.f32 %v4486_v55, %v4485_v8 }
 0x47c   : > { %v4401_v16 = vadd.f32 %v4400_v61, %v4399_v36  ;;  %v4488_v45 = vrot.slane %v4487_v7, 4 }
 0x47e   : > { %v4402_v34 = vrot.slane %v4401_v16, 2  ;;  %v4489_v11 = vadd.f32 %v4488_v45, %v4487_v7 }
 0x480   : > { %v4403_v26 = vadd.f32 %v4402_v34, %v4401_v16  ;;  %v4490_v21 = vrot.slane %v4489_v11, 2 }
 0x482   : > { %v4404_v30 = vrot.slane %v4403_v26, 1  ;;  %v4491_v51 = vadd.f32 %v4490_v21, %v4489_v11 }
 0x484   : > { %v4492_v39 = vrot.slane %v4491_v51, 1  ;;  %v4405_v54 = vadd.f32 %v4404_v30, %v4403_v26 }
 0x486   : > { %v4493_v57 = vadd.f32 %v4492_v39, %v4491_v51 }
 0x488   : > { %v4536_v49 = vsel %vm4535_vm13, %v4405_v54, %v4493_v57 }
 0x489   : > { %v4538_v10 = vsel %vm987_vm2, %v4536_v49, 0.0 }
 0x48a   : > { %4539 = vst [vmem:[%s289_s27] sm:$0xff] %v4538_v10 }
 0x48b PF: > { %s18_s24 = sadd.s32 1, %s6110_s24  }
 0x48c   : > { %p15_p4 = scmp.ge.s32.totalorder %s18_s24, 4  }
 0x48e   :  { %17 = sbr.rel (!%p15_p4) target bundleno = 1 (0x1), region = 94 }

</bundles_post_ra>
